<compile_context>
chip_gen: v5e
topology: v5e:2x2
jax: 0.10.0
libtpu: 0.0.40
codegen_flags: <defaults>
</compile_context>

<pallas_src>
import math

import numpy as np

import jax
import jax.numpy as jnp
from jax.experimental import pallas as pl
from jax.experimental.pallas import tpu as pltpu

LEAKY_SLOPE = 0.01   # nn.LeakyReLU() default negative_slope
BN_EPS = 1e-5        # nn.BatchNorm2d default eps

_ALL_TAPS = [(dy, dx) for dy in (-1, 0, 1) for dx in (-1, 0, 1)]   # index 4 = center


def _round_up(v, m):
    return -(-v // m) * m


def _leaky(v):
    return jnp.where(v >= 0.0, v, LEAKY_SLOPE * v)


class _WeightPack:
    """Packs many small (rows<=rp, width) matrices into one (rp, n*128) buffer."""

    def __init__(self, rows):
        self.rows = rows
        self._bufs = []
        self._off = 0
        self.meta = {}

    def add(self, name, mat):
        mat = np.asarray(mat, np.float32)
        width = mat.shape[1]
        segw = max(128, _round_up(width, 128))
        buf = np.zeros((self.rows, segw), np.float32)
        buf[:mat.shape[0], :width] = mat
        self._bufs.append(buf)
        self.meta[name] = (self._off, width)
        self._off += segw

    def concat(self):
        return np.concatenate(self._bufs, axis=1)


# ----------------------------------------------------------------------------
# Build a fused forward function for a fixed input shape.  All parameter
# packing / constant building happens once, on the host, with numpy.
# ----------------------------------------------------------------------------
def build_densenet_forward(params, x_shape):
    n, cin, h, w = x_shape
    assert h % 16 == 0 and w % 16 == 0, "spatial size must be divisible by 16"
    c = int(params["db1"]["conv1"][0].shape[0])        # channel_size
    cout = int(params["out_conv1"][0].shape[0])
    cpad = _round_up(cin, 8)
    assert c % 8 == 0 and cpad <= c and cout <= c
    rp = c                                             # row count of packed buffers

    # Per-resolution geometry: (h, w, M_real, M_pad). Spatial axis is flattened
    # (image, row, col) row-major and lives on the lane axis, padded to 128.
    geo = []
    for d in (1, 4, 8, 16):
        hh, ww = h // d, w // d
        mr = n * hh * ww
        geo.append((hh, ww, mr, _round_up(max(mr, 128), 128)))
    m0p = geo[0][3]
    lvl_mp = [g[3] for g in geo]
    lvl_mr = [g[2] for g in geo]

    def taps_for(lvl):
        hh, ww, _, _ = geo[lvl]
        return [(k, dy * ww + dx) for k, (dy, dx) in enumerate(_ALL_TAPS)
                if abs(dy) < hh and abs(dx) < ww]

    # Host-precomputed masks, one (9, Mp) array per resolution:
    #   row k != 4 : 1.0 where 3x3 tap k reads an in-image neighbour
    #   row 4      : 1.0 on real (non-padding) lanes (used by BatchNorm)
    def masks_for(lvl):
        hh, ww, mr, mp = geo[lvl]
        m = np.zeros((9, mp), np.float32)
        j = np.arange(mr)
        y = (j % (hh * ww)) // ww
        x = j % ww
        m[4, :mr] = 1.0
        for k, (dy, dx) in enumerate(_ALL_TAPS):
            if k == 4:
                continue
            m[k, :mr] = ((y + dy >= 0) & (y + dy < hh)
                         & (x + dx >= 0) & (x + dx < ww))
        return m

    masks = [masks_for(l) for l in range(4)]

    # Constant avg-pool / nearest-upsample matrices on the padded flat axis.
    def pool_mat(li, lo, k):
        hi, wi, _, mpi = geo[li]
        ho, wo, _, mpo = geo[lo]
        mat = np.zeros((mpi, mpo), np.float32)
        inv = 1.0 / (k * k)
        for b in range(n):
            for yo in range(ho):
                for xo in range(wo):
                    jo = (b * ho + yo) * wo + xo
                    for dy in range(k):
                        for dx in range(k):
                            ji = (b * hi + yo * k + dy) * wi + xo * k + dx
                            mat[ji, jo] = inv
        return mat

    def up_mat(li, lo, s):
        hi, wi, _, mpi = geo[li]
        ho, wo, _, mpo = geo[lo]
        mat = np.zeros((mpi, mpo), np.float32)
        for b in range(n):
            for yo in range(ho):
                for xo in range(wo):
                    jo = (b * ho + yo) * wo + xo
                    ji = (b * hi + yo // s) * wi + xo // s
                    mat[ji, jo] = 1.0
        return mat

    pool3, pool4, pool5 = pool_mat(0, 1, 4), pool_mat(1, 2, 2), pool_mat(2, 3, 2)
    up1, up2, up4 = up_mat(3, 2, 2), up_mat(2, 1, 2), up_mat(1, 0, 4)

    # ---- pack every conv weight into ONE lane-aligned bf16 buffer and every
    #      bias into one small f32 buffer (one DMA each). -----------------------
    wp = _WeightPack(rp)
    bias_vecs = []
    c3meta, c1meta, b_idx = {}, {}, {}

    def _add_bias(name, bvec):
        b_idx[name] = len(bias_vecs)
        bias_vecs.append(np.asarray(bvec, np.float32))

    def add_c3(name, wb, lvl, in_rows):
        wt, bv = wb
        wt = np.asarray(wt, np.float32)
        co, ci = wt.shape[0], wt.shape[1]
        tlist = taps_for(lvl)
        mat = np.zeros((rp, len(tlist) * in_rows), np.float32)
        for t, (k, _s) in enumerate(tlist):
            dy, dx = _ALL_TAPS[k]
            mat[:co, t * in_rows:t * in_rows + ci] = wt[:, :, dy + 1, dx + 1]
        wp.add(name, mat)
        _add_bias(name, bv)
        off, wd = wp.meta[name]
        c3meta[name] = dict(lvl=lvl, rows=in_rows, taps=tlist, off=off, wd=wd)

    def add_c1(name, wb, chunks):
        # chunks: list of (actual_cin, padded_cin) in channel-concat order.
        wt, bv = wb
        wt = np.asarray(wt, np.float32).reshape(wt.shape[0], wt.shape[1])
        co = wt.shape[0]
        mat = np.zeros((rp, sum(p for _a, p in chunks)), np.float32)
        src = dst = 0
        for a, p in chunks:
            mat[:co, dst:dst + a] = wt[:, src:src + a]
            src += a
            dst += p
        wp.add(name, mat)
        _add_bias(name, bv)
        off, wd = wp.meta[name]
        c1meta[name] = dict(off=off, wd=wd)

    def add_down(blk, p, lvl, xrows, xact):
        add_c3(blk + "/conv1", p["conv1"], lvl, xrows)
        add_c1(blk + "/conv21", p["conv21"], [(xact, xrows), (c, c)])
        add_c3(blk + "/conv22", p["conv22"], lvl, c)
        add_c1(blk + "/conv31", p["conv31"], [(xact, xrows), (c, c), (c, c)])
        add_c3(blk + "/conv32", p["conv32"], lvl, c)

    def add_up(blk, p, lvl):
        add_c1(blk + "/conv11", p["conv11"], [(c, c), (c, c)])
        add_c3(blk + "/conv12", p["conv12"], lvl, c)
        add_c1(blk + "/conv21", p["conv21"], [(c, c), (c, c), (c, c)])
        add_c3(blk + "/conv22", p["conv22"], lvl, c)

    add_down("db1", params["db1"], 0, cpad, cin)
    add_down("db3", params["db3"], 1, c, c)
    add_down("db4", params["db4"], 2, c, c)
    add_down("db5", params["db5"], 3, c, c)
    add_up("ub1", params["ub1"], 2)
    add_up("ub2", params["ub2"], 1)
    add_up("ub4", params["ub4"], 0)
    add_c1("out", params["out_conv1"], [(c, c)])

    wpk = jnp.asarray(wp.concat()).astype(jnp.bfloat16)   # matmul operands in bf16
    bpk_np = np.zeros((rp, len(bias_vecs)), np.float32)
    for i, bv in enumerate(bias_vecs):
        bpk_np[:bv.shape[0], i] = bv
    bpk = jnp.asarray(bpk_np)

    mask_arrs = [jnp.asarray(m) for m in masks]
    pool_arrs = [jnp.asarray(a) for a in (pool3, pool4, pool5)]
    up_arrs = [jnp.asarray(a) for a in (up1, up2, up4)]

    # ------------------------------- kernel ----------------------------------
    def kernel(x_ref, wpk_ref, bpk_ref,
               m0_ref, m1_ref, m2_ref, m3_ref,
               p3_ref, p4_ref, p5_ref, u1_ref, u2_ref, u4_ref,
               out_ref, tap_s, cat_s):
        mask_refs = (m0_ref, m1_ref, m2_ref, m3_ref)
        ball = bpk_ref[...]                              # (rp, n_convs) f32

        def bias(name):
            i = b_idx[name]
            return ball[:, i:i + 1]

        def conv3(xv, name):
            md = c3meta[name]
            mp = lvl_mp[md["lvl"]]
            rows = md["rows"]
            mref = mask_refs[md["lvl"]]
            wgt = wpk_ref[:, md["off"]:md["off"] + md["wd"]]        # bf16
            if len(md["taps"]) == 1:                     # 1x1 spatial: center only
                stacked = xv
            else:
                # Write the shifted + boundary-masked copies into the VMEM tap
                # stack so the whole 3x3 conv is ONE K = 9*Cin MXU matmul.
                for t, (k, s) in enumerate(md["taps"]):
                    if s == 0:
                        piece = xv
                    else:
                        piece = (pltpu.roll(xv, shift=(-s) % mp, axis=1)
                                 * mref[k:k + 1, :])
                    tap_s[t * rows:(t + 1) * rows, 0:mp] = piece
                stacked = tap_s[0:len(md["taps"]) * rows, 0:mp]
            y = jnp.dot(wgt, stacked.astype(jnp.bfloat16),
                        preferred_element_type=jnp.float32)
            return y + bias(name)

        def conv1(xin, name):
            md = c1meta[name]
            wgt = wpk_ref[:, md["off"]:md["off"] + md["wd"]]        # bf16
            y = jnp.dot(wgt, xin.astype(jnp.bfloat16),
                        preferred_element_type=jnp.float32)
            return y + bias(name)

        def batchnorm(xv, lvl):
            # Training-mode batch stats of a fresh BatchNorm2d (gamma=1, beta=0,
            # biased variance).  Padding lanes excluded via the real-lane mask.
            msk = mask_refs[lvl][4:5, :]
            inv_m = 1.0 / lvl_mr[lvl]
            mean = jnp.sum(xv * msk, axis=1, keepdims=True) * inv_m
            cent = (xv - mean) * msk
            var = jnp.sum(cent * cent, axis=1, keepdims=True) * inv_m
            return (xv - mean) * jax.lax.rsqrt(var + BN_EPS)

        def down_block(xv, blk, lvl, pool_ref, xrows):
            mp = lvl_mp[lvl]
            if pool_ref is not None:
                xv = jnp.dot(xv, pool_ref[...],
                             preferred_element_type=jnp.float32)
            x1 = _leaky(conv3(xv, blk + "/conv1"))
            cat_s[0:xrows, 0:mp] = xv                    # virtual concat buffer
            cat_s[xrows:xrows + c, 0:mp] = x1
            t = conv1(cat_s[0:xrows + c, 0:mp], blk + "/conv21")
            x22 = _leaky(conv3(t, blk + "/conv22"))
            cat_s[xrows + c:xrows + 2 * c, 0:mp] = x22
            t = conv1(cat_s[0:xrows + 2 * c, 0:mp], blk + "/conv31")
            out = _leaky(conv3(t, blk + "/conv32"))
            return batchnorm(out, lvl)

        def up_block(prev, xv, blk, lvl, up_ref):
            mp = lvl_mp[lvl]
            xu = jnp.dot(xv, up_ref[...], preferred_element_type=jnp.float32)
            cat_s[0:c, 0:mp] = xu
            cat_s[c:2 * c, 0:mp] = prev
            t = conv1(cat_s[0:2 * c, 0:mp], blk + "/conv11")
            x1 = _leaky(conv3(t, blk + "/conv12"))
            cat_s[2 * c:3 * c, 0:mp] = x1
            t = conv1(cat_s[0:3 * c, 0:mp], blk + "/conv21")
            return _leaky(conv3(t, blk + "/conv22"))

        xin = x_ref[...]
        x1 = down_block(xin, "db1", 0, None, cpad)
        x3 = down_block(x1, "db3", 1, p3_ref, c)
        x4 = down_block(x3, "db4", 2, p4_ref, c)
        x5 = down_block(x4, "db5", 3, p5_ref, c)
        x6 = up_block(x4, x5, "ub1", 2, u1_ref)
        x7 = up_block(x3, x6, "ub2", 1, u2_ref)
        x9 = up_block(x1, x7, "ub4", 0, u4_ref)
        out_ref[...] = conv1(x9, "out")

    tap_rows = 9 * max(c, cpad)
    cat_rows = max(cpad + 2 * c, 3 * c)
    scratch = [pltpu.VMEM((tap_rows, m0p), jnp.float32),
               pltpu.VMEM((cat_rows, m0p), jnp.float32)]

    const_inputs = [wpk, bpk] + mask_arrs + pool_arrs + up_arrs

    @jax.jit
    def fwd(x_nchw):
        # channel-major, lane-dense activation layout: (Cin_pad, N*H*W padded)
        x2d = jnp.transpose(x_nchw, (1, 0, 2, 3)).reshape(cin, n * h * w)
        x2d = x2d.astype(jnp.float32)
        x2d = jnp.pad(x2d, ((0, cpad - cin), (0, m0p - n * h * w)))
        ins = [x2d] + const_inputs
        in_specs = [pl.BlockSpec(a.shape, (lambda i, nd=a.ndim: (0,) * nd))
                    for a in ins]
        out2d = pl.pallas_call(
            kernel,
            out_shape=jax.ShapeDtypeStruct((rp, m0p), jnp.float32),
            grid=(1,),
            in_specs=in_specs,
            out_specs=pl.BlockSpec((rp, m0p), lambda i: (0, 0)),
            scratch_shapes=scratch,
            compiler_params=pltpu.CompilerParams(
                dimension_semantics=("arbitrary",)),
        )(*ins)
        out = out2d[:cout, :n * h * w].reshape(cout, n, h, w)
        return jnp.transpose(out, (1, 0, 2, 3))

    return fwd


# ----------------------------------------------------------------------------
# Deterministic parameters (PyTorch layout).  Weight init follows
# _initialize_weights; biases are given small non-zero values so the kernel's
# bias plumbing is actually exercised by the self-check.
# ----------------------------------------------------------------------------
def _conv_params(key, cin, cout, k):
    kw, kb = jax.random.split(key)
    std = math.sqrt(2.0 / (k * k * cout))
    wgt = std * jax.random.normal(kw, (cout, cin, k, k), dtype=jnp.float32)
    b = 0.1 * jax.random.normal(kb, (cout,), dtype=jnp.float32)
    return wgt, b


def _down_params(key, cin, c):
    ks = jax.random.split(key, 5)
    return {"conv1": _conv_params(ks[0], cin, c, 3),
            "conv21": _conv_params(ks[1], cin + c, c, 1),
            "conv22": _conv_params(ks[2], c, c, 3),
            "conv31": _conv_params(ks[3], cin + 2 * c, c, 1),
            "conv32": _conv_params(ks[4], c, c, 3)}


def _up_params(key, skip, cin, c):
    ks = jax.random.split(key, 4)
    return {"conv11": _conv_params(ks[0], skip + cin, c, 1),
            "conv12": _conv_params(ks[1], c, c, 3),
            "conv21": _conv_params(ks[2], skip + cin + c, c, 1),
            "conv22": _conv_params(ks[3], c, c, 3)}


def make_model_params(key, in_channels=1, out_channels=4, channel_size=8):
    ks = jax.random.split(key, 8)
    c = channel_size
    return {"db1": _down_params(ks[0], in_channels, c),
            "db3": _down_params(ks[1], c, c),
            "db4": _down_params(ks[2], c, c),
            "db5": _down_params(ks[3], c, c),
            "ub1": _up_params(ks[4], c, c, c),
            "ub2": _up_params(ks[5], c, c, c),
            "ub4": _up_params(ks[6], c, c, c),
            "out_conv1": _conv_params(ks[7], c, out_channels, 1)}


# ----------------------------------------------------------------------------
# Pure-JAX (non-Pallas) reference of the same module, for self-checking.
# ----------------------------------------------------------------------------
def reference_forward(params, x_nchw):
    x = jnp.transpose(x_nchw, (0, 2, 3, 1)).astype(jnp.float32)   # NHWC

    def conv(v, wb):
        wgt, b = wb
        kh, kw = wgt.shape[2], wgt.shape[3]
        dn = jax.lax.conv_dimension_numbers(v.shape, wgt.shape,
                                            ("NHWC", "OIHW", "NHWC"))
        y = jax.lax.conv_general_dilated(
            v, wgt, window_strides=(1, 1),
            padding=((kh // 2, kh // 2), (kw // 2, kw // 2)),
            dimension_numbers=dn, precision=jax.lax.Precision.HIGHEST)
        return y + b.reshape(1, 1, 1, -1)

    def leaky(v):
        return jnp.where(v >= 0.0, v, LEAKY_SLOPE * v)

    def bn(v):
        m = jnp.mean(v, axis=(0, 1, 2), keepdims=True)
        var = jnp.mean((v - m) ** 2, axis=(0, 1, 2), keepdims=True)
        return (v - m) * jax.lax.rsqrt(var + BN_EPS)

    def pool(v, k):
        nb, hh, ww, cc = v.shape
        return jnp.mean(v.reshape(nb, hh // k, k, ww // k, k, cc), axis=(2, 4))

    def up(v, s):
        return jnp.repeat(jnp.repeat(v, s, axis=1), s, axis=2)

    def down_block(v, p, k):
        if k is not None:
            v = pool(v, k)
        x1 = leaky(conv(v, p["conv1"]))
        x21 = jnp.concatenate([v, x1], axis=-1)
        x22 = leaky(conv(conv(x21, p["conv21"]), p["conv22"]))
        x31 = jnp.concatenate([x21, x22], axis=-1)
        out = leaky(conv(conv(x31, p["conv31"]), p["conv32"]))
        return bn(out)

    def up_block(prev, v, p, s):
        v = jnp.concatenate([up(v, s), prev], axis=-1)
        x1 = leaky(conv(conv(v, p["conv11"]), p["conv12"]))
        x21 = jnp.concatenate([v, x1], axis=-1)
        return leaky(conv(conv(x21, p["conv21"]), p["conv22"]))

    x1 = down_block(x, params["db1"], None)
    x3 = down_block(x1, params["db3"], 4)
    x4 = down_block(x3, params["db4"], 2)
    x5 = down_block(x4, params["db5"], 2)
    x6 = up_block(x4, x5, params["ub1"], 2)
    x7 = up_block(x3, x6, params["ub2"], 2)
    x9 = up_block(x1, x7, params["ub4"], 4)
    out = conv(x9, params["out_conv1"])
    return jnp.transpose(out, (0, 3, 1, 2))


# ----------------------------------------------------------------------------
if __name__ == "__main__":
    key = jax.random.PRNGKey(0)
    k_x, k_p = jax.random.split(key)

    # batch=2, in_channels=1, 16x16 spatial (divisible by the 4*2*2
    # downsampling), channel_size=8, out_channels=4.
    x = jax.random.normal(k_x, (2, 1, 16, 16), dtype=jnp.float32)
    params = make_model_params(k_p, in_channels=1, out_channels=4, channel_size=8)

    fwd = build_densenet_forward(params, x.shape)
    out = fwd(x)
    jax.block_until_ready(out)

    assert out.shape == (2, 4, 16, 16), out.shape
    assert bool(jnp.all(jnp.isfinite(out)))

    # Cross-check against the pure-JAX reference.  The kernel runs all conv
    # matmuls with bf16 operands (f32 accumulation), so allow a few-percent
    # relative budget; structural bugs produce O(1) relative errors.
    ref = jax.jit(reference_forward)(params, x)
    max_err = float(jnp.max(jnp.abs(out - ref)))
    scale = max(1.0, float(jnp.max(jnp.abs(ref))))
    assert max_err < 0.1 * scale, f"kernel/reference mismatch: {max_err} vs scale {scale}"

    print("KERNEL_OK")
</pallas_src>

<mosaic_0001>
module attributes {stable_mosaic.version = 11 : i64} {
  func.func @kernel(%arg0: i32, %arg1: memref<8x512xf32, #tpu.memory_space<vmem>>, %arg2: memref<8x4224xbf16, #tpu.memory_space<vmem>>, %arg3: memref<8x33xf32, #tpu.memory_space<vmem>>, %arg4: memref<9x512xf32, #tpu.memory_space<vmem>>, %arg5: memref<9x128xf32, #tpu.memory_space<vmem>>, %arg6: memref<9x128xf32, #tpu.memory_space<vmem>>, %arg7: memref<9x128xf32, #tpu.memory_space<vmem>>, %arg8: memref<512x128xf32, #tpu.memory_space<vmem>>, %arg9: memref<128x128xf32, #tpu.memory_space<vmem>>, %arg10: memref<128x128xf32, #tpu.memory_space<vmem>>, %arg11: memref<128x128xf32, #tpu.memory_space<vmem>>, %arg12: memref<128x128xf32, #tpu.memory_space<vmem>>, %arg13: memref<128x512xf32, #tpu.memory_space<vmem>>, %arg14: memref<8x512xf32, #tpu.memory_space<vmem>>, %arg15: memref<72x512xf32, #tpu.memory_space<vmem>>, %arg16: memref<24x512xf32, #tpu.memory_space<vmem>>) attributes {dimension_semantics = [#tpu.dimension_semantics<arbitrary>], iteration_bounds = array<i64: 1>, scalar_prefetch = 0 : i64, scratch_operands = 2 : i64, tpu.core_type = #tpu.core_type<tc>, window_params = [{pipeline_mode = #tpu.pipeline_mode<synchronous>, transform_indices = @transform_0, window_bounds = array<i64: 8, 512>}, {pipeline_mode = #tpu.pipeline_mode<synchronous>, transform_indices = @transform_1, window_bounds = array<i64: 8, 4224>}, {pipeline_mode = #tpu.pipeline_mode<synchronous>, transform_indices = @transform_2, window_bounds = array<i64: 8, 33>}, {pipeline_mode = #tpu.pipeline_mode<synchronous>, transform_indices = @transform_3, window_bounds = array<i64: 9, 512>}, {pipeline_mode = #tpu.pipeline_mode<synchronous>, transform_indices = @transform_4, window_bounds = array<i64: 9, 128>}, {pipeline_mode = #tpu.pipeline_mode<synchronous>, transform_indices = @transform_5, window_bounds = array<i64: 9, 128>}, {pipeline_mode = #tpu.pipeline_mode<synchronous>, transform_indices = @transform_6, window_bounds = array<i64: 9, 128>}, {pipeline_mode = #tpu.pipeline_mode<synchronous>, transform_indices = @transform_7, window_bounds = array<i64: 512, 128>}, {pipeline_mode = #tpu.pipeline_mode<synchronous>, transform_indices = @transform_8, window_bounds = array<i64: 128, 128>}, {pipeline_mode = #tpu.pipeline_mode<synchronous>, transform_indices = @transform_9, window_bounds = array<i64: 128, 128>}, {pipeline_mode = #tpu.pipeline_mode<synchronous>, transform_indices = @transform_10, window_bounds = array<i64: 128, 128>}, {pipeline_mode = #tpu.pipeline_mode<synchronous>, transform_indices = @transform_11, window_bounds = array<i64: 128, 128>}, {pipeline_mode = #tpu.pipeline_mode<synchronous>, transform_indices = @transform_12, window_bounds = array<i64: 128, 512>}, {pipeline_mode = #tpu.pipeline_mode<synchronous>, transform_indices = @transform_13, window_bounds = array<i64: 8, 512>}]} {
    %c0 = arith.constant 0 : index
    %c0_0 = arith.constant 0 : index
    %0 = vector.load %arg3[%c0, %c0_0] : memref<8x33xf32, #tpu.memory_space<vmem>>, vector<8x33xf32>
    %c0_1 = arith.constant 0 : index
    %c0_2 = arith.constant 0 : index
    %1 = vector.load %arg1[%c0_1, %c0_2] : memref<8x512xf32, #tpu.memory_space<vmem>>, vector<8x512xf32>
    %c0_3 = arith.constant 0 : index
    %c0_4 = arith.constant 0 : index
    %2 = vector.load %arg2[%c0_3, %c0_4] : memref<8x4224xbf16, #tpu.memory_space<vmem>>, vector<8x72xbf16>
    %c17_i32 = arith.constant 17 : i32
    %3 = tpu.dynamic_rotate %1 by %c17_i32 dim 1 : vector<8x512xf32>, i32 -> vector<8x512xf32>
    %c0_5 = arith.constant 0 : index
    %c0_6 = arith.constant 0 : index
    %4 = vector.load %arg4[%c0_5, %c0_6] : memref<9x512xf32, #tpu.memory_space<vmem>>, vector<1x512xf32>
    %5 = vector.broadcast %4 : vector<1x512xf32> to vector<8x512xf32>
    %6 = arith.mulf %3, %5 : vector<8x512xf32>
    %c0_7 = arith.constant 0 : index
    %c0_8 = arith.constant 0 : index
    %7 = vector.load %arg15[%c0_7, %c0_8] : memref<72x512xf32, #tpu.memory_space<vmem>>, vector<8x512xf32>
    tpu.vector_store %arg15[%c0_7, %c0_8], %6 {strides = array<i32>} : memref<72x512xf32, #tpu.memory_space<vmem>>, vector<8x512xf32>,
    %c16_i32 = arith.constant 16 : i32
    %8 = tpu.dynamic_rotate %1 by %c16_i32 dim 1 : vector<8x512xf32>, i32 -> vector<8x512xf32>
    %c1 = arith.constant 1 : index
    %c0_9 = arith.constant 0 : index
    %9 = vector.load %arg4[%c1, %c0_9] : memref<9x512xf32, #tpu.memory_space<vmem>>, vector<1x512xf32>
    %10 = vector.broadcast %9 : vector<1x512xf32> to vector<8x512xf32>
    %11 = arith.mulf %8, %10 : vector<8x512xf32>
    %c8 = arith.constant 8 : index
    %c0_10 = arith.constant 0 : index
    %12 = vector.load %arg15[%c8, %c0_10] : memref<72x512xf32, #tpu.memory_space<vmem>>, vector<8x512xf32>
    tpu.vector_store %arg15[%c8, %c0_10], %11 {strides = array<i32>} : memref<72x512xf32, #tpu.memory_space<vmem>>, vector<8x512xf32>,
    %c15_i32 = arith.constant 15 : i32
    %13 = tpu.dynamic_rotate %1 by %c15_i32 dim 1 : vector<8x512xf32>, i32 -> vector<8x512xf32>
    %c2 = arith.constant 2 : index
    %c0_11 = arith.constant 0 : index
    %14 = vector.load %arg4[%c2, %c0_11] : memref<9x512xf32, #tpu.memory_space<vmem>>, vector<1x512xf32>
    %15 = vector.broadcast %14 : vector<1x512xf32> to vector<8x512xf32>
    %16 = arith.mulf %13, %15 : vector<8x512xf32>
    %c16 = arith.constant 16 : index
    %c0_12 = arith.constant 0 : index
    %17 = vector.load %arg15[%c16, %c0_12] : memref<72x512xf32, #tpu.memory_space<vmem>>, vector<8x512xf32>
    tpu.vector_store %arg15[%c16, %c0_12], %16 {strides = array<i32>} : memref<72x512xf32, #tpu.memory_space<vmem>>, vector<8x512xf32>,
    %c1_i32 = arith.constant 1 : i32
    %18 = tpu.dynamic_rotate %1 by %c1_i32 dim 1 : vector<8x512xf32>, i32 -> vector<8x512xf32>
    %c3 = arith.constant 3 : index
    %c0_13 = arith.constant 0 : index
    %19 = vector.load %arg4[%c3, %c0_13] : memref<9x512xf32, #tpu.memory_space<vmem>>, vector<1x512xf32>
    %20 = vector.broadcast %19 : vector<1x512xf32> to vector<8x512xf32>
    %21 = arith.mulf %18, %20 : vector<8x512xf32>
    %c24 = arith.constant 24 : index
    %c0_14 = arith.constant 0 : index
    %22 = vector.load %arg15[%c24, %c0_14] : memref<72x512xf32, #tpu.memory_space<vmem>>, vector<8x512xf32>
    tpu.vector_store %arg15[%c24, %c0_14], %21 {strides = array<i32>} : memref<72x512xf32, #tpu.memory_space<vmem>>, vector<8x512xf32>,
    %c32 = arith.constant 32 : index
    %c0_15 = arith.constant 0 : index
    %23 = vector.load %arg15[%c32, %c0_15] : memref<72x512xf32, #tpu.memory_space<vmem>>, vector<8x512xf32>
    tpu.vector_store %arg15[%c32, %c0_15], %1 {strides = array<i32>} : memref<72x512xf32, #tpu.memory_space<vmem>>, vector<8x512xf32>,
    %c511_i32 = arith.constant 511 : i32
    %24 = tpu.dynamic_rotate %1 by %c511_i32 dim 1 : vector<8x512xf32>, i32 -> vector<8x512xf32>
    %c5 = arith.constant 5 : index
    %c0_16 = arith.constant 0 : index
    %25 = vector.load %arg4[%c5, %c0_16] : memref<9x512xf32, #tpu.memory_space<vmem>>, vector<1x512xf32>
    %26 = vector.broadcast %25 : vector<1x512xf32> to vector<8x512xf32>
    %27 = arith.mulf %24, %26 : vector<8x512xf32>
    %c40 = arith.constant 40 : index
    %c0_17 = arith.constant 0 : index
    %28 = vector.load %arg15[%c40, %c0_17] : memref<72x512xf32, #tpu.memory_space<vmem>>, vector<8x512xf32>
    tpu.vector_store %arg15[%c40, %c0_17], %27 {strides = array<i32>} : memref<72x512xf32, #tpu.memory_space<vmem>>, vector<8x512xf32>,
    %c497_i32 = arith.constant 497 : i32
    %29 = tpu.dynamic_rotate %1 by %c497_i32 dim 1 : vector<8x512xf32>, i32 -> vector<8x512xf32>
    %c6 = arith.constant 6 : index
    %c0_18 = arith.constant 0 : index
    %30 = vector.load %arg4[%c6, %c0_18] : memref<9x512xf32, #tpu.memory_space<vmem>>, vector<1x512xf32>
    %31 = vector.broadcast %30 : vector<1x512xf32> to vector<8x512xf32>
    %32 = arith.mulf %29, %31 : vector<8x512xf32>
    %c48 = arith.constant 48 : index
    %c0_19 = arith.constant 0 : index
    %33 = vector.load %arg15[%c48, %c0_19] : memref<72x512xf32, #tpu.memory_space<vmem>>, vector<8x512xf32>
    tpu.vector_store %arg15[%c48, %c0_19], %32 {strides = array<i32>} : memref<72x512xf32, #tpu.memory_space<vmem>>, vector<8x512xf32>,
    %c496_i32 = arith.constant 496 : i32
    %34 = tpu.dynamic_rotate %1 by %c496_i32 dim 1 : vector<8x512xf32>, i32 -> vector<8x512xf32>
    %c7 = arith.constant 7 : index
    %c0_20 = arith.constant 0 : index
    %35 = vector.load %arg4[%c7, %c0_20] : memref<9x512xf32, #tpu.memory_space<vmem>>, vector<1x512xf32>
    %36 = vector.broadcast %35 : vector<1x512xf32> to vector<8x512xf32>
    %37 = arith.mulf %34, %36 : vector<8x512xf32>
    %c56 = arith.constant 56 : index
    %c0_21 = arith.constant 0 : index
    %38 = vector.load %arg15[%c56, %c0_21] : memref<72x512xf32, #tpu.memory_space<vmem>>, vector<8x512xf32>
    tpu.vector_store %arg15[%c56, %c0_21], %37 {strides = array<i32>} : memref<72x512xf32, #tpu.memory_space<vmem>>, vector<8x512xf32>,
    %c495_i32 = arith.constant 495 : i32
    %39 = tpu.dynamic_rotate %1 by %c495_i32 dim 1 : vector<8x512xf32>, i32 -> vector<8x512xf32>
    %c8_22 = arith.constant 8 : index
    %c0_23 = arith.constant 0 : index
    %40 = vector.load %arg4[%c8_22, %c0_23] : memref<9x512xf32, #tpu.memory_space<vmem>>, vector<1x512xf32>
    %41 = vector.broadcast %40 : vector<1x512xf32> to vector<8x512xf32>
    %42 = arith.mulf %39, %41 : vector<8x512xf32>
    %c64 = arith.constant 64 : index
    %c0_24 = arith.constant 0 : index
    %43 = vector.load %arg15[%c64, %c0_24] : memref<72x512xf32, #tpu.memory_space<vmem>>, vector<8x512xf32>
    tpu.vector_store %arg15[%c64, %c0_24], %42 {strides = array<i32>} : memref<72x512xf32, #tpu.memory_space<vmem>>, vector<8x512xf32>,
    %c0_25 = arith.constant 0 : index
    %c0_26 = arith.constant 0 : index
    %44 = vector.load %arg15[%c0_25, %c0_26] : memref<72x512xf32, #tpu.memory_space<vmem>>, vector<72x512xf32>
    %45 = arith.truncf %44 : vector<72x512xf32> to vector<72x512xbf16>
    %cst = arith.constant dense<0.000000e+00> : vector<8x512xf32>
    %46 = tpu.matmul %2, %45, %cst {dimension_numbers = #tpu.dot_dimension_numbers<[1], [0], [0], [1], [0, 0, 1, 1], [], []>} : vector<8x72xbf16>, vector<72x512xbf16>, vector<8x512xf32> -> vector<8x512xf32>
    %47 = vector.extract_strided_slice %0 {offsets = [0, 0], sizes = [8, 1], strides = [1, 1]} : vector<8x33xf32> to vector<8x1xf32>
    %48 = vector.broadcast %47 : vector<8x1xf32> to vector<8x512xf32>
    %49 = arith.addf %46, %48 : vector<8x512xf32>
    %cst_27 = arith.constant 0.000000e+00 : f32
    %50 = vector.broadcast %cst_27 : f32 to vector<8x512xf32>
    %51 = arith.cmpf oge, %49, %50 : vector<8x512xf32>
    %cst_28 = arith.constant 0.00999999977 : f32
    %52 = vector.broadcast %cst_28 : f32 to vector<8x512xf32>
    %53 = arith.mulf %52, %49 : vector<8x512xf32>
    %54 = arith.select %51, %49, %53 : vector<8x512xi1>, vector<8x512xf32>
    %c0_29 = arith.constant 0 : index
    %c0_30 = arith.constant 0 : index
    %55 = vector.load %arg16[%c0_29, %c0_30] : memref<24x512xf32, #tpu.memory_space<vmem>>, vector<8x512xf32>
    tpu.vector_store %arg16[%c0_29, %c0_30], %1 {strides = array<i32>} : memref<24x512xf32, #tpu.memory_space<vmem>>, vector<8x512xf32>,
    %c8_31 = arith.constant 8 : index
    %c0_32 = arith.constant 0 : index
    %56 = vector.load %arg16[%c8_31, %c0_32] : memref<24x512xf32, #tpu.memory_space<vmem>>, vector<8x512xf32>
    tpu.vector_store %arg16[%c8_31, %c0_32], %54 {strides = array<i32>} : memref<24x512xf32, #tpu.memory_space<vmem>>, vector<8x512xf32>,
    %c0_33 = arith.constant 0 : index
    %c0_34 = arith.constant 0 : index
    %57 = vector.load %arg16[%c0_33, %c0_34] : memref<24x512xf32, #tpu.memory_space<vmem>>, vector<16x512xf32>
    %c0_35 = arith.constant 0 : index
    %c128 = arith.constant 128 : index
    %58 = vector.load %arg2[%c0_35, %c128] : memref<8x4224xbf16, #tpu.memory_space<vmem>>, vector<8x16xbf16>
    %59 = arith.truncf %57 : vector<16x512xf32> to vector<16x512xbf16>
    %cst_36 = arith.constant dense<0.000000e+00> : vector<8x512xf32>
    %60 = tpu.matmul %58, %59, %cst_36 {dimension_numbers = #tpu.dot_dimension_numbers<[1], [0], [0], [1], [0, 0, 1, 1], [], []>} : vector<8x16xbf16>, vector<16x512xbf16>, vector<8x512xf32> -> vector<8x512xf32>
    %61 = vector.extract_strided_slice %0 {offsets = [0, 1], sizes = [8, 1], strides = [1, 1]} : vector<8x33xf32> to vector<8x1xf32>
    %62 = vector.broadcast %61 : vector<8x1xf32> to vector<8x512xf32>
    %63 = arith.addf %60, %62 : vector<8x512xf32>
    %c0_37 = arith.constant 0 : index
    %c256 = arith.constant 256 : index
    %64 = vector.load %arg2[%c0_37, %c256] : memref<8x4224xbf16, #tpu.memory_space<vmem>>, vector<8x72xbf16>
    %c17_i32_38 = arith.constant 17 : i32
    %65 = tpu.dynamic_rotate %63 by %c17_i32_38 dim 1 : vector<8x512xf32>, i32 -> vector<8x512xf32>
    %c0_39 = arith.constant 0 : index
    %c0_40 = arith.constant 0 : index
    %66 = vector.load %arg4[%c0_39, %c0_40] : memref<9x512xf32, #tpu.memory_space<vmem>>, vector<1x512xf32>
    %67 = vector.broadcast %66 : vector<1x512xf32> to vector<8x512xf32>
    %68 = arith.mulf %65, %67 : vector<8x512xf32>
    %c0_41 = arith.constant 0 : index
    %c0_42 = arith.constant 0 : index
    %69 = vector.load %arg15[%c0_41, %c0_42] : memref<72x512xf32, #tpu.memory_space<vmem>>, vector<8x512xf32>
    tpu.vector_store %arg15[%c0_41, %c0_42], %68 {strides = array<i32>} : memref<72x512xf32, #tpu.memory_space<vmem>>, vector<8x512xf32>,
    %c16_i32_43 = arith.constant 16 : i32
    %70 = tpu.dynamic_rotate %63 by %c16_i32_43 dim 1 : vector<8x512xf32>, i32 -> vector<8x512xf32>
    %c1_44 = arith.constant 1 : index
    %c0_45 = arith.constant 0 : index
    %71 = vector.load %arg4[%c1_44, %c0_45] : memref<9x512xf32, #tpu.memory_space<vmem>>, vector<1x512xf32>
    %72 = vector.broadcast %71 : vector<1x512xf32> to vector<8x512xf32>
    %73 = arith.mulf %70, %72 : vector<8x512xf32>
    %c8_46 = arith.constant 8 : index
    %c0_47 = arith.constant 0 : index
    %74 = vector.load %arg15[%c8_46, %c0_47] : memref<72x512xf32, #tpu.memory_space<vmem>>, vector<8x512xf32>
    tpu.vector_store %arg15[%c8_46, %c0_47], %73 {strides = array<i32>} : memref<72x512xf32, #tpu.memory_space<vmem>>, vector<8x512xf32>,
    %c15_i32_48 = arith.constant 15 : i32
    %75 = tpu.dynamic_rotate %63 by %c15_i32_48 dim 1 : vector<8x512xf32>, i32 -> vector<8x512xf32>
    %c2_49 = arith.constant 2 : index
    %c0_50 = arith.constant 0 : index
    %76 = vector.load %arg4[%c2_49, %c0_50] : memref<9x512xf32, #tpu.memory_space<vmem>>, vector<1x512xf32>
    %77 = vector.broadcast %76 : vector<1x512xf32> to vector<8x512xf32>
    %78 = arith.mulf %75, %77 : vector<8x512xf32>
    %c16_51 = arith.constant 16 : index
    %c0_52 = arith.constant 0 : index
    %79 = vector.load %arg15[%c16_51, %c0_52] : memref<72x512xf32, #tpu.memory_space<vmem>>, vector<8x512xf32>
    tpu.vector_store %arg15[%c16_51, %c0_52], %78 {strides = array<i32>} : memref<72x512xf32, #tpu.memory_space<vmem>>, vector<8x512xf32>,
    %c1_i32_53 = arith.constant 1 : i32
    %80 = tpu.dynamic_rotate %63 by %c1_i32_53 dim 1 : vector<8x512xf32>, i32 -> vector<8x512xf32>
    %c3_54 = arith.constant 3 : index
    %c0_55 = arith.constant 0 : index
    %81 = vector.load %arg4[%c3_54, %c0_55] : memref<9x512xf32, #tpu.memory_space<vmem>>, vector<1x512xf32>
    %82 = vector.broadcast %81 : vector<1x512xf32> to vector<8x512xf32>
    %83 = arith.mulf %80, %82 : vector<8x512xf32>
    %c24_56 = arith.constant 24 : index
    %c0_57 = arith.constant 0 : index
    %84 = vector.load %arg15[%c24_56, %c0_57] : memref<72x512xf32, #tpu.memory_space<vmem>>, vector<8x512xf32>
    tpu.vector_store %arg15[%c24_56, %c0_57], %83 {strides = array<i32>} : memref<72x512xf32, #tpu.memory_space<vmem>>, vector<8x512xf32>,
    %c32_58 = arith.constant 32 : index
    %c0_59 = arith.constant 0 : index
    %85 = vector.load %arg15[%c32_58, %c0_59] : memref<72x512xf32, #tpu.memory_space<vmem>>, vector<8x512xf32>
    tpu.vector_store %arg15[%c32_58, %c0_59], %63 {strides = array<i32>} : memref<72x512xf32, #tpu.memory_space<vmem>>, vector<8x512xf32>,
    %c511_i32_60 = arith.constant 511 : i32
    %86 = tpu.dynamic_rotate %63 by %c511_i32_60 dim 1 : vector<8x512xf32>, i32 -> vector<8x512xf32>
    %c5_61 = arith.constant 5 : index
    %c0_62 = arith.constant 0 : index
    %87 = vector.load %arg4[%c5_61, %c0_62] : memref<9x512xf32, #tpu.memory_space<vmem>>, vector<1x512xf32>
    %88 = vector.broadcast %87 : vector<1x512xf32> to vector<8x512xf32>
    %89 = arith.mulf %86, %88 : vector<8x512xf32>
    %c40_63 = arith.constant 40 : index
    %c0_64 = arith.constant 0 : index
    %90 = vector.load %arg15[%c40_63, %c0_64] : memref<72x512xf32, #tpu.memory_space<vmem>>, vector<8x512xf32>
    tpu.vector_store %arg15[%c40_63, %c0_64], %89 {strides = array<i32>} : memref<72x512xf32, #tpu.memory_space<vmem>>, vector<8x512xf32>,
    %c497_i32_65 = arith.constant 497 : i32
    %91 = tpu.dynamic_rotate %63 by %c497_i32_65 dim 1 : vector<8x512xf32>, i32 -> vector<8x512xf32>
    %c6_66 = arith.constant 6 : index
    %c0_67 = arith.constant 0 : index
    %92 = vector.load %arg4[%c6_66, %c0_67] : memref<9x512xf32, #tpu.memory_space<vmem>>, vector<1x512xf32>
    %93 = vector.broadcast %92 : vector<1x512xf32> to vector<8x512xf32>
    %94 = arith.mulf %91, %93 : vector<8x512xf32>
    %c48_68 = arith.constant 48 : index
    %c0_69 = arith.constant 0 : index
    %95 = vector.load %arg15[%c48_68, %c0_69] : memref<72x512xf32, #tpu.memory_space<vmem>>, vector<8x512xf32>
    tpu.vector_store %arg15[%c48_68, %c0_69], %94 {strides = array<i32>} : memref<72x512xf32, #tpu.memory_space<vmem>>, vector<8x512xf32>,
    %c496_i32_70 = arith.constant 496 : i32
    %96 = tpu.dynamic_rotate %63 by %c496_i32_70 dim 1 : vector<8x512xf32>, i32 -> vector<8x512xf32>
    %c7_71 = arith.constant 7 : index
    %c0_72 = arith.constant 0 : index
    %97 = vector.load %arg4[%c7_71, %c0_72] : memref<9x512xf32, #tpu.memory_space<vmem>>, vector<1x512xf32>
    %98 = vector.broadcast %97 : vector<1x512xf32> to vector<8x512xf32>
    %99 = arith.mulf %96, %98 : vector<8x512xf32>
    %c56_73 = arith.constant 56 : index
    %c0_74 = arith.constant 0 : index
    %100 = vector.load %arg15[%c56_73, %c0_74] : memref<72x512xf32, #tpu.memory_space<vmem>>, vector<8x512xf32>
    tpu.vector_store %arg15[%c56_73, %c0_74], %99 {strides = array<i32>} : memref<72x512xf32, #tpu.memory_space<vmem>>, vector<8x512xf32>,
    %c495_i32_75 = arith.constant 495 : i32
    %101 = tpu.dynamic_rotate %63 by %c495_i32_75 dim 1 : vector<8x512xf32>, i32 -> vector<8x512xf32>
    %c8_76 = arith.constant 8 : index
    %c0_77 = arith.constant 0 : index
    %102 = vector.load %arg4[%c8_76, %c0_77] : memref<9x512xf32, #tpu.memory_space<vmem>>, vector<1x512xf32>
    %103 = vector.broadcast %102 : vector<1x512xf32> to vector<8x512xf32>
    %104 = arith.mulf %101, %103 : vector<8x512xf32>
    %c64_78 = arith.constant 64 : index
    %c0_79 = arith.constant 0 : index
    %105 = vector.load %arg15[%c64_78, %c0_79] : memref<72x512xf32, #tpu.memory_space<vmem>>, vector<8x512xf32>
    tpu.vector_store %arg15[%c64_78, %c0_79], %104 {strides = array<i32>} : memref<72x512xf32, #tpu.memory_space<vmem>>, vector<8x512xf32>,
    %c0_80 = arith.constant 0 : index
    %c0_81 = arith.constant 0 : index
    %106 = vector.load %arg15[%c0_80, %c0_81] : memref<72x512xf32, #tpu.memory_space<vmem>>, vector<72x512xf32>
    %107 = arith.truncf %106 : vector<72x512xf32> to vector<72x512xbf16>
    %cst_82 = arith.constant dense<0.000000e+00> : vector<8x512xf32>
    %108 = tpu.matmul %64, %107, %cst_82 {dimension_numbers = #tpu.dot_dimension_numbers<[1], [0], [0], [1], [0, 0, 1, 1], [], []>} : vector<8x72xbf16>, vector<72x512xbf16>, vector<8x512xf32> -> vector<8x512xf32>
    %109 = vector.extract_strided_slice %0 {offsets = [0, 2], sizes = [8, 1], strides = [1, 1]} : vector<8x33xf32> to vector<8x1xf32>
    %110 = vector.broadcast %109 : vector<8x1xf32> to vector<8x512xf32>
    %111 = arith.addf %108, %110 : vector<8x512xf32>
    %cst_83 = arith.constant 0.000000e+00 : f32
    %112 = vector.broadcast %cst_83 : f32 to vector<8x512xf32>
    %113 = arith.cmpf oge, %111, %112 : vector<8x512xf32>
    %cst_84 = arith.constant 0.00999999977 : f32
    %114 = vector.broadcast %cst_84 : f32 to vector<8x512xf32>
    %115 = arith.mulf %114, %111 : vector<8x512xf32>
    %116 = arith.select %113, %111, %115 : vector<8x512xi1>, vector<8x512xf32>
    %c16_85 = arith.constant 16 : index
    %c0_86 = arith.constant 0 : index
    %117 = vector.load %arg16[%c16_85, %c0_86] : memref<24x512xf32, #tpu.memory_space<vmem>>, vector<8x512xf32>
    tpu.vector_store %arg16[%c16_85, %c0_86], %116 {strides = array<i32>} : memref<24x512xf32, #tpu.memory_space<vmem>>, vector<8x512xf32>,
    %c0_87 = arith.constant 0 : index
    %c0_88 = arith.constant 0 : index
    %118 = vector.load %arg16[%c0_87, %c0_88] : memref<24x512xf32, #tpu.memory_space<vmem>>, vector<24x512xf32>
    %c0_89 = arith.constant 0 : index
    %c384 = arith.constant 384 : index
    %119 = vector.load %arg2[%c0_89, %c384] : memref<8x4224xbf16, #tpu.memory_space<vmem>>, vector<8x24xbf16>
    %120 = arith.truncf %118 : vector<24x512xf32> to vector<24x512xbf16>
    %cst_90 = arith.constant dense<0.000000e+00> : vector<8x512xf32>
    %121 = tpu.matmul %119, %120, %cst_90 {dimension_numbers = #tpu.dot_dimension_numbers<[1], [0], [0], [1], [0, 0, 1, 1], [], []>} : vector<8x24xbf16>, vector<24x512xbf16>, vector<8x512xf32> -> vector<8x512xf32>
    %122 = vector.extract_strided_slice %0 {offsets = [0, 3], sizes = [8, 1], strides = [1, 1]} : vector<8x33xf32> to vector<8x1xf32>
    %123 = vector.broadcast %122 : vector<8x1xf32> to vector<8x512xf32>
    %124 = arith.addf %121, %123 : vector<8x512xf32>
    %c0_91 = arith.constant 0 : index
    %c512 = arith.constant 512 : index
    %125 = vector.load %arg2[%c0_91, %c512] : memref<8x4224xbf16, #tpu.memory_space<vmem>>, vector<8x72xbf16>
    %c17_i32_92 = arith.constant 17 : i32
    %126 = tpu.dynamic_rotate %124 by %c17_i32_92 dim 1 : vector<8x512xf32>, i32 -> vector<8x512xf32>
    %c0_93 = arith.constant 0 : index
    %c0_94 = arith.constant 0 : index
    %127 = vector.load %arg4[%c0_93, %c0_94] : memref<9x512xf32, #tpu.memory_space<vmem>>, vector<1x512xf32>
    %128 = vector.broadcast %127 : vector<1x512xf32> to vector<8x512xf32>
    %129 = arith.mulf %126, %128 : vector<8x512xf32>
    %c0_95 = arith.constant 0 : index
    %c0_96 = arith.constant 0 : index
    %130 = vector.load %arg15[%c0_95, %c0_96] : memref<72x512xf32, #tpu.memory_space<vmem>>, vector<8x512xf32>
    tpu.vector_store %arg15[%c0_95, %c0_96], %129 {strides = array<i32>} : memref<72x512xf32, #tpu.memory_space<vmem>>, vector<8x512xf32>,
    %c16_i32_97 = arith.constant 16 : i32
    %131 = tpu.dynamic_rotate %124 by %c16_i32_97 dim 1 : vector<8x512xf32>, i32 -> vector<8x512xf32>
    %c1_98 = arith.constant 1 : index
    %c0_99 = arith.constant 0 : index
    %132 = vector.load %arg4[%c1_98, %c0_99] : memref<9x512xf32, #tpu.memory_space<vmem>>, vector<1x512xf32>
    %133 = vector.broadcast %132 : vector<1x512xf32> to vector<8x512xf32>
    %134 = arith.mulf %131, %133 : vector<8x512xf32>
    %c8_100 = arith.constant 8 : index
    %c0_101 = arith.constant 0 : index
    %135 = vector.load %arg15[%c8_100, %c0_101] : memref<72x512xf32, #tpu.memory_space<vmem>>, vector<8x512xf32>
    tpu.vector_store %arg15[%c8_100, %c0_101], %134 {strides = array<i32>} : memref<72x512xf32, #tpu.memory_space<vmem>>, vector<8x512xf32>,
    %c15_i32_102 = arith.constant 15 : i32
    %136 = tpu.dynamic_rotate %124 by %c15_i32_102 dim 1 : vector<8x512xf32>, i32 -> vector<8x512xf32>
    %c2_103 = arith.constant 2 : index
    %c0_104 = arith.constant 0 : index
    %137 = vector.load %arg4[%c2_103, %c0_104] : memref<9x512xf32, #tpu.memory_space<vmem>>, vector<1x512xf32>
    %138 = vector.broadcast %137 : vector<1x512xf32> to vector<8x512xf32>
    %139 = arith.mulf %136, %138 : vector<8x512xf32>
    %c16_105 = arith.constant 16 : index
    %c0_106 = arith.constant 0 : index
    %140 = vector.load %arg15[%c16_105, %c0_106] : memref<72x512xf32, #tpu.memory_space<vmem>>, vector<8x512xf32>
    tpu.vector_store %arg15[%c16_105, %c0_106], %139 {strides = array<i32>} : memref<72x512xf32, #tpu.memory_space<vmem>>, vector<8x512xf32>,
    %c1_i32_107 = arith.constant 1 : i32
    %141 = tpu.dynamic_rotate %124 by %c1_i32_107 dim 1 : vector<8x512xf32>, i32 -> vector<8x512xf32>
    %c3_108 = arith.constant 3 : index
    %c0_109 = arith.constant 0 : index
    %142 = vector.load %arg4[%c3_108, %c0_109] : memref<9x512xf32, #tpu.memory_space<vmem>>, vector<1x512xf32>
    %143 = vector.broadcast %142 : vector<1x512xf32> to vector<8x512xf32>
    %144 = arith.mulf %141, %143 : vector<8x512xf32>
    %c24_110 = arith.constant 24 : index
    %c0_111 = arith.constant 0 : index
    %145 = vector.load %arg15[%c24_110, %c0_111] : memref<72x512xf32, #tpu.memory_space<vmem>>, vector<8x512xf32>
    tpu.vector_store %arg15[%c24_110, %c0_111], %144 {strides = array<i32>} : memref<72x512xf32, #tpu.memory_space<vmem>>, vector<8x512xf32>,
    %c32_112 = arith.constant 32 : index
    %c0_113 = arith.constant 0 : index
    %146 = vector.load %arg15[%c32_112, %c0_113] : memref<72x512xf32, #tpu.memory_space<vmem>>, vector<8x512xf32>
    tpu.vector_store %arg15[%c32_112, %c0_113], %124 {strides = array<i32>} : memref<72x512xf32, #tpu.memory_space<vmem>>, vector<8x512xf32>,
    %c511_i32_114 = arith.constant 511 : i32
    %147 = tpu.dynamic_rotate %124 by %c511_i32_114 dim 1 : vector<8x512xf32>, i32 -> vector<8x512xf32>
    %c5_115 = arith.constant 5 : index
    %c0_116 = arith.constant 0 : index
    %148 = vector.load %arg4[%c5_115, %c0_116] : memref<9x512xf32, #tpu.memory_space<vmem>>, vector<1x512xf32>
    %149 = vector.broadcast %148 : vector<1x512xf32> to vector<8x512xf32>
    %150 = arith.mulf %147, %149 : vector<8x512xf32>
    %c40_117 = arith.constant 40 : index
    %c0_118 = arith.constant 0 : index
    %151 = vector.load %arg15[%c40_117, %c0_118] : memref<72x512xf32, #tpu.memory_space<vmem>>, vector<8x512xf32>
    tpu.vector_store %arg15[%c40_117, %c0_118], %150 {strides = array<i32>} : memref<72x512xf32, #tpu.memory_space<vmem>>, vector<8x512xf32>,
    %c497_i32_119 = arith.constant 497 : i32
    %152 = tpu.dynamic_rotate %124 by %c497_i32_119 dim 1 : vector<8x512xf32>, i32 -> vector<8x512xf32>
    %c6_120 = arith.constant 6 : index
    %c0_121 = arith.constant 0 : index
    %153 = vector.load %arg4[%c6_120, %c0_121] : memref<9x512xf32, #tpu.memory_space<vmem>>, vector<1x512xf32>
    %154 = vector.broadcast %153 : vector<1x512xf32> to vector<8x512xf32>
    %155 = arith.mulf %152, %154 : vector<8x512xf32>
    %c48_122 = arith.constant 48 : index
    %c0_123 = arith.constant 0 : index
    %156 = vector.load %arg15[%c48_122, %c0_123] : memref<72x512xf32, #tpu.memory_space<vmem>>, vector<8x512xf32>
    tpu.vector_store %arg15[%c48_122, %c0_123], %155 {strides = array<i32>} : memref<72x512xf32, #tpu.memory_space<vmem>>, vector<8x512xf32>,
    %c496_i32_124 = arith.constant 496 : i32
    %157 = tpu.dynamic_rotate %124 by %c496_i32_124 dim 1 : vector<8x512xf32>, i32 -> vector<8x512xf32>
    %c7_125 = arith.constant 7 : index
    %c0_126 = arith.constant 0 : index
    %158 = vector.load %arg4[%c7_125, %c0_126] : memref<9x512xf32, #tpu.memory_space<vmem>>, vector<1x512xf32>
    %159 = vector.broadcast %158 : vector<1x512xf32> to vector<8x512xf32>
    %160 = arith.mulf %157, %159 : vector<8x512xf32>
    %c56_127 = arith.constant 56 : index
    %c0_128 = arith.constant 0 : index
    %161 = vector.load %arg15[%c56_127, %c0_128] : memref<72x512xf32, #tpu.memory_space<vmem>>, vector<8x512xf32>
    tpu.vector_store %arg15[%c56_127, %c0_128], %160 {strides = array<i32>} : memref<72x512xf32, #tpu.memory_space<vmem>>, vector<8x512xf32>,
    %c495_i32_129 = arith.constant 495 : i32
    %162 = tpu.dynamic_rotate %124 by %c495_i32_129 dim 1 : vector<8x512xf32>, i32 -> vector<8x512xf32>
    %c8_130 = arith.constant 8 : index
    %c0_131 = arith.constant 0 : index
    %163 = vector.load %arg4[%c8_130, %c0_131] : memref<9x512xf32, #tpu.memory_space<vmem>>, vector<1x512xf32>
    %164 = vector.broadcast %163 : vector<1x512xf32> to vector<8x512xf32>
    %165 = arith.mulf %162, %164 : vector<8x512xf32>
    %c64_132 = arith.constant 64 : index
    %c0_133 = arith.constant 0 : index
    %166 = vector.load %arg15[%c64_132, %c0_133] : memref<72x512xf32, #tpu.memory_space<vmem>>, vector<8x512xf32>
    tpu.vector_store %arg15[%c64_132, %c0_133], %165 {strides = array<i32>} : memref<72x512xf32, #tpu.memory_space<vmem>>, vector<8x512xf32>,
    %c0_134 = arith.constant 0 : index
    %c0_135 = arith.constant 0 : index
    %167 = vector.load %arg15[%c0_134, %c0_135] : memref<72x512xf32, #tpu.memory_space<vmem>>, vector<72x512xf32>
    %168 = arith.truncf %167 : vector<72x512xf32> to vector<72x512xbf16>
    %cst_136 = arith.constant dense<0.000000e+00> : vector<8x512xf32>
    %169 = tpu.matmul %125, %168, %cst_136 {dimension_numbers = #tpu.dot_dimension_numbers<[1], [0], [0], [1], [0, 0, 1, 1], [], []>} : vector<8x72xbf16>, vector<72x512xbf16>, vector<8x512xf32> -> vector<8x512xf32>
    %170 = vector.extract_strided_slice %0 {offsets = [0, 4], sizes = [8, 1], strides = [1, 1]} : vector<8x33xf32> to vector<8x1xf32>
    %171 = vector.broadcast %170 : vector<8x1xf32> to vector<8x512xf32>
    %172 = arith.addf %169, %171 : vector<8x512xf32>
    %cst_137 = arith.constant 0.000000e+00 : f32
    %173 = vector.broadcast %cst_137 : f32 to vector<8x512xf32>
    %174 = arith.cmpf oge, %172, %173 : vector<8x512xf32>
    %cst_138 = arith.constant 0.00999999977 : f32
    %175 = vector.broadcast %cst_138 : f32 to vector<8x512xf32>
    %176 = arith.mulf %175, %172 : vector<8x512xf32>
    %177 = arith.select %174, %172, %176 : vector<8x512xi1>, vector<8x512xf32>
    %c4 = arith.constant 4 : index
    %c0_139 = arith.constant 0 : index
    %178 = vector.load %arg4[%c4, %c0_139] : memref<9x512xf32, #tpu.memory_space<vmem>>, vector<1x512xf32>
    %179 = vector.broadcast %178 : vector<1x512xf32> to vector<8x512xf32>
    %180 = arith.mulf %177, %179 : vector<8x512xf32>
    %cst_140 = arith.constant dense<0.000000e+00> : vector<8xf32>
    %181 = vector.multi_reduction <add>, %180, %cst_140 [1] : vector<8x512xf32> to vector<8xf32>
    %182 = vector.shape_cast %181 : vector<8xf32> to vector<8x1xf32>
    %cst_141 = arith.constant 0.001953125 : f32
    %183 = vector.broadcast %cst_141 : f32 to vector<8x1xf32>
    %184 = arith.mulf %182, %183 : vector<8x1xf32>
    %185 = vector.broadcast %184 : vector<8x1xf32> to vector<8x512xf32>
    %186 = arith.subf %177, %185 : vector<8x512xf32>
    %187 = vector.broadcast %178 : vector<1x512xf32> to vector<8x512xf32>
    %188 = arith.mulf %186, %187 : vector<8x512xf32>
    %189 = arith.mulf %188, %188 : vector<8x512xf32>
    %cst_142 = arith.constant dense<0.000000e+00> : vector<8xf32>
    %190 = vector.multi_reduction <add>, %189, %cst_142 [1] : vector<8x512xf32> to vector<8xf32>
    %191 = vector.shape_cast %190 : vector<8xf32> to vector<8x1xf32>
    %cst_143 = arith.constant 0.001953125 : f32
    %192 = vector.broadcast %cst_143 : f32 to vector<8x1xf32>
    %193 = arith.mulf %191, %192 : vector<8x1xf32>
    %194 = vector.broadcast %184 : vector<8x1xf32> to vector<8x512xf32>
    %195 = arith.subf %177, %194 : vector<8x512xf32>
    %cst_144 = arith.constant 9.99999974E-6 : f32
    %196 = vector.broadcast %cst_144 : f32 to vector<8x1xf32>
    %197 = arith.addf %193, %196 : vector<8x1xf32>
    %198 = math.rsqrt %197 : vector<8x1xf32>
    %199 = vector.broadcast %198 : vector<8x1xf32> to vector<8x512xf32>
    %200 = arith.mulf %195, %199 : vector<8x512xf32>
    %c0_145 = arith.constant 0 : index
    %c0_146 = arith.constant 0 : index
    %201 = vector.load %arg8[%c0_145, %c0_146] : memref<512x128xf32, #tpu.memory_space<vmem>>, vector<512x128xf32>
    %cst_147 = arith.constant dense<0.000000e+00> : vector<8x128xf32>
    %202 = tpu.matmul %200, %201, %cst_147 {dimension_numbers = #tpu.dot_dimension_numbers<[1], [0], [0], [1], [0, 0, 1, 1], [], []>} : vector<8x512xf32>, vector<512x128xf32>, vector<8x128xf32> -> vector<8x128xf32>
    %c0_148 = arith.constant 0 : index
    %c640 = arith.constant 640 : index
    %203 = vector.load %arg2[%c0_148, %c640] : memref<8x4224xbf16, #tpu.memory_space<vmem>>, vector<8x72xbf16>
    %c5_i32 = arith.constant 5 : i32
    %204 = tpu.dynamic_rotate %202 by %c5_i32 dim 1 : vector<8x128xf32>, i32 -> vector<8x128xf32>
    %c0_149 = arith.constant 0 : index
    %c0_150 = arith.constant 0 : index
    %205 = vector.load %arg5[%c0_149, %c0_150] : memref<9x128xf32, #tpu.memory_space<vmem>>, vector<1x128xf32>
    %206 = vector.broadcast %205 : vector<1x128xf32> to vector<8x128xf32>
    %207 = arith.mulf %204, %206 : vector<8x128xf32>
    %c0_151 = arith.constant 0 : index
    %c0_152 = arith.constant 0 : index
    %208 = vector.load %arg15[%c0_151, %c0_152] : memref<72x512xf32, #tpu.memory_space<vmem>>, vector<8x128xf32>
    tpu.vector_store %arg15[%c0_151, %c0_152], %207 {strides = array<i32>} : memref<72x512xf32, #tpu.memory_space<vmem>>, vector<8x128xf32>,
    %c4_i32 = arith.constant 4 : i32
    %209 = tpu.dynamic_rotate %202 by %c4_i32 dim 1 : vector<8x128xf32>, i32 -> vector<8x128xf32>
    %c1_153 = arith.constant 1 : index
    %c0_154 = arith.constant 0 : index
    %210 = vector.load %arg5[%c1_153, %c0_154] : memref<9x128xf32, #tpu.memory_space<vmem>>, vector<1x128xf32>
    %211 = vector.broadcast %210 : vector<1x128xf32> to vector<8x128xf32>
    %212 = arith.mulf %209, %211 : vector<8x128xf32>
    %c8_155 = arith.constant 8 : index
    %c0_156 = arith.constant 0 : index
    %213 = vector.load %arg15[%c8_155, %c0_156] : memref<72x512xf32, #tpu.memory_space<vmem>>, vector<8x128xf32>
    tpu.vector_store %arg15[%c8_155, %c0_156], %212 {strides = array<i32>} : memref<72x512xf32, #tpu.memory_space<vmem>>, vector<8x128xf32>,
    %c3_i32 = arith.constant 3 : i32
    %214 = tpu.dynamic_rotate %202 by %c3_i32 dim 1 : vector<8x128xf32>, i32 -> vector<8x128xf32>
    %c2_157 = arith.constant 2 : index
    %c0_158 = arith.constant 0 : index
    %215 = vector.load %arg5[%c2_157, %c0_158] : memref<9x128xf32, #tpu.memory_space<vmem>>, vector<1x128xf32>
    %216 = vector.broadcast %215 : vector<1x128xf32> to vector<8x128xf32>
    %217 = arith.mulf %214, %216 : vector<8x128xf32>
    %c16_159 = arith.constant 16 : index
    %c0_160 = arith.constant 0 : index
    %218 = vector.load %arg15[%c16_159, %c0_160] : memref<72x512xf32, #tpu.memory_space<vmem>>, vector<8x128xf32>
    tpu.vector_store %arg15[%c16_159, %c0_160], %217 {strides = array<i32>} : memref<72x512xf32, #tpu.memory_space<vmem>>, vector<8x128xf32>,
    %c1_i32_161 = arith.constant 1 : i32
    %219 = tpu.dynamic_rotate %202 by %c1_i32_161 dim 1 : vector<8x128xf32>, i32 -> vector<8x128xf32>
    %c3_162 = arith.constant 3 : index
    %c0_163 = arith.constant 0 : index
    %220 = vector.load %arg5[%c3_162, %c0_163] : memref<9x128xf32, #tpu.memory_space<vmem>>, vector<1x128xf32>
    %221 = vector.broadcast %220 : vector<1x128xf32> to vector<8x128xf32>
    %222 = arith.mulf %219, %221 : vector<8x128xf32>
    %c24_164 = arith.constant 24 : index
    %c0_165 = arith.constant 0 : index
    %223 = vector.load %arg15[%c24_164, %c0_165] : memref<72x512xf32, #tpu.memory_space<vmem>>, vector<8x128xf32>
    tpu.vector_store %arg15[%c24_164, %c0_165], %222 {strides = array<i32>} : memref<72x512xf32, #tpu.memory_space<vmem>>, vector<8x128xf32>,
    %c32_166 = arith.constant 32 : index
    %c0_167 = arith.constant 0 : index
    %224 = vector.load %arg15[%c32_166, %c0_167] : memref<72x512xf32, #tpu.memory_space<vmem>>, vector<8x128xf32>
    tpu.vector_store %arg15[%c32_166, %c0_167], %202 {strides = array<i32>} : memref<72x512xf32, #tpu.memory_space<vmem>>, vector<8x128xf32>,
    %c127_i32 = arith.constant 127 : i32
    %225 = tpu.dynamic_rotate %202 by %c127_i32 dim 1 : vector<8x128xf32>, i32 -> vector<8x128xf32>
    %c5_168 = arith.constant 5 : index
    %c0_169 = arith.constant 0 : index
    %226 = vector.load %arg5[%c5_168, %c0_169] : memref<9x128xf32, #tpu.memory_space<vmem>>, vector<1x128xf32>
    %227 = vector.broadcast %226 : vector<1x128xf32> to vector<8x128xf32>
    %228 = arith.mulf %225, %227 : vector<8x128xf32>
    %c40_170 = arith.constant 40 : index
    %c0_171 = arith.constant 0 : index
    %229 = vector.load %arg15[%c40_170, %c0_171] : memref<72x512xf32, #tpu.memory_space<vmem>>, vector<8x128xf32>
    tpu.vector_store %arg15[%c40_170, %c0_171], %228 {strides = array<i32>} : memref<72x512xf32, #tpu.memory_space<vmem>>, vector<8x128xf32>,
    %c125_i32 = arith.constant 125 : i32
    %230 = tpu.dynamic_rotate %202 by %c125_i32 dim 1 : vector<8x128xf32>, i32 -> vector<8x128xf32>
    %c6_172 = arith.constant 6 : index
    %c0_173 = arith.constant 0 : index
    %231 = vector.load %arg5[%c6_172, %c0_173] : memref<9x128xf32, #tpu.memory_space<vmem>>, vector<1x128xf32>
    %232 = vector.broadcast %231 : vector<1x128xf32> to vector<8x128xf32>
    %233 = arith.mulf %230, %232 : vector<8x128xf32>
    %c48_174 = arith.constant 48 : index
    %c0_175 = arith.constant 0 : index
    %234 = vector.load %arg15[%c48_174, %c0_175] : memref<72x512xf32, #tpu.memory_space<vmem>>, vector<8x128xf32>
    tpu.vector_store %arg15[%c48_174, %c0_175], %233 {strides = array<i32>} : memref<72x512xf32, #tpu.memory_space<vmem>>, vector<8x128xf32>,
    %c124_i32 = arith.constant 124 : i32
    %235 = tpu.dynamic_rotate %202 by %c124_i32 dim 1 : vector<8x128xf32>, i32 -> vector<8x128xf32>
    %c7_176 = arith.constant 7 : index
    %c0_177 = arith.constant 0 : index
    %236 = vector.load %arg5[%c7_176, %c0_177] : memref<9x128xf32, #tpu.memory_space<vmem>>, vector<1x128xf32>
    %237 = vector.broadcast %236 : vector<1x128xf32> to vector<8x128xf32>
    %238 = arith.mulf %235, %237 : vector<8x128xf32>
    %c56_178 = arith.constant 56 : index
    %c0_179 = arith.constant 0 : index
    %239 = vector.load %arg15[%c56_178, %c0_179] : memref<72x512xf32, #tpu.memory_space<vmem>>, vector<8x128xf32>
    tpu.vector_store %arg15[%c56_178, %c0_179], %238 {strides = array<i32>} : memref<72x512xf32, #tpu.memory_space<vmem>>, vector<8x128xf32>,
    %c123_i32 = arith.constant 123 : i32
    %240 = tpu.dynamic_rotate %202 by %c123_i32 dim 1 : vector<8x128xf32>, i32 -> vector<8x128xf32>
    %c8_180 = arith.constant 8 : index
    %c0_181 = arith.constant 0 : index
    %241 = vector.load %arg5[%c8_180, %c0_181] : memref<9x128xf32, #tpu.memory_space<vmem>>, vector<1x128xf32>
    %242 = vector.broadcast %241 : vector<1x128xf32> to vector<8x128xf32>
    %243 = arith.mulf %240, %242 : vector<8x128xf32>
    %c64_182 = arith.constant 64 : index
    %c0_183 = arith.constant 0 : index
    %244 = vector.load %arg15[%c64_182, %c0_183] : memref<72x512xf32, #tpu.memory_space<vmem>>, vector<8x128xf32>
    tpu.vector_store %arg15[%c64_182, %c0_183], %243 {strides = array<i32>} : memref<72x512xf32, #tpu.memory_space<vmem>>, vector<8x128xf32>,
    %c0_184 = arith.constant 0 : index
    %c0_185 = arith.constant 0 : index
    %245 = vector.load %arg15[%c0_184, %c0_185] : memref<72x512xf32, #tpu.memory_space<vmem>>, vector<72x128xf32>
    %246 = arith.truncf %245 : vector<72x128xf32> to vector<72x128xbf16>
    %cst_186 = arith.constant dense<0.000000e+00> : vector<8x128xf32>
    %247 = tpu.matmul %203, %246, %cst_186 {dimension_numbers = #tpu.dot_dimension_numbers<[1], [0], [0], [1], [0, 0, 1, 1], [], []>} : vector<8x72xbf16>, vector<72x128xbf16>, vector<8x128xf32> -> vector<8x128xf32>
    %248 = vector.extract_strided_slice %0 {offsets = [0, 5], sizes = [8, 1], strides = [1, 1]} : vector<8x33xf32> to vector<8x1xf32>
    %249 = vector.broadcast %248 : vector<8x1xf32> to vector<8x128xf32>
    %250 = arith.addf %247, %249 : vector<8x128xf32>
    %cst_187 = arith.constant 0.000000e+00 : f32
    %251 = vector.broadcast %cst_187 : f32 to vector<8x128xf32>
    %252 = arith.cmpf oge, %250, %251 : vector<8x128xf32>
    %cst_188 = arith.constant 0.00999999977 : f32
    %253 = vector.broadcast %cst_188 : f32 to vector<8x128xf32>
    %254 = arith.mulf %253, %250 : vector<8x128xf32>
    %255 = arith.select %252, %250, %254 : vector<8x128xi1>, vector<8x128xf32>
    %c0_189 = arith.constant 0 : index
    %c0_190 = arith.constant 0 : index
    %256 = vector.load %arg16[%c0_189, %c0_190] : memref<24x512xf32, #tpu.memory_space<vmem>>, vector<8x128xf32>
    tpu.vector_store %arg16[%c0_189, %c0_190], %202 {strides = array<i32>} : memref<24x512xf32, #tpu.memory_space<vmem>>, vector<8x128xf32>,
    %c8_191 = arith.constant 8 : index
    %c0_192 = arith.constant 0 : index
    %257 = vector.load %arg16[%c8_191, %c0_192] : memref<24x512xf32, #tpu.memory_space<vmem>>, vector<8x128xf32>
    tpu.vector_store %arg16[%c8_191, %c0_192], %255 {strides = array<i32>} : memref<24x512xf32, #tpu.memory_space<vmem>>, vector<8x128xf32>,
    %c0_193 = arith.constant 0 : index
    %c0_194 = arith.constant 0 : index
    %258 = vector.load %arg16[%c0_193, %c0_194] : memref<24x512xf32, #tpu.memory_space<vmem>>, vector<16x128xf32>
    %c0_195 = arith.constant 0 : index
    %c768 = arith.constant 768 : index
    %259 = vector.load %arg2[%c0_195, %c768] : memref<8x4224xbf16, #tpu.memory_space<vmem>>, vector<8x16xbf16>
    %260 = arith.truncf %258 : vector<16x128xf32> to vector<16x128xbf16>
    %cst_196 = arith.constant dense<0.000000e+00> : vector<8x128xf32>
    %261 = tpu.matmul %259, %260, %cst_196 {dimension_numbers = #tpu.dot_dimension_numbers<[1], [0], [0], [1], [0, 0, 1, 1], [], []>} : vector<8x16xbf16>, vector<16x128xbf16>, vector<8x128xf32> -> vector<8x128xf32>
    %262 = vector.extract_strided_slice %0 {offsets = [0, 6], sizes = [8, 1], strides = [1, 1]} : vector<8x33xf32> to vector<8x1xf32>
    %263 = vector.broadcast %262 : vector<8x1xf32> to vector<8x128xf32>
    %264 = arith.addf %261, %263 : vector<8x128xf32>
    %c0_197 = arith.constant 0 : index
    %c896 = arith.constant 896 : index
    %265 = vector.load %arg2[%c0_197, %c896] : memref<8x4224xbf16, #tpu.memory_space<vmem>>, vector<8x72xbf16>
    %c5_i32_198 = arith.constant 5 : i32
    %266 = tpu.dynamic_rotate %264 by %c5_i32_198 dim 1 : vector<8x128xf32>, i32 -> vector<8x128xf32>
    %c0_199 = arith.constant 0 : index
    %c0_200 = arith.constant 0 : index
    %267 = vector.load %arg5[%c0_199, %c0_200] : memref<9x128xf32, #tpu.memory_space<vmem>>, vector<1x128xf32>
    %268 = vector.broadcast %267 : vector<1x128xf32> to vector<8x128xf32>
    %269 = arith.mulf %266, %268 : vector<8x128xf32>
    %c0_201 = arith.constant 0 : index
    %c0_202 = arith.constant 0 : index
    %270 = vector.load %arg15[%c0_201, %c0_202] : memref<72x512xf32, #tpu.memory_space<vmem>>, vector<8x128xf32>
    tpu.vector_store %arg15[%c0_201, %c0_202], %269 {strides = array<i32>} : memref<72x512xf32, #tpu.memory_space<vmem>>, vector<8x128xf32>,
    %c4_i32_203 = arith.constant 4 : i32
    %271 = tpu.dynamic_rotate %264 by %c4_i32_203 dim 1 : vector<8x128xf32>, i32 -> vector<8x128xf32>
    %c1_204 = arith.constant 1 : index
    %c0_205 = arith.constant 0 : index
    %272 = vector.load %arg5[%c1_204, %c0_205] : memref<9x128xf32, #tpu.memory_space<vmem>>, vector<1x128xf32>
    %273 = vector.broadcast %272 : vector<1x128xf32> to vector<8x128xf32>
    %274 = arith.mulf %271, %273 : vector<8x128xf32>
    %c8_206 = arith.constant 8 : index
    %c0_207 = arith.constant 0 : index
    %275 = vector.load %arg15[%c8_206, %c0_207] : memref<72x512xf32, #tpu.memory_space<vmem>>, vector<8x128xf32>
    tpu.vector_store %arg15[%c8_206, %c0_207], %274 {strides = array<i32>} : memref<72x512xf32, #tpu.memory_space<vmem>>, vector<8x128xf32>,
    %c3_i32_208 = arith.constant 3 : i32
    %276 = tpu.dynamic_rotate %264 by %c3_i32_208 dim 1 : vector<8x128xf32>, i32 -> vector<8x128xf32>
    %c2_209 = arith.constant 2 : index
    %c0_210 = arith.constant 0 : index
    %277 = vector.load %arg5[%c2_209, %c0_210] : memref<9x128xf32, #tpu.memory_space<vmem>>, vector<1x128xf32>
    %278 = vector.broadcast %277 : vector<1x128xf32> to vector<8x128xf32>
    %279 = arith.mulf %276, %278 : vector<8x128xf32>
    %c16_211 = arith.constant 16 : index
    %c0_212 = arith.constant 0 : index
    %280 = vector.load %arg15[%c16_211, %c0_212] : memref<72x512xf32, #tpu.memory_space<vmem>>, vector<8x128xf32>
    tpu.vector_store %arg15[%c16_211, %c0_212], %279 {strides = array<i32>} : memref<72x512xf32, #tpu.memory_space<vmem>>, vector<8x128xf32>,
    %c1_i32_213 = arith.constant 1 : i32
    %281 = tpu.dynamic_rotate %264 by %c1_i32_213 dim 1 : vector<8x128xf32>, i32 -> vector<8x128xf32>
    %c3_214 = arith.constant 3 : index
    %c0_215 = arith.constant 0 : index
    %282 = vector.load %arg5[%c3_214, %c0_215] : memref<9x128xf32, #tpu.memory_space<vmem>>, vector<1x128xf32>
    %283 = vector.broadcast %282 : vector<1x128xf32> to vector<8x128xf32>
    %284 = arith.mulf %281, %283 : vector<8x128xf32>
    %c24_216 = arith.constant 24 : index
    %c0_217 = arith.constant 0 : index
    %285 = vector.load %arg15[%c24_216, %c0_217] : memref<72x512xf32, #tpu.memory_space<vmem>>, vector<8x128xf32>
    tpu.vector_store %arg15[%c24_216, %c0_217], %284 {strides = array<i32>} : memref<72x512xf32, #tpu.memory_space<vmem>>, vector<8x128xf32>,
    %c32_218 = arith.constant 32 : index
    %c0_219 = arith.constant 0 : index
    %286 = vector.load %arg15[%c32_218, %c0_219] : memref<72x512xf32, #tpu.memory_space<vmem>>, vector<8x128xf32>
    tpu.vector_store %arg15[%c32_218, %c0_219], %264 {strides = array<i32>} : memref<72x512xf32, #tpu.memory_space<vmem>>, vector<8x128xf32>,
    %c127_i32_220 = arith.constant 127 : i32
    %287 = tpu.dynamic_rotate %264 by %c127_i32_220 dim 1 : vector<8x128xf32>, i32 -> vector<8x128xf32>
    %c5_221 = arith.constant 5 : index
    %c0_222 = arith.constant 0 : index
    %288 = vector.load %arg5[%c5_221, %c0_222] : memref<9x128xf32, #tpu.memory_space<vmem>>, vector<1x128xf32>
    %289 = vector.broadcast %288 : vector<1x128xf32> to vector<8x128xf32>
    %290 = arith.mulf %287, %289 : vector<8x128xf32>
    %c40_223 = arith.constant 40 : index
    %c0_224 = arith.constant 0 : index
    %291 = vector.load %arg15[%c40_223, %c0_224] : memref<72x512xf32, #tpu.memory_space<vmem>>, vector<8x128xf32>
    tpu.vector_store %arg15[%c40_223, %c0_224], %290 {strides = array<i32>} : memref<72x512xf32, #tpu.memory_space<vmem>>, vector<8x128xf32>,
    %c125_i32_225 = arith.constant 125 : i32
    %292 = tpu.dynamic_rotate %264 by %c125_i32_225 dim 1 : vector<8x128xf32>, i32 -> vector<8x128xf32>
    %c6_226 = arith.constant 6 : index
    %c0_227 = arith.constant 0 : index
    %293 = vector.load %arg5[%c6_226, %c0_227] : memref<9x128xf32, #tpu.memory_space<vmem>>, vector<1x128xf32>
    %294 = vector.broadcast %293 : vector<1x128xf32> to vector<8x128xf32>
    %295 = arith.mulf %292, %294 : vector<8x128xf32>
    %c48_228 = arith.constant 48 : index
    %c0_229 = arith.constant 0 : index
    %296 = vector.load %arg15[%c48_228, %c0_229] : memref<72x512xf32, #tpu.memory_space<vmem>>, vector<8x128xf32>
    tpu.vector_store %arg15[%c48_228, %c0_229], %295 {strides = array<i32>} : memref<72x512xf32, #tpu.memory_space<vmem>>, vector<8x128xf32>,
    %c124_i32_230 = arith.constant 124 : i32
    %297 = tpu.dynamic_rotate %264 by %c124_i32_230 dim 1 : vector<8x128xf32>, i32 -> vector<8x128xf32>
    %c7_231 = arith.constant 7 : index
    %c0_232 = arith.constant 0 : index
    %298 = vector.load %arg5[%c7_231, %c0_232] : memref<9x128xf32, #tpu.memory_space<vmem>>, vector<1x128xf32>
    %299 = vector.broadcast %298 : vector<1x128xf32> to vector<8x128xf32>
    %300 = arith.mulf %297, %299 : vector<8x128xf32>
    %c56_233 = arith.constant 56 : index
    %c0_234 = arith.constant 0 : index
    %301 = vector.load %arg15[%c56_233, %c0_234] : memref<72x512xf32, #tpu.memory_space<vmem>>, vector<8x128xf32>
    tpu.vector_store %arg15[%c56_233, %c0_234], %300 {strides = array<i32>} : memref<72x512xf32, #tpu.memory_space<vmem>>, vector<8x128xf32>,
    %c123_i32_235 = arith.constant 123 : i32
    %302 = tpu.dynamic_rotate %264 by %c123_i32_235 dim 1 : vector<8x128xf32>, i32 -> vector<8x128xf32>
    %c8_236 = arith.constant 8 : index
    %c0_237 = arith.constant 0 : index
    %303 = vector.load %arg5[%c8_236, %c0_237] : memref<9x128xf32, #tpu.memory_space<vmem>>, vector<1x128xf32>
    %304 = vector.broadcast %303 : vector<1x128xf32> to vector<8x128xf32>
    %305 = arith.mulf %302, %304 : vector<8x128xf32>
    %c64_238 = arith.constant 64 : index
    %c0_239 = arith.constant 0 : index
    %306 = vector.load %arg15[%c64_238, %c0_239] : memref<72x512xf32, #tpu.memory_space<vmem>>, vector<8x128xf32>
    tpu.vector_store %arg15[%c64_238, %c0_239], %305 {strides = array<i32>} : memref<72x512xf32, #tpu.memory_space<vmem>>, vector<8x128xf32>,
    %c0_240 = arith.constant 0 : index
    %c0_241 = arith.constant 0 : index
    %307 = vector.load %arg15[%c0_240, %c0_241] : memref<72x512xf32, #tpu.memory_space<vmem>>, vector<72x128xf32>
    %308 = arith.truncf %307 : vector<72x128xf32> to vector<72x128xbf16>
    %cst_242 = arith.constant dense<0.000000e+00> : vector<8x128xf32>
    %309 = tpu.matmul %265, %308, %cst_242 {dimension_numbers = #tpu.dot_dimension_numbers<[1], [0], [0], [1], [0, 0, 1, 1], [], []>} : vector<8x72xbf16>, vector<72x128xbf16>, vector<8x128xf32> -> vector<8x128xf32>
    %310 = vector.extract_strided_slice %0 {offsets = [0, 7], sizes = [8, 1], strides = [1, 1]} : vector<8x33xf32> to vector<8x1xf32>
    %311 = vector.broadcast %310 : vector<8x1xf32> to vector<8x128xf32>
    %312 = arith.addf %309, %311 : vector<8x128xf32>
    %cst_243 = arith.constant 0.000000e+00 : f32
    %313 = vector.broadcast %cst_243 : f32 to vector<8x128xf32>
    %314 = arith.cmpf oge, %312, %313 : vector<8x128xf32>
    %cst_244 = arith.constant 0.00999999977 : f32
    %315 = vector.broadcast %cst_244 : f32 to vector<8x128xf32>
    %316 = arith.mulf %315, %312 : vector<8x128xf32>
    %317 = arith.select %314, %312, %316 : vector<8x128xi1>, vector<8x128xf32>
    %c16_245 = arith.constant 16 : index
    %c0_246 = arith.constant 0 : index
    %318 = vector.load %arg16[%c16_245, %c0_246] : memref<24x512xf32, #tpu.memory_space<vmem>>, vector<8x128xf32>
    tpu.vector_store %arg16[%c16_245, %c0_246], %317 {strides = array<i32>} : memref<24x512xf32, #tpu.memory_space<vmem>>, vector<8x128xf32>,
    %c0_247 = arith.constant 0 : index
    %c0_248 = arith.constant 0 : index
    %319 = vector.load %arg16[%c0_247, %c0_248] : memref<24x512xf32, #tpu.memory_space<vmem>>, vector<24x128xf32>
    %c0_249 = arith.constant 0 : index
    %c1024 = arith.constant 1024 : index
    %320 = vector.load %arg2[%c0_249, %c1024] : memref<8x4224xbf16, #tpu.memory_space<vmem>>, vector<8x24xbf16>
    %321 = arith.truncf %319 : vector<24x128xf32> to vector<24x128xbf16>
    %cst_250 = arith.constant dense<0.000000e+00> : vector<8x128xf32>
    %322 = tpu.matmul %320, %321, %cst_250 {dimension_numbers = #tpu.dot_dimension_numbers<[1], [0], [0], [1], [0, 0, 1, 1], [], []>} : vector<8x24xbf16>, vector<24x128xbf16>, vector<8x128xf32> -> vector<8x128xf32>
    %323 = vector.extract_strided_slice %0 {offsets = [0, 8], sizes = [8, 1], strides = [1, 1]} : vector<8x33xf32> to vector<8x1xf32>
    %324 = vector.broadcast %323 : vector<8x1xf32> to vector<8x128xf32>
    %325 = arith.addf %322, %324 : vector<8x128xf32>
    %c0_251 = arith.constant 0 : index
    %c1152 = arith.constant 1152 : index
    %326 = vector.load %arg2[%c0_251, %c1152] : memref<8x4224xbf16, #tpu.memory_space<vmem>>, vector<8x72xbf16>
    %c5_i32_252 = arith.constant 5 : i32
    %327 = tpu.dynamic_rotate %325 by %c5_i32_252 dim 1 : vector<8x128xf32>, i32 -> vector<8x128xf32>
    %c0_253 = arith.constant 0 : index
    %c0_254 = arith.constant 0 : index
    %328 = vector.load %arg5[%c0_253, %c0_254] : memref<9x128xf32, #tpu.memory_space<vmem>>, vector<1x128xf32>
    %329 = vector.broadcast %328 : vector<1x128xf32> to vector<8x128xf32>
    %330 = arith.mulf %327, %329 : vector<8x128xf32>
    %c0_255 = arith.constant 0 : index
    %c0_256 = arith.constant 0 : index
    %331 = vector.load %arg15[%c0_255, %c0_256] : memref<72x512xf32, #tpu.memory_space<vmem>>, vector<8x128xf32>
    tpu.vector_store %arg15[%c0_255, %c0_256], %330 {strides = array<i32>} : memref<72x512xf32, #tpu.memory_space<vmem>>, vector<8x128xf32>,
    %c4_i32_257 = arith.constant 4 : i32
    %332 = tpu.dynamic_rotate %325 by %c4_i32_257 dim 1 : vector<8x128xf32>, i32 -> vector<8x128xf32>
    %c1_258 = arith.constant 1 : index
    %c0_259 = arith.constant 0 : index
    %333 = vector.load %arg5[%c1_258, %c0_259] : memref<9x128xf32, #tpu.memory_space<vmem>>, vector<1x128xf32>
    %334 = vector.broadcast %333 : vector<1x128xf32> to vector<8x128xf32>
    %335 = arith.mulf %332, %334 : vector<8x128xf32>
    %c8_260 = arith.constant 8 : index
    %c0_261 = arith.constant 0 : index
    %336 = vector.load %arg15[%c8_260, %c0_261] : memref<72x512xf32, #tpu.memory_space<vmem>>, vector<8x128xf32>
    tpu.vector_store %arg15[%c8_260, %c0_261], %335 {strides = array<i32>} : memref<72x512xf32, #tpu.memory_space<vmem>>, vector<8x128xf32>,
    %c3_i32_262 = arith.constant 3 : i32
    %337 = tpu.dynamic_rotate %325 by %c3_i32_262 dim 1 : vector<8x128xf32>, i32 -> vector<8x128xf32>
    %c2_263 = arith.constant 2 : index
    %c0_264 = arith.constant 0 : index
    %338 = vector.load %arg5[%c2_263, %c0_264] : memref<9x128xf32, #tpu.memory_space<vmem>>, vector<1x128xf32>
    %339 = vector.broadcast %338 : vector<1x128xf32> to vector<8x128xf32>
    %340 = arith.mulf %337, %339 : vector<8x128xf32>
    %c16_265 = arith.constant 16 : index
    %c0_266 = arith.constant 0 : index
    %341 = vector.load %arg15[%c16_265, %c0_266] : memref<72x512xf32, #tpu.memory_space<vmem>>, vector<8x128xf32>
    tpu.vector_store %arg15[%c16_265, %c0_266], %340 {strides = array<i32>} : memref<72x512xf32, #tpu.memory_space<vmem>>, vector<8x128xf32>,
    %c1_i32_267 = arith.constant 1 : i32
    %342 = tpu.dynamic_rotate %325 by %c1_i32_267 dim 1 : vector<8x128xf32>, i32 -> vector<8x128xf32>
    %c3_268 = arith.constant 3 : index
    %c0_269 = arith.constant 0 : index
    %343 = vector.load %arg5[%c3_268, %c0_269] : memref<9x128xf32, #tpu.memory_space<vmem>>, vector<1x128xf32>
    %344 = vector.broadcast %343 : vector<1x128xf32> to vector<8x128xf32>
    %345 = arith.mulf %342, %344 : vector<8x128xf32>
    %c24_270 = arith.constant 24 : index
    %c0_271 = arith.constant 0 : index
    %346 = vector.load %arg15[%c24_270, %c0_271] : memref<72x512xf32, #tpu.memory_space<vmem>>, vector<8x128xf32>
    tpu.vector_store %arg15[%c24_270, %c0_271], %345 {strides = array<i32>} : memref<72x512xf32, #tpu.memory_space<vmem>>, vector<8x128xf32>,
    %c32_272 = arith.constant 32 : index
    %c0_273 = arith.constant 0 : index
    %347 = vector.load %arg15[%c32_272, %c0_273] : memref<72x512xf32, #tpu.memory_space<vmem>>, vector<8x128xf32>
    tpu.vector_store %arg15[%c32_272, %c0_273], %325 {strides = array<i32>} : memref<72x512xf32, #tpu.memory_space<vmem>>, vector<8x128xf32>,
    %c127_i32_274 = arith.constant 127 : i32
    %348 = tpu.dynamic_rotate %325 by %c127_i32_274 dim 1 : vector<8x128xf32>, i32 -> vector<8x128xf32>
    %c5_275 = arith.constant 5 : index
    %c0_276 = arith.constant 0 : index
    %349 = vector.load %arg5[%c5_275, %c0_276] : memref<9x128xf32, #tpu.memory_space<vmem>>, vector<1x128xf32>
    %350 = vector.broadcast %349 : vector<1x128xf32> to vector<8x128xf32>
    %351 = arith.mulf %348, %350 : vector<8x128xf32>
    %c40_277 = arith.constant 40 : index
    %c0_278 = arith.constant 0 : index
    %352 = vector.load %arg15[%c40_277, %c0_278] : memref<72x512xf32, #tpu.memory_space<vmem>>, vector<8x128xf32>
    tpu.vector_store %arg15[%c40_277, %c0_278], %351 {strides = array<i32>} : memref<72x512xf32, #tpu.memory_space<vmem>>, vector<8x128xf32>,
    %c125_i32_279 = arith.constant 125 : i32
    %353 = tpu.dynamic_rotate %325 by %c125_i32_279 dim 1 : vector<8x128xf32>, i32 -> vector<8x128xf32>
    %c6_280 = arith.constant 6 : index
    %c0_281 = arith.constant 0 : index
    %354 = vector.load %arg5[%c6_280, %c0_281] : memref<9x128xf32, #tpu.memory_space<vmem>>, vector<1x128xf32>
    %355 = vector.broadcast %354 : vector<1x128xf32> to vector<8x128xf32>
    %356 = arith.mulf %353, %355 : vector<8x128xf32>
    %c48_282 = arith.constant 48 : index
    %c0_283 = arith.constant 0 : index
    %357 = vector.load %arg15[%c48_282, %c0_283] : memref<72x512xf32, #tpu.memory_space<vmem>>, vector<8x128xf32>
    tpu.vector_store %arg15[%c48_282, %c0_283], %356 {strides = array<i32>} : memref<72x512xf32, #tpu.memory_space<vmem>>, vector<8x128xf32>,
    %c124_i32_284 = arith.constant 124 : i32
    %358 = tpu.dynamic_rotate %325 by %c124_i32_284 dim 1 : vector<8x128xf32>, i32 -> vector<8x128xf32>
    %c7_285 = arith.constant 7 : index
    %c0_286 = arith.constant 0 : index
    %359 = vector.load %arg5[%c7_285, %c0_286] : memref<9x128xf32, #tpu.memory_space<vmem>>, vector<1x128xf32>
    %360 = vector.broadcast %359 : vector<1x128xf32> to vector<8x128xf32>
    %361 = arith.mulf %358, %360 : vector<8x128xf32>
    %c56_287 = arith.constant 56 : index
    %c0_288 = arith.constant 0 : index
    %362 = vector.load %arg15[%c56_287, %c0_288] : memref<72x512xf32, #tpu.memory_space<vmem>>, vector<8x128xf32>
    tpu.vector_store %arg15[%c56_287, %c0_288], %361 {strides = array<i32>} : memref<72x512xf32, #tpu.memory_space<vmem>>, vector<8x128xf32>,
    %c123_i32_289 = arith.constant 123 : i32
    %363 = tpu.dynamic_rotate %325 by %c123_i32_289 dim 1 : vector<8x128xf32>, i32 -> vector<8x128xf32>
    %c8_290 = arith.constant 8 : index
    %c0_291 = arith.constant 0 : index
    %364 = vector.load %arg5[%c8_290, %c0_291] : memref<9x128xf32, #tpu.memory_space<vmem>>, vector<1x128xf32>
    %365 = vector.broadcast %364 : vector<1x128xf32> to vector<8x128xf32>
    %366 = arith.mulf %363, %365 : vector<8x128xf32>
    %c64_292 = arith.constant 64 : index
    %c0_293 = arith.constant 0 : index
    %367 = vector.load %arg15[%c64_292, %c0_293] : memref<72x512xf32, #tpu.memory_space<vmem>>, vector<8x128xf32>
    tpu.vector_store %arg15[%c64_292, %c0_293], %366 {strides = array<i32>} : memref<72x512xf32, #tpu.memory_space<vmem>>, vector<8x128xf32>,
    %c0_294 = arith.constant 0 : index
    %c0_295 = arith.constant 0 : index
    %368 = vector.load %arg15[%c0_294, %c0_295] : memref<72x512xf32, #tpu.memory_space<vmem>>, vector<72x128xf32>
    %369 = arith.truncf %368 : vector<72x128xf32> to vector<72x128xbf16>
    %cst_296 = arith.constant dense<0.000000e+00> : vector<8x128xf32>
    %370 = tpu.matmul %326, %369, %cst_296 {dimension_numbers = #tpu.dot_dimension_numbers<[1], [0], [0], [1], [0, 0, 1, 1], [], []>} : vector<8x72xbf16>, vector<72x128xbf16>, vector<8x128xf32> -> vector<8x128xf32>
    %371 = vector.extract_strided_slice %0 {offsets = [0, 9], sizes = [8, 1], strides = [1, 1]} : vector<8x33xf32> to vector<8x1xf32>
    %372 = vector.broadcast %371 : vector<8x1xf32> to vector<8x128xf32>
    %373 = arith.addf %370, %372 : vector<8x128xf32>
    %cst_297 = arith.constant 0.000000e+00 : f32
    %374 = vector.broadcast %cst_297 : f32 to vector<8x128xf32>
    %375 = arith.cmpf oge, %373, %374 : vector<8x128xf32>
    %cst_298 = arith.constant 0.00999999977 : f32
    %376 = vector.broadcast %cst_298 : f32 to vector<8x128xf32>
    %377 = arith.mulf %376, %373 : vector<8x128xf32>
    %378 = arith.select %375, %373, %377 : vector<8x128xi1>, vector<8x128xf32>
    %c4_299 = arith.constant 4 : index
    %c0_300 = arith.constant 0 : index
    %379 = vector.load %arg5[%c4_299, %c0_300] : memref<9x128xf32, #tpu.memory_space<vmem>>, vector<1x128xf32>
    %380 = vector.broadcast %379 : vector<1x128xf32> to vector<8x128xf32>
    %381 = arith.mulf %378, %380 : vector<8x128xf32>
    %cst_301 = arith.constant dense<0.000000e+00> : vector<8xf32>
    %382 = vector.multi_reduction <add>, %381, %cst_301 [1] : vector<8x128xf32> to vector<8xf32>
    %383 = vector.shape_cast %382 : vector<8xf32> to vector<8x1xf32>
    %cst_302 = arith.constant 3.125000e-02 : f32
    %384 = vector.broadcast %cst_302 : f32 to vector<8x1xf32>
    %385 = arith.mulf %383, %384 : vector<8x1xf32>
    %386 = vector.broadcast %385 : vector<8x1xf32> to vector<8x128xf32>
    %387 = arith.subf %378, %386 : vector<8x128xf32>
    %388 = vector.broadcast %379 : vector<1x128xf32> to vector<8x128xf32>
    %389 = arith.mulf %387, %388 : vector<8x128xf32>
    %390 = arith.mulf %389, %389 : vector<8x128xf32>
    %cst_303 = arith.constant dense<0.000000e+00> : vector<8xf32>
    %391 = vector.multi_reduction <add>, %390, %cst_303 [1] : vector<8x128xf32> to vector<8xf32>
    %392 = vector.shape_cast %391 : vector<8xf32> to vector<8x1xf32>
    %cst_304 = arith.constant 3.125000e-02 : f32
    %393 = vector.broadcast %cst_304 : f32 to vector<8x1xf32>
    %394 = arith.mulf %392, %393 : vector<8x1xf32>
    %395 = vector.broadcast %385 : vector<8x1xf32> to vector<8x128xf32>
    %396 = arith.subf %378, %395 : vector<8x128xf32>
    %cst_305 = arith.constant 9.99999974E-6 : f32
    %397 = vector.broadcast %cst_305 : f32 to vector<8x1xf32>
    %398 = arith.addf %394, %397 : vector<8x1xf32>
    %399 = math.rsqrt %398 : vector<8x1xf32>
    %400 = vector.broadcast %399 : vector<8x1xf32> to vector<8x128xf32>
    %401 = arith.mulf %396, %400 : vector<8x128xf32>
    %c0_306 = arith.constant 0 : index
    %c0_307 = arith.constant 0 : index
    %402 = vector.load %arg9[%c0_306, %c0_307] : memref<128x128xf32, #tpu.memory_space<vmem>>, vector<128x128xf32>
    %cst_308 = arith.constant dense<0.000000e+00> : vector<8x128xf32>
    %403 = tpu.matmul %401, %402, %cst_308 {dimension_numbers = #tpu.dot_dimension_numbers<[1], [0], [0], [1], [0, 0, 1, 1], [], []>} : vector<8x128xf32>, vector<128x128xf32>, vector<8x128xf32> -> vector<8x128xf32>
    %c0_309 = arith.constant 0 : index
    %c1280 = arith.constant 1280 : index
    %404 = vector.load %arg2[%c0_309, %c1280] : memref<8x4224xbf16, #tpu.memory_space<vmem>>, vector<8x72xbf16>
    %c3_i32_310 = arith.constant 3 : i32
    %405 = tpu.dynamic_rotate %403 by %c3_i32_310 dim 1 : vector<8x128xf32>, i32 -> vector<8x128xf32>
    %c0_311 = arith.constant 0 : index
    %c0_312 = arith.constant 0 : index
    %406 = vector.load %arg6[%c0_311, %c0_312] : memref<9x128xf32, #tpu.memory_space<vmem>>, vector<1x128xf32>
    %407 = vector.broadcast %406 : vector<1x128xf32> to vector<8x128xf32>
    %408 = arith.mulf %405, %407 : vector<8x128xf32>
    %c0_313 = arith.constant 0 : index
    %c0_314 = arith.constant 0 : index
    %409 = vector.load %arg15[%c0_313, %c0_314] : memref<72x512xf32, #tpu.memory_space<vmem>>, vector<8x128xf32>
    tpu.vector_store %arg15[%c0_313, %c0_314], %408 {strides = array<i32>} : memref<72x512xf32, #tpu.memory_space<vmem>>, vector<8x128xf32>,
    %c2_i32 = arith.constant 2 : i32
    %410 = tpu.dynamic_rotate %403 by %c2_i32 dim 1 : vector<8x128xf32>, i32 -> vector<8x128xf32>
    %c1_315 = arith.constant 1 : index
    %c0_316 = arith.constant 0 : index
    %411 = vector.load %arg6[%c1_315, %c0_316] : memref<9x128xf32, #tpu.memory_space<vmem>>, vector<1x128xf32>
    %412 = vector.broadcast %411 : vector<1x128xf32> to vector<8x128xf32>
    %413 = arith.mulf %410, %412 : vector<8x128xf32>
    %c8_317 = arith.constant 8 : index
    %c0_318 = arith.constant 0 : index
    %414 = vector.load %arg15[%c8_317, %c0_318] : memref<72x512xf32, #tpu.memory_space<vmem>>, vector<8x128xf32>
    tpu.vector_store %arg15[%c8_317, %c0_318], %413 {strides = array<i32>} : memref<72x512xf32, #tpu.memory_space<vmem>>, vector<8x128xf32>,
    %c1_i32_319 = arith.constant 1 : i32
    %415 = tpu.dynamic_rotate %403 by %c1_i32_319 dim 1 : vector<8x128xf32>, i32 -> vector<8x128xf32>
    %c2_320 = arith.constant 2 : index
    %c0_321 = arith.constant 0 : index
    %416 = vector.load %arg6[%c2_320, %c0_321] : memref<9x128xf32, #tpu.memory_space<vmem>>, vector<1x128xf32>
    %417 = vector.broadcast %416 : vector<1x128xf32> to vector<8x128xf32>
    %418 = arith.mulf %415, %417 : vector<8x128xf32>
    %c16_322 = arith.constant 16 : index
    %c0_323 = arith.constant 0 : index
    %419 = vector.load %arg15[%c16_322, %c0_323] : memref<72x512xf32, #tpu.memory_space<vmem>>, vector<8x128xf32>
    tpu.vector_store %arg15[%c16_322, %c0_323], %418 {strides = array<i32>} : memref<72x512xf32, #tpu.memory_space<vmem>>, vector<8x128xf32>,
    %c1_i32_324 = arith.constant 1 : i32
    %420 = tpu.dynamic_rotate %403 by %c1_i32_324 dim 1 : vector<8x128xf32>, i32 -> vector<8x128xf32>
    %c3_325 = arith.constant 3 : index
    %c0_326 = arith.constant 0 : index
    %421 = vector.load %arg6[%c3_325, %c0_326] : memref<9x128xf32, #tpu.memory_space<vmem>>, vector<1x128xf32>
    %422 = vector.broadcast %421 : vector<1x128xf32> to vector<8x128xf32>
    %423 = arith.mulf %420, %422 : vector<8x128xf32>
    %c24_327 = arith.constant 24 : index
    %c0_328 = arith.constant 0 : index
    %424 = vector.load %arg15[%c24_327, %c0_328] : memref<72x512xf32, #tpu.memory_space<vmem>>, vector<8x128xf32>
    tpu.vector_store %arg15[%c24_327, %c0_328], %423 {strides = array<i32>} : memref<72x512xf32, #tpu.memory_space<vmem>>, vector<8x128xf32>,
    %c32_329 = arith.constant 32 : index
    %c0_330 = arith.constant 0 : index
    %425 = vector.load %arg15[%c32_329, %c0_330] : memref<72x512xf32, #tpu.memory_space<vmem>>, vector<8x128xf32>
    tpu.vector_store %arg15[%c32_329, %c0_330], %403 {strides = array<i32>} : memref<72x512xf32, #tpu.memory_space<vmem>>, vector<8x128xf32>,
    %c127_i32_331 = arith.constant 127 : i32
    %426 = tpu.dynamic_rotate %403 by %c127_i32_331 dim 1 : vector<8x128xf32>, i32 -> vector<8x128xf32>
    %c5_332 = arith.constant 5 : index
    %c0_333 = arith.constant 0 : index
    %427 = vector.load %arg6[%c5_332, %c0_333] : memref<9x128xf32, #tpu.memory_space<vmem>>, vector<1x128xf32>
    %428 = vector.broadcast %427 : vector<1x128xf32> to vector<8x128xf32>
    %429 = arith.mulf %426, %428 : vector<8x128xf32>
    %c40_334 = arith.constant 40 : index
    %c0_335 = arith.constant 0 : index
    %430 = vector.load %arg15[%c40_334, %c0_335] : memref<72x512xf32, #tpu.memory_space<vmem>>, vector<8x128xf32>
    tpu.vector_store %arg15[%c40_334, %c0_335], %429 {strides = array<i32>} : memref<72x512xf32, #tpu.memory_space<vmem>>, vector<8x128xf32>,
    %c127_i32_336 = arith.constant 127 : i32
    %431 = tpu.dynamic_rotate %403 by %c127_i32_336 dim 1 : vector<8x128xf32>, i32 -> vector<8x128xf32>
    %c6_337 = arith.constant 6 : index
    %c0_338 = arith.constant 0 : index
    %432 = vector.load %arg6[%c6_337, %c0_338] : memref<9x128xf32, #tpu.memory_space<vmem>>, vector<1x128xf32>
    %433 = vector.broadcast %432 : vector<1x128xf32> to vector<8x128xf32>
    %434 = arith.mulf %431, %433 : vector<8x128xf32>
    %c48_339 = arith.constant 48 : index
    %c0_340 = arith.constant 0 : index
    %435 = vector.load %arg15[%c48_339, %c0_340] : memref<72x512xf32, #tpu.memory_space<vmem>>, vector<8x128xf32>
    tpu.vector_store %arg15[%c48_339, %c0_340], %434 {strides = array<i32>} : memref<72x512xf32, #tpu.memory_space<vmem>>, vector<8x128xf32>,
    %c126_i32 = arith.constant 126 : i32
    %436 = tpu.dynamic_rotate %403 by %c126_i32 dim 1 : vector<8x128xf32>, i32 -> vector<8x128xf32>
    %c7_341 = arith.constant 7 : index
    %c0_342 = arith.constant 0 : index
    %437 = vector.load %arg6[%c7_341, %c0_342] : memref<9x128xf32, #tpu.memory_space<vmem>>, vector<1x128xf32>
    %438 = vector.broadcast %437 : vector<1x128xf32> to vector<8x128xf32>
    %439 = arith.mulf %436, %438 : vector<8x128xf32>
    %c56_343 = arith.constant 56 : index
    %c0_344 = arith.constant 0 : index
    %440 = vector.load %arg15[%c56_343, %c0_344] : memref<72x512xf32, #tpu.memory_space<vmem>>, vector<8x128xf32>
    tpu.vector_store %arg15[%c56_343, %c0_344], %439 {strides = array<i32>} : memref<72x512xf32, #tpu.memory_space<vmem>>, vector<8x128xf32>,
    %c125_i32_345 = arith.constant 125 : i32
    %441 = tpu.dynamic_rotate %403 by %c125_i32_345 dim 1 : vector<8x128xf32>, i32 -> vector<8x128xf32>
    %c8_346 = arith.constant 8 : index
    %c0_347 = arith.constant 0 : index
    %442 = vector.load %arg6[%c8_346, %c0_347] : memref<9x128xf32, #tpu.memory_space<vmem>>, vector<1x128xf32>
    %443 = vector.broadcast %442 : vector<1x128xf32> to vector<8x128xf32>
    %444 = arith.mulf %441, %443 : vector<8x128xf32>
    %c64_348 = arith.constant 64 : index
    %c0_349 = arith.constant 0 : index
    %445 = vector.load %arg15[%c64_348, %c0_349] : memref<72x512xf32, #tpu.memory_space<vmem>>, vector<8x128xf32>
    tpu.vector_store %arg15[%c64_348, %c0_349], %444 {strides = array<i32>} : memref<72x512xf32, #tpu.memory_space<vmem>>, vector<8x128xf32>,
    %c0_350 = arith.constant 0 : index
    %c0_351 = arith.constant 0 : index
    %446 = vector.load %arg15[%c0_350, %c0_351] : memref<72x512xf32, #tpu.memory_space<vmem>>, vector<72x128xf32>
    %447 = arith.truncf %446 : vector<72x128xf32> to vector<72x128xbf16>
    %cst_352 = arith.constant dense<0.000000e+00> : vector<8x128xf32>
    %448 = tpu.matmul %404, %447, %cst_352 {dimension_numbers = #tpu.dot_dimension_numbers<[1], [0], [0], [1], [0, 0, 1, 1], [], []>} : vector<8x72xbf16>, vector<72x128xbf16>, vector<8x128xf32> -> vector<8x128xf32>
    %449 = vector.extract_strided_slice %0 {offsets = [0, 10], sizes = [8, 1], strides = [1, 1]} : vector<8x33xf32> to vector<8x1xf32>
    %450 = vector.broadcast %449 : vector<8x1xf32> to vector<8x128xf32>
    %451 = arith.addf %448, %450 : vector<8x128xf32>
    %cst_353 = arith.constant 0.000000e+00 : f32
    %452 = vector.broadcast %cst_353 : f32 to vector<8x128xf32>
    %453 = arith.cmpf oge, %451, %452 : vector<8x128xf32>
    %cst_354 = arith.constant 0.00999999977 : f32
    %454 = vector.broadcast %cst_354 : f32 to vector<8x128xf32>
    %455 = arith.mulf %454, %451 : vector<8x128xf32>
    %456 = arith.select %453, %451, %455 : vector<8x128xi1>, vector<8x128xf32>
    %c0_355 = arith.constant 0 : index
    %c0_356 = arith.constant 0 : index
    %457 = vector.load %arg16[%c0_355, %c0_356] : memref<24x512xf32, #tpu.memory_space<vmem>>, vector<8x128xf32>
    tpu.vector_store %arg16[%c0_355, %c0_356], %403 {strides = array<i32>} : memref<24x512xf32, #tpu.memory_space<vmem>>, vector<8x128xf32>,
    %c8_357 = arith.constant 8 : index
    %c0_358 = arith.constant 0 : index
    %458 = vector.load %arg16[%c8_357, %c0_358] : memref<24x512xf32, #tpu.memory_space<vmem>>, vector<8x128xf32>
    tpu.vector_store %arg16[%c8_357, %c0_358], %456 {strides = array<i32>} : memref<24x512xf32, #tpu.memory_space<vmem>>, vector<8x128xf32>,
    %c0_359 = arith.constant 0 : index
    %c0_360 = arith.constant 0 : index
    %459 = vector.load %arg16[%c0_359, %c0_360] : memref<24x512xf32, #tpu.memory_space<vmem>>, vector<16x128xf32>
    %c0_361 = arith.constant 0 : index
    %c1408 = arith.constant 1408 : index
    %460 = vector.load %arg2[%c0_361, %c1408] : memref<8x4224xbf16, #tpu.memory_space<vmem>>, vector<8x16xbf16>
    %461 = arith.truncf %459 : vector<16x128xf32> to vector<16x128xbf16>
    %cst_362 = arith.constant dense<0.000000e+00> : vector<8x128xf32>
    %462 = tpu.matmul %460, %461, %cst_362 {dimension_numbers = #tpu.dot_dimension_numbers<[1], [0], [0], [1], [0, 0, 1, 1], [], []>} : vector<8x16xbf16>, vector<16x128xbf16>, vector<8x128xf32> -> vector<8x128xf32>
    %463 = vector.extract_strided_slice %0 {offsets = [0, 11], sizes = [8, 1], strides = [1, 1]} : vector<8x33xf32> to vector<8x1xf32>
    %464 = vector.broadcast %463 : vector<8x1xf32> to vector<8x128xf32>
    %465 = arith.addf %462, %464 : vector<8x128xf32>
    %c0_363 = arith.constant 0 : index
    %c1536 = arith.constant 1536 : index
    %466 = vector.load %arg2[%c0_363, %c1536] : memref<8x4224xbf16, #tpu.memory_space<vmem>>, vector<8x72xbf16>
    %c3_i32_364 = arith.constant 3 : i32
    %467 = tpu.dynamic_rotate %465 by %c3_i32_364 dim 1 : vector<8x128xf32>, i32 -> vector<8x128xf32>
    %c0_365 = arith.constant 0 : index
    %c0_366 = arith.constant 0 : index
    %468 = vector.load %arg6[%c0_365, %c0_366] : memref<9x128xf32, #tpu.memory_space<vmem>>, vector<1x128xf32>
    %469 = vector.broadcast %468 : vector<1x128xf32> to vector<8x128xf32>
    %470 = arith.mulf %467, %469 : vector<8x128xf32>
    %c0_367 = arith.constant 0 : index
    %c0_368 = arith.constant 0 : index
    %471 = vector.load %arg15[%c0_367, %c0_368] : memref<72x512xf32, #tpu.memory_space<vmem>>, vector<8x128xf32>
    tpu.vector_store %arg15[%c0_367, %c0_368], %470 {strides = array<i32>} : memref<72x512xf32, #tpu.memory_space<vmem>>, vector<8x128xf32>,
    %c2_i32_369 = arith.constant 2 : i32
    %472 = tpu.dynamic_rotate %465 by %c2_i32_369 dim 1 : vector<8x128xf32>, i32 -> vector<8x128xf32>
    %c1_370 = arith.constant 1 : index
    %c0_371 = arith.constant 0 : index
    %473 = vector.load %arg6[%c1_370, %c0_371] : memref<9x128xf32, #tpu.memory_space<vmem>>, vector<1x128xf32>
    %474 = vector.broadcast %473 : vector<1x128xf32> to vector<8x128xf32>
    %475 = arith.mulf %472, %474 : vector<8x128xf32>
    %c8_372 = arith.constant 8 : index
    %c0_373 = arith.constant 0 : index
    %476 = vector.load %arg15[%c8_372, %c0_373] : memref<72x512xf32, #tpu.memory_space<vmem>>, vector<8x128xf32>
    tpu.vector_store %arg15[%c8_372, %c0_373], %475 {strides = array<i32>} : memref<72x512xf32, #tpu.memory_space<vmem>>, vector<8x128xf32>,
    %c1_i32_374 = arith.constant 1 : i32
    %477 = tpu.dynamic_rotate %465 by %c1_i32_374 dim 1 : vector<8x128xf32>, i32 -> vector<8x128xf32>
    %c2_375 = arith.constant 2 : index
    %c0_376 = arith.constant 0 : index
    %478 = vector.load %arg6[%c2_375, %c0_376] : memref<9x128xf32, #tpu.memory_space<vmem>>, vector<1x128xf32>
    %479 = vector.broadcast %478 : vector<1x128xf32> to vector<8x128xf32>
    %480 = arith.mulf %477, %479 : vector<8x128xf32>
    %c16_377 = arith.constant 16 : index
    %c0_378 = arith.constant 0 : index
    %481 = vector.load %arg15[%c16_377, %c0_378] : memref<72x512xf32, #tpu.memory_space<vmem>>, vector<8x128xf32>
    tpu.vector_store %arg15[%c16_377, %c0_378], %480 {strides = array<i32>} : memref<72x512xf32, #tpu.memory_space<vmem>>, vector<8x128xf32>,
    %c1_i32_379 = arith.constant 1 : i32
    %482 = tpu.dynamic_rotate %465 by %c1_i32_379 dim 1 : vector<8x128xf32>, i32 -> vector<8x128xf32>
    %c3_380 = arith.constant 3 : index
    %c0_381 = arith.constant 0 : index
    %483 = vector.load %arg6[%c3_380, %c0_381] : memref<9x128xf32, #tpu.memory_space<vmem>>, vector<1x128xf32>
    %484 = vector.broadcast %483 : vector<1x128xf32> to vector<8x128xf32>
    %485 = arith.mulf %482, %484 : vector<8x128xf32>
    %c24_382 = arith.constant 24 : index
    %c0_383 = arith.constant 0 : index
    %486 = vector.load %arg15[%c24_382, %c0_383] : memref<72x512xf32, #tpu.memory_space<vmem>>, vector<8x128xf32>
    tpu.vector_store %arg15[%c24_382, %c0_383], %485 {strides = array<i32>} : memref<72x512xf32, #tpu.memory_space<vmem>>, vector<8x128xf32>,
    %c32_384 = arith.constant 32 : index
    %c0_385 = arith.constant 0 : index
    %487 = vector.load %arg15[%c32_384, %c0_385] : memref<72x512xf32, #tpu.memory_space<vmem>>, vector<8x128xf32>
    tpu.vector_store %arg15[%c32_384, %c0_385], %465 {strides = array<i32>} : memref<72x512xf32, #tpu.memory_space<vmem>>, vector<8x128xf32>,
    %c127_i32_386 = arith.constant 127 : i32
    %488 = tpu.dynamic_rotate %465 by %c127_i32_386 dim 1 : vector<8x128xf32>, i32 -> vector<8x128xf32>
    %c5_387 = arith.constant 5 : index
    %c0_388 = arith.constant 0 : index
    %489 = vector.load %arg6[%c5_387, %c0_388] : memref<9x128xf32, #tpu.memory_space<vmem>>, vector<1x128xf32>
    %490 = vector.broadcast %489 : vector<1x128xf32> to vector<8x128xf32>
    %491 = arith.mulf %488, %490 : vector<8x128xf32>
    %c40_389 = arith.constant 40 : index
    %c0_390 = arith.constant 0 : index
    %492 = vector.load %arg15[%c40_389, %c0_390] : memref<72x512xf32, #tpu.memory_space<vmem>>, vector<8x128xf32>
    tpu.vector_store %arg15[%c40_389, %c0_390], %491 {strides = array<i32>} : memref<72x512xf32, #tpu.memory_space<vmem>>, vector<8x128xf32>,
    %c127_i32_391 = arith.constant 127 : i32
    %493 = tpu.dynamic_rotate %465 by %c127_i32_391 dim 1 : vector<8x128xf32>, i32 -> vector<8x128xf32>
    %c6_392 = arith.constant 6 : index
    %c0_393 = arith.constant 0 : index
    %494 = vector.load %arg6[%c6_392, %c0_393] : memref<9x128xf32, #tpu.memory_space<vmem>>, vector<1x128xf32>
    %495 = vector.broadcast %494 : vector<1x128xf32> to vector<8x128xf32>
    %496 = arith.mulf %493, %495 : vector<8x128xf32>
    %c48_394 = arith.constant 48 : index
    %c0_395 = arith.constant 0 : index
    %497 = vector.load %arg15[%c48_394, %c0_395] : memref<72x512xf32, #tpu.memory_space<vmem>>, vector<8x128xf32>
    tpu.vector_store %arg15[%c48_394, %c0_395], %496 {strides = array<i32>} : memref<72x512xf32, #tpu.memory_space<vmem>>, vector<8x128xf32>,
    %c126_i32_396 = arith.constant 126 : i32
    %498 = tpu.dynamic_rotate %465 by %c126_i32_396 dim 1 : vector<8x128xf32>, i32 -> vector<8x128xf32>
    %c7_397 = arith.constant 7 : index
    %c0_398 = arith.constant 0 : index
    %499 = vector.load %arg6[%c7_397, %c0_398] : memref<9x128xf32, #tpu.memory_space<vmem>>, vector<1x128xf32>
    %500 = vector.broadcast %499 : vector<1x128xf32> to vector<8x128xf32>
    %501 = arith.mulf %498, %500 : vector<8x128xf32>
    %c56_399 = arith.constant 56 : index
    %c0_400 = arith.constant 0 : index
    %502 = vector.load %arg15[%c56_399, %c0_400] : memref<72x512xf32, #tpu.memory_space<vmem>>, vector<8x128xf32>
    tpu.vector_store %arg15[%c56_399, %c0_400], %501 {strides = array<i32>} : memref<72x512xf32, #tpu.memory_space<vmem>>, vector<8x128xf32>,
    %c125_i32_401 = arith.constant 125 : i32
    %503 = tpu.dynamic_rotate %465 by %c125_i32_401 dim 1 : vector<8x128xf32>, i32 -> vector<8x128xf32>
    %c8_402 = arith.constant 8 : index
    %c0_403 = arith.constant 0 : index
    %504 = vector.load %arg6[%c8_402, %c0_403] : memref<9x128xf32, #tpu.memory_space<vmem>>, vector<1x128xf32>
    %505 = vector.broadcast %504 : vector<1x128xf32> to vector<8x128xf32>
    %506 = arith.mulf %503, %505 : vector<8x128xf32>
    %c64_404 = arith.constant 64 : index
    %c0_405 = arith.constant 0 : index
    %507 = vector.load %arg15[%c64_404, %c0_405] : memref<72x512xf32, #tpu.memory_space<vmem>>, vector<8x128xf32>
    tpu.vector_store %arg15[%c64_404, %c0_405], %506 {strides = array<i32>} : memref<72x512xf32, #tpu.memory_space<vmem>>, vector<8x128xf32>,
    %c0_406 = arith.constant 0 : index
    %c0_407 = arith.constant 0 : index
    %508 = vector.load %arg15[%c0_406, %c0_407] : memref<72x512xf32, #tpu.memory_space<vmem>>, vector<72x128xf32>
    %509 = arith.truncf %508 : vector<72x128xf32> to vector<72x128xbf16>
    %cst_408 = arith.constant dense<0.000000e+00> : vector<8x128xf32>
    %510 = tpu.matmul %466, %509, %cst_408 {dimension_numbers = #tpu.dot_dimension_numbers<[1], [0], [0], [1], [0, 0, 1, 1], [], []>} : vector<8x72xbf16>, vector<72x128xbf16>, vector<8x128xf32> -> vector<8x128xf32>
    %511 = vector.extract_strided_slice %0 {offsets = [0, 12], sizes = [8, 1], strides = [1, 1]} : vector<8x33xf32> to vector<8x1xf32>
    %512 = vector.broadcast %511 : vector<8x1xf32> to vector<8x128xf32>
    %513 = arith.addf %510, %512 : vector<8x128xf32>
    %cst_409 = arith.constant 0.000000e+00 : f32
    %514 = vector.broadcast %cst_409 : f32 to vector<8x128xf32>
    %515 = arith.cmpf oge, %513, %514 : vector<8x128xf32>
    %cst_410 = arith.constant 0.00999999977 : f32
    %516 = vector.broadcast %cst_410 : f32 to vector<8x128xf32>
    %517 = arith.mulf %516, %513 : vector<8x128xf32>
    %518 = arith.select %515, %513, %517 : vector<8x128xi1>, vector<8x128xf32>
    %c16_411 = arith.constant 16 : index
    %c0_412 = arith.constant 0 : index
    %519 = vector.load %arg16[%c16_411, %c0_412] : memref<24x512xf32, #tpu.memory_space<vmem>>, vector<8x128xf32>
    tpu.vector_store %arg16[%c16_411, %c0_412], %518 {strides = array<i32>} : memref<24x512xf32, #tpu.memory_space<vmem>>, vector<8x128xf32>,
    %c0_413 = arith.constant 0 : index
    %c0_414 = arith.constant 0 : index
    %520 = vector.load %arg16[%c0_413, %c0_414] : memref<24x512xf32, #tpu.memory_space<vmem>>, vector<24x128xf32>
    %c0_415 = arith.constant 0 : index
    %c1664 = arith.constant 1664 : index
    %521 = vector.load %arg2[%c0_415, %c1664] : memref<8x4224xbf16, #tpu.memory_space<vmem>>, vector<8x24xbf16>
    %522 = arith.truncf %520 : vector<24x128xf32> to vector<24x128xbf16>
    %cst_416 = arith.constant dense<0.000000e+00> : vector<8x128xf32>
    %523 = tpu.matmul %521, %522, %cst_416 {dimension_numbers = #tpu.dot_dimension_numbers<[1], [0], [0], [1], [0, 0, 1, 1], [], []>} : vector<8x24xbf16>, vector<24x128xbf16>, vector<8x128xf32> -> vector<8x128xf32>
    %524 = vector.extract_strided_slice %0 {offsets = [0, 13], sizes = [8, 1], strides = [1, 1]} : vector<8x33xf32> to vector<8x1xf32>
    %525 = vector.broadcast %524 : vector<8x1xf32> to vector<8x128xf32>
    %526 = arith.addf %523, %525 : vector<8x128xf32>
    %c0_417 = arith.constant 0 : index
    %c1792 = arith.constant 1792 : index
    %527 = vector.load %arg2[%c0_417, %c1792] : memref<8x4224xbf16, #tpu.memory_space<vmem>>, vector<8x72xbf16>
    %c3_i32_418 = arith.constant 3 : i32
    %528 = tpu.dynamic_rotate %526 by %c3_i32_418 dim 1 : vector<8x128xf32>, i32 -> vector<8x128xf32>
    %c0_419 = arith.constant 0 : index
    %c0_420 = arith.constant 0 : index
    %529 = vector.load %arg6[%c0_419, %c0_420] : memref<9x128xf32, #tpu.memory_space<vmem>>, vector<1x128xf32>
    %530 = vector.broadcast %529 : vector<1x128xf32> to vector<8x128xf32>
    %531 = arith.mulf %528, %530 : vector<8x128xf32>
    %c0_421 = arith.constant 0 : index
    %c0_422 = arith.constant 0 : index
    %532 = vector.load %arg15[%c0_421, %c0_422] : memref<72x512xf32, #tpu.memory_space<vmem>>, vector<8x128xf32>
    tpu.vector_store %arg15[%c0_421, %c0_422], %531 {strides = array<i32>} : memref<72x512xf32, #tpu.memory_space<vmem>>, vector<8x128xf32>,
    %c2_i32_423 = arith.constant 2 : i32
    %533 = tpu.dynamic_rotate %526 by %c2_i32_423 dim 1 : vector<8x128xf32>, i32 -> vector<8x128xf32>
    %c1_424 = arith.constant 1 : index
    %c0_425 = arith.constant 0 : index
    %534 = vector.load %arg6[%c1_424, %c0_425] : memref<9x128xf32, #tpu.memory_space<vmem>>, vector<1x128xf32>
    %535 = vector.broadcast %534 : vector<1x128xf32> to vector<8x128xf32>
    %536 = arith.mulf %533, %535 : vector<8x128xf32>
    %c8_426 = arith.constant 8 : index
    %c0_427 = arith.constant 0 : index
    %537 = vector.load %arg15[%c8_426, %c0_427] : memref<72x512xf32, #tpu.memory_space<vmem>>, vector<8x128xf32>
    tpu.vector_store %arg15[%c8_426, %c0_427], %536 {strides = array<i32>} : memref<72x512xf32, #tpu.memory_space<vmem>>, vector<8x128xf32>,
    %c1_i32_428 = arith.constant 1 : i32
    %538 = tpu.dynamic_rotate %526 by %c1_i32_428 dim 1 : vector<8x128xf32>, i32 -> vector<8x128xf32>
    %c2_429 = arith.constant 2 : index
    %c0_430 = arith.constant 0 : index
    %539 = vector.load %arg6[%c2_429, %c0_430] : memref<9x128xf32, #tpu.memory_space<vmem>>, vector<1x128xf32>
    %540 = vector.broadcast %539 : vector<1x128xf32> to vector<8x128xf32>
    %541 = arith.mulf %538, %540 : vector<8x128xf32>
    %c16_431 = arith.constant 16 : index
    %c0_432 = arith.constant 0 : index
    %542 = vector.load %arg15[%c16_431, %c0_432] : memref<72x512xf32, #tpu.memory_space<vmem>>, vector<8x128xf32>
    tpu.vector_store %arg15[%c16_431, %c0_432], %541 {strides = array<i32>} : memref<72x512xf32, #tpu.memory_space<vmem>>, vector<8x128xf32>,
    %c1_i32_433 = arith.constant 1 : i32
    %543 = tpu.dynamic_rotate %526 by %c1_i32_433 dim 1 : vector<8x128xf32>, i32 -> vector<8x128xf32>
    %c3_434 = arith.constant 3 : index
    %c0_435 = arith.constant 0 : index
    %544 = vector.load %arg6[%c3_434, %c0_435] : memref<9x128xf32, #tpu.memory_space<vmem>>, vector<1x128xf32>
    %545 = vector.broadcast %544 : vector<1x128xf32> to vector<8x128xf32>
    %546 = arith.mulf %543, %545 : vector<8x128xf32>
    %c24_436 = arith.constant 24 : index
    %c0_437 = arith.constant 0 : index
    %547 = vector.load %arg15[%c24_436, %c0_437] : memref<72x512xf32, #tpu.memory_space<vmem>>, vector<8x128xf32>
    tpu.vector_store %arg15[%c24_436, %c0_437], %546 {strides = array<i32>} : memref<72x512xf32, #tpu.memory_space<vmem>>, vector<8x128xf32>,
    %c32_438 = arith.constant 32 : index
    %c0_439 = arith.constant 0 : index
    %548 = vector.load %arg15[%c32_438, %c0_439] : memref<72x512xf32, #tpu.memory_space<vmem>>, vector<8x128xf32>
    tpu.vector_store %arg15[%c32_438, %c0_439], %526 {strides = array<i32>} : memref<72x512xf32, #tpu.memory_space<vmem>>, vector<8x128xf32>,
    %c127_i32_440 = arith.constant 127 : i32
    %549 = tpu.dynamic_rotate %526 by %c127_i32_440 dim 1 : vector<8x128xf32>, i32 -> vector<8x128xf32>
    %c5_441 = arith.constant 5 : index
    %c0_442 = arith.constant 0 : index
    %550 = vector.load %arg6[%c5_441, %c0_442] : memref<9x128xf32, #tpu.memory_space<vmem>>, vector<1x128xf32>
    %551 = vector.broadcast %550 : vector<1x128xf32> to vector<8x128xf32>
    %552 = arith.mulf %549, %551 : vector<8x128xf32>
    %c40_443 = arith.constant 40 : index
    %c0_444 = arith.constant 0 : index
    %553 = vector.load %arg15[%c40_443, %c0_444] : memref<72x512xf32, #tpu.memory_space<vmem>>, vector<8x128xf32>
    tpu.vector_store %arg15[%c40_443, %c0_444], %552 {strides = array<i32>} : memref<72x512xf32, #tpu.memory_space<vmem>>, vector<8x128xf32>,
    %c127_i32_445 = arith.constant 127 : i32
    %554 = tpu.dynamic_rotate %526 by %c127_i32_445 dim 1 : vector<8x128xf32>, i32 -> vector<8x128xf32>
    %c6_446 = arith.constant 6 : index
    %c0_447 = arith.constant 0 : index
    %555 = vector.load %arg6[%c6_446, %c0_447] : memref<9x128xf32, #tpu.memory_space<vmem>>, vector<1x128xf32>
    %556 = vector.broadcast %555 : vector<1x128xf32> to vector<8x128xf32>
    %557 = arith.mulf %554, %556 : vector<8x128xf32>
    %c48_448 = arith.constant 48 : index
    %c0_449 = arith.constant 0 : index
    %558 = vector.load %arg15[%c48_448, %c0_449] : memref<72x512xf32, #tpu.memory_space<vmem>>, vector<8x128xf32>
    tpu.vector_store %arg15[%c48_448, %c0_449], %557 {strides = array<i32>} : memref<72x512xf32, #tpu.memory_space<vmem>>, vector<8x128xf32>,
    %c126_i32_450 = arith.constant 126 : i32
    %559 = tpu.dynamic_rotate %526 by %c126_i32_450 dim 1 : vector<8x128xf32>, i32 -> vector<8x128xf32>
    %c7_451 = arith.constant 7 : index
    %c0_452 = arith.constant 0 : index
    %560 = vector.load %arg6[%c7_451, %c0_452] : memref<9x128xf32, #tpu.memory_space<vmem>>, vector<1x128xf32>
    %561 = vector.broadcast %560 : vector<1x128xf32> to vector<8x128xf32>
    %562 = arith.mulf %559, %561 : vector<8x128xf32>
    %c56_453 = arith.constant 56 : index
    %c0_454 = arith.constant 0 : index
    %563 = vector.load %arg15[%c56_453, %c0_454] : memref<72x512xf32, #tpu.memory_space<vmem>>, vector<8x128xf32>
    tpu.vector_store %arg15[%c56_453, %c0_454], %562 {strides = array<i32>} : memref<72x512xf32, #tpu.memory_space<vmem>>, vector<8x128xf32>,
    %c125_i32_455 = arith.constant 125 : i32
    %564 = tpu.dynamic_rotate %526 by %c125_i32_455 dim 1 : vector<8x128xf32>, i32 -> vector<8x128xf32>
    %c8_456 = arith.constant 8 : index
    %c0_457 = arith.constant 0 : index
    %565 = vector.load %arg6[%c8_456, %c0_457] : memref<9x128xf32, #tpu.memory_space<vmem>>, vector<1x128xf32>
    %566 = vector.broadcast %565 : vector<1x128xf32> to vector<8x128xf32>
    %567 = arith.mulf %564, %566 : vector<8x128xf32>
    %c64_458 = arith.constant 64 : index
    %c0_459 = arith.constant 0 : index
    %568 = vector.load %arg15[%c64_458, %c0_459] : memref<72x512xf32, #tpu.memory_space<vmem>>, vector<8x128xf32>
    tpu.vector_store %arg15[%c64_458, %c0_459], %567 {strides = array<i32>} : memref<72x512xf32, #tpu.memory_space<vmem>>, vector<8x128xf32>,
    %c0_460 = arith.constant 0 : index
    %c0_461 = arith.constant 0 : index
    %569 = vector.load %arg15[%c0_460, %c0_461] : memref<72x512xf32, #tpu.memory_space<vmem>>, vector<72x128xf32>
    %570 = arith.truncf %569 : vector<72x128xf32> to vector<72x128xbf16>
    %cst_462 = arith.constant dense<0.000000e+00> : vector<8x128xf32>
    %571 = tpu.matmul %527, %570, %cst_462 {dimension_numbers = #tpu.dot_dimension_numbers<[1], [0], [0], [1], [0, 0, 1, 1], [], []>} : vector<8x72xbf16>, vector<72x128xbf16>, vector<8x128xf32> -> vector<8x128xf32>
    %572 = vector.extract_strided_slice %0 {offsets = [0, 14], sizes = [8, 1], strides = [1, 1]} : vector<8x33xf32> to vector<8x1xf32>
    %573 = vector.broadcast %572 : vector<8x1xf32> to vector<8x128xf32>
    %574 = arith.addf %571, %573 : vector<8x128xf32>
    %cst_463 = arith.constant 0.000000e+00 : f32
    %575 = vector.broadcast %cst_463 : f32 to vector<8x128xf32>
    %576 = arith.cmpf oge, %574, %575 : vector<8x128xf32>
    %cst_464 = arith.constant 0.00999999977 : f32
    %577 = vector.broadcast %cst_464 : f32 to vector<8x128xf32>
    %578 = arith.mulf %577, %574 : vector<8x128xf32>
    %579 = arith.select %576, %574, %578 : vector<8x128xi1>, vector<8x128xf32>
    %c4_465 = arith.constant 4 : index
    %c0_466 = arith.constant 0 : index
    %580 = vector.load %arg6[%c4_465, %c0_466] : memref<9x128xf32, #tpu.memory_space<vmem>>, vector<1x128xf32>
    %581 = vector.broadcast %580 : vector<1x128xf32> to vector<8x128xf32>
    %582 = arith.mulf %579, %581 : vector<8x128xf32>
    %cst_467 = arith.constant dense<0.000000e+00> : vector<8xf32>
    %583 = vector.multi_reduction <add>, %582, %cst_467 [1] : vector<8x128xf32> to vector<8xf32>
    %584 = vector.shape_cast %583 : vector<8xf32> to vector<8x1xf32>
    %cst_468 = arith.constant 1.250000e-01 : f32
    %585 = vector.broadcast %cst_468 : f32 to vector<8x1xf32>
    %586 = arith.mulf %584, %585 : vector<8x1xf32>
    %587 = vector.broadcast %586 : vector<8x1xf32> to vector<8x128xf32>
    %588 = arith.subf %579, %587 : vector<8x128xf32>
    %589 = vector.broadcast %580 : vector<1x128xf32> to vector<8x128xf32>
    %590 = arith.mulf %588, %589 : vector<8x128xf32>
    %591 = arith.mulf %590, %590 : vector<8x128xf32>
    %cst_469 = arith.constant dense<0.000000e+00> : vector<8xf32>
    %592 = vector.multi_reduction <add>, %591, %cst_469 [1] : vector<8x128xf32> to vector<8xf32>
    %593 = vector.shape_cast %592 : vector<8xf32> to vector<8x1xf32>
    %cst_470 = arith.constant 1.250000e-01 : f32
    %594 = vector.broadcast %cst_470 : f32 to vector<8x1xf32>
    %595 = arith.mulf %593, %594 : vector<8x1xf32>
    %596 = vector.broadcast %586 : vector<8x1xf32> to vector<8x128xf32>
    %597 = arith.subf %579, %596 : vector<8x128xf32>
    %cst_471 = arith.constant 9.99999974E-6 : f32
    %598 = vector.broadcast %cst_471 : f32 to vector<8x1xf32>
    %599 = arith.addf %595, %598 : vector<8x1xf32>
    %600 = math.rsqrt %599 : vector<8x1xf32>
    %601 = vector.broadcast %600 : vector<8x1xf32> to vector<8x128xf32>
    %602 = arith.mulf %597, %601 : vector<8x128xf32>
    %c0_472 = arith.constant 0 : index
    %c0_473 = arith.constant 0 : index
    %603 = vector.load %arg10[%c0_472, %c0_473] : memref<128x128xf32, #tpu.memory_space<vmem>>, vector<128x128xf32>
    %cst_474 = arith.constant dense<0.000000e+00> : vector<8x128xf32>
    %604 = tpu.matmul %602, %603, %cst_474 {dimension_numbers = #tpu.dot_dimension_numbers<[1], [0], [0], [1], [0, 0, 1, 1], [], []>} : vector<8x128xf32>, vector<128x128xf32>, vector<8x128xf32> -> vector<8x128xf32>
    %c0_475 = arith.constant 0 : index
    %c1920 = arith.constant 1920 : index
    %605 = vector.load %arg2[%c0_475, %c1920] : memref<8x4224xbf16, #tpu.memory_space<vmem>>, vector<8x8xbf16>
    %606 = arith.truncf %604 : vector<8x128xf32> to vector<8x128xbf16>
    %cst_476 = arith.constant dense<0.000000e+00> : vector<8x128xf32>
    %607 = tpu.matmul %605, %606, %cst_476 {dimension_numbers = #tpu.dot_dimension_numbers<[1], [0], [0], [1], [0, 0, 1, 1], [], []>} : vector<8x8xbf16>, vector<8x128xbf16>, vector<8x128xf32> -> vector<8x128xf32>
    %608 = vector.extract_strided_slice %0 {offsets = [0, 15], sizes = [8, 1], strides = [1, 1]} : vector<8x33xf32> to vector<8x1xf32>
    %609 = vector.broadcast %608 : vector<8x1xf32> to vector<8x128xf32>
    %610 = arith.addf %607, %609 : vector<8x128xf32>
    %cst_477 = arith.constant 0.000000e+00 : f32
    %611 = vector.broadcast %cst_477 : f32 to vector<8x128xf32>
    %612 = arith.cmpf oge, %610, %611 : vector<8x128xf32>
    %cst_478 = arith.constant 0.00999999977 : f32
    %613 = vector.broadcast %cst_478 : f32 to vector<8x128xf32>
    %614 = arith.mulf %613, %610 : vector<8x128xf32>
    %615 = arith.select %612, %610, %614 : vector<8x128xi1>, vector<8x128xf32>
    %c0_479 = arith.constant 0 : index
    %c0_480 = arith.constant 0 : index
    %616 = vector.load %arg16[%c0_479, %c0_480] : memref<24x512xf32, #tpu.memory_space<vmem>>, vector<8x128xf32>
    tpu.vector_store %arg16[%c0_479, %c0_480], %604 {strides = array<i32>} : memref<24x512xf32, #tpu.memory_space<vmem>>, vector<8x128xf32>,
    %c8_481 = arith.constant 8 : index
    %c0_482 = arith.constant 0 : index
    %617 = vector.load %arg16[%c8_481, %c0_482] : memref<24x512xf32, #tpu.memory_space<vmem>>, vector<8x128xf32>
    tpu.vector_store %arg16[%c8_481, %c0_482], %615 {strides = array<i32>} : memref<24x512xf32, #tpu.memory_space<vmem>>, vector<8x128xf32>,
    %c0_483 = arith.constant 0 : index
    %c0_484 = arith.constant 0 : index
    %618 = vector.load %arg16[%c0_483, %c0_484] : memref<24x512xf32, #tpu.memory_space<vmem>>, vector<16x128xf32>
    %c0_485 = arith.constant 0 : index
    %c2048 = arith.constant 2048 : index
    %619 = vector.load %arg2[%c0_485, %c2048] : memref<8x4224xbf16, #tpu.memory_space<vmem>>, vector<8x16xbf16>
    %620 = arith.truncf %618 : vector<16x128xf32> to vector<16x128xbf16>
    %cst_486 = arith.constant dense<0.000000e+00> : vector<8x128xf32>
    %621 = tpu.matmul %619, %620, %cst_486 {dimension_numbers = #tpu.dot_dimension_numbers<[1], [0], [0], [1], [0, 0, 1, 1], [], []>} : vector<8x16xbf16>, vector<16x128xbf16>, vector<8x128xf32> -> vector<8x128xf32>
    %622 = vector.extract_strided_slice %0 {offsets = [0, 16], sizes = [8, 1], strides = [1, 1]} : vector<8x33xf32> to vector<8x1xf32>
    %623 = vector.broadcast %622 : vector<8x1xf32> to vector<8x128xf32>
    %624 = arith.addf %621, %623 : vector<8x128xf32>
    %c0_487 = arith.constant 0 : index
    %c2176 = arith.constant 2176 : index
    %625 = vector.load %arg2[%c0_487, %c2176] : memref<8x4224xbf16, #tpu.memory_space<vmem>>, vector<8x8xbf16>
    %626 = arith.truncf %624 : vector<8x128xf32> to vector<8x128xbf16>
    %cst_488 = arith.constant dense<0.000000e+00> : vector<8x128xf32>
    %627 = tpu.matmul %625, %626, %cst_488 {dimension_numbers = #tpu.dot_dimension_numbers<[1], [0], [0], [1], [0, 0, 1, 1], [], []>} : vector<8x8xbf16>, vector<8x128xbf16>, vector<8x128xf32> -> vector<8x128xf32>
    %628 = vector.extract_strided_slice %0 {offsets = [0, 17], sizes = [8, 1], strides = [1, 1]} : vector<8x33xf32> to vector<8x1xf32>
    %629 = vector.broadcast %628 : vector<8x1xf32> to vector<8x128xf32>
    %630 = arith.addf %627, %629 : vector<8x128xf32>
    %cst_489 = arith.constant 0.000000e+00 : f32
    %631 = vector.broadcast %cst_489 : f32 to vector<8x128xf32>
    %632 = arith.cmpf oge, %630, %631 : vector<8x128xf32>
    %cst_490 = arith.constant 0.00999999977 : f32
    %633 = vector.broadcast %cst_490 : f32 to vector<8x128xf32>
    %634 = arith.mulf %633, %630 : vector<8x128xf32>
    %635 = arith.select %632, %630, %634 : vector<8x128xi1>, vector<8x128xf32>
    %c16_491 = arith.constant 16 : index
    %c0_492 = arith.constant 0 : index
    %636 = vector.load %arg16[%c16_491, %c0_492] : memref<24x512xf32, #tpu.memory_space<vmem>>, vector<8x128xf32>
    tpu.vector_store %arg16[%c16_491, %c0_492], %635 {strides = array<i32>} : memref<24x512xf32, #tpu.memory_space<vmem>>, vector<8x128xf32>,
    %c0_493 = arith.constant 0 : index
    %c0_494 = arith.constant 0 : index
    %637 = vector.load %arg16[%c0_493, %c0_494] : memref<24x512xf32, #tpu.memory_space<vmem>>, vector<24x128xf32>
    %c0_495 = arith.constant 0 : index
    %c2304 = arith.constant 2304 : index
    %638 = vector.load %arg2[%c0_495, %c2304] : memref<8x4224xbf16, #tpu.memory_space<vmem>>, vector<8x24xbf16>
    %639 = arith.truncf %637 : vector<24x128xf32> to vector<24x128xbf16>
    %cst_496 = arith.constant dense<0.000000e+00> : vector<8x128xf32>
    %640 = tpu.matmul %638, %639, %cst_496 {dimension_numbers = #tpu.dot_dimension_numbers<[1], [0], [0], [1], [0, 0, 1, 1], [], []>} : vector<8x24xbf16>, vector<24x128xbf16>, vector<8x128xf32> -> vector<8x128xf32>
    %641 = vector.extract_strided_slice %0 {offsets = [0, 18], sizes = [8, 1], strides = [1, 1]} : vector<8x33xf32> to vector<8x1xf32>
    %642 = vector.broadcast %641 : vector<8x1xf32> to vector<8x128xf32>
    %643 = arith.addf %640, %642 : vector<8x128xf32>
    %c0_497 = arith.constant 0 : index
    %c2432 = arith.constant 2432 : index
    %644 = vector.load %arg2[%c0_497, %c2432] : memref<8x4224xbf16, #tpu.memory_space<vmem>>, vector<8x8xbf16>
    %645 = arith.truncf %643 : vector<8x128xf32> to vector<8x128xbf16>
    %cst_498 = arith.constant dense<0.000000e+00> : vector<8x128xf32>
    %646 = tpu.matmul %644, %645, %cst_498 {dimension_numbers = #tpu.dot_dimension_numbers<[1], [0], [0], [1], [0, 0, 1, 1], [], []>} : vector<8x8xbf16>, vector<8x128xbf16>, vector<8x128xf32> -> vector<8x128xf32>
    %647 = vector.extract_strided_slice %0 {offsets = [0, 19], sizes = [8, 1], strides = [1, 1]} : vector<8x33xf32> to vector<8x1xf32>
    %648 = vector.broadcast %647 : vector<8x1xf32> to vector<8x128xf32>
    %649 = arith.addf %646, %648 : vector<8x128xf32>
    %cst_499 = arith.constant 0.000000e+00 : f32
    %650 = vector.broadcast %cst_499 : f32 to vector<8x128xf32>
    %651 = arith.cmpf oge, %649, %650 : vector<8x128xf32>
    %cst_500 = arith.constant 0.00999999977 : f32
    %652 = vector.broadcast %cst_500 : f32 to vector<8x128xf32>
    %653 = arith.mulf %652, %649 : vector<8x128xf32>
    %654 = arith.select %651, %649, %653 : vector<8x128xi1>, vector<8x128xf32>
    %c4_501 = arith.constant 4 : index
    %c0_502 = arith.constant 0 : index
    %655 = vector.load %arg7[%c4_501, %c0_502] : memref<9x128xf32, #tpu.memory_space<vmem>>, vector<1x128xf32>
    %656 = vector.broadcast %655 : vector<1x128xf32> to vector<8x128xf32>
    %657 = arith.mulf %654, %656 : vector<8x128xf32>
    %cst_503 = arith.constant dense<0.000000e+00> : vector<8xf32>
    %658 = vector.multi_reduction <add>, %657, %cst_503 [1] : vector<8x128xf32> to vector<8xf32>
    %659 = vector.shape_cast %658 : vector<8xf32> to vector<8x1xf32>
    %cst_504 = arith.constant 5.000000e-01 : f32
    %660 = vector.broadcast %cst_504 : f32 to vector<8x1xf32>
    %661 = arith.mulf %659, %660 : vector<8x1xf32>
    %662 = vector.broadcast %661 : vector<8x1xf32> to vector<8x128xf32>
    %663 = arith.subf %654, %662 : vector<8x128xf32>
    %664 = vector.broadcast %655 : vector<1x128xf32> to vector<8x128xf32>
    %665 = arith.mulf %663, %664 : vector<8x128xf32>
    %666 = arith.mulf %665, %665 : vector<8x128xf32>
    %cst_505 = arith.constant dense<0.000000e+00> : vector<8xf32>
    %667 = vector.multi_reduction <add>, %666, %cst_505 [1] : vector<8x128xf32> to vector<8xf32>
    %668 = vector.shape_cast %667 : vector<8xf32> to vector<8x1xf32>
    %cst_506 = arith.constant 5.000000e-01 : f32
    %669 = vector.broadcast %cst_506 : f32 to vector<8x1xf32>
    %670 = arith.mulf %668, %669 : vector<8x1xf32>
    %671 = vector.broadcast %661 : vector<8x1xf32> to vector<8x128xf32>
    %672 = arith.subf %654, %671 : vector<8x128xf32>
    %cst_507 = arith.constant 9.99999974E-6 : f32
    %673 = vector.broadcast %cst_507 : f32 to vector<8x1xf32>
    %674 = arith.addf %670, %673 : vector<8x1xf32>
    %675 = math.rsqrt %674 : vector<8x1xf32>
    %676 = vector.broadcast %675 : vector<8x1xf32> to vector<8x128xf32>
    %677 = arith.mulf %672, %676 : vector<8x128xf32>
    %c0_508 = arith.constant 0 : index
    %c0_509 = arith.constant 0 : index
    %678 = vector.load %arg11[%c0_508, %c0_509] : memref<128x128xf32, #tpu.memory_space<vmem>>, vector<128x128xf32>
    %cst_510 = arith.constant dense<0.000000e+00> : vector<8x128xf32>
    %679 = tpu.matmul %677, %678, %cst_510 {dimension_numbers = #tpu.dot_dimension_numbers<[1], [0], [0], [1], [0, 0, 1, 1], [], []>} : vector<8x128xf32>, vector<128x128xf32>, vector<8x128xf32> -> vector<8x128xf32>
    %c0_511 = arith.constant 0 : index
    %c0_512 = arith.constant 0 : index
    %680 = vector.load %arg16[%c0_511, %c0_512] : memref<24x512xf32, #tpu.memory_space<vmem>>, vector<8x128xf32>
    tpu.vector_store %arg16[%c0_511, %c0_512], %679 {strides = array<i32>} : memref<24x512xf32, #tpu.memory_space<vmem>>, vector<8x128xf32>,
    %c8_513 = arith.constant 8 : index
    %c0_514 = arith.constant 0 : index
    %681 = vector.load %arg16[%c8_513, %c0_514] : memref<24x512xf32, #tpu.memory_space<vmem>>, vector<8x128xf32>
    tpu.vector_store %arg16[%c8_513, %c0_514], %602 {strides = array<i32>} : memref<24x512xf32, #tpu.memory_space<vmem>>, vector<8x128xf32>,
    %c0_515 = arith.constant 0 : index
    %c0_516 = arith.constant 0 : index
    %682 = vector.load %arg16[%c0_515, %c0_516] : memref<24x512xf32, #tpu.memory_space<vmem>>, vector<16x128xf32>
    %c0_517 = arith.constant 0 : index
    %c2560 = arith.constant 2560 : index
    %683 = vector.load %arg2[%c0_517, %c2560] : memref<8x4224xbf16, #tpu.memory_space<vmem>>, vector<8x16xbf16>
    %684 = arith.truncf %682 : vector<16x128xf32> to vector<16x128xbf16>
    %cst_518 = arith.constant dense<0.000000e+00> : vector<8x128xf32>
    %685 = tpu.matmul %683, %684, %cst_518 {dimension_numbers = #tpu.dot_dimension_numbers<[1], [0], [0], [1], [0, 0, 1, 1], [], []>} : vector<8x16xbf16>, vector<16x128xbf16>, vector<8x128xf32> -> vector<8x128xf32>
    %686 = vector.extract_strided_slice %0 {offsets = [0, 20], sizes = [8, 1], strides = [1, 1]} : vector<8x33xf32> to vector<8x1xf32>
    %687 = vector.broadcast %686 : vector<8x1xf32> to vector<8x128xf32>
    %688 = arith.addf %685, %687 : vector<8x128xf32>
    %c0_519 = arith.constant 0 : index
    %c2688 = arith.constant 2688 : index
    %689 = vector.load %arg2[%c0_519, %c2688] : memref<8x4224xbf16, #tpu.memory_space<vmem>>, vector<8x72xbf16>
    %c3_i32_520 = arith.constant 3 : i32
    %690 = tpu.dynamic_rotate %688 by %c3_i32_520 dim 1 : vector<8x128xf32>, i32 -> vector<8x128xf32>
    %c0_521 = arith.constant 0 : index
    %c0_522 = arith.constant 0 : index
    %691 = vector.load %arg6[%c0_521, %c0_522] : memref<9x128xf32, #tpu.memory_space<vmem>>, vector<1x128xf32>
    %692 = vector.broadcast %691 : vector<1x128xf32> to vector<8x128xf32>
    %693 = arith.mulf %690, %692 : vector<8x128xf32>
    %c0_523 = arith.constant 0 : index
    %c0_524 = arith.constant 0 : index
    %694 = vector.load %arg15[%c0_523, %c0_524] : memref<72x512xf32, #tpu.memory_space<vmem>>, vector<8x128xf32>
    tpu.vector_store %arg15[%c0_523, %c0_524], %693 {strides = array<i32>} : memref<72x512xf32, #tpu.memory_space<vmem>>, vector<8x128xf32>,
    %c2_i32_525 = arith.constant 2 : i32
    %695 = tpu.dynamic_rotate %688 by %c2_i32_525 dim 1 : vector<8x128xf32>, i32 -> vector<8x128xf32>
    %c1_526 = arith.constant 1 : index
    %c0_527 = arith.constant 0 : index
    %696 = vector.load %arg6[%c1_526, %c0_527] : memref<9x128xf32, #tpu.memory_space<vmem>>, vector<1x128xf32>
    %697 = vector.broadcast %696 : vector<1x128xf32> to vector<8x128xf32>
    %698 = arith.mulf %695, %697 : vector<8x128xf32>
    %c8_528 = arith.constant 8 : index
    %c0_529 = arith.constant 0 : index
    %699 = vector.load %arg15[%c8_528, %c0_529] : memref<72x512xf32, #tpu.memory_space<vmem>>, vector<8x128xf32>
    tpu.vector_store %arg15[%c8_528, %c0_529], %698 {strides = array<i32>} : memref<72x512xf32, #tpu.memory_space<vmem>>, vector<8x128xf32>,
    %c1_i32_530 = arith.constant 1 : i32
    %700 = tpu.dynamic_rotate %688 by %c1_i32_530 dim 1 : vector<8x128xf32>, i32 -> vector<8x128xf32>
    %c2_531 = arith.constant 2 : index
    %c0_532 = arith.constant 0 : index
    %701 = vector.load %arg6[%c2_531, %c0_532] : memref<9x128xf32, #tpu.memory_space<vmem>>, vector<1x128xf32>
    %702 = vector.broadcast %701 : vector<1x128xf32> to vector<8x128xf32>
    %703 = arith.mulf %700, %702 : vector<8x128xf32>
    %c16_533 = arith.constant 16 : index
    %c0_534 = arith.constant 0 : index
    %704 = vector.load %arg15[%c16_533, %c0_534] : memref<72x512xf32, #tpu.memory_space<vmem>>, vector<8x128xf32>
    tpu.vector_store %arg15[%c16_533, %c0_534], %703 {strides = array<i32>} : memref<72x512xf32, #tpu.memory_space<vmem>>, vector<8x128xf32>,
    %c1_i32_535 = arith.constant 1 : i32
    %705 = tpu.dynamic_rotate %688 by %c1_i32_535 dim 1 : vector<8x128xf32>, i32 -> vector<8x128xf32>
    %c3_536 = arith.constant 3 : index
    %c0_537 = arith.constant 0 : index
    %706 = vector.load %arg6[%c3_536, %c0_537] : memref<9x128xf32, #tpu.memory_space<vmem>>, vector<1x128xf32>
    %707 = vector.broadcast %706 : vector<1x128xf32> to vector<8x128xf32>
    %708 = arith.mulf %705, %707 : vector<8x128xf32>
    %c24_538 = arith.constant 24 : index
    %c0_539 = arith.constant 0 : index
    %709 = vector.load %arg15[%c24_538, %c0_539] : memref<72x512xf32, #tpu.memory_space<vmem>>, vector<8x128xf32>
    tpu.vector_store %arg15[%c24_538, %c0_539], %708 {strides = array<i32>} : memref<72x512xf32, #tpu.memory_space<vmem>>, vector<8x128xf32>,
    %c32_540 = arith.constant 32 : index
    %c0_541 = arith.constant 0 : index
    %710 = vector.load %arg15[%c32_540, %c0_541] : memref<72x512xf32, #tpu.memory_space<vmem>>, vector<8x128xf32>
    tpu.vector_store %arg15[%c32_540, %c0_541], %688 {strides = array<i32>} : memref<72x512xf32, #tpu.memory_space<vmem>>, vector<8x128xf32>,
    %c127_i32_542 = arith.constant 127 : i32
    %711 = tpu.dynamic_rotate %688 by %c127_i32_542 dim 1 : vector<8x128xf32>, i32 -> vector<8x128xf32>
    %c5_543 = arith.constant 5 : index
    %c0_544 = arith.constant 0 : index
    %712 = vector.load %arg6[%c5_543, %c0_544] : memref<9x128xf32, #tpu.memory_space<vmem>>, vector<1x128xf32>
    %713 = vector.broadcast %712 : vector<1x128xf32> to vector<8x128xf32>
    %714 = arith.mulf %711, %713 : vector<8x128xf32>
    %c40_545 = arith.constant 40 : index
    %c0_546 = arith.constant 0 : index
    %715 = vector.load %arg15[%c40_545, %c0_546] : memref<72x512xf32, #tpu.memory_space<vmem>>, vector<8x128xf32>
    tpu.vector_store %arg15[%c40_545, %c0_546], %714 {strides = array<i32>} : memref<72x512xf32, #tpu.memory_space<vmem>>, vector<8x128xf32>,
    %c127_i32_547 = arith.constant 127 : i32
    %716 = tpu.dynamic_rotate %688 by %c127_i32_547 dim 1 : vector<8x128xf32>, i32 -> vector<8x128xf32>
    %c6_548 = arith.constant 6 : index
    %c0_549 = arith.constant 0 : index
    %717 = vector.load %arg6[%c6_548, %c0_549] : memref<9x128xf32, #tpu.memory_space<vmem>>, vector<1x128xf32>
    %718 = vector.broadcast %717 : vector<1x128xf32> to vector<8x128xf32>
    %719 = arith.mulf %716, %718 : vector<8x128xf32>
    %c48_550 = arith.constant 48 : index
    %c0_551 = arith.constant 0 : index
    %720 = vector.load %arg15[%c48_550, %c0_551] : memref<72x512xf32, #tpu.memory_space<vmem>>, vector<8x128xf32>
    tpu.vector_store %arg15[%c48_550, %c0_551], %719 {strides = array<i32>} : memref<72x512xf32, #tpu.memory_space<vmem>>, vector<8x128xf32>,
    %c126_i32_552 = arith.constant 126 : i32
    %721 = tpu.dynamic_rotate %688 by %c126_i32_552 dim 1 : vector<8x128xf32>, i32 -> vector<8x128xf32>
    %c7_553 = arith.constant 7 : index
    %c0_554 = arith.constant 0 : index
    %722 = vector.load %arg6[%c7_553, %c0_554] : memref<9x128xf32, #tpu.memory_space<vmem>>, vector<1x128xf32>
    %723 = vector.broadcast %722 : vector<1x128xf32> to vector<8x128xf32>
    %724 = arith.mulf %721, %723 : vector<8x128xf32>
    %c56_555 = arith.constant 56 : index
    %c0_556 = arith.constant 0 : index
    %725 = vector.load %arg15[%c56_555, %c0_556] : memref<72x512xf32, #tpu.memory_space<vmem>>, vector<8x128xf32>
    tpu.vector_store %arg15[%c56_555, %c0_556], %724 {strides = array<i32>} : memref<72x512xf32, #tpu.memory_space<vmem>>, vector<8x128xf32>,
    %c125_i32_557 = arith.constant 125 : i32
    %726 = tpu.dynamic_rotate %688 by %c125_i32_557 dim 1 : vector<8x128xf32>, i32 -> vector<8x128xf32>
    %c8_558 = arith.constant 8 : index
    %c0_559 = arith.constant 0 : index
    %727 = vector.load %arg6[%c8_558, %c0_559] : memref<9x128xf32, #tpu.memory_space<vmem>>, vector<1x128xf32>
    %728 = vector.broadcast %727 : vector<1x128xf32> to vector<8x128xf32>
    %729 = arith.mulf %726, %728 : vector<8x128xf32>
    %c64_560 = arith.constant 64 : index
    %c0_561 = arith.constant 0 : index
    %730 = vector.load %arg15[%c64_560, %c0_561] : memref<72x512xf32, #tpu.memory_space<vmem>>, vector<8x128xf32>
    tpu.vector_store %arg15[%c64_560, %c0_561], %729 {strides = array<i32>} : memref<72x512xf32, #tpu.memory_space<vmem>>, vector<8x128xf32>,
    %c0_562 = arith.constant 0 : index
    %c0_563 = arith.constant 0 : index
    %731 = vector.load %arg15[%c0_562, %c0_563] : memref<72x512xf32, #tpu.memory_space<vmem>>, vector<72x128xf32>
    %732 = arith.truncf %731 : vector<72x128xf32> to vector<72x128xbf16>
    %cst_564 = arith.constant dense<0.000000e+00> : vector<8x128xf32>
    %733 = tpu.matmul %689, %732, %cst_564 {dimension_numbers = #tpu.dot_dimension_numbers<[1], [0], [0], [1], [0, 0, 1, 1], [], []>} : vector<8x72xbf16>, vector<72x128xbf16>, vector<8x128xf32> -> vector<8x128xf32>
    %734 = vector.extract_strided_slice %0 {offsets = [0, 21], sizes = [8, 1], strides = [1, 1]} : vector<8x33xf32> to vector<8x1xf32>
    %735 = vector.broadcast %734 : vector<8x1xf32> to vector<8x128xf32>
    %736 = arith.addf %733, %735 : vector<8x128xf32>
    %cst_565 = arith.constant 0.000000e+00 : f32
    %737 = vector.broadcast %cst_565 : f32 to vector<8x128xf32>
    %738 = arith.cmpf oge, %736, %737 : vector<8x128xf32>
    %cst_566 = arith.constant 0.00999999977 : f32
    %739 = vector.broadcast %cst_566 : f32 to vector<8x128xf32>
    %740 = arith.mulf %739, %736 : vector<8x128xf32>
    %741 = arith.select %738, %736, %740 : vector<8x128xi1>, vector<8x128xf32>
    %c16_567 = arith.constant 16 : index
    %c0_568 = arith.constant 0 : index
    %742 = vector.load %arg16[%c16_567, %c0_568] : memref<24x512xf32, #tpu.memory_space<vmem>>, vector<8x128xf32>
    tpu.vector_store %arg16[%c16_567, %c0_568], %741 {strides = array<i32>} : memref<24x512xf32, #tpu.memory_space<vmem>>, vector<8x128xf32>,
    %c0_569 = arith.constant 0 : index
    %c0_570 = arith.constant 0 : index
    %743 = vector.load %arg16[%c0_569, %c0_570] : memref<24x512xf32, #tpu.memory_space<vmem>>, vector<24x128xf32>
    %c0_571 = arith.constant 0 : index
    %c2816 = arith.constant 2816 : index
    %744 = vector.load %arg2[%c0_571, %c2816] : memref<8x4224xbf16, #tpu.memory_space<vmem>>, vector<8x24xbf16>
    %745 = arith.truncf %743 : vector<24x128xf32> to vector<24x128xbf16>
    %cst_572 = arith.constant dense<0.000000e+00> : vector<8x128xf32>
    %746 = tpu.matmul %744, %745, %cst_572 {dimension_numbers = #tpu.dot_dimension_numbers<[1], [0], [0], [1], [0, 0, 1, 1], [], []>} : vector<8x24xbf16>, vector<24x128xbf16>, vector<8x128xf32> -> vector<8x128xf32>
    %747 = vector.extract_strided_slice %0 {offsets = [0, 22], sizes = [8, 1], strides = [1, 1]} : vector<8x33xf32> to vector<8x1xf32>
    %748 = vector.broadcast %747 : vector<8x1xf32> to vector<8x128xf32>
    %749 = arith.addf %746, %748 : vector<8x128xf32>
    %c0_573 = arith.constant 0 : index
    %c2944 = arith.constant 2944 : index
    %750 = vector.load %arg2[%c0_573, %c2944] : memref<8x4224xbf16, #tpu.memory_space<vmem>>, vector<8x72xbf16>
    %c3_i32_574 = arith.constant 3 : i32
    %751 = tpu.dynamic_rotate %749 by %c3_i32_574 dim 1 : vector<8x128xf32>, i32 -> vector<8x128xf32>
    %c0_575 = arith.constant 0 : index
    %c0_576 = arith.constant 0 : index
    %752 = vector.load %arg6[%c0_575, %c0_576] : memref<9x128xf32, #tpu.memory_space<vmem>>, vector<1x128xf32>
    %753 = vector.broadcast %752 : vector<1x128xf32> to vector<8x128xf32>
    %754 = arith.mulf %751, %753 : vector<8x128xf32>
    %c0_577 = arith.constant 0 : index
    %c0_578 = arith.constant 0 : index
    %755 = vector.load %arg15[%c0_577, %c0_578] : memref<72x512xf32, #tpu.memory_space<vmem>>, vector<8x128xf32>
    tpu.vector_store %arg15[%c0_577, %c0_578], %754 {strides = array<i32>} : memref<72x512xf32, #tpu.memory_space<vmem>>, vector<8x128xf32>,
    %c2_i32_579 = arith.constant 2 : i32
    %756 = tpu.dynamic_rotate %749 by %c2_i32_579 dim 1 : vector<8x128xf32>, i32 -> vector<8x128xf32>
    %c1_580 = arith.constant 1 : index
    %c0_581 = arith.constant 0 : index
    %757 = vector.load %arg6[%c1_580, %c0_581] : memref<9x128xf32, #tpu.memory_space<vmem>>, vector<1x128xf32>
    %758 = vector.broadcast %757 : vector<1x128xf32> to vector<8x128xf32>
    %759 = arith.mulf %756, %758 : vector<8x128xf32>
    %c8_582 = arith.constant 8 : index
    %c0_583 = arith.constant 0 : index
    %760 = vector.load %arg15[%c8_582, %c0_583] : memref<72x512xf32, #tpu.memory_space<vmem>>, vector<8x128xf32>
    tpu.vector_store %arg15[%c8_582, %c0_583], %759 {strides = array<i32>} : memref<72x512xf32, #tpu.memory_space<vmem>>, vector<8x128xf32>,
    %c1_i32_584 = arith.constant 1 : i32
    %761 = tpu.dynamic_rotate %749 by %c1_i32_584 dim 1 : vector<8x128xf32>, i32 -> vector<8x128xf32>
    %c2_585 = arith.constant 2 : index
    %c0_586 = arith.constant 0 : index
    %762 = vector.load %arg6[%c2_585, %c0_586] : memref<9x128xf32, #tpu.memory_space<vmem>>, vector<1x128xf32>
    %763 = vector.broadcast %762 : vector<1x128xf32> to vector<8x128xf32>
    %764 = arith.mulf %761, %763 : vector<8x128xf32>
    %c16_587 = arith.constant 16 : index
    %c0_588 = arith.constant 0 : index
    %765 = vector.load %arg15[%c16_587, %c0_588] : memref<72x512xf32, #tpu.memory_space<vmem>>, vector<8x128xf32>
    tpu.vector_store %arg15[%c16_587, %c0_588], %764 {strides = array<i32>} : memref<72x512xf32, #tpu.memory_space<vmem>>, vector<8x128xf32>,
    %c1_i32_589 = arith.constant 1 : i32
    %766 = tpu.dynamic_rotate %749 by %c1_i32_589 dim 1 : vector<8x128xf32>, i32 -> vector<8x128xf32>
    %c3_590 = arith.constant 3 : index
    %c0_591 = arith.constant 0 : index
    %767 = vector.load %arg6[%c3_590, %c0_591] : memref<9x128xf32, #tpu.memory_space<vmem>>, vector<1x128xf32>
    %768 = vector.broadcast %767 : vector<1x128xf32> to vector<8x128xf32>
    %769 = arith.mulf %766, %768 : vector<8x128xf32>
    %c24_592 = arith.constant 24 : index
    %c0_593 = arith.constant 0 : index
    %770 = vector.load %arg15[%c24_592, %c0_593] : memref<72x512xf32, #tpu.memory_space<vmem>>, vector<8x128xf32>
    tpu.vector_store %arg15[%c24_592, %c0_593], %769 {strides = array<i32>} : memref<72x512xf32, #tpu.memory_space<vmem>>, vector<8x128xf32>,
    %c32_594 = arith.constant 32 : index
    %c0_595 = arith.constant 0 : index
    %771 = vector.load %arg15[%c32_594, %c0_595] : memref<72x512xf32, #tpu.memory_space<vmem>>, vector<8x128xf32>
    tpu.vector_store %arg15[%c32_594, %c0_595], %749 {strides = array<i32>} : memref<72x512xf32, #tpu.memory_space<vmem>>, vector<8x128xf32>,
    %c127_i32_596 = arith.constant 127 : i32
    %772 = tpu.dynamic_rotate %749 by %c127_i32_596 dim 1 : vector<8x128xf32>, i32 -> vector<8x128xf32>
    %c5_597 = arith.constant 5 : index
    %c0_598 = arith.constant 0 : index
    %773 = vector.load %arg6[%c5_597, %c0_598] : memref<9x128xf32, #tpu.memory_space<vmem>>, vector<1x128xf32>
    %774 = vector.broadcast %773 : vector<1x128xf32> to vector<8x128xf32>
    %775 = arith.mulf %772, %774 : vector<8x128xf32>
    %c40_599 = arith.constant 40 : index
    %c0_600 = arith.constant 0 : index
    %776 = vector.load %arg15[%c40_599, %c0_600] : memref<72x512xf32, #tpu.memory_space<vmem>>, vector<8x128xf32>
    tpu.vector_store %arg15[%c40_599, %c0_600], %775 {strides = array<i32>} : memref<72x512xf32, #tpu.memory_space<vmem>>, vector<8x128xf32>,
    %c127_i32_601 = arith.constant 127 : i32
    %777 = tpu.dynamic_rotate %749 by %c127_i32_601 dim 1 : vector<8x128xf32>, i32 -> vector<8x128xf32>
    %c6_602 = arith.constant 6 : index
    %c0_603 = arith.constant 0 : index
    %778 = vector.load %arg6[%c6_602, %c0_603] : memref<9x128xf32, #tpu.memory_space<vmem>>, vector<1x128xf32>
    %779 = vector.broadcast %778 : vector<1x128xf32> to vector<8x128xf32>
    %780 = arith.mulf %777, %779 : vector<8x128xf32>
    %c48_604 = arith.constant 48 : index
    %c0_605 = arith.constant 0 : index
    %781 = vector.load %arg15[%c48_604, %c0_605] : memref<72x512xf32, #tpu.memory_space<vmem>>, vector<8x128xf32>
    tpu.vector_store %arg15[%c48_604, %c0_605], %780 {strides = array<i32>} : memref<72x512xf32, #tpu.memory_space<vmem>>, vector<8x128xf32>,
    %c126_i32_606 = arith.constant 126 : i32
    %782 = tpu.dynamic_rotate %749 by %c126_i32_606 dim 1 : vector<8x128xf32>, i32 -> vector<8x128xf32>
    %c7_607 = arith.constant 7 : index
    %c0_608 = arith.constant 0 : index
    %783 = vector.load %arg6[%c7_607, %c0_608] : memref<9x128xf32, #tpu.memory_space<vmem>>, vector<1x128xf32>
    %784 = vector.broadcast %783 : vector<1x128xf32> to vector<8x128xf32>
    %785 = arith.mulf %782, %784 : vector<8x128xf32>
    %c56_609 = arith.constant 56 : index
    %c0_610 = arith.constant 0 : index
    %786 = vector.load %arg15[%c56_609, %c0_610] : memref<72x512xf32, #tpu.memory_space<vmem>>, vector<8x128xf32>
    tpu.vector_store %arg15[%c56_609, %c0_610], %785 {strides = array<i32>} : memref<72x512xf32, #tpu.memory_space<vmem>>, vector<8x128xf32>,
    %c125_i32_611 = arith.constant 125 : i32
    %787 = tpu.dynamic_rotate %749 by %c125_i32_611 dim 1 : vector<8x128xf32>, i32 -> vector<8x128xf32>
    %c8_612 = arith.constant 8 : index
    %c0_613 = arith.constant 0 : index
    %788 = vector.load %arg6[%c8_612, %c0_613] : memref<9x128xf32, #tpu.memory_space<vmem>>, vector<1x128xf32>
    %789 = vector.broadcast %788 : vector<1x128xf32> to vector<8x128xf32>
    %790 = arith.mulf %787, %789 : vector<8x128xf32>
    %c64_614 = arith.constant 64 : index
    %c0_615 = arith.constant 0 : index
    %791 = vector.load %arg15[%c64_614, %c0_615] : memref<72x512xf32, #tpu.memory_space<vmem>>, vector<8x128xf32>
    tpu.vector_store %arg15[%c64_614, %c0_615], %790 {strides = array<i32>} : memref<72x512xf32, #tpu.memory_space<vmem>>, vector<8x128xf32>,
    %c0_616 = arith.constant 0 : index
    %c0_617 = arith.constant 0 : index
    %792 = vector.load %arg15[%c0_616, %c0_617] : memref<72x512xf32, #tpu.memory_space<vmem>>, vector<72x128xf32>
    %793 = arith.truncf %792 : vector<72x128xf32> to vector<72x128xbf16>
    %cst_618 = arith.constant dense<0.000000e+00> : vector<8x128xf32>
    %794 = tpu.matmul %750, %793, %cst_618 {dimension_numbers = #tpu.dot_dimension_numbers<[1], [0], [0], [1], [0, 0, 1, 1], [], []>} : vector<8x72xbf16>, vector<72x128xbf16>, vector<8x128xf32> -> vector<8x128xf32>
    %795 = vector.extract_strided_slice %0 {offsets = [0, 23], sizes = [8, 1], strides = [1, 1]} : vector<8x33xf32> to vector<8x1xf32>
    %796 = vector.broadcast %795 : vector<8x1xf32> to vector<8x128xf32>
    %797 = arith.addf %794, %796 : vector<8x128xf32>
    %cst_619 = arith.constant 0.000000e+00 : f32
    %798 = vector.broadcast %cst_619 : f32 to vector<8x128xf32>
    %799 = arith.cmpf oge, %797, %798 : vector<8x128xf32>
    %cst_620 = arith.constant 0.00999999977 : f32
    %800 = vector.broadcast %cst_620 : f32 to vector<8x128xf32>
    %801 = arith.mulf %800, %797 : vector<8x128xf32>
    %802 = arith.select %799, %797, %801 : vector<8x128xi1>, vector<8x128xf32>
    %c0_621 = arith.constant 0 : index
    %c0_622 = arith.constant 0 : index
    %803 = vector.load %arg12[%c0_621, %c0_622] : memref<128x128xf32, #tpu.memory_space<vmem>>, vector<128x128xf32>
    %cst_623 = arith.constant dense<0.000000e+00> : vector<8x128xf32>
    %804 = tpu.matmul %802, %803, %cst_623 {dimension_numbers = #tpu.dot_dimension_numbers<[1], [0], [0], [1], [0, 0, 1, 1], [], []>} : vector<8x128xf32>, vector<128x128xf32>, vector<8x128xf32> -> vector<8x128xf32>
    %c0_624 = arith.constant 0 : index
    %c0_625 = arith.constant 0 : index
    %805 = vector.load %arg16[%c0_624, %c0_625] : memref<24x512xf32, #tpu.memory_space<vmem>>, vector<8x128xf32>
    tpu.vector_store %arg16[%c0_624, %c0_625], %804 {strides = array<i32>} : memref<24x512xf32, #tpu.memory_space<vmem>>, vector<8x128xf32>,
    %c8_626 = arith.constant 8 : index
    %c0_627 = arith.constant 0 : index
    %806 = vector.load %arg16[%c8_626, %c0_627] : memref<24x512xf32, #tpu.memory_space<vmem>>, vector<8x128xf32>
    tpu.vector_store %arg16[%c8_626, %c0_627], %401 {strides = array<i32>} : memref<24x512xf32, #tpu.memory_space<vmem>>, vector<8x128xf32>,
    %c0_628 = arith.constant 0 : index
    %c0_629 = arith.constant 0 : index
    %807 = vector.load %arg16[%c0_628, %c0_629] : memref<24x512xf32, #tpu.memory_space<vmem>>, vector<16x128xf32>
    %c0_630 = arith.constant 0 : index
    %c3072 = arith.constant 3072 : index
    %808 = vector.load %arg2[%c0_630, %c3072] : memref<8x4224xbf16, #tpu.memory_space<vmem>>, vector<8x16xbf16>
    %809 = arith.truncf %807 : vector<16x128xf32> to vector<16x128xbf16>
    %cst_631 = arith.constant dense<0.000000e+00> : vector<8x128xf32>
    %810 = tpu.matmul %808, %809, %cst_631 {dimension_numbers = #tpu.dot_dimension_numbers<[1], [0], [0], [1], [0, 0, 1, 1], [], []>} : vector<8x16xbf16>, vector<16x128xbf16>, vector<8x128xf32> -> vector<8x128xf32>
    %811 = vector.extract_strided_slice %0 {offsets = [0, 24], sizes = [8, 1], strides = [1, 1]} : vector<8x33xf32> to vector<8x1xf32>
    %812 = vector.broadcast %811 : vector<8x1xf32> to vector<8x128xf32>
    %813 = arith.addf %810, %812 : vector<8x128xf32>
    %c0_632 = arith.constant 0 : index
    %c3200 = arith.constant 3200 : index
    %814 = vector.load %arg2[%c0_632, %c3200] : memref<8x4224xbf16, #tpu.memory_space<vmem>>, vector<8x72xbf16>
    %c5_i32_633 = arith.constant 5 : i32
    %815 = tpu.dynamic_rotate %813 by %c5_i32_633 dim 1 : vector<8x128xf32>, i32 -> vector<8x128xf32>
    %c0_634 = arith.constant 0 : index
    %c0_635 = arith.constant 0 : index
    %816 = vector.load %arg5[%c0_634, %c0_635] : memref<9x128xf32, #tpu.memory_space<vmem>>, vector<1x128xf32>
    %817 = vector.broadcast %816 : vector<1x128xf32> to vector<8x128xf32>
    %818 = arith.mulf %815, %817 : vector<8x128xf32>
    %c0_636 = arith.constant 0 : index
    %c0_637 = arith.constant 0 : index
    %819 = vector.load %arg15[%c0_636, %c0_637] : memref<72x512xf32, #tpu.memory_space<vmem>>, vector<8x128xf32>
    tpu.vector_store %arg15[%c0_636, %c0_637], %818 {strides = array<i32>} : memref<72x512xf32, #tpu.memory_space<vmem>>, vector<8x128xf32>,
    %c4_i32_638 = arith.constant 4 : i32
    %820 = tpu.dynamic_rotate %813 by %c4_i32_638 dim 1 : vector<8x128xf32>, i32 -> vector<8x128xf32>
    %c1_639 = arith.constant 1 : index
    %c0_640 = arith.constant 0 : index
    %821 = vector.load %arg5[%c1_639, %c0_640] : memref<9x128xf32, #tpu.memory_space<vmem>>, vector<1x128xf32>
    %822 = vector.broadcast %821 : vector<1x128xf32> to vector<8x128xf32>
    %823 = arith.mulf %820, %822 : vector<8x128xf32>
    %c8_641 = arith.constant 8 : index
    %c0_642 = arith.constant 0 : index
    %824 = vector.load %arg15[%c8_641, %c0_642] : memref<72x512xf32, #tpu.memory_space<vmem>>, vector<8x128xf32>
    tpu.vector_store %arg15[%c8_641, %c0_642], %823 {strides = array<i32>} : memref<72x512xf32, #tpu.memory_space<vmem>>, vector<8x128xf32>,
    %c3_i32_643 = arith.constant 3 : i32
    %825 = tpu.dynamic_rotate %813 by %c3_i32_643 dim 1 : vector<8x128xf32>, i32 -> vector<8x128xf32>
    %c2_644 = arith.constant 2 : index
    %c0_645 = arith.constant 0 : index
    %826 = vector.load %arg5[%c2_644, %c0_645] : memref<9x128xf32, #tpu.memory_space<vmem>>, vector<1x128xf32>
    %827 = vector.broadcast %826 : vector<1x128xf32> to vector<8x128xf32>
    %828 = arith.mulf %825, %827 : vector<8x128xf32>
    %c16_646 = arith.constant 16 : index
    %c0_647 = arith.constant 0 : index
    %829 = vector.load %arg15[%c16_646, %c0_647] : memref<72x512xf32, #tpu.memory_space<vmem>>, vector<8x128xf32>
    tpu.vector_store %arg15[%c16_646, %c0_647], %828 {strides = array<i32>} : memref<72x512xf32, #tpu.memory_space<vmem>>, vector<8x128xf32>,
    %c1_i32_648 = arith.constant 1 : i32
    %830 = tpu.dynamic_rotate %813 by %c1_i32_648 dim 1 : vector<8x128xf32>, i32 -> vector<8x128xf32>
    %c3_649 = arith.constant 3 : index
    %c0_650 = arith.constant 0 : index
    %831 = vector.load %arg5[%c3_649, %c0_650] : memref<9x128xf32, #tpu.memory_space<vmem>>, vector<1x128xf32>
    %832 = vector.broadcast %831 : vector<1x128xf32> to vector<8x128xf32>
    %833 = arith.mulf %830, %832 : vector<8x128xf32>
    %c24_651 = arith.constant 24 : index
    %c0_652 = arith.constant 0 : index
    %834 = vector.load %arg15[%c24_651, %c0_652] : memref<72x512xf32, #tpu.memory_space<vmem>>, vector<8x128xf32>
    tpu.vector_store %arg15[%c24_651, %c0_652], %833 {strides = array<i32>} : memref<72x512xf32, #tpu.memory_space<vmem>>, vector<8x128xf32>,
    %c32_653 = arith.constant 32 : index
    %c0_654 = arith.constant 0 : index
    %835 = vector.load %arg15[%c32_653, %c0_654] : memref<72x512xf32, #tpu.memory_space<vmem>>, vector<8x128xf32>
    tpu.vector_store %arg15[%c32_653, %c0_654], %813 {strides = array<i32>} : memref<72x512xf32, #tpu.memory_space<vmem>>, vector<8x128xf32>,
    %c127_i32_655 = arith.constant 127 : i32
    %836 = tpu.dynamic_rotate %813 by %c127_i32_655 dim 1 : vector<8x128xf32>, i32 -> vector<8x128xf32>
    %c5_656 = arith.constant 5 : index
    %c0_657 = arith.constant 0 : index
    %837 = vector.load %arg5[%c5_656, %c0_657] : memref<9x128xf32, #tpu.memory_space<vmem>>, vector<1x128xf32>
    %838 = vector.broadcast %837 : vector<1x128xf32> to vector<8x128xf32>
    %839 = arith.mulf %836, %838 : vector<8x128xf32>
    %c40_658 = arith.constant 40 : index
    %c0_659 = arith.constant 0 : index
    %840 = vector.load %arg15[%c40_658, %c0_659] : memref<72x512xf32, #tpu.memory_space<vmem>>, vector<8x128xf32>
    tpu.vector_store %arg15[%c40_658, %c0_659], %839 {strides = array<i32>} : memref<72x512xf32, #tpu.memory_space<vmem>>, vector<8x128xf32>,
    %c125_i32_660 = arith.constant 125 : i32
    %841 = tpu.dynamic_rotate %813 by %c125_i32_660 dim 1 : vector<8x128xf32>, i32 -> vector<8x128xf32>
    %c6_661 = arith.constant 6 : index
    %c0_662 = arith.constant 0 : index
    %842 = vector.load %arg5[%c6_661, %c0_662] : memref<9x128xf32, #tpu.memory_space<vmem>>, vector<1x128xf32>
    %843 = vector.broadcast %842 : vector<1x128xf32> to vector<8x128xf32>
    %844 = arith.mulf %841, %843 : vector<8x128xf32>
    %c48_663 = arith.constant 48 : index
    %c0_664 = arith.constant 0 : index
    %845 = vector.load %arg15[%c48_663, %c0_664] : memref<72x512xf32, #tpu.memory_space<vmem>>, vector<8x128xf32>
    tpu.vector_store %arg15[%c48_663, %c0_664], %844 {strides = array<i32>} : memref<72x512xf32, #tpu.memory_space<vmem>>, vector<8x128xf32>,
    %c124_i32_665 = arith.constant 124 : i32
    %846 = tpu.dynamic_rotate %813 by %c124_i32_665 dim 1 : vector<8x128xf32>, i32 -> vector<8x128xf32>
    %c7_666 = arith.constant 7 : index
    %c0_667 = arith.constant 0 : index
    %847 = vector.load %arg5[%c7_666, %c0_667] : memref<9x128xf32, #tpu.memory_space<vmem>>, vector<1x128xf32>
    %848 = vector.broadcast %847 : vector<1x128xf32> to vector<8x128xf32>
    %849 = arith.mulf %846, %848 : vector<8x128xf32>
    %c56_668 = arith.constant 56 : index
    %c0_669 = arith.constant 0 : index
    %850 = vector.load %arg15[%c56_668, %c0_669] : memref<72x512xf32, #tpu.memory_space<vmem>>, vector<8x128xf32>
    tpu.vector_store %arg15[%c56_668, %c0_669], %849 {strides = array<i32>} : memref<72x512xf32, #tpu.memory_space<vmem>>, vector<8x128xf32>,
    %c123_i32_670 = arith.constant 123 : i32
    %851 = tpu.dynamic_rotate %813 by %c123_i32_670 dim 1 : vector<8x128xf32>, i32 -> vector<8x128xf32>
    %c8_671 = arith.constant 8 : index
    %c0_672 = arith.constant 0 : index
    %852 = vector.load %arg5[%c8_671, %c0_672] : memref<9x128xf32, #tpu.memory_space<vmem>>, vector<1x128xf32>
    %853 = vector.broadcast %852 : vector<1x128xf32> to vector<8x128xf32>
    %854 = arith.mulf %851, %853 : vector<8x128xf32>
    %c64_673 = arith.constant 64 : index
    %c0_674 = arith.constant 0 : index
    %855 = vector.load %arg15[%c64_673, %c0_674] : memref<72x512xf32, #tpu.memory_space<vmem>>, vector<8x128xf32>
    tpu.vector_store %arg15[%c64_673, %c0_674], %854 {strides = array<i32>} : memref<72x512xf32, #tpu.memory_space<vmem>>, vector<8x128xf32>,
    %c0_675 = arith.constant 0 : index
    %c0_676 = arith.constant 0 : index
    %856 = vector.load %arg15[%c0_675, %c0_676] : memref<72x512xf32, #tpu.memory_space<vmem>>, vector<72x128xf32>
    %857 = arith.truncf %856 : vector<72x128xf32> to vector<72x128xbf16>
    %cst_677 = arith.constant dense<0.000000e+00> : vector<8x128xf32>
    %858 = tpu.matmul %814, %857, %cst_677 {dimension_numbers = #tpu.dot_dimension_numbers<[1], [0], [0], [1], [0, 0, 1, 1], [], []>} : vector<8x72xbf16>, vector<72x128xbf16>, vector<8x128xf32> -> vector<8x128xf32>
    %859 = vector.extract_strided_slice %0 {offsets = [0, 25], sizes = [8, 1], strides = [1, 1]} : vector<8x33xf32> to vector<8x1xf32>
    %860 = vector.broadcast %859 : vector<8x1xf32> to vector<8x128xf32>
    %861 = arith.addf %858, %860 : vector<8x128xf32>
    %cst_678 = arith.constant 0.000000e+00 : f32
    %862 = vector.broadcast %cst_678 : f32 to vector<8x128xf32>
    %863 = arith.cmpf oge, %861, %862 : vector<8x128xf32>
    %cst_679 = arith.constant 0.00999999977 : f32
    %864 = vector.broadcast %cst_679 : f32 to vector<8x128xf32>
    %865 = arith.mulf %864, %861 : vector<8x128xf32>
    %866 = arith.select %863, %861, %865 : vector<8x128xi1>, vector<8x128xf32>
    %c16_680 = arith.constant 16 : index
    %c0_681 = arith.constant 0 : index
    %867 = vector.load %arg16[%c16_680, %c0_681] : memref<24x512xf32, #tpu.memory_space<vmem>>, vector<8x128xf32>
    tpu.vector_store %arg16[%c16_680, %c0_681], %866 {strides = array<i32>} : memref<24x512xf32, #tpu.memory_space<vmem>>, vector<8x128xf32>,
    %c0_682 = arith.constant 0 : index
    %c0_683 = arith.constant 0 : index
    %868 = vector.load %arg16[%c0_682, %c0_683] : memref<24x512xf32, #tpu.memory_space<vmem>>, vector<24x128xf32>
    %c0_684 = arith.constant 0 : index
    %c3328 = arith.constant 3328 : index
    %869 = vector.load %arg2[%c0_684, %c3328] : memref<8x4224xbf16, #tpu.memory_space<vmem>>, vector<8x24xbf16>
    %870 = arith.truncf %868 : vector<24x128xf32> to vector<24x128xbf16>
    %cst_685 = arith.constant dense<0.000000e+00> : vector<8x128xf32>
    %871 = tpu.matmul %869, %870, %cst_685 {dimension_numbers = #tpu.dot_dimension_numbers<[1], [0], [0], [1], [0, 0, 1, 1], [], []>} : vector<8x24xbf16>, vector<24x128xbf16>, vector<8x128xf32> -> vector<8x128xf32>
    %872 = vector.extract_strided_slice %0 {offsets = [0, 26], sizes = [8, 1], strides = [1, 1]} : vector<8x33xf32> to vector<8x1xf32>
    %873 = vector.broadcast %872 : vector<8x1xf32> to vector<8x128xf32>
    %874 = arith.addf %871, %873 : vector<8x128xf32>
    %c0_686 = arith.constant 0 : index
    %c3456 = arith.constant 3456 : index
    %875 = vector.load %arg2[%c0_686, %c3456] : memref<8x4224xbf16, #tpu.memory_space<vmem>>, vector<8x72xbf16>
    %c5_i32_687 = arith.constant 5 : i32
    %876 = tpu.dynamic_rotate %874 by %c5_i32_687 dim 1 : vector<8x128xf32>, i32 -> vector<8x128xf32>
    %c0_688 = arith.constant 0 : index
    %c0_689 = arith.constant 0 : index
    %877 = vector.load %arg5[%c0_688, %c0_689] : memref<9x128xf32, #tpu.memory_space<vmem>>, vector<1x128xf32>
    %878 = vector.broadcast %877 : vector<1x128xf32> to vector<8x128xf32>
    %879 = arith.mulf %876, %878 : vector<8x128xf32>
    %c0_690 = arith.constant 0 : index
    %c0_691 = arith.constant 0 : index
    %880 = vector.load %arg15[%c0_690, %c0_691] : memref<72x512xf32, #tpu.memory_space<vmem>>, vector<8x128xf32>
    tpu.vector_store %arg15[%c0_690, %c0_691], %879 {strides = array<i32>} : memref<72x512xf32, #tpu.memory_space<vmem>>, vector<8x128xf32>,
    %c4_i32_692 = arith.constant 4 : i32
    %881 = tpu.dynamic_rotate %874 by %c4_i32_692 dim 1 : vector<8x128xf32>, i32 -> vector<8x128xf32>
    %c1_693 = arith.constant 1 : index
    %c0_694 = arith.constant 0 : index
    %882 = vector.load %arg5[%c1_693, %c0_694] : memref<9x128xf32, #tpu.memory_space<vmem>>, vector<1x128xf32>
    %883 = vector.broadcast %882 : vector<1x128xf32> to vector<8x128xf32>
    %884 = arith.mulf %881, %883 : vector<8x128xf32>
    %c8_695 = arith.constant 8 : index
    %c0_696 = arith.constant 0 : index
    %885 = vector.load %arg15[%c8_695, %c0_696] : memref<72x512xf32, #tpu.memory_space<vmem>>, vector<8x128xf32>
    tpu.vector_store %arg15[%c8_695, %c0_696], %884 {strides = array<i32>} : memref<72x512xf32, #tpu.memory_space<vmem>>, vector<8x128xf32>,
    %c3_i32_697 = arith.constant 3 : i32
    %886 = tpu.dynamic_rotate %874 by %c3_i32_697 dim 1 : vector<8x128xf32>, i32 -> vector<8x128xf32>
    %c2_698 = arith.constant 2 : index
    %c0_699 = arith.constant 0 : index
    %887 = vector.load %arg5[%c2_698, %c0_699] : memref<9x128xf32, #tpu.memory_space<vmem>>, vector<1x128xf32>
    %888 = vector.broadcast %887 : vector<1x128xf32> to vector<8x128xf32>
    %889 = arith.mulf %886, %888 : vector<8x128xf32>
    %c16_700 = arith.constant 16 : index
    %c0_701 = arith.constant 0 : index
    %890 = vector.load %arg15[%c16_700, %c0_701] : memref<72x512xf32, #tpu.memory_space<vmem>>, vector<8x128xf32>
    tpu.vector_store %arg15[%c16_700, %c0_701], %889 {strides = array<i32>} : memref<72x512xf32, #tpu.memory_space<vmem>>, vector<8x128xf32>,
    %c1_i32_702 = arith.constant 1 : i32
    %891 = tpu.dynamic_rotate %874 by %c1_i32_702 dim 1 : vector<8x128xf32>, i32 -> vector<8x128xf32>
    %c3_703 = arith.constant 3 : index
    %c0_704 = arith.constant 0 : index
    %892 = vector.load %arg5[%c3_703, %c0_704] : memref<9x128xf32, #tpu.memory_space<vmem>>, vector<1x128xf32>
    %893 = vector.broadcast %892 : vector<1x128xf32> to vector<8x128xf32>
    %894 = arith.mulf %891, %893 : vector<8x128xf32>
    %c24_705 = arith.constant 24 : index
    %c0_706 = arith.constant 0 : index
    %895 = vector.load %arg15[%c24_705, %c0_706] : memref<72x512xf32, #tpu.memory_space<vmem>>, vector<8x128xf32>
    tpu.vector_store %arg15[%c24_705, %c0_706], %894 {strides = array<i32>} : memref<72x512xf32, #tpu.memory_space<vmem>>, vector<8x128xf32>,
    %c32_707 = arith.constant 32 : index
    %c0_708 = arith.constant 0 : index
    %896 = vector.load %arg15[%c32_707, %c0_708] : memref<72x512xf32, #tpu.memory_space<vmem>>, vector<8x128xf32>
    tpu.vector_store %arg15[%c32_707, %c0_708], %874 {strides = array<i32>} : memref<72x512xf32, #tpu.memory_space<vmem>>, vector<8x128xf32>,
    %c127_i32_709 = arith.constant 127 : i32
    %897 = tpu.dynamic_rotate %874 by %c127_i32_709 dim 1 : vector<8x128xf32>, i32 -> vector<8x128xf32>
    %c5_710 = arith.constant 5 : index
    %c0_711 = arith.constant 0 : index
    %898 = vector.load %arg5[%c5_710, %c0_711] : memref<9x128xf32, #tpu.memory_space<vmem>>, vector<1x128xf32>
    %899 = vector.broadcast %898 : vector<1x128xf32> to vector<8x128xf32>
    %900 = arith.mulf %897, %899 : vector<8x128xf32>
    %c40_712 = arith.constant 40 : index
    %c0_713 = arith.constant 0 : index
    %901 = vector.load %arg15[%c40_712, %c0_713] : memref<72x512xf32, #tpu.memory_space<vmem>>, vector<8x128xf32>
    tpu.vector_store %arg15[%c40_712, %c0_713], %900 {strides = array<i32>} : memref<72x512xf32, #tpu.memory_space<vmem>>, vector<8x128xf32>,
    %c125_i32_714 = arith.constant 125 : i32
    %902 = tpu.dynamic_rotate %874 by %c125_i32_714 dim 1 : vector<8x128xf32>, i32 -> vector<8x128xf32>
    %c6_715 = arith.constant 6 : index
    %c0_716 = arith.constant 0 : index
    %903 = vector.load %arg5[%c6_715, %c0_716] : memref<9x128xf32, #tpu.memory_space<vmem>>, vector<1x128xf32>
    %904 = vector.broadcast %903 : vector<1x128xf32> to vector<8x128xf32>
    %905 = arith.mulf %902, %904 : vector<8x128xf32>
    %c48_717 = arith.constant 48 : index
    %c0_718 = arith.constant 0 : index
    %906 = vector.load %arg15[%c48_717, %c0_718] : memref<72x512xf32, #tpu.memory_space<vmem>>, vector<8x128xf32>
    tpu.vector_store %arg15[%c48_717, %c0_718], %905 {strides = array<i32>} : memref<72x512xf32, #tpu.memory_space<vmem>>, vector<8x128xf32>,
    %c124_i32_719 = arith.constant 124 : i32
    %907 = tpu.dynamic_rotate %874 by %c124_i32_719 dim 1 : vector<8x128xf32>, i32 -> vector<8x128xf32>
    %c7_720 = arith.constant 7 : index
    %c0_721 = arith.constant 0 : index
    %908 = vector.load %arg5[%c7_720, %c0_721] : memref<9x128xf32, #tpu.memory_space<vmem>>, vector<1x128xf32>
    %909 = vector.broadcast %908 : vector<1x128xf32> to vector<8x128xf32>
    %910 = arith.mulf %907, %909 : vector<8x128xf32>
    %c56_722 = arith.constant 56 : index
    %c0_723 = arith.constant 0 : index
    %911 = vector.load %arg15[%c56_722, %c0_723] : memref<72x512xf32, #tpu.memory_space<vmem>>, vector<8x128xf32>
    tpu.vector_store %arg15[%c56_722, %c0_723], %910 {strides = array<i32>} : memref<72x512xf32, #tpu.memory_space<vmem>>, vector<8x128xf32>,
    %c123_i32_724 = arith.constant 123 : i32
    %912 = tpu.dynamic_rotate %874 by %c123_i32_724 dim 1 : vector<8x128xf32>, i32 -> vector<8x128xf32>
    %c8_725 = arith.constant 8 : index
    %c0_726 = arith.constant 0 : index
    %913 = vector.load %arg5[%c8_725, %c0_726] : memref<9x128xf32, #tpu.memory_space<vmem>>, vector<1x128xf32>
    %914 = vector.broadcast %913 : vector<1x128xf32> to vector<8x128xf32>
    %915 = arith.mulf %912, %914 : vector<8x128xf32>
    %c64_727 = arith.constant 64 : index
    %c0_728 = arith.constant 0 : index
    %916 = vector.load %arg15[%c64_727, %c0_728] : memref<72x512xf32, #tpu.memory_space<vmem>>, vector<8x128xf32>
    tpu.vector_store %arg15[%c64_727, %c0_728], %915 {strides = array<i32>} : memref<72x512xf32, #tpu.memory_space<vmem>>, vector<8x128xf32>,
    %c0_729 = arith.constant 0 : index
    %c0_730 = arith.constant 0 : index
    %917 = vector.load %arg15[%c0_729, %c0_730] : memref<72x512xf32, #tpu.memory_space<vmem>>, vector<72x128xf32>
    %918 = arith.truncf %917 : vector<72x128xf32> to vector<72x128xbf16>
    %cst_731 = arith.constant dense<0.000000e+00> : vector<8x128xf32>
    %919 = tpu.matmul %875, %918, %cst_731 {dimension_numbers = #tpu.dot_dimension_numbers<[1], [0], [0], [1], [0, 0, 1, 1], [], []>} : vector<8x72xbf16>, vector<72x128xbf16>, vector<8x128xf32> -> vector<8x128xf32>
    %920 = vector.extract_strided_slice %0 {offsets = [0, 27], sizes = [8, 1], strides = [1, 1]} : vector<8x33xf32> to vector<8x1xf32>
    %921 = vector.broadcast %920 : vector<8x1xf32> to vector<8x128xf32>
    %922 = arith.addf %919, %921 : vector<8x128xf32>
    %cst_732 = arith.constant 0.000000e+00 : f32
    %923 = vector.broadcast %cst_732 : f32 to vector<8x128xf32>
    %924 = arith.cmpf oge, %922, %923 : vector<8x128xf32>
    %cst_733 = arith.constant 0.00999999977 : f32
    %925 = vector.broadcast %cst_733 : f32 to vector<8x128xf32>
    %926 = arith.mulf %925, %922 : vector<8x128xf32>
    %927 = arith.select %924, %922, %926 : vector<8x128xi1>, vector<8x128xf32>
    %c0_734 = arith.constant 0 : index
    %c0_735 = arith.constant 0 : index
    %928 = vector.load %arg13[%c0_734, %c0_735] : memref<128x512xf32, #tpu.memory_space<vmem>>, vector<128x512xf32>
    %cst_736 = arith.constant dense<0.000000e+00> : vector<8x512xf32>
    %929 = tpu.matmul %927, %928, %cst_736 {dimension_numbers = #tpu.dot_dimension_numbers<[1], [0], [0], [1], [0, 0, 1, 1], [], []>} : vector<8x128xf32>, vector<128x512xf32>, vector<8x512xf32> -> vector<8x512xf32>
    %c0_737 = arith.constant 0 : index
    %c0_738 = arith.constant 0 : index
    %930 = vector.load %arg16[%c0_737, %c0_738] : memref<24x512xf32, #tpu.memory_space<vmem>>, vector<8x512xf32>
    tpu.vector_store %arg16[%c0_737, %c0_738], %929 {strides = array<i32>} : memref<24x512xf32, #tpu.memory_space<vmem>>, vector<8x512xf32>,
    %c8_739 = arith.constant 8 : index
    %c0_740 = arith.constant 0 : index
    %931 = vector.load %arg16[%c8_739, %c0_740] : memref<24x512xf32, #tpu.memory_space<vmem>>, vector<8x512xf32>
    tpu.vector_store %arg16[%c8_739, %c0_740], %200 {strides = array<i32>} : memref<24x512xf32, #tpu.memory_space<vmem>>, vector<8x512xf32>,
    %c0_741 = arith.constant 0 : index
    %c0_742 = arith.constant 0 : index
    %932 = vector.load %arg16[%c0_741, %c0_742] : memref<24x512xf32, #tpu.memory_space<vmem>>, vector<16x512xf32>
    %c0_743 = arith.constant 0 : index
    %c3584 = arith.constant 3584 : index
    %933 = vector.load %arg2[%c0_743, %c3584] : memref<8x4224xbf16, #tpu.memory_space<vmem>>, vector<8x16xbf16>
    %934 = arith.truncf %932 : vector<16x512xf32> to vector<16x512xbf16>
    %cst_744 = arith.constant dense<0.000000e+00> : vector<8x512xf32>
    %935 = tpu.matmul %933, %934, %cst_744 {dimension_numbers = #tpu.dot_dimension_numbers<[1], [0], [0], [1], [0, 0, 1, 1], [], []>} : vector<8x16xbf16>, vector<16x512xbf16>, vector<8x512xf32> -> vector<8x512xf32>
    %936 = vector.extract_strided_slice %0 {offsets = [0, 28], sizes = [8, 1], strides = [1, 1]} : vector<8x33xf32> to vector<8x1xf32>
    %937 = vector.broadcast %936 : vector<8x1xf32> to vector<8x512xf32>
    %938 = arith.addf %935, %937 : vector<8x512xf32>
    %c0_745 = arith.constant 0 : index
    %c3712 = arith.constant 3712 : index
    %939 = vector.load %arg2[%c0_745, %c3712] : memref<8x4224xbf16, #tpu.memory_space<vmem>>, vector<8x72xbf16>
    %c17_i32_746 = arith.constant 17 : i32
    %940 = tpu.dynamic_rotate %938 by %c17_i32_746 dim 1 : vector<8x512xf32>, i32 -> vector<8x512xf32>
    %c0_747 = arith.constant 0 : index
    %c0_748 = arith.constant 0 : index
    %941 = vector.load %arg4[%c0_747, %c0_748] : memref<9x512xf32, #tpu.memory_space<vmem>>, vector<1x512xf32>
    %942 = vector.broadcast %941 : vector<1x512xf32> to vector<8x512xf32>
    %943 = arith.mulf %940, %942 : vector<8x512xf32>
    %c0_749 = arith.constant 0 : index
    %c0_750 = arith.constant 0 : index
    %944 = vector.load %arg15[%c0_749, %c0_750] : memref<72x512xf32, #tpu.memory_space<vmem>>, vector<8x512xf32>
    tpu.vector_store %arg15[%c0_749, %c0_750], %943 {strides = array<i32>} : memref<72x512xf32, #tpu.memory_space<vmem>>, vector<8x512xf32>,
    %c16_i32_751 = arith.constant 16 : i32
    %945 = tpu.dynamic_rotate %938 by %c16_i32_751 dim 1 : vector<8x512xf32>, i32 -> vector<8x512xf32>
    %c1_752 = arith.constant 1 : index
    %c0_753 = arith.constant 0 : index
    %946 = vector.load %arg4[%c1_752, %c0_753] : memref<9x512xf32, #tpu.memory_space<vmem>>, vector<1x512xf32>
    %947 = vector.broadcast %946 : vector<1x512xf32> to vector<8x512xf32>
    %948 = arith.mulf %945, %947 : vector<8x512xf32>
    %c8_754 = arith.constant 8 : index
    %c0_755 = arith.constant 0 : index
    %949 = vector.load %arg15[%c8_754, %c0_755] : memref<72x512xf32, #tpu.memory_space<vmem>>, vector<8x512xf32>
    tpu.vector_store %arg15[%c8_754, %c0_755], %948 {strides = array<i32>} : memref<72x512xf32, #tpu.memory_space<vmem>>, vector<8x512xf32>,
    %c15_i32_756 = arith.constant 15 : i32
    %950 = tpu.dynamic_rotate %938 by %c15_i32_756 dim 1 : vector<8x512xf32>, i32 -> vector<8x512xf32>
    %c2_757 = arith.constant 2 : index
    %c0_758 = arith.constant 0 : index
    %951 = vector.load %arg4[%c2_757, %c0_758] : memref<9x512xf32, #tpu.memory_space<vmem>>, vector<1x512xf32>
    %952 = vector.broadcast %951 : vector<1x512xf32> to vector<8x512xf32>
    %953 = arith.mulf %950, %952 : vector<8x512xf32>
    %c16_759 = arith.constant 16 : index
    %c0_760 = arith.constant 0 : index
    %954 = vector.load %arg15[%c16_759, %c0_760] : memref<72x512xf32, #tpu.memory_space<vmem>>, vector<8x512xf32>
    tpu.vector_store %arg15[%c16_759, %c0_760], %953 {strides = array<i32>} : memref<72x512xf32, #tpu.memory_space<vmem>>, vector<8x512xf32>,
    %c1_i32_761 = arith.constant 1 : i32
    %955 = tpu.dynamic_rotate %938 by %c1_i32_761 dim 1 : vector<8x512xf32>, i32 -> vector<8x512xf32>
    %c3_762 = arith.constant 3 : index
    %c0_763 = arith.constant 0 : index
    %956 = vector.load %arg4[%c3_762, %c0_763] : memref<9x512xf32, #tpu.memory_space<vmem>>, vector<1x512xf32>
    %957 = vector.broadcast %956 : vector<1x512xf32> to vector<8x512xf32>
    %958 = arith.mulf %955, %957 : vector<8x512xf32>
    %c24_764 = arith.constant 24 : index
    %c0_765 = arith.constant 0 : index
    %959 = vector.load %arg15[%c24_764, %c0_765] : memref<72x512xf32, #tpu.memory_space<vmem>>, vector<8x512xf32>
    tpu.vector_store %arg15[%c24_764, %c0_765], %958 {strides = array<i32>} : memref<72x512xf32, #tpu.memory_space<vmem>>, vector<8x512xf32>,
    %c32_766 = arith.constant 32 : index
    %c0_767 = arith.constant 0 : index
    %960 = vector.load %arg15[%c32_766, %c0_767] : memref<72x512xf32, #tpu.memory_space<vmem>>, vector<8x512xf32>
    tpu.vector_store %arg15[%c32_766, %c0_767], %938 {strides = array<i32>} : memref<72x512xf32, #tpu.memory_space<vmem>>, vector<8x512xf32>,
    %c511_i32_768 = arith.constant 511 : i32
    %961 = tpu.dynamic_rotate %938 by %c511_i32_768 dim 1 : vector<8x512xf32>, i32 -> vector<8x512xf32>
    %c5_769 = arith.constant 5 : index
    %c0_770 = arith.constant 0 : index
    %962 = vector.load %arg4[%c5_769, %c0_770] : memref<9x512xf32, #tpu.memory_space<vmem>>, vector<1x512xf32>
    %963 = vector.broadcast %962 : vector<1x512xf32> to vector<8x512xf32>
    %964 = arith.mulf %961, %963 : vector<8x512xf32>
    %c40_771 = arith.constant 40 : index
    %c0_772 = arith.constant 0 : index
    %965 = vector.load %arg15[%c40_771, %c0_772] : memref<72x512xf32, #tpu.memory_space<vmem>>, vector<8x512xf32>
    tpu.vector_store %arg15[%c40_771, %c0_772], %964 {strides = array<i32>} : memref<72x512xf32, #tpu.memory_space<vmem>>, vector<8x512xf32>,
    %c497_i32_773 = arith.constant 497 : i32
    %966 = tpu.dynamic_rotate %938 by %c497_i32_773 dim 1 : vector<8x512xf32>, i32 -> vector<8x512xf32>
    %c6_774 = arith.constant 6 : index
    %c0_775 = arith.constant 0 : index
    %967 = vector.load %arg4[%c6_774, %c0_775] : memref<9x512xf32, #tpu.memory_space<vmem>>, vector<1x512xf32>
    %968 = vector.broadcast %967 : vector<1x512xf32> to vector<8x512xf32>
    %969 = arith.mulf %966, %968 : vector<8x512xf32>
    %c48_776 = arith.constant 48 : index
    %c0_777 = arith.constant 0 : index
    %970 = vector.load %arg15[%c48_776, %c0_777] : memref<72x512xf32, #tpu.memory_space<vmem>>, vector<8x512xf32>
    tpu.vector_store %arg15[%c48_776, %c0_777], %969 {strides = array<i32>} : memref<72x512xf32, #tpu.memory_space<vmem>>, vector<8x512xf32>,
    %c496_i32_778 = arith.constant 496 : i32
    %971 = tpu.dynamic_rotate %938 by %c496_i32_778 dim 1 : vector<8x512xf32>, i32 -> vector<8x512xf32>
    %c7_779 = arith.constant 7 : index
    %c0_780 = arith.constant 0 : index
    %972 = vector.load %arg4[%c7_779, %c0_780] : memref<9x512xf32, #tpu.memory_space<vmem>>, vector<1x512xf32>
    %973 = vector.broadcast %972 : vector<1x512xf32> to vector<8x512xf32>
    %974 = arith.mulf %971, %973 : vector<8x512xf32>
    %c56_781 = arith.constant 56 : index
    %c0_782 = arith.constant 0 : index
    %975 = vector.load %arg15[%c56_781, %c0_782] : memref<72x512xf32, #tpu.memory_space<vmem>>, vector<8x512xf32>
    tpu.vector_store %arg15[%c56_781, %c0_782], %974 {strides = array<i32>} : memref<72x512xf32, #tpu.memory_space<vmem>>, vector<8x512xf32>,
    %c495_i32_783 = arith.constant 495 : i32
    %976 = tpu.dynamic_rotate %938 by %c495_i32_783 dim 1 : vector<8x512xf32>, i32 -> vector<8x512xf32>
    %c8_784 = arith.constant 8 : index
    %c0_785 = arith.constant 0 : index
    %977 = vector.load %arg4[%c8_784, %c0_785] : memref<9x512xf32, #tpu.memory_space<vmem>>, vector<1x512xf32>
    %978 = vector.broadcast %977 : vector<1x512xf32> to vector<8x512xf32>
    %979 = arith.mulf %976, %978 : vector<8x512xf32>
    %c64_786 = arith.constant 64 : index
    %c0_787 = arith.constant 0 : index
    %980 = vector.load %arg15[%c64_786, %c0_787] : memref<72x512xf32, #tpu.memory_space<vmem>>, vector<8x512xf32>
    tpu.vector_store %arg15[%c64_786, %c0_787], %979 {strides = array<i32>} : memref<72x512xf32, #tpu.memory_space<vmem>>, vector<8x512xf32>,
    %c0_788 = arith.constant 0 : index
    %c0_789 = arith.constant 0 : index
    %981 = vector.load %arg15[%c0_788, %c0_789] : memref<72x512xf32, #tpu.memory_space<vmem>>, vector<72x512xf32>
    %982 = arith.truncf %981 : vector<72x512xf32> to vector<72x512xbf16>
    %cst_790 = arith.constant dense<0.000000e+00> : vector<8x512xf32>
    %983 = tpu.matmul %939, %982, %cst_790 {dimension_numbers = #tpu.dot_dimension_numbers<[1], [0], [0], [1], [0, 0, 1, 1], [], []>} : vector<8x72xbf16>, vector<72x512xbf16>, vector<8x512xf32> -> vector<8x512xf32>
    %984 = vector.extract_strided_slice %0 {offsets = [0, 29], sizes = [8, 1], strides = [1, 1]} : vector<8x33xf32> to vector<8x1xf32>
    %985 = vector.broadcast %984 : vector<8x1xf32> to vector<8x512xf32>
    %986 = arith.addf %983, %985 : vector<8x512xf32>
    %cst_791 = arith.constant 0.000000e+00 : f32
    %987 = vector.broadcast %cst_791 : f32 to vector<8x512xf32>
    %988 = arith.cmpf oge, %986, %987 : vector<8x512xf32>
    %cst_792 = arith.constant 0.00999999977 : f32
    %989 = vector.broadcast %cst_792 : f32 to vector<8x512xf32>
    %990 = arith.mulf %989, %986 : vector<8x512xf32>
    %991 = arith.select %988, %986, %990 : vector<8x512xi1>, vector<8x512xf32>
    %c16_793 = arith.constant 16 : index
    %c0_794 = arith.constant 0 : index
    %992 = vector.load %arg16[%c16_793, %c0_794] : memref<24x512xf32, #tpu.memory_space<vmem>>, vector<8x512xf32>
    tpu.vector_store %arg16[%c16_793, %c0_794], %991 {strides = array<i32>} : memref<24x512xf32, #tpu.memory_space<vmem>>, vector<8x512xf32>,
    %c0_795 = arith.constant 0 : index
    %c0_796 = arith.constant 0 : index
    %993 = vector.load %arg16[%c0_795, %c0_796] : memref<24x512xf32, #tpu.memory_space<vmem>>, vector<24x512xf32>
    %c0_797 = arith.constant 0 : index
    %c3840 = arith.constant 3840 : index
    %994 = vector.load %arg2[%c0_797, %c3840] : memref<8x4224xbf16, #tpu.memory_space<vmem>>, vector<8x24xbf16>
    %995 = arith.truncf %993 : vector<24x512xf32> to vector<24x512xbf16>
    %cst_798 = arith.constant dense<0.000000e+00> : vector<8x512xf32>
    %996 = tpu.matmul %994, %995, %cst_798 {dimension_numbers = #tpu.dot_dimension_numbers<[1], [0], [0], [1], [0, 0, 1, 1], [], []>} : vector<8x24xbf16>, vector<24x512xbf16>, vector<8x512xf32> -> vector<8x512xf32>
    %997 = vector.extract_strided_slice %0 {offsets = [0, 30], sizes = [8, 1], strides = [1, 1]} : vector<8x33xf32> to vector<8x1xf32>
    %998 = vector.broadcast %997 : vector<8x1xf32> to vector<8x512xf32>
    %999 = arith.addf %996, %998 : vector<8x512xf32>
    %c0_799 = arith.constant 0 : index
    %c3968 = arith.constant 3968 : index
    %1000 = vector.load %arg2[%c0_799, %c3968] : memref<8x4224xbf16, #tpu.memory_space<vmem>>, vector<8x72xbf16>
    %c17_i32_800 = arith.constant 17 : i32
    %1001 = tpu.dynamic_rotate %999 by %c17_i32_800 dim 1 : vector<8x512xf32>, i32 -> vector<8x512xf32>
    %c0_801 = arith.constant 0 : index
    %c0_802 = arith.constant 0 : index
    %1002 = vector.load %arg4[%c0_801, %c0_802] : memref<9x512xf32, #tpu.memory_space<vmem>>, vector<1x512xf32>
    %1003 = vector.broadcast %1002 : vector<1x512xf32> to vector<8x512xf32>
    %1004 = arith.mulf %1001, %1003 : vector<8x512xf32>
    %c0_803 = arith.constant 0 : index
    %c0_804 = arith.constant 0 : index
    %1005 = vector.load %arg15[%c0_803, %c0_804] : memref<72x512xf32, #tpu.memory_space<vmem>>, vector<8x512xf32>
    tpu.vector_store %arg15[%c0_803, %c0_804], %1004 {strides = array<i32>} : memref<72x512xf32, #tpu.memory_space<vmem>>, vector<8x512xf32>,
    %c16_i32_805 = arith.constant 16 : i32
    %1006 = tpu.dynamic_rotate %999 by %c16_i32_805 dim 1 : vector<8x512xf32>, i32 -> vector<8x512xf32>
    %c1_806 = arith.constant 1 : index
    %c0_807 = arith.constant 0 : index
    %1007 = vector.load %arg4[%c1_806, %c0_807] : memref<9x512xf32, #tpu.memory_space<vmem>>, vector<1x512xf32>
    %1008 = vector.broadcast %1007 : vector<1x512xf32> to vector<8x512xf32>
    %1009 = arith.mulf %1006, %1008 : vector<8x512xf32>
    %c8_808 = arith.constant 8 : index
    %c0_809 = arith.constant 0 : index
    %1010 = vector.load %arg15[%c8_808, %c0_809] : memref<72x512xf32, #tpu.memory_space<vmem>>, vector<8x512xf32>
    tpu.vector_store %arg15[%c8_808, %c0_809], %1009 {strides = array<i32>} : memref<72x512xf32, #tpu.memory_space<vmem>>, vector<8x512xf32>,
    %c15_i32_810 = arith.constant 15 : i32
    %1011 = tpu.dynamic_rotate %999 by %c15_i32_810 dim 1 : vector<8x512xf32>, i32 -> vector<8x512xf32>
    %c2_811 = arith.constant 2 : index
    %c0_812 = arith.constant 0 : index
    %1012 = vector.load %arg4[%c2_811, %c0_812] : memref<9x512xf32, #tpu.memory_space<vmem>>, vector<1x512xf32>
    %1013 = vector.broadcast %1012 : vector<1x512xf32> to vector<8x512xf32>
    %1014 = arith.mulf %1011, %1013 : vector<8x512xf32>
    %c16_813 = arith.constant 16 : index
    %c0_814 = arith.constant 0 : index
    %1015 = vector.load %arg15[%c16_813, %c0_814] : memref<72x512xf32, #tpu.memory_space<vmem>>, vector<8x512xf32>
    tpu.vector_store %arg15[%c16_813, %c0_814], %1014 {strides = array<i32>} : memref<72x512xf32, #tpu.memory_space<vmem>>, vector<8x512xf32>,
    %c1_i32_815 = arith.constant 1 : i32
    %1016 = tpu.dynamic_rotate %999 by %c1_i32_815 dim 1 : vector<8x512xf32>, i32 -> vector<8x512xf32>
    %c3_816 = arith.constant 3 : index
    %c0_817 = arith.constant 0 : index
    %1017 = vector.load %arg4[%c3_816, %c0_817] : memref<9x512xf32, #tpu.memory_space<vmem>>, vector<1x512xf32>
    %1018 = vector.broadcast %1017 : vector<1x512xf32> to vector<8x512xf32>
    %1019 = arith.mulf %1016, %1018 : vector<8x512xf32>
    %c24_818 = arith.constant 24 : index
    %c0_819 = arith.constant 0 : index
    %1020 = vector.load %arg15[%c24_818, %c0_819] : memref<72x512xf32, #tpu.memory_space<vmem>>, vector<8x512xf32>
    tpu.vector_store %arg15[%c24_818, %c0_819], %1019 {strides = array<i32>} : memref<72x512xf32, #tpu.memory_space<vmem>>, vector<8x512xf32>,
    %c32_820 = arith.constant 32 : index
    %c0_821 = arith.constant 0 : index
    %1021 = vector.load %arg15[%c32_820, %c0_821] : memref<72x512xf32, #tpu.memory_space<vmem>>, vector<8x512xf32>
    tpu.vector_store %arg15[%c32_820, %c0_821], %999 {strides = array<i32>} : memref<72x512xf32, #tpu.memory_space<vmem>>, vector<8x512xf32>,
    %c511_i32_822 = arith.constant 511 : i32
    %1022 = tpu.dynamic_rotate %999 by %c511_i32_822 dim 1 : vector<8x512xf32>, i32 -> vector<8x512xf32>
    %c5_823 = arith.constant 5 : index
    %c0_824 = arith.constant 0 : index
    %1023 = vector.load %arg4[%c5_823, %c0_824] : memref<9x512xf32, #tpu.memory_space<vmem>>, vector<1x512xf32>
    %1024 = vector.broadcast %1023 : vector<1x512xf32> to vector<8x512xf32>
    %1025 = arith.mulf %1022, %1024 : vector<8x512xf32>
    %c40_825 = arith.constant 40 : index
    %c0_826 = arith.constant 0 : index
    %1026 = vector.load %arg15[%c40_825, %c0_826] : memref<72x512xf32, #tpu.memory_space<vmem>>, vector<8x512xf32>
    tpu.vector_store %arg15[%c40_825, %c0_826], %1025 {strides = array<i32>} : memref<72x512xf32, #tpu.memory_space<vmem>>, vector<8x512xf32>,
    %c497_i32_827 = arith.constant 497 : i32
    %1027 = tpu.dynamic_rotate %999 by %c497_i32_827 dim 1 : vector<8x512xf32>, i32 -> vector<8x512xf32>
    %c6_828 = arith.constant 6 : index
    %c0_829 = arith.constant 0 : index
    %1028 = vector.load %arg4[%c6_828, %c0_829] : memref<9x512xf32, #tpu.memory_space<vmem>>, vector<1x512xf32>
    %1029 = vector.broadcast %1028 : vector<1x512xf32> to vector<8x512xf32>
    %1030 = arith.mulf %1027, %1029 : vector<8x512xf32>
    %c48_830 = arith.constant 48 : index
    %c0_831 = arith.constant 0 : index
    %1031 = vector.load %arg15[%c48_830, %c0_831] : memref<72x512xf32, #tpu.memory_space<vmem>>, vector<8x512xf32>
    tpu.vector_store %arg15[%c48_830, %c0_831], %1030 {strides = array<i32>} : memref<72x512xf32, #tpu.memory_space<vmem>>, vector<8x512xf32>,
    %c496_i32_832 = arith.constant 496 : i32
    %1032 = tpu.dynamic_rotate %999 by %c496_i32_832 dim 1 : vector<8x512xf32>, i32 -> vector<8x512xf32>
    %c7_833 = arith.constant 7 : index
    %c0_834 = arith.constant 0 : index
    %1033 = vector.load %arg4[%c7_833, %c0_834] : memref<9x512xf32, #tpu.memory_space<vmem>>, vector<1x512xf32>
    %1034 = vector.broadcast %1033 : vector<1x512xf32> to vector<8x512xf32>
    %1035 = arith.mulf %1032, %1034 : vector<8x512xf32>
    %c56_835 = arith.constant 56 : index
    %c0_836 = arith.constant 0 : index
    %1036 = vector.load %arg15[%c56_835, %c0_836] : memref<72x512xf32, #tpu.memory_space<vmem>>, vector<8x512xf32>
    tpu.vector_store %arg15[%c56_835, %c0_836], %1035 {strides = array<i32>} : memref<72x512xf32, #tpu.memory_space<vmem>>, vector<8x512xf32>,
    %c495_i32_837 = arith.constant 495 : i32
    %1037 = tpu.dynamic_rotate %999 by %c495_i32_837 dim 1 : vector<8x512xf32>, i32 -> vector<8x512xf32>
    %c8_838 = arith.constant 8 : index
    %c0_839 = arith.constant 0 : index
    %1038 = vector.load %arg4[%c8_838, %c0_839] : memref<9x512xf32, #tpu.memory_space<vmem>>, vector<1x512xf32>
    %1039 = vector.broadcast %1038 : vector<1x512xf32> to vector<8x512xf32>
    %1040 = arith.mulf %1037, %1039 : vector<8x512xf32>
    %c64_840 = arith.constant 64 : index
    %c0_841 = arith.constant 0 : index
    %1041 = vector.load %arg15[%c64_840, %c0_841] : memref<72x512xf32, #tpu.memory_space<vmem>>, vector<8x512xf32>
    tpu.vector_store %arg15[%c64_840, %c0_841], %1040 {strides = array<i32>} : memref<72x512xf32, #tpu.memory_space<vmem>>, vector<8x512xf32>,
    %c0_842 = arith.constant 0 : index
    %c0_843 = arith.constant 0 : index
    %1042 = vector.load %arg15[%c0_842, %c0_843] : memref<72x512xf32, #tpu.memory_space<vmem>>, vector<72x512xf32>
    %1043 = arith.truncf %1042 : vector<72x512xf32> to vector<72x512xbf16>
    %cst_844 = arith.constant dense<0.000000e+00> : vector<8x512xf32>
    %1044 = tpu.matmul %1000, %1043, %cst_844 {dimension_numbers = #tpu.dot_dimension_numbers<[1], [0], [0], [1], [0, 0, 1, 1], [], []>} : vector<8x72xbf16>, vector<72x512xbf16>, vector<8x512xf32> -> vector<8x512xf32>
    %1045 = vector.extract_strided_slice %0 {offsets = [0, 31], sizes = [8, 1], strides = [1, 1]} : vector<8x33xf32> to vector<8x1xf32>
    %1046 = vector.broadcast %1045 : vector<8x1xf32> to vector<8x512xf32>
    %1047 = arith.addf %1044, %1046 : vector<8x512xf32>
    %cst_845 = arith.constant 0.000000e+00 : f32
    %1048 = vector.broadcast %cst_845 : f32 to vector<8x512xf32>
    %1049 = arith.cmpf oge, %1047, %1048 : vector<8x512xf32>
    %cst_846 = arith.constant 0.00999999977 : f32
    %1050 = vector.broadcast %cst_846 : f32 to vector<8x512xf32>
    %1051 = arith.mulf %1050, %1047 : vector<8x512xf32>
    %1052 = arith.select %1049, %1047, %1051 : vector<8x512xi1>, vector<8x512xf32>
    %c0_847 = arith.constant 0 : index
    %c4096 = arith.constant 4096 : index
    %1053 = vector.load %arg2[%c0_847, %c4096] : memref<8x4224xbf16, #tpu.memory_space<vmem>>, vector<8x8xbf16>
    %1054 = arith.truncf %1052 : vector<8x512xf32> to vector<8x512xbf16>
    %cst_848 = arith.constant dense<0.000000e+00> : vector<8x512xf32>
    %1055 = tpu.matmul %1053, %1054, %cst_848 {dimension_numbers = #tpu.dot_dimension_numbers<[1], [0], [0], [1], [0, 0, 1, 1], [], []>} : vector<8x8xbf16>, vector<8x512xbf16>, vector<8x512xf32> -> vector<8x512xf32>
    %1056 = vector.extract_strided_slice %0 {offsets = [0, 32], sizes = [8, 1], strides = [1, 1]} : vector<8x33xf32> to vector<8x1xf32>
    %1057 = vector.broadcast %1056 : vector<8x1xf32> to vector<8x512xf32>
    %1058 = arith.addf %1055, %1057 : vector<8x512xf32>
    %c0_849 = arith.constant 0 : index
    %c0_850 = arith.constant 0 : index
    %1059 = vector.load %arg14[%c0_849, %c0_850] : memref<8x512xf32, #tpu.memory_space<vmem>>, vector<8x512xf32>
    tpu.vector_store %arg14[%c0_849, %c0_850], %1058 {strides = array<i32>} : memref<8x512xf32, #tpu.memory_space<vmem>>, vector<8x512xf32>,
    return
  }
  func.func @transform_0(%arg0: i32) -> (i32, i32) {
    %c0_i32 = arith.constant 0 : i32
    %c0_i32_0 = arith.constant 0 : i32
    %c0_i32_1 = arith.constant 0 : i32
    return %c0_i32, %c0_i32_0 : i32, i32
  }
  func.func @transform_1(%arg0: i32) -> (i32, i32) {
    %c0_i32 = arith.constant 0 : i32
    %c0_i32_0 = arith.constant 0 : i32
    %c0_i32_1 = arith.constant 0 : i32
    return %c0_i32, %c0_i32_0 : i32, i32
  }
  func.func @transform_2(%arg0: i32) -> (i32, i32) {
    %c0_i32 = arith.constant 0 : i32
    %c0_i32_0 = arith.constant 0 : i32
    %c0_i32_1 = arith.constant 0 : i32
    return %c0_i32, %c0_i32_0 : i32, i32
  }
  func.func @transform_3(%arg0: i32) -> (i32, i32) {
    %c0_i32 = arith.constant 0 : i32
    %c0_i32_0 = arith.constant 0 : i32
    %c0_i32_1 = arith.constant 0 : i32
    return %c0_i32, %c0_i32_0 : i32, i32
  }
  func.func @transform_4(%arg0: i32) -> (i32, i32) {
    %c0_i32 = arith.constant 0 : i32
    %c0_i32_0 = arith.constant 0 : i32
    %c0_i32_1 = arith.constant 0 : i32
    return %c0_i32, %c0_i32_0 : i32, i32
  }
  func.func @transform_5(%arg0: i32) -> (i32, i32) {
    %c0_i32 = arith.constant 0 : i32
    %c0_i32_0 = arith.constant 0 : i32
    %c0_i32_1 = arith.constant 0 : i32
    return %c0_i32, %c0_i32_0 : i32, i32
  }
  func.func @transform_6(%arg0: i32) -> (i32, i32) {
    %c0_i32 = arith.constant 0 : i32
    %c0_i32_0 = arith.constant 0 : i32
    %c0_i32_1 = arith.constant 0 : i32
    return %c0_i32, %c0_i32_0 : i32, i32
  }
  func.func @transform_7(%arg0: i32) -> (i32, i32) {
    %c0_i32 = arith.constant 0 : i32
    %c0_i32_0 = arith.constant 0 : i32
    %c0_i32_1 = arith.constant 0 : i32
    return %c0_i32, %c0_i32_0 : i32, i32
  }
  func.func @transform_8(%arg0: i32) -> (i32, i32) {
    %c0_i32 = arith.constant 0 : i32
    %c0_i32_0 = arith.constant 0 : i32
    %c0_i32_1 = arith.constant 0 : i32
    return %c0_i32, %c0_i32_0 : i32, i32
  }
  func.func @transform_9(%arg0: i32) -> (i32, i32) {
    %c0_i32 = arith.constant 0 : i32
    %c0_i32_0 = arith.constant 0 : i32
    %c0_i32_1 = arith.constant 0 : i32
    return %c0_i32, %c0_i32_0 : i32, i32
  }
  func.func @transform_10(%arg0: i32) -> (i32, i32) {
    %c0_i32 = arith.constant 0 : i32
    %c0_i32_0 = arith.constant 0 : i32
    %c0_i32_1 = arith.constant 0 : i32
    return %c0_i32, %c0_i32_0 : i32, i32
  }
  func.func @transform_11(%arg0: i32) -> (i32, i32) {
    %c0_i32 = arith.constant 0 : i32
    %c0_i32_0 = arith.constant 0 : i32
    %c0_i32_1 = arith.constant 0 : i32
    return %c0_i32, %c0_i32_0 : i32, i32
  }
  func.func @transform_12(%arg0: i32) -> (i32, i32) {
    %c0_i32 = arith.constant 0 : i32
    %c0_i32_0 = arith.constant 0 : i32
    %c0_i32_1 = arith.constant 0 : i32
    return %c0_i32, %c0_i32_0 : i32, i32
  }
  func.func @transform_13(%arg0: i32) -> (i32, i32) {
    %c0_i32 = arith.constant 0 : i32
    %c0_i32_0 = arith.constant 0 : i32
    %c0_i32_1 = arith.constant 0 : i32
    return %c0_i32, %c0_i32_0 : i32, i32
  }
}

</mosaic_0001>

<bundles_post_ra>
// kernel: fwd.1
= control target key start
LH: loop header
LB: loop body
LE: loop exit
PB: predicated region body
PF: predicated region fallthrough
CT: control target
= control target key end

     0   :  { %18 = vsyncpa [#allocation5], 0  ;;  %s6711_s0 = inlined_call_operand.vmem [shape: f32[8,512], index: 0, kind: input, shape index: {}]   ;;  %s6712_s1 = inlined_call_operand.hbm [shape: bf16[8,4224], index: 1, kind: input, shape index: {}]   ;;  %s6713_s2 = inlined_call_operand.vmem [shape: f32[8,33], index: 2, kind: input, shape index: {}]   ;;  %s6714_s3 = inlined_call_operand.vmem [shape: f32[9,512], index: 3, kind: input, shape index: {}]   ;;  %s6715_s4 = inlined_call_operand.hbm [shape: f32[9,128], index: 4, kind: input, shape index: {}]   ;;  %s6716_s5 = inlined_call_operand.hbm [shape: f32[9,128], index: 5, kind: input, shape index: {}]   ;;  %s6717_s6 = inlined_call_operand.hbm [shape: f32[9,128], index: 6, kind: input, shape index: {}]   ;;  %s6718_s7 = inlined_call_operand.hbm [shape: f32[512,128], index: 7, kind: input, shape index: {}]   ;;  %s6719_s8 = inlined_call_operand.hbm [shape: f32[128,128], index: 8, kind: input, shape index: {}]   ;;  %s6720_s9 = inlined_call_operand.hbm [shape: f32[128,128], index: 9, kind: input, shape index: {}]   ;;  %s6721_s10 = inlined_call_operand.hbm [shape: f32[128,128], index: 10, kind: input, shape index: {}]   ;;  %s6722_s11 = inlined_call_operand.hbm [shape: f32[128,128], index: 11, kind: input, shape index: {}]   ;;  %s6723_s12 = inlined_call_operand.hbm [shape: f32[128,512], index: 12, kind: input, shape index: {}]   ;;  %s6724_s13 = inlined_call_operand.vmem [shape: f32[8,512], index: 13, kind: output, shape index: {}]  }
   0x1   :  { %19 = vsyncpa [#allocation7], 0 }
   0x2   :  { %20 = vsyncpa [#allocation10], 0 }
   0x3   :  { %21 = vsyncpa [#allocation13], 0 }
   0x4   :  { %22 = vsyncpa [#allocation16], 0  ;;  %s45_s27 = sshll.u32 %s6715_s4, 4  ;;  %s46_s27 = int_to_ptr.hbm [resolvable:$true] %s45_s27 }
   0x5   :  { %23 = vsyncpa [#allocation19], 0  ;;  %s4933_s28 = smov [#allocation6]   ;;  %s71_s15 = sshll.u32 %s6717_s6, 4  ;;  %s72_s15 = int_to_ptr.hbm [resolvable:$true] %s71_s15 }
   0x6   :  { %s47_s29 = sshll.u32 %s4933_s28, 4  ;;  %s4934_s16 = smov 128   ;;  %s48_s29 = int_to_ptr.vmem [resolvable:$true] %s47_s29 }
   0x7   :  { %s4935_s17 = smov 8   ;;  %s4936_s18 = smov [#allocation9]  }
   0x8   :  { %53 = dma.hbm_to_vmem [thread:$0]  %s46_s27, 256, %s48_s29, [#allocation7], %s4934_s16, %s4934_s16, %s4935_s17  }
   0x9   :  { %s73_s19 = sshll.u32 %s4936_s18, 4  ;;  %s97_s21 = sshll.u32 %s6719_s8, 4  ;;  %s74_s19 = int_to_ptr.vmem [resolvable:$true] %s73_s19  ;;  %s98_s21 = int_to_ptr.hbm [resolvable:$true] %s97_s21 }
   0xa   :  { %79 = dma.hbm_to_vmem [thread:$0]  %s72_s15, 256, %s74_s19, [#allocation10], %s4934_s16, %s4934_s16, %s4935_s17  }
   0xb   :  { %s123_s23 = sshll.u32 %s6721_s10, 4  ;;  %s4937_s24 = smov [#allocation12]   ;;  %s124_s23 = int_to_ptr.hbm [resolvable:$true] %s123_s23 }
   0xc   :  { %s99_s25 = sshll.u32 %s4937_s24, 4  ;;  %s4938_s26 = smov [#allocation15]   ;;  %s100_s25 = int_to_ptr.vmem [resolvable:$true] %s99_s25 }
   0xd   :  { %105 = dma.hbm_to_vmem [thread:$0]  %s98_s21, 2048, %s100_s25, [#allocation13], %s4934_s16, %s4934_s16, %s4935_s17  }
   0xe   :  { %s125_s8 = sshll.u32 %s4938_s26, 4  ;;  %s31_s29 = sshll.u32 %s6712_s1, 4  ;;  %s126_s8 = int_to_ptr.vmem [resolvable:$true] %s125_s8  ;;  %s32_s29 = int_to_ptr.hbm [resolvable:$true] %s31_s29 }
   0xf   :  { %131 = dma.hbm_to_vmem [thread:$0]  %s124_s23, 2048, %s126_s8, [#allocation16], %s4934_s16, %s4934_s16, %s4935_s17  }
  0x10   :  { %s58_s14 = sshll.u32 %s6716_s5, 4  ;;  %s4939_s15 = smov [#allocation4]   ;;  %s59_s14 = int_to_ptr.hbm [resolvable:$true] %s58_s14 }
  0x11   :  { %s33_s18 = sshll.u32 %s4939_s15, 4  ;;  %s4940_s19 = smov [#allocation8]   ;;  %s34_s18 = int_to_ptr.vmem [resolvable:$true] %s33_s18 }
  0x12   :  { %36 = dma.hbm_to_vmem [thread:$0]  %s32_s29, 2112, %s34_s18, [#allocation5]  }
  0x13   :  { %s60_s20 = sshll.u32 %s4940_s19, 4  ;;  %s84_s1 = sshll.u32 %s6718_s7, 4  ;;  %s61_s20 = int_to_ptr.vmem [resolvable:$true] %s60_s20  ;;  %s85_s1 = int_to_ptr.hbm [resolvable:$true] %s84_s1 }
  0x14   :  { %66 = dma.hbm_to_vmem [thread:$0]  %s59_s14, 256, %s61_s20, [#allocation7], %s4934_s16, %s4934_s16, %s4935_s17  }
  0x15   :  { %s110_s5 = sshll.u32 %s6720_s9, 4  ;;  %s4941_s23 = smov [#allocation11]   ;;  %s111_s5 = int_to_ptr.hbm [resolvable:$true] %s110_s5 }
  0x16   :  { %s86_s24 = sshll.u32 %s4941_s23, 4  ;;  %s4942_s25 = smov [#allocation14]   ;;  %s87_s24 = int_to_ptr.vmem [resolvable:$true] %s86_s24 }
  0x17   :  { %92 = dma.hbm_to_vmem [thread:$0]  %s85_s1, 8192, %s87_s24, [#allocation10], %s4934_s16, %s4934_s16, %s4935_s17  }
  0x18   :  { %s112_s7 = sshll.u32 %s4942_s25, 4  ;;  %s136_s27 = sshll.u32 %s6722_s11, 4  ;;  %s113_s7 = int_to_ptr.vmem [resolvable:$true] %s112_s7  ;;  %s137_s27 = int_to_ptr.hbm [resolvable:$true] %s136_s27 }
  0x19   :  { %118 = dma.hbm_to_vmem [thread:$0]  %s111_s5, 2048, %s113_s7, [#allocation13], %s4934_s16, %s4934_s16, %s4935_s17  }
  0x1a   :  { %s149_s29 = sshll.u32 %s6723_s12, 4  ;;  %s4943_s10 = smov [#allocation17]   ;;  %s150_s29 = int_to_ptr.hbm [resolvable:$true] %s149_s29 }
  0x1b   :  { %s138_s30 = sshll.u32 %s4943_s10, 4  ;;  %s4944_s14 = smov [#allocation18]   ;;  %s139_s30 = int_to_ptr.vmem [resolvable:$true] %s138_s30 }
  0x1c   :  { %144 = dma.hbm_to_vmem [thread:$0]  %s137_s27, 2048, %s139_s30, [#allocation16], %s4934_s16, %s4934_s16, %s4935_s17  }
  0x1d   :  { %s151_s11 = sshll.u32 %s4944_s14, 4  ;;  %s4945_s15 = smov 512   ;;  %s152_s11 = int_to_ptr.vmem [resolvable:$true] %s151_s11 }
  0x1e   :  { %s4946_s18 = smov 32  }
  0x1f   :  { %157 = dma.hbm_to_vmem [thread:$0]  %s150_s29, 8192, %s152_s11, [#allocation19], %s4945_s15, %s4945_s15, %s4946_s18  }
  0x20   :  { %4921 = dma.done.wait [#allocation5], 2112  }
  0x21   :  { %4922 = vsyncadd [#allocation5], 4294965184 }
  0x22   :  { %4923 = dma.done.wait [#allocation7], 512  }
  0x23   :  { %4924 = vsyncadd [#allocation7], 4294966784 }
  0x24   :  { %4925 = dma.done.wait [#allocation10], 8448  }
  0x25   :  { %4926 = vsyncadd [#allocation10], 4294958848 }
  0x26   :  { %4927 = dma.done.wait [#allocation13], 4096  }
  0x27   :  { %4928 = vsyncadd [#allocation13], 4294963200 }
  0x28   :  { %4929 = dma.done.wait [#allocation16], 4096  }
  0x29   :  { %4930 = vsyncadd [#allocation16], 4294963200 }
  0x2a   :  { %4931 = dma.done.wait [#allocation19], 8192  }
  0x2b   :  { %4932 = vsyncadd [#allocation19], 4294959104  ;;  %v5123_v0 = vld [vmem:[%s6711_s0 + $0x18] sm:$0xff]  ;;  %v5128_v1 = vld [vmem:[%s6711_s0 + $0x10] sm:$0xff]  ;;  %s4947_s21 = smov 111   ;;  %s4948_s1 = smov 113   ;;  %v213_v6 = vlaneseq }
  0x2c   :  { %v5133_v2 = vld [vmem:[%s6711_s0] sm:$0xff]  ;;  %440 = vrot.lane.b32.xlu1 %v5123_v0, %s4947_s21  ;;  %374 = vrot.lane.b32.xlu2 %v5128_v1, %s4948_s1  ;;  %s4949_s6 = smov 112   ;;  %s4950_s22 = smov 127   ;;  %v5162_v3 = vld [vmem:[%s6711_s0 + $0x8] sm:$0xff]  ;;  %vm531_vm1 = vcmask 1043456   ;;  %vm527_vm9 = vcmask 588800  }
  0x2d   :  { %434 = vrot.lane.b32.xlu0 %v5133_v2, %s4947_s21  ;;  %s4951_s24 = smov 15   ;;  %s4952_s25 = smov 1   ;;  %v5206_v7 = vand.u32 127, %v213_v6  ;;  %v5211_v8 = vld [vmem:[%s6714_s3 + $0x20] ss:$8 sm:$0xf] }
  0x2e   :  { %s4953_s0 = smov 17   ;;  %s4954_s7 = smov 16   ;;  %v453_v10 = vperm.slane %v5211_v8, 3  ;;  %v452_v17 = vperm.slane %v5211_v8, 2  ;;  %v450_v56 = vperm.slane %v5211_v8, 0  ;;  %v451_v57 = vperm.slane %v5211_v8, 1 }
  0x2f   :  { %vm442_vm0 = vcmp.lt.s32.totalorder %v5206_v7, 111  ;;  %v5226_v23 = vld [vmem:[%s6714_s3 + $0x6] ss:$8 sm:$0xf]  ;;  %vm378_vm2 = vcmp.lt.s32.totalorder %v5206_v7, 113  ;;  %vm410_vm3 = vcmp.lt.s32.totalorder %v5206_v7, 112 }
  0x30   :  { %v5231_v24 = vld [vmem:[%s6714_s3 + $0x7] ss:$8 sm:$0xf]  ;;  %v388_v26 = vperm.slane %v5226_v23, 2  ;;  %v389_v30 = vperm.slane %v5226_v23, 3  ;;  %vm346_vm4 = vcmp.lt.s32.totalorder %v5206_v7, 127 }
  0x31   :  { %v420_v27 = vperm.slane %v5231_v24, 2  ;;  %v421_v31 = vperm.slane %v5231_v24, 3  ;;  %v5259_v42 = vld [vmem:[%s6714_s3 + $0x5] ss:$8 sm:$0xf]  ;;  %vm278_vm5 = vcmp.lt.s32.totalorder %v5206_v7, 15 }
  0x32   :  { %v356_v45 = vperm.slane %v5259_v42, 2  ;;  %v357_v46 = vperm.slane %v5259_v42, 3  ;;  %v5292_v6 = vld [vmem:[%s6714_s3 + $0x3] ss:$8 sm:$0xf]  ;;  %vm310_vm6 = vcmp.lt.s32.totalorder %v5206_v7, 1 }
  0x33   :  { %vm215_vm7 = vcmp.lt.s32.totalorder %v5206_v7, 17  ;;  %vm246_vm8 = vcmp.lt.s32.totalorder %v5206_v7, 16  ;;  %vm633_vm11 = vcmask 130048   ;;  %s4960_s17 = smov 4   ;;  %s4961_s19 = smov 5   ;;  %v4995_v7 = vmov 32  }
  0x34   :  { %376 = vrot.lane.b32.xlu2 %v5123_v0, %s4948_s1  ;;  %370 = vrot.lane.b32.xlu1 %v5133_v2, %s4948_s1  ;;  %s4962_s20 = smov 123   ;;  %s4963_s4 = smov 125  }
  0x35   :  { %438 = vrot.lane.b32.xlu0 %v5128_v1, %s4947_s21  ;;  %s4964_s5 = smov 124   ;;  %s4965_s23 = smov 3  }
  0x36   :  { %s4971_s26 = smov 2   ;;  %s4972_s8 = smov 126  }
  0x3c   :  { %408 = vrot.lane.b32.xlu2 %v5123_v0, %s4949_s6  ;;  %406 = vrot.lane.b32.xlu1 %v5128_v1, %s4949_s6 }
  0x3d   :  { %402 = vrot.lane.b32.xlu0 %v5133_v2, %s4949_s6 }
  0x44   :  { %344 = vrot.lane.b32.xlu2 %v5123_v0, %s4950_s22  ;;  %342 = vrot.lane.b32.xlu1 %v5128_v1, %s4950_s22 }
  0x45   :  { %338 = vrot.lane.b32.xlu0 %v5133_v2, %s4950_s22 }
  0x4c   :  { %274 = vrot.lane.b32.xlu2 %v5128_v1, %s4951_s24  ;;  %272 = vrot.lane.b32.xlu1 %v5162_v3, %s4951_s24 }
  0x4d   :  { %436 = vrot.lane.b32.xlu0 %v5162_v3, %s4947_s21 }
  0x54   :  { %306 = vrot.lane.b32.xlu2 %v5128_v1, %s4952_s25  ;;  %304 = vrot.lane.b32.xlu1 %v5162_v3, %s4952_s25 }
  0x55   :  { %276 = vrot.lane.b32.xlu0 %v5123_v0, %s4951_s24 }
  0x5c   :  { %209 = vrot.lane.b32.xlu2 %v5128_v1, %s4953_s0  ;;  %207 = vrot.lane.b32.xlu1 %v5162_v3, %s4953_s0 }
  0x5d   :  { %308 = vrot.lane.b32.xlu0 %v5123_v0, %s4952_s25 }
  0x64   :  { %242 = vrot.lane.b32.xlu2 %v5128_v1, %s4954_s7  ;;  %240 = vrot.lane.b32.xlu1 %v5162_v3, %s4954_s7 }
  0x65   :  { %211 = vrot.lane.b32.xlu0 %v5123_v0, %s4953_s0 }
  0x6c   :  { %404 = vrot.lane.b32.xlu2 %v5162_v3, %s4949_s6  ;;  %372 = vrot.lane.b32.xlu1 %v5162_v3, %s4948_s1 }
  0x6d   :  { %244 = vrot.lane.b32.xlu0 %v5123_v0, %s4954_s7 }
  0x74   :  { %302 = vrot.lane.b32.xlu2 %v5133_v2, %s4952_s25  ;;  %270 = vrot.lane.b32.xlu1 %v5133_v2, %s4951_s24 }
  0x75   :  { %340 = vrot.lane.b32.xlu0 %v5162_v3, %s4950_s22 }
  0x7c   :  { %238 = vrot.lane.b32.xlu1 %v5133_v2, %s4954_s7 }
  0x7d   :  { %205 = vrot.lane.b32.xlu0 %v5133_v2, %s4953_s0 }
  0x86   :  { %v5204_v4 = vpop.permute.xlu2 %374 }
  0x8e   :  { %v377_v5 = vpop.permute.xlu2 %376 }
  0x8f   :  { %v379_v28 = vsel %vm378_vm2, %v5204_v4, %v377_v5 }
  0x90   :  { %v396_v37 = vmul.f32 %v388_v26, %v379_v28  ;;  %v321_v26 = vperm.slane %v5292_v6, 3 }
  0x96   :  { %v409_v9 = vpop.permute.xlu2 %408 }
  0x9e   :  { %v441_v11 = vpop.permute.xlu1 %440  ;;  %v345_v19 = vpop.permute.xlu2 %344 }
  0x9f   :  { %v435_v12 = vpop.permute.xlu0 %434 }
  0xa0   :  { %v446_v13 = vsel %vm442_vm0, %v441_v11, %v435_v12 }
  0xa1   :  { %v461_v14 = vmul.f32 %v453_v10, %v446_v13 }
  0xa3   :  { %v521_v15 = vpack.c.bf16 %v461_v14, %v461_v14 }
  0xa5   :  { %v542_v16 = vsel %vm531_vm1, %v521_v15, 0 }
  0xa6   :  { %586 = vmatpush.bf16.msra.mxu3 %v542_v16  ;;  %v5219_v18 = vpop.permute.xlu1 %370  ;;  %v275_v39 = vpop.permute.xlu2 %274 }
  0xa7   :  { %v439_v20 = vpop.permute.xlu0 %438  ;;  %v382_v32 = vsel %vm378_vm2, %v377_v5, %v5219_v18  ;;  %v5287_v5 = vld [vmem:[%s6714_s3 + $0x2] ss:$8 sm:$0xf] }
  0xa8   :  { %v443_v21 = vsel %vm442_vm0, %v439_v20, %v441_v11  ;;  %v397_v40 = vmul.f32 %v389_v30, %v382_v32  ;;  %v288_v10 = vperm.slane %v5287_v5, 2  ;;  %v320_v11 = vperm.slane %v5292_v6, 2 }
  0xa9   :  { %v460_v22 = vmul.f32 %v452_v17, %v443_v21 }
  0xab   :  { %v520_v25 = vpack.c.bf16 %v460_v22, %v460_v22 }
  0xad   :  { %v539_v29 = vsel %vm531_vm1, %v520_v25, 0  ;;  %v289_v25 = vperm.slane %v5287_v5, 3 }
  0xae   :  { %573 = vmatpush.bf16.msra.mxu2 %v539_v29  ;;  %v5246_v33 = vpop.permute.xlu1 %406  ;;  %v307_v54 = vpop.permute.xlu2 %306 }
  0xaf   :  { %v411_v34 = vsel %vm410_vm3, %v5246_v33, %v409_v9  ;;  %v5251_v35 = vpop.permute.xlu0 %402 }
  0xb0   :  { %v414_v36 = vsel %vm410_vm3, %v409_v9, %v5251_v35  ;;  %v428_v38 = vmul.f32 %v420_v27, %v411_v34 }
  0xb1   :  { %v429_v41 = vmul.f32 %v421_v31, %v414_v36  ;;  %v5325_v36 = vld [vmem:[%s6714_s3] ss:$8 sm:$0xf] }
  0xb2   :  { %v516_v43 = vpack.c.bf16 %v428_v38, %v396_v37  ;;  %v5330_v37 = vld [vmem:[%s6714_s3 + $0x1] ss:$8 sm:$0xf] }
  0xb3   :  { %v517_v44 = vpack.c.bf16 %v429_v41, %v397_v40  ;;  %v256_v40 = vperm.slane %v5330_v37, 2 }
  0xb4   :  { %574 = vmatpush.bf16.msra.mxu2 %v516_v43 }
  0xb5   :  { %587 = vmatpush.bf16.msra.mxu3 %v517_v44 }
  0xb6   :  { %v5264_v47 = vpop.permute.xlu1 %342 }
  0xb7   :  { %v347_v48 = vsel %vm346_vm4, %v5264_v47, %v345_v19  ;;  %v5269_v49 = vpop.permute.xlu0 %338 }
  0xb8   :  { %v350_v50 = vsel %vm346_vm4, %v345_v19, %v5269_v49  ;;  %v364_v51 = vmul.f32 %v356_v45, %v347_v48 }
  0xb9   :  { %v365_v52 = vmul.f32 %v357_v46, %v350_v50  ;;  %v5349_v50 = vld [vmem:[%s6713_s2] sm:$0xff] }
  0xba   :  { %v512_v53 = vpack.c.bf16 %v364_v51, %v5128_v1 }
  0xbb   :  { %v513_v55 = vpack.c.bf16 %v365_v52, %v5123_v0  ;;  %v4955_v52 = vmov 0  }
  0xbc   :  { %575 = vmatpush.bf16.msra.mxu2 %v512_v53  ;;  %4553 = vset.pattern.permute.xlu2 %v4955_v52  ;;  %v223_v52 = vperm.slane %v5325_v36, 1 }
  0xbd   :  { %588 = vmatpush.bf16.msra.mxu3 %v513_v55  ;;  %524 = vperm.xlu2 %4553, %v5349_v50   ;;  %v419_v55 = vperm.slane %v5231_v24, 1 }
  0xbe   :  { %v5278_v58 = vpop.permute.xlu1 %272 }
  0xbf   :  { %v437_v59 = vpop.permute.xlu0 %436  ;;  %v280_v13 = vsel %vm278_vm5, %v5278_v58, %v275_v39 }
  0xc0   :  { %v445_v60 = vsel %vm442_vm0, %v435_v12, %v437_v59  ;;  %v444_v61 = vsel %vm442_vm0, %v437_v59, %v439_v20  ;;  %v210_v12 = vpop.permute.xlu2 %209  ;;  %v296_v20 = vmul.f32 %v288_v10, %v280_v13  ;;  %v387_v59 = vperm.slane %v5226_v23, 1 }
  0xc1   :  { %v458_v62 = vmul.f32 %v450_v56, %v445_v60  ;;  %v459_v63 = vmul.f32 %v451_v57, %v444_v61  ;;  %v386_v57 = vperm.slane %v5226_v23, 0  ;;  %v5359_v60 = vld [vmem:[#allocation4] sm:$0xf] }
  0xc3   :  { %v518_v8 = vpack.c.bf16 %v458_v62, %v458_v62  ;;  %v519_v9 = vpack.c.bf16 %v459_v63, %v459_v63  ;;  %v225_v62 = vperm.slane %v5325_v36, 3 }
  0xc5   :  { %v533_v14 = vsel %vm531_vm1, %v518_v8, 0  ;;  %v536_v15 = vsel %vm531_vm1, %v519_v9, 0 }
  0xc6   :  { %547 = vmatpush.bf16.msra.mxu0 %v533_v14  ;;  %560 = vmatpush.bf16.msra.mxu1 %v536_v15  ;;  %v5303_v16 = vpop.permute.xlu1 %304 }
  0xc7   :  { %v312_v17 = vsel %vm310_vm6, %v5303_v16, %v307_v54  ;;  %v5308_v19 = vpop.permute.xlu0 %276 }
  0xc8   :  { %v328_v21 = vmul.f32 %v320_v11, %v312_v17  ;;  %v279_v27 = vsel %vm278_vm5, %v275_v39, %v5308_v19  ;;  %v243_v29 = vpop.permute.xlu2 %242  ;;  %v224_v39 = vperm.slane %v5325_v36, 2 }
  0xc9   :  { %v297_v32 = vmul.f32 %v289_v25, %v279_v27  ;;  %v286_v27 = vperm.slane %v5287_v5, 0 }
  0xca   :  { %v508_v22 = vpack.c.bf16 %v328_v21, %v296_v20  ;;  %v355_v21 = vperm.slane %v5259_v42, 1 }
  0xcc   :  { %576 = vmatpush.bf16.msra.mxu2 %v508_v22 }
  0xce   :  { %v5315_v28 = vpop.permute.xlu1 %207 }
  0xcf   :  { %v5317_v30 = vpop.permute.xlu0 %308  ;;  %v217_v41 = vsel %vm215_vm7, %v5315_v28, %v210_v12 }
  0xd0   :  { %v311_v31 = vsel %vm310_vm6, %v307_v54, %v5317_v30  ;;  %v232_v46 = vmul.f32 %v224_v39, %v217_v41  ;;  %v405_v51 = vpop.permute.xlu2 %404  ;;  %v418_v54 = vperm.slane %v5231_v24, 0  ;;  %v257_v24 = vperm.slane %v5330_v37, 3 }
  0xd1   :  { %v329_v34 = vmul.f32 %v321_v26, %v311_v31  ;;  %v413_v56 = vsel %vm410_vm3, %v5251_v35, %v405_v51  ;;  %v412_v61 = vsel %vm410_vm3, %v405_v51, %v5246_v33  ;;  %v318_v39 = vperm.slane %v5292_v6, 0 }
  0xd2   :  { %v426_v10 = vmul.f32 %v418_v54, %v413_v56 }
  0xd3   :  { %v509_v38 = vpack.c.bf16 %v329_v34, %v297_v32 }
  0xd5   :  { %589 = vmatpush.bf16.msra.mxu3 %v509_v38 }
  0xd6   :  { %v5339_v43 = vpop.permute.xlu1 %240 }
  0xd7   :  { %v248_v44 = vsel %vm246_vm8, %v5339_v43, %v243_v29  ;;  %v5344_v45 = vpop.permute.xlu0 %211 }
  0xd8   :  { %v264_v48 = vmul.f32 %v256_v40, %v248_v44  ;;  %v216_v35 = vsel %vm215_vm7, %v210_v12, %v5344_v45  ;;  %v427_v12 = vmul.f32 %v419_v55, %v412_v61  ;;  %v303_v25 = vpop.permute.xlu2 %302 }
  0xd9   :  { %v233_v14 = vmul.f32 %v225_v62, %v216_v35 }
  0xda   :  { %v504_v53 = vpack.c.bf16 %v264_v48, %v232_v46  ;;  %v254_v46 = vperm.slane %v5330_v37, 0  ;;  %v255_v48 = vperm.slane %v5330_v37, 1 }
  0xdc   :  { %577 = vmatpush.bf16.msra.mxu2 %v504_v53 }
  0xde   :  { %v373_v63 = vpop.permute.xlu1 %372 }
  0xdf   :  { %v380_v23 = vsel %vm378_vm2, %v373_v63, %v5204_v4  ;;  %v381_v8 = vsel %vm378_vm2, %v5219_v18, %v373_v63  ;;  %v245_v9 = vpop.permute.xlu0 %244  ;;  %4400 = vmatmul.msk.bf16.vlgmr.msra.gmra.mxu2 %vm527_vm9, %v5359_v60  ;;  %v354_v18 = vperm.slane %v5259_v42, 0  ;;  %v4956_v63 = vmov 1  }
  0xe0   :  { %v247_v33 = vsel %vm246_vm8, %v243_v29, %v245_v9  ;;  %v394_v11 = vmul.f32 %v386_v57, %v381_v8  ;;  %v395_v13 = vmul.f32 %v387_v59, %v380_v23  ;;  %v287_v29 = vperm.slane %v5287_v5, 1  ;;  %4554 = vset.pattern.permute.xlu0 %v4956_v63  ;;  %v5551_v63 = vld [vmem:[%s6714_s3 + $0x7] ss:$8 sm:$0xf] }
  0xe1   :  { %v265_v15 = vmul.f32 %v257_v24, %v247_v33  ;;  %630 = vperm.xlu0 %4554, %v5349_v50   ;;  %v624_v33 = vld [vmem:[#allocation4 + $0x4] sm:$0xf] }
  0xe2   :  { %v514_v17 = vpack.c.bf16 %v426_v10, %v394_v11  ;;  %v515_v20 = vpack.c.bf16 %v427_v12, %v395_v13 }
  0xe3   :  { %v505_v4 = vpack.c.bf16 %v265_v15, %v233_v14 }
  0xe4   :  { %548 = vmatpush.bf16.msra.mxu0 %v514_v17  ;;  %561 = vmatpush.bf16.msra.mxu1 %v515_v20 }
  0xe5   :  { %590 = vmatpush.bf16.msra.mxu3 %v505_v4 }
  0xe6   :  { %v271_v22 = vpop.permute.xlu1 %270 }
  0xe7   :  { %v341_v26 = vpop.permute.xlu0 %340  ;;  %v281_v31 = vsel %vm278_vm5, %v271_v22, %v5278_v58  ;;  %v282_v32 = vsel %vm278_vm5, %v5308_v19, %v271_v22  ;;  %v319_v58 = vperm.slane %v5292_v6, 1  ;;  %v313_v19 = vsel %vm310_vm6, %v303_v25, %v5303_v16 }
  0xe8   :  { %v348_v34 = vsel %vm346_vm4, %v341_v26, %v5264_v47  ;;  %v349_v42 = vsel %vm346_vm4, %v5269_v49, %v341_v26  ;;  %4401 = vmatmul.msk.bf16.vlgmr.msra.gmra.mxu3 %vm527_vm9, %v5359_v60  ;;  %v314_v47 = vsel %vm310_vm6, %v5317_v30, %v303_v25  ;;  %v294_v41 = vmul.f32 %v286_v27, %v282_v32 }
  0xe9   :  { %v362_v5 = vmul.f32 %v354_v18, %v349_v42  ;;  %v363_v38 = vmul.f32 %v355_v21, %v348_v34  ;;  %v295_v44 = vmul.f32 %v287_v29, %v281_v31  ;;  %v326_v6 = vmul.f32 %v318_v39, %v314_v47 }
  0xea   :  { %v327_v51 = vmul.f32 %v319_v58, %v313_v19  ;;  %v222_v16 = vperm.slane %v5325_v36, 0 }
  0xeb   :  { %v510_v40 = vpack.c.bf16 %v362_v5, %v5133_v2  ;;  %v511_v49 = vpack.c.bf16 %v363_v38, %v5162_v3  ;;  %v506_v56 = vpack.c.bf16 %v326_v6, %v294_v41 }
  0xec   :  { %v507_v57 = vpack.c.bf16 %v327_v51, %v295_v44 }
  0xed   :  { %549 = vmatpush.bf16.msra.mxu0 %v510_v40  ;;  %562 = vmatpush.bf16.msra.mxu1 %v511_v49 }
  0xee   :  { %v239_v53 = vpop.permute.xlu1 %238 }
  0xef   :  { %v249_v30 = vsel %vm246_vm8, %v239_v53, %v5339_v43  ;;  %v250_v54 = vsel %vm246_vm8, %v245_v9, %v239_v53  ;;  %v206_v55 = vpop.permute.xlu0 %205 }
  0xf0   :  { %v218_v37 = vsel %vm215_vm7, %v206_v55, %v5315_v28  ;;  %v219_v59 = vsel %vm215_vm7, %v5344_v45, %v206_v55  ;;  %v262_v36 = vmul.f32 %v254_v46, %v250_v54  ;;  %v263_v61 = vmul.f32 %v255_v48, %v249_v30 }
  0xf1   :  { %550 = vmatpush.bf16.msra.mxu0 %v506_v56  ;;  %563 = vmatpush.bf16.msra.mxu1 %v507_v57  ;;  %v230_v62 = vmul.f32 %v222_v16, %v219_v59  ;;  %v231_v43 = vmul.f32 %v223_v52, %v218_v37  ;;  %v4412_v16 = vld [vmem:[%s6714_s3 + $0x20] ss:$8 sm:$0xf] }
  0xf2   :  { %v921_v52 = vperm.slane %v4412_v16, 3  ;;  %v918_v37 = vperm.slane %v4412_v16, 0 }
  0xf3   :  { %v502_v24 = vpack.c.bf16 %v262_v36, %v230_v62  ;;  %v503_v35 = vpack.c.bf16 %v263_v61, %v231_v43 }
  0xf5   :  { %551 = vmatpush.bf16.msra.mxu0 %v502_v24  ;;  %564 = vmatpush.bf16.msra.mxu1 %v503_v35 }
  0xf8   :  { %4398 = vmatmul.msk.bf16.vlgmr.msra.gmra.mxu0 %vm527_vm9, %v5359_v60  ;;  %4399 = vmatmul.msk.bf16.vlgmr.msra.gmra.mxu1 %vm527_vm9, %v5359_v60 }
 0x117   :  { %v525_v28 = vpop.permute.xlu2 %524 }
 0x153   :  { %v631_v5 = vpop.permute.xlu0 %630 }
 0x162   :  { %v579_v45 = vpop.f32.mrf.mxu2 }
 0x163   :  { %v580_v23 = vadd.f32 %v579_v45, %v525_v28 }
 0x165   :  { %vm598_vm10 = vcmp.ge.f32.partialorder %v580_v23, 0.0  ;;  %v602_v8 = vmul.f32 0.01, %v580_v23 }
 0x167   :  { %v606_v9 = vsel %vm598_vm10, %v580_v23, %v602_v8  ;;  %v919_v23 = vperm.slane %v4412_v16, 1  ;;  %v920_v8 = vperm.slane %v4412_v16, 2 }
 0x168   :  { %v5428_v10 = vpack.c.bf16 %v606_v9, %v5128_v1 }
 0x16a   :  { %670 = vmatpush.bf16.msrb.mxu2 %v5428_v10  ;;  %v581_v11 = vpop.f32.mrf.mxu2 }
 0x16b   :  { %v592_v13 = vpop.f32.mrf.mxu3 }
 0x16c   :  { %v593_v60 = vadd.f32 %v592_v13, %v525_v28 }
 0x16d   :  { %4404 = vmatmul.msk.bf16.vlgmr.msrb.gmra.mxu2 %vm633_vm11, %v624_v33 }
 0x16e   :  { %vm599_vm12 = vcmp.ge.f32.partialorder %v593_v60, 0.0  ;;  %v603_v12 = vmul.f32 0.01, %v593_v60 }
 0x170   :  { %v607_v14 = vsel %vm599_vm12, %v593_v60, %v603_v12  ;;  %vm1102_vm12 = vcmask 195584  }
 0x171   :  { %v5433_v15 = vpack.c.bf16 %v607_v14, %v5123_v0 }
 0x173   :  { %v594_v17 = vpop.f32.mrf.mxu3  ;;  %683 = vmatpush.bf16.msrb.mxu3 %v5433_v15 }
 0x175   :  { %v553_v1 = vpop.f32.mrf.mxu0  ;;  %v566_v20 = vpop.f32.mrf.mxu1 }
 0x176   :  { %v554_v4 = vadd.f32 %v553_v1, %v525_v28  ;;  %v567_v18 = vadd.f32 %v566_v20, %v525_v28  ;;  %4405 = vmatmul.msk.bf16.vlgmr.msrb.gmra.mxu3 %vm633_vm11, %v624_v33  ;;  %v5546_v28 = vld [vmem:[%s6714_s3 + $0x6] ss:$8 sm:$0xf] }
 0x177   :  { %v861_v9 = vperm.slane %v5546_v28, 3 }
 0x178   :  { %v600_v21 = vmul.f32 0.01, %v554_v4  ;;  %v601_v22 = vmul.f32 0.01, %v567_v18  ;;  %vm596_vm13 = vcmp.ge.f32.partialorder %v554_v4, 0.0  ;;  %vm597_vm14 = vcmp.ge.f32.partialorder %v567_v18, 0.0 }
 0x17a   :  { %v604_v25 = vsel %vm596_vm13, %v554_v4, %v600_v21  ;;  %v605_v26 = vsel %vm597_vm14, %v567_v18, %v601_v22  ;;  %v890_v4 = vperm.slane %v5551_v63, 2 }
 0x17b   :  { %v5438_v27 = vpack.c.bf16 %v604_v25, %v5133_v2  ;;  %v5441_v0 = vpack.c.bf16 %v605_v26, %v5162_v3  ;;  %v860_v26 = vperm.slane %v5546_v28, 2 }
 0x17d   :  { %v555_v29 = vpop.f32.mrf.mxu0  ;;  %644 = vmatpush.bf16.msrb.mxu0 %v5438_v27  ;;  %657 = vmatpush.bf16.msrb.mxu1 %v5441_v0  ;;  %v568_v31 = vpop.f32.mrf.mxu1 }
 0x180   :  { %4402 = vmatmul.msk.bf16.vlgmr.msrb.gmra.mxu0 %vm633_vm11, %v624_v33  ;;  %4403 = vmatmul.msk.bf16.vlgmr.msrb.gmra.mxu1 %vm633_vm11, %v624_v33  ;;  %v891_v33 = vperm.slane %v5551_v63, 3 }
 0x1f0   :  { %v672_v32 = vpop.f32.mrf.mxu2 }
 0x1f1   :  { %v5465_v49 = vadd.f32 %v672_v32, %v631_v5  ;;  %v5576_v32 = vld [vmem:[%s6714_s3 + $0x5] ss:$8 sm:$0xf] }
 0x1f8   :  { %v674_v34 = vpop.f32.mrf.mxu2 }
 0x1f9   :  { %v685_v42 = vpop.f32.mrf.mxu3 }
 0x1fa   :  { %v5457_v40 = vadd.f32 %v685_v42, %v631_v5 }
 0x1fd   :  { %v646_v38 = vpop.f32.mrf.mxu0  ;;  %v659_v2 = vpop.f32.mrf.mxu1 }
 0x1fe   :  { %v5447_v39 = vadd.f32 %v646_v38, %v631_v5  ;;  %v5449_v3 = vadd.f32 %v659_v2, %v631_v5 }
 0x200   :  { %692 = vrot.lane.b32.xlu0 %v5449_v3, %s4953_s0  ;;  %844 = vrot.lane.b32.xlu2 %v5447_v39, %s4948_s1 }
 0x201   :  { %904 = vrot.lane.b32.xlu1 %v5447_v39, %s4947_s21  ;;  %v687_v58 = vpop.f32.mrf.mxu3 }
 0x202   :  { %v830_v58 = vperm.slane %v5576_v32, 2 }
 0x205   :  { %v648_v19 = vpop.f32.mrf.mxu0  ;;  %v661_v47 = vpop.f32.mrf.mxu1 }
 0x206   :  { %v831_v19 = vperm.slane %v5576_v32, 3 }
 0x208   :  { %722 = vrot.lane.b32.xlu0 %v5449_v3, %s4954_s7  ;;  %874 = vrot.lane.b32.xlu2 %v5447_v39, %s4949_s6 }
 0x209   :  { %910 = vrot.lane.b32.xlu1 %v5457_v40, %s4947_s21 }
 0x210   :  { %848 = vrot.lane.b32.xlu0 %v5465_v49, %s4948_s1  ;;  %814 = vrot.lane.b32.xlu2 %v5447_v39, %s4950_s22 }
 0x211   :  { %850 = vrot.lane.b32.xlu1 %v5457_v40, %s4948_s1 }
 0x218   :  { %878 = vrot.lane.b32.xlu0 %v5465_v49, %s4949_s6  ;;  %752 = vrot.lane.b32.xlu2 %v5449_v3, %s4951_s24 }
 0x219   :  { %880 = vrot.lane.b32.xlu1 %v5457_v40, %s4949_s6 }
 0x220   :  { %818 = vrot.lane.b32.xlu0 %v5465_v49, %s4950_s22  ;;  %782 = vrot.lane.b32.xlu2 %v5449_v3, %s4952_s25 }
 0x221   :  { %820 = vrot.lane.b32.xlu1 %v5457_v40, %s4950_s22 }
 0x228   :  { %754 = vrot.lane.b32.xlu0 %v5465_v49, %s4951_s24  ;;  %906 = vrot.lane.b32.xlu2 %v5449_v3, %s4947_s21 }
 0x229   :  { %756 = vrot.lane.b32.xlu1 %v5457_v40, %s4951_s24 }
 0x230   :  { %784 = vrot.lane.b32.xlu0 %v5465_v49, %s4952_s25  ;;  %908 = vrot.lane.b32.xlu2 %v5465_v49, %s4947_s21 }
 0x231   :  { %786 = vrot.lane.b32.xlu1 %v5457_v40, %s4952_s25 }
 0x238   :  { %846 = vrot.lane.b32.xlu0 %v5449_v3, %s4948_s1  ;;  %696 = vrot.lane.b32.xlu2 %v5457_v40, %s4953_s0 }
 0x239   :  { %694 = vrot.lane.b32.xlu1 %v5465_v49, %s4953_s0 }
 0x240   :  { %750 = vrot.lane.b32.xlu0 %v5447_v39, %s4951_s24  ;;  %726 = vrot.lane.b32.xlu2 %v5457_v40, %s4954_s7 }
 0x241   :  { %724 = vrot.lane.b32.xlu1 %v5465_v49, %s4954_s7 }
 0x248   :  { %720 = vrot.lane.b32.xlu0 %v5447_v39, %s4954_s7  ;;  %816 = vrot.lane.b32.xlu2 %v5449_v3, %s4950_s22 }
 0x249   :  { %876 = vrot.lane.b32.xlu1 %v5449_v3, %s4949_s6 }
 0x250   :  { %690 = vrot.lane.b32.xlu2 %v5447_v39, %s4953_s0 }
 0x251   :  { %780 = vrot.lane.b32.xlu1 %v5447_v39, %s4952_s25 }
 0x25a   :  { %v5519_v41 = vpop.permute.xlu2 %844 }
 0x262   :  { %v5521_v44 = vpop.permute.xlu2 %874 }
 0x26a   :  { %v5523_v46 = vpop.permute.xlu2 %814 }
 0x272   :  { %v5525_v48 = vpop.permute.xlu0 %692  ;;  %v5527_v6 = vpop.permute.xlu2 %752 }
 0x273   :  { %v905_v51 = vpop.permute.xlu1 %904 }
 0x27a   :  { %v5532_v53 = vpop.permute.xlu0 %722  ;;  %v5534_v30 = vpop.permute.xlu2 %782 }
 0x27b   :  { %v911_v54 = vpop.permute.xlu1 %910 }
 0x27c   :  { %v915_v55 = vsel %vm442_vm0, %v911_v54, %v905_v51 }
 0x27d   :  { %v929_v56 = vmul.f32 %v921_v52, %v915_v55 }
 0x27f   :  { %v989_v57 = vpack.c.bf16 %v929_v56, %v929_v56 }
 0x281   :  { %v1007_v59 = vsel %vm531_vm1, %v989_v57, 0 }
 0x282   :  { %1051 = vmatpush.bf16.msra.mxu3 %v1007_v59  ;;  %v5539_v36 = vpop.permute.xlu0 %848  ;;  %v907_v61 = vpop.permute.xlu2 %906 }
 0x283   :  { %v914_v62 = vsel %vm442_vm0, %v905_v51, %v907_v61  ;;  %v851_v43 = vpop.permute.xlu1 %850 }
 0x284   :  { %v926_v24 = vmul.f32 %v918_v37, %v914_v62  ;;  %v855_v11 = vsel %vm378_vm2, %v851_v43, %v5519_v41  ;;  %v852_v34 = vsel %vm378_vm2, %v5539_v36, %v851_v43  ;;  %v5600_v43 = vld [vmem:[%s6714_s3 + $0x2] ss:$8 sm:$0xf] }
 0x285   :  { %v869_v21 = vmul.f32 %v861_v9, %v855_v11  ;;  %v868_v47 = vmul.f32 %v860_v26, %v852_v34  ;;  %v5631_v26 = vld [vmem:[%s6714_s3] ss:$8 sm:$0xf] }
 0x286   :  { %v986_v35 = vpack.c.bf16 %v926_v24, %v926_v24  ;;  %v5605_v24 = vld [vmem:[%s6714_s3 + $0x3] ss:$8 sm:$0xf]  ;;  %v706_v34 = vperm.slane %v5631_v26, 2 }
 0x288   :  { %v998_v45 = vsel %vm531_vm1, %v986_v35, 0  ;;  %v766_v35 = vperm.slane %v5600_v43, 2 }
 0x289   :  { %1012 = vmatpush.bf16.msra.mxu0 %v998_v45  ;;  %v767_v45 = vperm.slane %v5600_v43, 3 }
 0x28a   :  { %v5559_v13 = vpop.permute.xlu0 %878  ;;  %v909_v60 = vpop.permute.xlu2 %908 }
 0x28b   :  { %v912_v12 = vsel %vm442_vm0, %v909_v60, %v911_v54  ;;  %v913_v14 = vsel %vm442_vm0, %v907_v61, %v909_v60  ;;  %v881_v17 = vpop.permute.xlu1 %880 }
 0x28c   :  { %v927_v1 = vmul.f32 %v919_v23, %v913_v14  ;;  %v928_v20 = vmul.f32 %v920_v8, %v912_v12  ;;  %v885_v18 = vsel %vm410_vm3, %v881_v17, %v5521_v44  ;;  %v882_v22 = vsel %vm410_vm3, %v5559_v13, %v881_v17 }
 0x28d   :  { %v899_v25 = vmul.f32 %v891_v33, %v885_v18  ;;  %v898_v5 = vmul.f32 %v890_v4, %v882_v22  ;;  %v797_v23 = vperm.slane %v5605_v24, 3 }
 0x28e   :  { %v987_v29 = vpack.c.bf16 %v927_v1, %v927_v1  ;;  %v988_v31 = vpack.c.bf16 %v928_v20, %v928_v20 }
 0x28f   :  { %v985_v42 = vpack.c.bf16 %v899_v25, %v869_v21  ;;  %v984_v55 = vpack.c.bf16 %v898_v5, %v868_v47  ;;  %v4957_v21 = vmov 2  }
 0x290   :  { %v1001_v38 = vsel %vm531_vm1, %v987_v29, 0  ;;  %v1004_v2 = vsel %vm531_vm1, %v988_v31, 0  ;;  %4555 = vset.pattern.permute.xlu1 %v4957_v21  ;;  %v5636_v29 = vld [vmem:[%s6714_s3 + $0x1] ss:$8 sm:$0xf] }
 0x291   :  { %1052 = vmatpush.bf16.msra.mxu3 %v985_v42  ;;  %1025 = vmatpush.bf16.msra.mxu1 %v1001_v38  ;;  %v707_v42 = vperm.slane %v5631_v26, 3  ;;  %v736_v5 = vperm.slane %v5636_v29, 2  ;;  %v737_v38 = vperm.slane %v5636_v29, 3 }
 0x292   :  { %1038 = vmatpush.bf16.msra.mxu2 %v1004_v2  ;;  %v5585_v51 = vpop.permute.xlu0 %818  ;;  %v5625_v17 = vpop.permute.xlu2 %696  ;;  %991 = vperm.xlu1 %4555, %v5349_v50  }
 0x293   :  { %v821_v16 = vpop.permute.xlu1 %820 }
 0x294   :  { %v822_v52 = vsel %vm346_vm4, %v5585_v51, %v821_v16  ;;  %v825_v54 = vsel %vm346_vm4, %v821_v16, %v5523_v46 }
 0x295   :  { %v838_v56 = vmul.f32 %v830_v58, %v822_v52  ;;  %v839_v57 = vmul.f32 %v831_v19, %v825_v54 }
 0x296   :  { %1039 = vmatpush.bf16.msra.mxu2 %v984_v55 }
 0x297   :  { %v981_v37 = vpack.c.bf16 %v839_v57, %v5457_v40  ;;  %v980_v59 = vpack.c.bf16 %v838_v56, %v5465_v49  ;;  %v796_v40 = vperm.slane %v5605_v24, 2 }
 0x299   :  { %1053 = vmatpush.bf16.msra.mxu3 %v981_v37 }
 0x29a   :  { %1040 = vmatpush.bf16.msra.mxu2 %v980_v59  ;;  %v755_v61 = vpop.permute.xlu0 %754  ;;  %v5638_v31 = vpop.permute.xlu2 %726 }
 0x29b   :  { %v5595_v62 = vpop.permute.xlu1 %756  ;;  %v759_v49 = vsel %vm278_vm5, %v5527_v6, %v755_v61 }
 0x29c   :  { %v758_v8 = vsel %vm278_vm5, %v755_v61, %v5595_v62  ;;  %v774_v60 = vmul.f32 %v766_v35, %v759_v49  ;;  %v858_v35 = vperm.slane %v5546_v28, 0  ;;  %v888_v49 = vperm.slane %v5551_v63, 0 }
 0x29d   :  { %v775_v1 = vmul.f32 %v767_v45, %v758_v8  ;;  %v889_v45 = vperm.slane %v5551_v63, 1 }
 0x2a2   :  { %v785_v9 = vpop.permute.xlu0 %784  ;;  %v817_v61 = vpop.permute.xlu2 %816 }
 0x2a3   :  { %v789_v33 = vsel %vm310_vm6, %v5534_v30, %v785_v9  ;;  %v5620_v11 = vpop.permute.xlu1 %786  ;;  %v824_v63 = vsel %vm346_vm4, %v5523_v46, %v817_v61 }
 0x2a4   :  { %v804_v12 = vmul.f32 %v796_v40, %v789_v33  ;;  %v788_v14 = vsel %vm310_vm6, %v785_v9, %v5620_v11  ;;  %v859_v40 = vperm.slane %v5546_v28, 1  ;;  %v828_v33 = vperm.slane %v5576_v32, 0 }
 0x2a5   :  { %v805_v20 = vmul.f32 %v797_v23, %v788_v14  ;;  %v689_v23 = vld [vmem:[#allocation4 + $0x8] sm:$0xf] }
 0x2a6   :  { %v976_v4 = vpack.c.bf16 %v804_v12, %v774_v60  ;;  %v829_v60 = vperm.slane %v5576_v32, 1  ;;  %v823_v12 = vsel %vm346_vm4, %v817_v61, %v5585_v51  ;;  %v764_v51 = vperm.slane %v5600_v43, 0 }
 0x2a7   :  { %v977_v18 = vpack.c.bf16 %v805_v20, %v775_v1  ;;  %v4958_v61 = vmov 3  }
 0x2a8   :  { %1041 = vmatpush.bf16.msra.mxu2 %v976_v4  ;;  %v836_v4 = vmul.f32 %v828_v33, %v824_v63  ;;  %v837_v46 = vmul.f32 %v829_v60, %v823_v12  ;;  %4556 = vset.pattern.permute.xlu2 %v4958_v61 }
 0x2a9   :  { %1054 = vmatpush.bf16.msra.mxu3 %v977_v18  ;;  %1099 = vperm.xlu2 %4556, %v5349_v50   ;;  %v1089_v50 = vld [vmem:[#allocation4 + $0xc] sm:$0xf] }
 0x2aa   :  { %v847_v25 = vpop.permute.xlu0 %846 }
 0x2ab   :  { %v695_v22 = vpop.permute.xlu1 %694  ;;  %v853_v8 = vsel %vm378_vm2, %v847_v25, %v5539_v36  ;;  %v854_v9 = vsel %vm378_vm2, %v5519_v41, %v847_v25  ;;  %v794_v25 = vperm.slane %v5605_v24, 0 }
 0x2ac   :  { %v698_v2 = vsel %vm215_vm7, %v695_v22, %v5625_v17  ;;  %v699_v58 = vsel %vm215_vm7, %v5525_v48, %v695_v22  ;;  %v866_v32 = vmul.f32 %v858_v35, %v854_v9  ;;  %v867_v14 = vmul.f32 %v859_v40, %v853_v8 }
 0x2ad   :  { %v714_v52 = vmul.f32 %v706_v34, %v699_v58  ;;  %v715_v54 = vmul.f32 %v707_v42, %v698_v2  ;;  %v795_v34 = vperm.slane %v5605_v24, 1  ;;  %v704_v42 = vperm.slane %v5631_v26, 0  ;;  %v691_v2 = vpop.permute.xlu2 %690 }
 0x2b2   :  { %v751_v57 = vpop.permute.xlu0 %750 }
 0x2b3   :  { %v725_v19 = vpop.permute.xlu1 %724 }
 0x2b4   :  { %v728_v47 = vsel %vm246_vm8, %v725_v19, %v5638_v31  ;;  %v729_v16 = vsel %vm246_vm8, %v5532_v53, %v725_v19  ;;  %v978_v19 = vpack.c.bf16 %v836_v4, %v5447_v39  ;;  %v705_v39 = vperm.slane %v5631_v26, 1 }
 0x2b5   :  { %v744_v55 = vmul.f32 %v736_v5, %v729_v16  ;;  %v745_v56 = vmul.f32 %v737_v38, %v728_v47  ;;  %v760_v5 = vsel %vm278_vm5, %v751_v57, %v5527_v6  ;;  %v734_v38 = vperm.slane %v5636_v29, 0 }
 0x2b6   :  { %v979_v47 = vpack.c.bf16 %v837_v46, %v5449_v3 }
 0x2b7   :  { %v972_v37 = vpack.c.bf16 %v744_v55, %v714_v52  ;;  %v973_v59 = vpack.c.bf16 %v745_v56, %v715_v54 }
 0x2b9   :  { %1042 = vmatpush.bf16.msra.mxu2 %v972_v37  ;;  %1055 = vmatpush.bf16.msra.mxu3 %v973_v59 }
 0x2ba   :  { %v721_v22 = vpop.permute.xlu0 %720 }
 0x2bb   :  { %v877_v28 = vpop.permute.xlu1 %876  ;;  %v730_v24 = vsel %vm246_vm8, %v721_v22, %v5532_v53  ;;  %v731_v16 = vsel %vm246_vm8, %v5638_v31, %v721_v22  ;;  %v700_v53 = vsel %vm215_vm7, %v691_v2, %v5525_v48  ;;  %v701_v31 = vsel %vm215_vm7, %v5625_v17, %v691_v2 }
 0x2bc   :  { %v883_v36 = vsel %vm410_vm3, %v877_v28, %v5559_v13  ;;  %v884_v41 = vsel %vm410_vm3, %v5521_v44, %v877_v28  ;;  %4415 = vmatmul.msk.bf16.vlgmr.msra.gmra.mxu2 %vm527_vm9, %v689_v23  ;;  %4416 = vmatmul.msk.bf16.vlgmr.msra.gmra.mxu3 %vm527_vm9, %v689_v23  ;;  %v761_v13 = vsel %vm278_vm5, %v5595_v62, %v751_v57  ;;  %v765_v44 = vperm.slane %v5600_v43, 1 }
 0x2bd   :  { %v896_v1 = vmul.f32 %v888_v49, %v884_v41  ;;  %v897_v20 = vmul.f32 %v889_v45, %v883_v36  ;;  %v772_v58 = vmul.f32 %v764_v51, %v761_v13  ;;  %v735_v62 = vperm.slane %v5636_v29, 1 }
 0x2be   :  { %v773_v52 = vmul.f32 %v765_v44, %v760_v5  ;;  %v713_v37 = vmul.f32 %v705_v39, %v700_v53 }
 0x2bf   :  { %v982_v18 = vpack.c.bf16 %v896_v1, %v866_v32  ;;  %v983_v21 = vpack.c.bf16 %v897_v20, %v867_v14  ;;  %v743_v55 = vmul.f32 %v735_v62, %v730_v24 }
 0x2c1   :  { %1013 = vmatpush.bf16.msra.mxu0 %v982_v18  ;;  %1026 = vmatpush.bf16.msra.mxu1 %v983_v21  ;;  %v971_v59 = vpack.c.bf16 %v743_v55, %v713_v37 }
 0x2c3   :  { %v781_v43 = vpop.permute.xlu1 %780 }
 0x2c4   :  { %v790_v6 = vsel %vm310_vm6, %v781_v43, %v5534_v30  ;;  %v791_v29 = vsel %vm310_vm6, %v5620_v11, %v781_v43  ;;  %v742_v30 = vmul.f32 %v734_v38, %v731_v16  ;;  %v712_v11 = vmul.f32 %v704_v42, %v701_v31 }
 0x2c5   :  { %v802_v3 = vmul.f32 %v794_v25, %v791_v29  ;;  %v803_v54 = vmul.f32 %v795_v34, %v790_v6  ;;  %1014 = vmatpush.bf16.msra.mxu0 %v978_v19  ;;  %1027 = vmatpush.bf16.msra.mxu1 %v979_v47 }
 0x2c6   :  { %v970_v26 = vpack.c.bf16 %v742_v30, %v712_v11  ;;  %v5823_v11 = vld [vmem:[%s6714_s3 + $0x7] ss:$8 sm:$0xf] }
 0x2c7   :  { %v974_v56 = vpack.c.bf16 %v802_v3, %v772_v58  ;;  %v975_v57 = vpack.c.bf16 %v803_v54, %v773_v52  ;;  %v4427_v54 = vld [vmem:[%s6714_s3 + $0x20] ss:$8 sm:$0xf] }
 0x2c8   :  { %v1399_v53 = vperm.slane %v4427_v54, 0 }
 0x2c9   :  { %1015 = vmatpush.bf16.msra.mxu0 %v974_v56  ;;  %1028 = vmatpush.bf16.msra.mxu1 %v975_v57 }
 0x2cd   :  { %1016 = vmatpush.bf16.msra.mxu0 %v970_v26  ;;  %1029 = vmatpush.bf16.msra.mxu1 %v971_v59  ;;  %v5828_v26 = vld [vmem:[%s6714_s3 + $0x5] ss:$8 sm:$0xf]  ;;  %v5833_v59 = vld [vmem:[%s6714_s3 + $0x6] ss:$8 sm:$0xf] }
 0x2d0   :  { %4413 = vmatmul.msk.bf16.vlgmr.msra.gmra.mxu0 %vm527_vm9, %v689_v23  ;;  %4414 = vmatmul.msk.bf16.vlgmr.msra.gmra.mxu1 %vm527_vm9, %v689_v23 }
 0x303   :  { %v1100_v34 = vpop.permute.xlu2 %1099 }
 0x304   :  { %v992_v48 = vpop.permute.xlu1 %991 }
 0x33f   :  { %v1044_v17 = vpop.f32.mrf.mxu2  ;;  %v1057_v35 = vpop.f32.mrf.mxu3 }
 0x340   :  { %v1045_v40 = vadd.f32 %v1044_v17, %v992_v48  ;;  %v1058_v49 = vadd.f32 %v1057_v35, %v992_v48  ;;  %v1402_v17 = vperm.slane %v4427_v54, 3  ;;  %v1339_v35 = vperm.slane %v5833_v59, 0 }
 0x342   :  { %vm1063_vm15 = vcmp.ge.f32.partialorder %v1045_v40, 0.0  ;;  %v1067_v45 = vmul.f32 0.01, %v1045_v40  ;;  %vm1064_vm10 = vcmp.ge.f32.partialorder %v1058_v49, 0.0  ;;  %v1068_v8 = vmul.f32 0.01, %v1058_v49 }
 0x344   :  { %v1071_v9 = vsel %vm1063_vm15, %v1045_v40, %v1067_v45  ;;  %v1072_v60 = vsel %vm1064_vm10, %v1058_v49, %v1068_v8  ;;  %v1309_v49 = vperm.slane %v5828_v26, 0 }
 0x345   :  { %v1096_v33 = vpack.c.bf16 %v1071_v9, %v1071_v9  ;;  %v1097_v28 = vpack.c.bf16 %v1072_v60, %v1072_v60 }
 0x347   :  { %v1113_v12 = vsel %vm531_vm1, %v1096_v33, 0  ;;  %v1046_v23 = vpop.f32.mrf.mxu2  ;;  %v1116_v63 = vsel %vm531_vm1, %v1097_v28, 0  ;;  %v1059_v36 = vpop.f32.mrf.mxu3 }
 0x348   :  { %1150 = vmatpush.bf16.msrb.mxu2 %v1113_v12  ;;  %1163 = vmatpush.bf16.msrb.mxu3 %v1116_v63 }
 0x34c   :  { %1151 = vmatpush.bf16.msrb.mxu2 %v5428_v10  ;;  %1164 = vmatpush.bf16.msrb.mxu3 %v5433_v15 }
 0x34d   :  { %v1018_v41 = vpop.f32.mrf.mxu0  ;;  %v1031_v32 = vpop.f32.mrf.mxu1 }
 0x34e   :  { %v1019_v14 = vadd.f32 %v1018_v41, %v992_v48  ;;  %v1032_v1 = vadd.f32 %v1031_v32, %v992_v48  ;;  %v1369_v48 = vperm.slane %v5823_v11, 0 }
 0x34f   :  { %4419 = vmatmul.msk.bf16.vlgmr.msrb.gmra.mxu2 %vm1102_vm12, %v1089_v50  ;;  %4420 = vmatmul.msk.bf16.vlgmr.msrb.gmra.mxu3 %vm1102_vm12, %v1089_v50 }
 0x350   :  { %vm1061_vm13 = vcmp.ge.f32.partialorder %v1019_v14, 0.0  ;;  %v1065_v20 = vmul.f32 0.01, %v1019_v14  ;;  %vm1062_vm14 = vcmp.ge.f32.partialorder %v1032_v1, 0.0  ;;  %v1066_v51 = vmul.f32 0.01, %v1032_v1 }
 0x352   :  { %v1069_v4 = vsel %vm1061_vm13, %v1019_v14, %v1065_v20  ;;  %v1070_v46 = vsel %vm1062_vm14, %v1032_v1, %v1066_v51  ;;  %v1342_v51 = vperm.slane %v5833_v59, 3 }
 0x353   :  { %v1094_v18 = vpack.c.bf16 %v1069_v4, %v1069_v4  ;;  %v1095_v10 = vpack.c.bf16 %v1070_v46, %v1070_v46  ;;  %v1372_v46 = vperm.slane %v5823_v11, 3 }
 0x355   :  { %v1020_v21 = vpop.f32.mrf.mxu0  ;;  %v1033_v13 = vpop.f32.mrf.mxu1  ;;  %v1107_v15 = vsel %vm531_vm1, %v1094_v18, 0  ;;  %v1110_v44 = vsel %vm531_vm1, %v1095_v10, 0  ;;  %v1312_v10 = vperm.slane %v5828_v26, 3 }
 0x356   :  { %1124 = vmatpush.bf16.msrb.mxu0 %v1107_v15  ;;  %1137 = vmatpush.bf16.msrb.mxu1 %v1110_v44 }
 0x35a   :  { %1125 = vmatpush.bf16.msrb.mxu0 %v5438_v27  ;;  %1138 = vmatpush.bf16.msrb.mxu1 %v5441_v0 }
 0x35d   :  { %4417 = vmatmul.msk.bf16.vlgmr.msrb.gmra.mxu0 %vm1102_vm12, %v1089_v50  ;;  %4418 = vmatmul.msk.bf16.vlgmr.msrb.gmra.mxu1 %vm1102_vm12, %v1089_v50 }
 0x3d2   :  { %v1153_v22 = vpop.f32.mrf.mxu2  ;;  %v1166_v25 = vpop.f32.mrf.mxu3 }
 0x3d3   :  { %v5753_v43 = vadd.f32 %v1166_v25, %v1100_v34  ;;  %v5761_v19 = vadd.f32 %v1153_v22, %v1100_v34 }
 0x3da   :  { %v1127_v42 = vpop.f32.mrf.mxu0  ;;  %v1140_v5 = vpop.f32.mrf.mxu1 }
 0x3db   :  { %v5731_v38 = vadd.f32 %v1127_v42, %v1100_v34  ;;  %v5733_v2 = vadd.f32 %v1140_v5, %v1100_v34  ;;  %v1168_v58 = vpop.f32.mrf.mxu3  ;;  %v1155_v62 = vpop.f32.mrf.mxu2  ;;  %v1400_v5 = vperm.slane %v4427_v54, 1 }
 0x3dd   :  { %1357 = vrot.lane.b32.xlu1 %v5733_v2, %s4949_s6  ;;  %1355 = vrot.lane.b32.xlu0 %v5731_v38, %s4949_s6 }
 0x3de   :  { %1385 = vrot.lane.b32.xlu2 %v5731_v38, %s4947_s21 }
 0x3e2   :  { %v1129_v27 = vpop.f32.mrf.mxu0  ;;  %v1142_v0 = vpop.f32.mrf.mxu1 }
 0x3e5   :  { %1297 = vrot.lane.b32.xlu1 %v5733_v2, %s4950_s22  ;;  %1261 = vrot.lane.b32.xlu0 %v5731_v38, %s4952_s25 }
 0x3e6   :  { %1325 = vrot.lane.b32.xlu2 %v5731_v38, %s4948_s1 }
 0x3ed   :  { %1173 = vrot.lane.b32.xlu1 %v5733_v2, %s4953_s0  ;;  %1387 = vrot.lane.b32.xlu0 %v5733_v2, %s4947_s21 }
 0x3ee   :  { %1295 = vrot.lane.b32.xlu2 %v5731_v38, %s4950_s22 }
 0x3f5   :  { %1391 = vrot.lane.b32.xlu1 %v5753_v43, %s4947_s21  ;;  %1327 = vrot.lane.b32.xlu0 %v5733_v2, %s4948_s1 }
 0x3f6   :  { %1231 = vrot.lane.b32.xlu2 %v5731_v38, %s4951_s24 }
 0x3fd   :  { %1329 = vrot.lane.b32.xlu1 %v5761_v19, %s4948_s1  ;;  %1233 = vrot.lane.b32.xlu0 %v5733_v2, %s4951_s24 }
 0x3fe   :  { %1263 = vrot.lane.b32.xlu2 %v5733_v2, %s4952_s25 }
 0x405   :  { %1361 = vrot.lane.b32.xlu1 %v5753_v43, %s4949_s6  ;;  %1203 = vrot.lane.b32.xlu0 %v5733_v2, %s4954_s7 }
 0x406   :  { %1331 = vrot.lane.b32.xlu2 %v5753_v43, %s4948_s1 }
 0x40d   :  { %1299 = vrot.lane.b32.xlu1 %v5761_v19, %s4950_s22  ;;  %1389 = vrot.lane.b32.xlu0 %v5761_v19, %s4947_s21 }
 0x40e   :  { %1301 = vrot.lane.b32.xlu2 %v5753_v43, %s4950_s22 }
 0x415   :  { %1235 = vrot.lane.b32.xlu1 %v5761_v19, %s4951_s24  ;;  %1359 = vrot.lane.b32.xlu0 %v5761_v19, %s4949_s6 }
 0x416   :  { %1237 = vrot.lane.b32.xlu2 %v5753_v43, %s4951_s24 }
 0x41d   :  { %1205 = vrot.lane.b32.xlu1 %v5761_v19, %s4954_s7  ;;  %1265 = vrot.lane.b32.xlu0 %v5761_v19, %s4952_s25 }
 0x41e   :  { %1175 = vrot.lane.b32.xlu2 %v5761_v19, %s4953_s0 }
 0x425   :  { %1177 = vrot.lane.b32.xlu1 %v5753_v43, %s4953_s0  ;;  %1267 = vrot.lane.b32.xlu0 %v5753_v43, %s4952_s25 }
 0x426   :  { %1207 = vrot.lane.b32.xlu2 %v5753_v43, %s4954_s7 }
 0x42d   :  { %1201 = vrot.lane.b32.xlu1 %v5731_v38, %s4954_s7  ;;  %1171 = vrot.lane.b32.xlu0 %v5731_v38, %s4953_s0 }
 0x438   :  { %v1386_v47 = vpop.permute.xlu2 %1385 }
 0x440   :  { %v1326_v24 = vpop.permute.xlu2 %1325 }
 0x448   :  { %v1296_v16 = vpop.permute.xlu2 %1295 }
 0x44f   :  { %v5803_v6 = vpop.permute.xlu1 %1357  ;;  %v1356_v29 = vpop.permute.xlu0 %1355 }
 0x450   :  { %v5805_v39 = vpop.permute.xlu2 %1231  ;;  %v1365_v40 = vsel %vm410_vm3, %v1356_v29, %v5803_v6 }
 0x451   :  { %v1377_v28 = vmul.f32 %v1369_v48, %v1365_v40  ;;  %v1370_v48 = vperm.slane %v5823_v11, 1  ;;  %v1311_v40 = vperm.slane %v5828_v26, 2 }
 0x457   :  { %v5807_v52 = vpop.permute.xlu1 %1297  ;;  %v5809_v3 = vpop.permute.xlu0 %1261 }
 0x458   :  { %v5818_v56 = vpop.permute.xlu2 %1263  ;;  %v1305_v9 = vsel %vm346_vm4, %v1296_v16, %v5807_v52 }
 0x459   :  { %v1317_v63 = vmul.f32 %v1309_v49, %v1305_v9 }
 0x45b   :  { %v1459_v20 = vpack.c.bf16 %v1317_v63, %v5731_v38  ;;  %v1401_v38 = vperm.slane %v4427_v54, 2 }
 0x45f   :  { %v5814_v31 = vpop.permute.xlu1 %1173  ;;  %v1388_v30 = vpop.permute.xlu0 %1387 }
 0x460   :  { %v1395_v55 = vsel %vm442_vm0, %v1386_v47, %v1388_v30  ;;  %v1332_v36 = vpop.permute.xlu2 %1331 }
 0x461   :  { %v1407_v57 = vmul.f32 %v1399_v53, %v1395_v55  ;;  %v1336_v18 = vsel %vm378_vm2, %v1332_v36, %v1326_v24  ;;  %v1340_v55 = vperm.slane %v5833_v59, 1 }
 0x462   :  { %v1350_v22 = vmul.f32 %v1342_v51, %v1336_v18  ;;  %v1271_v18 = vsel %vm310_vm6, %v5809_v3, %v5818_v56 }
 0x463   :  { %v1467_v37 = vpack.c.bf16 %v1407_v57, %v1407_v57  ;;  %v1341_v57 = vperm.slane %v5833_v59, 2  ;;  %v5884_v59 = vld [vmem:[%s6714_s3 + $0x2] ss:$8 sm:$0xf] }
 0x464   :  { %v1246_v63 = vperm.slane %v5884_v59, 1 }
 0x465   :  { %v1479_v61 = vsel %vm531_vm1, %v1467_v37, 0 }
 0x466   :  { %1493 = vmatpush.bf16.msra.mxu0 %v1479_v61  ;;  %v1371_v61 = vperm.slane %v5823_v11, 2 }
 0x467   :  { %v1392_v45 = vpop.permute.xlu1 %1391  ;;  %v1328_v8 = vpop.permute.xlu0 %1327 }
 0x468   :  { %v1396_v33 = vsel %vm442_vm0, %v1392_v45, %v1386_v47  ;;  %v1335_v60 = vsel %vm378_vm2, %v1326_v24, %v1328_v8  ;;  %v1302_v4 = vpop.permute.xlu2 %1301 }
 0x469   :  { %v1410_v12 = vmul.f32 %v1402_v17, %v1396_v33  ;;  %v1347_v23 = vmul.f32 %v1339_v35, %v1335_v60  ;;  %v1306_v15 = vsel %vm346_vm4, %v1302_v4, %v1296_v16  ;;  %v1310_v35 = vperm.slane %v5828_v26, 1 }
 0x46a   :  { %v1320_v34 = vmul.f32 %v1312_v10, %v1306_v15  ;;  %v5925_v10 = vld [vmem:[%s6714_s3] ss:$8 sm:$0xf] }
 0x46b   :  { %v1470_v50 = vpack.c.bf16 %v1410_v12, %v1410_v12  ;;  %v1463_v41 = vpack.c.bf16 %v1377_v28, %v1347_v23  ;;  %v4423_v23 = vld [vmem:[%s6714_s3 + $0x3] ss:$8 sm:$0xf] }
 0x46c   :  { %v1462_v27 = vpack.c.bf16 %v1320_v34, %v5753_v43  ;;  %v1276_v51 = vperm.slane %v4423_v23, 1 }
 0x46d   :  { %1494 = vmatpush.bf16.msra.mxu0 %v1463_v41  ;;  %v1488_v32 = vsel %vm531_vm1, %v1470_v50, 0 }
 0x46e   :  { %1532 = vmatpush.bf16.msra.mxu3 %v1488_v32  ;;  %v4959_v32 = vmov 4  }
 0x46f   :  { %v1330_v14 = vpop.permute.xlu1 %1329  ;;  %v5850_v1 = vpop.permute.xlu0 %1233  ;;  %4557 = vset.pattern.permute.xlu2 %v4959_v32 }
 0x470   :  { %v5871_v54 = vpop.permute.xlu2 %1237  ;;  %v1334_v17 = vsel %vm378_vm2, %v1328_v8, %v1330_v14 }
 0x471   :  { %1495 = vmatpush.bf16.msra.mxu0 %v1459_v20  ;;  %v1348_v60 = vmul.f32 %v1340_v55, %v1334_v17  ;;  %v5914_v20 = vld [vmem:[%s6713_s2] sm:$0xff]  ;;  %v1278_v55 = vperm.slane %v4423_v23, 3 }
 0x472   :  { %1472 = vperm.xlu2 %4557, %v5914_v20  }
 0x477   :  { %v1362_v21 = vpop.permute.xlu1 %1361  ;;  %v5858_v13 = vpop.permute.xlu0 %1203 }
 0x478   :  { %v1366_v44 = vsel %vm410_vm3, %v1362_v21, %v1356_v29 }
 0x479   :  { %v1380_v25 = vmul.f32 %v1372_v46, %v1366_v44  ;;  %v1277_v46 = vperm.slane %v4423_v23, 2 }
 0x47b   :  { %v1466_v42 = vpack.c.bf16 %v1380_v25, %v1350_v22 }
 0x47d   :  { %1533 = vmatpush.bf16.msra.mxu3 %v1466_v42 }
 0x47f   :  { %v1300_v58 = vpop.permute.xlu1 %1299  ;;  %v1390_v62 = vpop.permute.xlu0 %1389 }
 0x480   :  { %v1393_v0 = vsel %vm442_vm0, %v1390_v62, %v1392_v45  ;;  %v1394_v47 = vsel %vm442_vm0, %v1388_v30, %v1390_v62  ;;  %v1333_v30 = vsel %vm378_vm2, %v1330_v14, %v1332_v36  ;;  %v1303_v11 = vsel %vm346_vm4, %v1300_v58, %v1302_v4  ;;  %v5909_v14 = vld [vmem:[%s6714_s3 + $0x1] ss:$8 sm:$0xf] }
 0x481   :  { %v1408_v24 = vmul.f32 %v1400_v5, %v1394_v47  ;;  %v1409_v16 = vmul.f32 %v1401_v38, %v1393_v0  ;;  %1534 = vmatpush.bf16.msra.mxu3 %v1462_v27  ;;  %v1304_v8 = vsel %vm346_vm4, %v5807_v52, %v1300_v58  ;;  %v1349_v28 = vmul.f32 %v1341_v57, %v1333_v30 }
 0x482   :  { %v1318_v36 = vmul.f32 %v1310_v35, %v1304_v8  ;;  %v1319_v50 = vmul.f32 %v1311_v40, %v1303_v11  ;;  %v1247_v4 = vperm.slane %v5884_v59, 2  ;;  %v1217_v22 = vperm.slane %v5909_v14, 2  ;;  %v1170_v8 = vld [vmem:[#allocation4 + $0x10] sm:$0xf] }
 0x483   :  { %v1468_v29 = vpack.c.bf16 %v1408_v24, %v1408_v24  ;;  %v1469_v53 = vpack.c.bf16 %v1409_v16, %v1409_v16  ;;  %v1284_v62 = vmul.f32 %v1276_v51, %v1271_v18  ;;  %v1245_v16 = vperm.slane %v5884_v59, 0 }
 0x484   :  { %v1460_v42 = vpack.c.bf16 %v1318_v36, %v5733_v2  ;;  %v1461_v5 = vpack.c.bf16 %v1319_v50, %v5761_v19  ;;  %v1242_v57 = vsel %vm278_vm5, %v5871_v54, %v5805_v39  ;;  %v1218_v17 = vperm.slane %v5909_v14, 3 }
 0x485   :  { %v1482_v37 = vsel %vm531_vm1, %v1468_v29, 0  ;;  %v1485_v43 = vsel %vm531_vm1, %v1469_v53, 0  ;;  %v1248_v53 = vperm.slane %v5884_v59, 3  ;;  %v1253_v40 = vmul.f32 %v1245_v16, %v1242_v57 }
 0x486   :  { %1506 = vmatpush.bf16.msra.mxu1 %v1482_v37  ;;  %1519 = vmatpush.bf16.msra.mxu2 %v1485_v43  ;;  %v1188_v43 = vperm.slane %v5925_v10, 3 }
 0x487   :  { %v1236_v49 = vpop.permute.xlu1 %1235  ;;  %v1360_v45 = vpop.permute.xlu0 %1359 }
 0x488   :  { %v1363_v9 = vsel %vm410_vm3, %v1360_v45, %v1362_v21  ;;  %v1364_v33 = vsel %vm410_vm3, %v5803_v6, %v1360_v45  ;;  %v1241_v6 = vsel %vm278_vm5, %v5805_v39, %v5850_v1  ;;  %v1176_v21 = vpop.permute.xlu2 %1175  ;;  %v1240_v15 = vsel %vm278_vm5, %v5850_v1, %v1236_v49 }
 0x489   :  { %v1378_v12 = vmul.f32 %v1370_v48, %v1364_v33  ;;  %v1379_v26 = vmul.f32 %v1371_v61, %v1363_v9  ;;  %v1254_v44 = vmul.f32 %v1246_v63, %v1241_v6  ;;  %v1187_v1 = vperm.slane %v5925_v10, 2 }
 0x48a   :  { %v1255_v27 = vmul.f32 %v1247_v4, %v1240_v15  ;;  %v1180_v2 = vsel %vm215_vm7, %v5814_v31, %v1176_v21  ;;  %v1239_v37 = vsel %vm278_vm5, %v1236_v49, %v5871_v54  ;;  %v1186_v63 = vperm.slane %v5925_v10, 1 }
 0x48b   :  { %v1464_v52 = vpack.c.bf16 %v1378_v12, %v1348_v60  ;;  %v1465_v41 = vpack.c.bf16 %v1379_v26, %v1349_v28  ;;  %v1456_v47 = vpack.c.bf16 %v1284_v62, %v1254_v44  ;;  %v1195_v29 = vmul.f32 %v1187_v1, %v1180_v2 }
 0x48c   :  { %v1256_v54 = vmul.f32 %v1248_v53, %v1239_v37  ;;  %v1215_v12 = vperm.slane %v5909_v14, 0 }
 0x48d   :  { %1507 = vmatpush.bf16.msra.mxu1 %v1464_v52  ;;  %1520 = vmatpush.bf16.msra.mxu2 %v1465_v41 }
 0x48f   :  { %v1206_v25 = vpop.permute.xlu1 %1205  ;;  %v1266_v34 = vpop.permute.xlu0 %1265 }
 0x490   :  { %v1210_v38 = vsel %vm246_vm8, %v5858_v13, %v1206_v25  ;;  %v1270_v58 = vsel %vm310_vm6, %v5818_v56, %v1266_v34  ;;  %v1275_v56 = vperm.slane %v4423_v23, 0  ;;  %v1208_v45 = vpop.permute.xlu2 %1207  ;;  %v1185_v23 = vperm.slane %v5925_v10, 0 }
 0x491   :  { %v1285_v0 = vmul.f32 %v1277_v46, %v1270_v58  ;;  %1508 = vmatpush.bf16.msra.mxu1 %v1460_v42  ;;  %1521 = vmatpush.bf16.msra.mxu2 %v1461_v5  ;;  %v1225_v19 = vmul.f32 %v1217_v22, %v1210_v38  ;;  %v1209_v9 = vsel %vm246_vm8, %v1206_v25, %v1208_v45 }
 0x492   :  { %v1226_v26 = vmul.f32 %v1218_v17, %v1209_v9  ;;  %v1670_v9 = vld [vmem:[#allocation11 + $0x1f0] sm:$0xff] }
 0x493   :  { %v1457_v24 = vpack.c.bf16 %v1285_v0, %v1255_v27  ;;  %v1453_v30 = vpack.c.bf16 %v1225_v19, %v1195_v29 }
 0x495   :  { %1509 = vmatpush.bf16.msra.mxu1 %v1456_v47  ;;  %1522 = vmatpush.bf16.msra.mxu2 %v1457_v24 }
 0x497   :  { %v1178_v48 = vpop.permute.xlu1 %1177  ;;  %v1268_v61 = vpop.permute.xlu0 %1267 }
 0x498   :  { %v1179_v59 = vsel %vm215_vm7, %v1176_v21, %v1178_v48  ;;  %v1269_v35 = vsel %vm310_vm6, %v1266_v34, %v1268_v61  ;;  %v1272_v39 = vsel %vm310_vm6, %v1268_v61, %v5809_v3  ;;  %v1216_v3 = vperm.slane %v5909_v14, 1  ;;  %v5984_v34 = vld [vmem:[%s6714_s3 + $0x4] ss:$8 sm:$0xf] }
 0x499   :  { %v1283_v49 = vmul.f32 %v1275_v56, %v1272_v39  ;;  %v1286_v11 = vmul.f32 %v1278_v55, %v1269_v35  ;;  %1523 = vmatpush.bf16.msra.mxu2 %v1453_v30  ;;  %v1196_v33 = vmul.f32 %v1188_v43, %v1179_v59  ;;  %v1557_v38 = vperm.slane %v5984_v34, 0  ;;  %v1623_v39 = vld [vmem:[#allocation11 + $0x78] sm:$0xff] }
 0x49a   :  { %v1558_v58 = vperm.slane %v5984_v34, 1  ;;  %v1559_v19 = vperm.slane %v5984_v34, 2  ;;  %v1560_v29 = vperm.slane %v5984_v34, 3  ;;  %v1667_v34 = vld [vmem:[#allocation11 + $0x1d8] sm:$0xff] }
 0x49b   :  { %v1455_v60 = vpack.c.bf16 %v1283_v49, %v1253_v40  ;;  %v1458_v28 = vpack.c.bf16 %v1286_v11, %v1256_v54  ;;  %v1454_v52 = vpack.c.bf16 %v1226_v26, %v1196_v33  ;;  %v1639_v40 = vld [vmem:[#allocation11 + $0xf8] sm:$0xff]  ;;  %v1622_v49 = vld [vmem:[#allocation11 + $0x70] sm:$0xff]  ;;  %v1621_v33 = vld [vmem:[#allocation11 + $0x68] sm:$0xff] }
 0x49c   :  { %4430 = vmatmul.msk.bf16.vlgmr.msra.gmra.mxu2 %vm527_vm9, %v1170_v8  ;;  %v1671_v54 = vld [vmem:[#allocation11 + $0x1f8] sm:$0xff]  ;;  %v1638_v11 = vld [vmem:[#allocation11 + $0xf0] sm:$0xff]  ;;  %v1620_v26 = vld [vmem:[#allocation11 + $0x60] sm:$0xff] }
 0x49d   :  { %1496 = vmatpush.bf16.msra.mxu0 %v1455_v60  ;;  %1535 = vmatpush.bf16.msra.mxu3 %v1458_v28  ;;  %v1637_v60 = vld [vmem:[#allocation11 + $0xe8] sm:$0xff] }
 0x49e   :  { %v1653_v28 = vld [vmem:[#allocation11 + $0x168] sm:$0xff] }
 0x49f   :  { %v1202_v36 = vpop.permute.xlu1 %1201  ;;  %v1172_v50 = vpop.permute.xlu0 %1171 }
 0x4a0   :  { %v1211_v41 = vsel %vm246_vm8, %v1202_v36, %v5858_v13  ;;  %v1212_v32 = vsel %vm246_vm8, %v1208_v45, %v1202_v36  ;;  %v1181_v6 = vsel %vm215_vm7, %v1172_v50, %v5814_v31  ;;  %v1182_v14 = vsel %vm215_vm7, %v1178_v48, %v1172_v50  ;;  %v1655_v45 = vld [vmem:[#allocation11 + $0x178] sm:$0xff] }
 0x4a1   :  { %v1223_v51 = vmul.f32 %v1215_v12, %v1212_v32  ;;  %v1224_v4 = vmul.f32 %v1216_v3, %v1211_v41  ;;  %v1193_v46 = vmul.f32 %v1185_v23, %v1182_v14  ;;  %v1194_v18 = vmul.f32 %v1186_v63, %v1181_v6  ;;  %1536 = vmatpush.bf16.msra.mxu3 %v1454_v52  ;;  %v1669_v12 = vld [vmem:[#allocation11 + $0x1e8] sm:$0xff]  ;;  %v1636_v3 = vld [vmem:[#allocation11 + $0xe0] sm:$0xff] }
 0x4a2   :  { %1712 = vmatpush.msrb.mxu2 %v1655_v45  ;;  %v1652_v23 = vld [vmem:[#allocation11 + $0x160] sm:$0xff] }
 0x4a3   :  { %v1451_v10 = vpack.c.bf16 %v1223_v51, %v1193_v46  ;;  %v1452_v21 = vpack.c.bf16 %v1224_v4, %v1194_v18  ;;  %v1668_v63 = vld [vmem:[#allocation11 + $0x1e0] sm:$0xff] }
 0x4a4   :  { %4431 = vmatmul.msk.bf16.vlgmr.msra.gmra.mxu3 %vm527_vm9, %v1170_v8  ;;  %v1660_v45 = vld [vmem:[#allocation11 + $0x1a0] sm:$0xff] }
 0x4a5   :  { %1497 = vmatpush.bf16.msra.mxu0 %v1451_v10  ;;  %1510 = vmatpush.bf16.msra.mxu1 %v1452_v21 }
 0x4a6   :  { %1732 = vmatpush.msrb.mxu3 %v1671_v54  ;;  %v1611_v54 = vld [vmem:[#allocation11 + $0x18] sm:$0xff] }
 0x4a8   :  { %4428 = vmatmul.msk.bf16.vlgmr.msra.gmra.mxu0 %vm527_vm9, %v1170_v8  ;;  %4429 = vmatmul.msk.bf16.vlgmr.msra.gmra.mxu1 %vm527_vm9, %v1170_v8  ;;  %v1654_v8 = vld [vmem:[#allocation11 + $0x170] sm:$0xff] }
 0x4a9   :  { %1672 = vmatpush.msrb.mxu0 %v1623_v39  ;;  %1692 = vmatpush.msrb.mxu1 %v1639_v40  ;;  %v1628_v39 = vld [vmem:[#allocation11 + $0xa0] sm:$0xff] }
 0x4aa   :  { %1713 = vmatpush.msrb.mxu2 %v1654_v8  ;;  %1733 = vmatpush.msrb.mxu3 %v1670_v9  ;;  %v1644_v40 = vld [vmem:[#allocation11 + $0x120] sm:$0xff]  ;;  %v1659_v8 = vld [vmem:[#allocation11 + $0x198] sm:$0xff]  ;;  %v1610_v9 = vld [vmem:[#allocation11 + $0x10] sm:$0xff] }
 0x4ab   :  { %1673 = vmatpush.msrb.mxu0 %v1622_v49  ;;  %1693 = vmatpush.msrb.mxu1 %v1638_v11  ;;  %v1627_v49 = vld [vmem:[#allocation11 + $0x98] sm:$0xff] }
 0x4ac   :  { %1714 = vmatpush.msrb.mxu2 %v1653_v28  ;;  %1734 = vmatpush.msrb.mxu3 %v1669_v12  ;;  %v1643_v11 = vld [vmem:[#allocation11 + $0x118] sm:$0xff]  ;;  %v1658_v28 = vld [vmem:[#allocation11 + $0x190] sm:$0xff]  ;;  %v1609_v12 = vld [vmem:[#allocation11 + $0x8] sm:$0xff] }
 0x4ad   :  { %1674 = vmatpush.msrb.mxu0 %v1621_v33  ;;  %1694 = vmatpush.msrb.mxu1 %v1637_v60  ;;  %v1626_v33 = vld [vmem:[#allocation11 + $0x90] sm:$0xff] }
 0x4ae   :  { %1715 = vmatpush.msrb.mxu2 %v1652_v23  ;;  %1735 = vmatpush.msrb.mxu3 %v1668_v63  ;;  %v1642_v60 = vld [vmem:[#allocation11 + $0x110] sm:$0xff]  ;;  %v1657_v23 = vld [vmem:[#allocation11 + $0x188] sm:$0xff]  ;;  %v1608_v63 = vld [vmem:[#allocation11] sm:$0xff] }
 0x4af   :  { %1675 = vmatpush.msrb.mxu0 %v1620_v26  ;;  %1695 = vmatpush.msrb.mxu1 %v1636_v3  ;;  %v1625_v26 = vld [vmem:[#allocation11 + $0x88] sm:$0xff] }
 0x4b0   :  { %1736 = vmatpush.msrb.mxu3 %v1667_v34  ;;  %v1641_v3 = vld [vmem:[#allocation11 + $0x108] sm:$0xff] }
 0x4cc   :  { %v1473_v31 = vpop.permute.xlu2 %1472 }
 0x51f   :  { %v1525_v13 = vpop.f32.mrf.mxu2 }
 0x520   :  { %v1526_v15 = vadd.f32 %v1525_v13, %v1473_v31 }
 0x522   :  { %v1548_v5 = vmul.f32 0.01, %v1526_v15  ;;  %vm1544_vm15 = vcmp.ge.f32.partialorder %v1526_v15, 0.0 }
 0x524   :  { %v1552_v16 = vsel %vm1544_vm15, %v1526_v15, %v1548_v5  ;;  %v1618_v5 = vld [vmem:[#allocation11 + $0x50] sm:$0xff] }
 0x525   :  { %v1499_v44 = vpop.f32.mrf.mxu0  ;;  %v1512_v22 = vpop.f32.mrf.mxu1  ;;  %v1567_v48 = vmul.f32 %v1559_v19, %v1552_v16 }
 0x526   :  { %v1500_v25 = vadd.f32 %v1499_v44, %v1473_v31  ;;  %v1513_v42 = vadd.f32 %v1512_v22, %v1473_v31  ;;  %v1619_v22 = vld [vmem:[#allocation11 + $0x58] sm:$0xff] }
 0x527   :  { %v1527_v62 = vpop.f32.mrf.mxu2  ;;  %v1538_v1 = vpop.f32.mrf.mxu3  ;;  %1676 = vmatpush.msrb.mxu0 %v1619_v22 }
 0x528   :  { %vm1542_vm10 = vcmp.ge.f32.partialorder %v1500_v25, 0.0  ;;  %v1546_v27 = vmul.f32 0.01, %v1500_v25  ;;  %vm1543_vm13 = vcmp.ge.f32.partialorder %v1513_v42, 0.0  ;;  %v1547_v0 = vmul.f32 0.01, %v1513_v42 }
 0x529   :  { %v1539_v2 = vadd.f32 %v1538_v1, %v1473_v31  ;;  %1677 = vmatpush.msrb.mxu0 %v1618_v5  ;;  %v1666_v62 = vld [vmem:[#allocation11 + $0x1d0] sm:$0xff]  ;;  %v1617_v1 = vld [vmem:[#allocation11 + $0x48] sm:$0xff] }
 0x52a   :  { %v1550_v47 = vsel %vm1542_vm10, %v1500_v25, %v1546_v27  ;;  %v1551_v24 = vsel %vm1543_vm13, %v1513_v42, %v1547_v0  ;;  %v1635_v25 = vld [vmem:[#allocation11 + $0xd8] sm:$0xff]  ;;  %1737 = vmatpush.msrb.mxu3 %v1666_v62  ;;  %v1633_v27 = vld [vmem:[#allocation11 + $0xc8] sm:$0xff] }
 0x52b   :  { %v1565_v53 = vmul.f32 %v1557_v38, %v1550_v47  ;;  %v1566_v56 = vmul.f32 %v1558_v58, %v1551_v24  ;;  %vm1545_vm14 = vcmp.ge.f32.partialorder %v1539_v2, 0.0  ;;  %v1549_v55 = vmul.f32 0.01, %v1539_v2  ;;  %v1651_v42 = vld [vmem:[#allocation11 + $0x158] sm:$0xff]  ;;  %1696 = vmatpush.msrb.mxu1 %v1635_v25  ;;  %v1649_v0 = vld [vmem:[#allocation11 + $0x148] sm:$0xff]  ;;  %1678 = vmatpush.msrb.mxu0 %v1617_v1 }
 0x52c   :  { %1716 = vmatpush.msrb.mxu2 %v1651_v42 }
 0x52d   :  { %v1501_v57 = vpop.f32.mrf.mxu0  ;;  %v1514_v37 = vpop.f32.mrf.mxu1  ;;  %v1553_v43 = vsel %vm1545_vm14, %v1539_v2, %v1549_v55  ;;  %v1569_v61 = vadd.f32 %v1566_v56, %v1565_v53  ;;  %v1665_v2 = vld [vmem:[#allocation11 + $0x1c8] sm:$0xff]  ;;  %v1631_v53 = vld [vmem:[#allocation11 + $0xb8] sm:$0xff] }
 0x52e   :  { %v1568_v17 = vmul.f32 %v1560_v29, %v1553_v43  ;;  %1738 = vmatpush.msrb.mxu3 %v1665_v2  ;;  %v1647_v56 = vld [vmem:[#allocation11 + $0x138] sm:$0xff]  ;;  %v1614_v57 = vld [vmem:[#allocation11 + $0x30] sm:$0xff] }
 0x52f   :  { %v1540_v30 = vpop.f32.mrf.mxu3  ;;  %v1570_v59 = vadd.f32 %v1569_v61, %v1567_v48  ;;  %v1663_v55 = vld [vmem:[#allocation11 + $0x1b8] sm:$0xff]  ;;  %v1630_v37 = vld [vmem:[#allocation11 + $0xb0] sm:$0xff]  ;;  %v1613_v61 = vld [vmem:[#allocation11 + $0x28] sm:$0xff] }
 0x530   :  { %v1662_v48 = vld [vmem:[#allocation11 + $0x1b0] sm:$0xff]  ;;  %v1629_v30 = vld [vmem:[#allocation11 + $0xa8] sm:$0xff] }
 0x531   :  { %v1571_v35 = vadd.f32 %v1570_v59, %v1568_v17  ;;  %v1645_v17 = vld [vmem:[#allocation11 + $0x128] sm:$0xff] }
 0x532   :  { %v1661_v59 = vld [vmem:[#allocation11 + $0x1a8] sm:$0xff] }
 0x533   :  { %1572 = vadd.xlane.f32.xlu0 %v1571_v35  ;;  %v1612_v35 = vld [vmem:[#allocation11 + $0x20] sm:$0xff] }
 0x5a6   :  { %v1573_v36 = vpop.xlane.xlu0 %1572 }
 0x5a7   :  { %v1574_v50 = vmul.f32 0.001953125, %v1573_v36  ;;  %v1624_v36 = vld [vmem:[#allocation11 + $0x80] sm:$0xff] }
 0x5a9   :  { %v5994_v52 = vsub.f32 %v1550_v47, %v1574_v50  ;;  %v5996_v41 = vsub.f32 %v1551_v24, %v1574_v50  ;;  %v5998_v32 = vsub.f32 %v1552_v16, %v1574_v50  ;;  %v6000_v6 = vsub.f32 %v1553_v43, %v1574_v50  ;;  %v1632_v47 = vld [vmem:[#allocation11 + $0xc0] sm:$0xff]  ;;  %v1646_v43 = vld [vmem:[#allocation11 + $0x130] sm:$0xff] }
 0x5aa   :  { %v1648_v24 = vld [vmem:[#allocation11 + $0x140] sm:$0xff] }
 0x5ab   :  { %v1579_v14 = vmul.f32 %v5994_v52, %v1557_v38  ;;  %v1580_v51 = vmul.f32 %v5996_v41, %v1558_v58  ;;  %v1581_v4 = vmul.f32 %v5998_v32, %v1559_v19  ;;  %v1582_v46 = vmul.f32 %v6000_v6, %v1560_v29  ;;  %v1634_v38 = vld [vmem:[#allocation11 + $0xd0] sm:$0xff]  ;;  %v1616_v19 = vld [vmem:[#allocation11 + $0x40] sm:$0xff]  ;;  %v1615_v29 = vld [vmem:[#allocation11 + $0x38] sm:$0xff] }
 0x5ac   :  { %v1650_v58 = vld [vmem:[#allocation11 + $0x150] sm:$0xff]  ;;  %1697 = vmatpush.msrb.mxu1 %v1634_v38  ;;  %1679 = vmatpush.msrb.mxu0 %v1616_v19  ;;  %v1664_v16 = vld [vmem:[#allocation11 + $0x1c0] sm:$0xff] }
 0x5ad   :  { %v1583_v18 = vmul.f32 %v1579_v14, %v1579_v14  ;;  %v1584_v10 = vmul.f32 %v1580_v51, %v1580_v51  ;;  %v1585_v21 = vmul.f32 %v1581_v4, %v1581_v4  ;;  %v1586_v31 = vmul.f32 %v1582_v46, %v1582_v46  ;;  %1717 = vmatpush.msrb.mxu2 %v1650_v58  ;;  %v1640_v50 = vld [vmem:[#allocation11 + $0x100] sm:$0xff] }
 0x5ae   :  { %1698 = vmatpush.msrb.mxu1 %v1633_v27  ;;  %1739 = vmatpush.msrb.mxu3 %v1664_v16  ;;  %v1656_v14 = vld [vmem:[#allocation11 + $0x180] sm:$0xff] }
 0x5af   :  { %v1587_v13 = vadd.f32 %v1584_v10, %v1583_v18  ;;  %1718 = vmatpush.msrb.mxu2 %v1649_v0  ;;  %1680 = vmatpush.msrb.mxu0 %v1615_v29 }
 0x5b0   :  { %1699 = vmatpush.msrb.mxu1 %v1632_v47  ;;  %1740 = vmatpush.msrb.mxu3 %v1663_v55  ;;  %v4587_v47 = vld [vmem:[#allocation6 + $0x6] ss:$0 sm:$0xff]  ;;  %v4591_v55 = vld [vmem:[#allocation6 + $0x5] ss:$0 sm:$0xff] }
 0x5b1   :  { %v1588_v15 = vadd.f32 %v1587_v13, %v1585_v21  ;;  %1719 = vmatpush.msrb.mxu2 %v1648_v24  ;;  %1681 = vmatpush.msrb.mxu0 %v1614_v57  ;;  %v4588_v24 = vld [vmem:[#allocation6 + $0x7] ss:$0 sm:$0xff]  ;;  %v4966_v57 = vmov 5  }
 0x5b2   :  { %1700 = vmatpush.msrb.mxu1 %v1631_v53  ;;  %1741 = vmatpush.msrb.mxu3 %v1662_v48 }
 0x5b3   :  { %v1589_v44 = vadd.f32 %v1588_v15, %v1586_v31  ;;  %1720 = vmatpush.msrb.mxu2 %v1647_v56  ;;  %1682 = vmatpush.msrb.mxu0 %v1613_v61 }
 0x5b4   :  { %1701 = vmatpush.msrb.mxu1 %v1630_v37  ;;  %1742 = vmatpush.msrb.mxu3 %v1661_v59  ;;  %v4589_v59 = vld [vmem:[#allocation6 + $0x1] ss:$0 sm:$0xff] }
 0x5b5   :  { %1590 = vadd.xlane.f32.xlu1 %v1589_v44  ;;  %1721 = vmatpush.msrb.mxu2 %v1646_v43 }
 0x5b6   :  { %1702 = vmatpush.msrb.mxu1 %v1629_v30  ;;  %1683 = vmatpush.msrb.mxu0 %v1612_v35  ;;  %v4592_v30 = vld [vmem:[#allocation6 + $0x2] ss:$0 sm:$0xff] }
 0x5b7   :  { %1722 = vmatpush.msrb.mxu2 %v1645_v17  ;;  %1743 = vmatpush.msrb.mxu3 %v1660_v45  ;;  %v4593_v17 = vld [vmem:[#allocation6 + $0x3] ss:$0 sm:$0xff] }
 0x5b8   :  { %1703 = vmatpush.msrb.mxu1 %v1628_v39  ;;  %1684 = vmatpush.msrb.mxu0 %v1611_v54  ;;  %v4590_v39 = vld [vmem:[#allocation6] ss:$0 sm:$0xff] }
 0x5b9   :  { %1723 = vmatpush.msrb.mxu2 %v1644_v40  ;;  %1744 = vmatpush.msrb.mxu3 %v1659_v8 }
 0x5ba   :  { %1704 = vmatpush.msrb.mxu1 %v1627_v49  ;;  %1685 = vmatpush.msrb.mxu0 %v1610_v9 }
 0x5bb   :  { %1724 = vmatpush.msrb.mxu2 %v1643_v11  ;;  %1745 = vmatpush.msrb.mxu3 %v1658_v28  ;;  %v4967_v28 = vmov 6  }
 0x5bc   :  { %1705 = vmatpush.msrb.mxu1 %v1626_v33  ;;  %1686 = vmatpush.msrb.mxu0 %v1609_v12 }
 0x5bd   :  { %1725 = vmatpush.msrb.mxu2 %v1642_v60  ;;  %1746 = vmatpush.msrb.mxu3 %v1657_v23  ;;  %v1752_v60 = vld [vmem:[#allocation4 + $0x14] sm:$0xf] }
 0x5be   :  { %1706 = vmatpush.msrb.mxu1 %v1625_v26  ;;  %1687 = vmatpush.msrb.mxu0 %v1608_v63 }
 0x5bf   :  { %1726 = vmatpush.msrb.mxu2 %v1641_v3  ;;  %1747 = vmatpush.msrb.mxu3 %v1656_v14  ;;  %v1846_v14 = vld [vmem:[#allocation4 + $0x18] sm:$0xf] }
 0x5c0   :  { %1707 = vmatpush.msrb.mxu1 %v1624_v36  ;;  %4558 = vset.pattern.permute.xlu2 %v4966_v57 }
 0x5c1   :  { %1727 = vmatpush.msrb.mxu2 %v1640_v50 }
 0x628   :  { %v1591_v51 = vpop.xlane.xlu1 %1590 }
 0x629   :  { %v1592_v4 = vmul.f32 0.001953125, %v1591_v51 }
 0x62b   :  { %v1593_v46 = vadd.f32 1e-05, %v1592_v4 }
 0x62d   :  { %4669 = vrsqrt.f32 %v1593_v46  ;;  %vm1600_vm10 = vweird.f32 %v1593_v46 }
 0x633   :  { %v4670_v18 = vpop.eup %4669 }
 0x634   :  { %v1595_v10 = vmul.f32 %v4670_v18, %v1593_v46  ;;  %vm1601_vm15 = vweird.f32 %v4670_v18 }
 0x635   :  { %vm1602_vm13 = vmor %vm1600_vm10, %vm1601_vm15 }
 0x636   :  { %v1596_v21 = vmul.f32 %v4670_v18, %v1595_v10 }
 0x638   :  { %v1597_v13 = vmul.f32 0.5, %v1596_v21  ;;  %v4968_v21 = vmov 7  }
 0x639   :  { %4560 = vset.pattern.permute.xlu1 %v4968_v21 }
 0x63a   :  { %v1598_v31 = vsub.f32 1.5, %v1597_v13  ;;  %v4598_v13 = vld [vmem:[#allocation6 + $0x8] ss:$0 sm:$0xff] }
 0x63c   :  { %v1599_v15 = vmul.f32 %v4670_v18, %v1598_v31 }
 0x63e   :  { %v1603_v44 = vsel %vm1602_vm13, %v4670_v18, %v1599_v15  ;;  %v4597_v15 = vld [vmem:[#allocation6 + $0x7] ss:$0 sm:$0xff] }
 0x63f   :  { %v6011_v22 = vmul.f32 %v1603_v44, %v5994_v52  ;;  %v6014_v25 = vmul.f32 %v1603_v44, %v5996_v41  ;;  %v6017_v42 = vmul.f32 %v1603_v44, %v5998_v32  ;;  %v6020_v34 = vmul.f32 %v1603_v44, %v6000_v6  ;;  %v4586_v32 = vld [vmem:[#allocation6 + $0x8] ss:$0 sm:$0xff] }
 0x641   :  { %1688 = vmatmul.f32.vlgmr.msrb.gmra.mxu0 %v6011_v22  ;;  %1708 = vmatmul.f32.vlgmr.msrb.gmra.mxu1 %v6014_v25 }
 0x642   :  { %1728 = vmatmul.f32.vlgmr.msrb.gmra.mxu2 %v6017_v42  ;;  %1748 = vmatmul.f32.vlgmr.msrb.gmra.mxu3 %v6020_v34 }
 0x6be   :  { %v1689_v5 = vpop.f32.mrf.mxu0  ;;  %v1709_v52 = vpop.f32.mrf.mxu1 }
 0x6bf   :  { %v1710_v38 = vadd.f32 %v1709_v52, %v1689_v5  ;;  %v4594_v52 = vld [vmem:[#allocation6 + $0x6] ss:$0 sm:$0xff] }
 0x6c5   :  { %v1729_v58 = vpop.f32.mrf.mxu2  ;;  %v1749_v62 = vpop.f32.mrf.mxu3 }
 0x6c6   :  { %v1730_v41 = vadd.f32 %v1729_v58, %v1710_v38 }
 0x6c8   :  { %v6026_v1 = vadd.f32 %v1749_v62, %v1730_v41 }
 0x6ca   :  { %1759 = vrot.lane.b32.xlu1 %v6026_v1, %s4960_s17  ;;  %1753 = vrot.lane.b32.xlu0 %v6026_v1, %s4961_s19 }
 0x6cb   :  { %1796 = vrot.lane.b32.xlu2 %v6026_v1, %s4962_s20 }
 0x6d3   :  { %1784 = vrot.lane.b32.xlu2 %v6026_v1, %s4963_s4 }
 0x6db   :  { %1790 = vrot.lane.b32.xlu2 %v6026_v1, %s4964_s5 }
 0x6e3   :  { %1778 = vrot.lane.b32.xlu2 %v6026_v1, %s4950_s22 }
 0x6eb   :  { %1765 = vrot.lane.b32.xlu2 %v6026_v1, %s4965_s23 }
 0x6f3   :  { %1771 = vrot.lane.b32.xlu2 %v6026_v1, %s4952_s25 }
 0x6fb   :  { %1817 = vperm.xlu2 %4558, %v5914_v20  }
 0x703   :  { %4559 = vset.pattern.permute.xlu2 %v4967_v28 }
 0x704   :  { %1849 = vperm.xlu2 %4559, %v5914_v20  }
 0x725   :  { %v1797_v6 = vpop.permute.xlu2 %1796 }
 0x726   :  { %v1800_v27 = vmul.f32 %v4586_v32, %v1797_v6 }
 0x728   :  { %v1815_v0 = vpack.c.bf16 %v1800_v27, %v1800_v27  ;;  %v4599_v27 = vld [vmem:[#allocation6 + $0x3] ss:$0 sm:$0xff] }
 0x72a   :  { %v1824_v2 = vsel %vm531_vm1, %v1815_v0, 0 }
 0x72b   :  { %1829 = vmatpush.bf16.msra.mxu0 %v1824_v2 }
 0x72d   :  { %v1785_v19 = vpop.permute.xlu2 %1784 }
 0x72e   :  { %v1788_v29 = vmul.f32 %v4587_v47, %v1785_v19  ;;  %v4595_v47 = vld [vmem:[#allocation6 + $0x2] ss:$0 sm:$0xff] }
 0x735   :  { %v1791_v16 = vpop.permute.xlu2 %1790 }
 0x736   :  { %v1794_v53 = vmul.f32 %v4588_v24, %v1791_v16 }
 0x738   :  { %v1814_v56 = vpack.c.bf16 %v1794_v53, %v1788_v29  ;;  %v4596_v29 = vld [vmem:[#allocation6 + $0x1] ss:$0 sm:$0xff]  ;;  %v4601_v53 = vld [vmem:[#allocation6] ss:$0 sm:$0xff] }
 0x73a   :  { %1830 = vmatpush.bf16.msra.mxu0 %v1814_v56 }
 0x73c   :  { %v1760_v35 = vpop.permute.xlu1 %1759  ;;  %v1754_v40 = vpop.permute.xlu0 %1753 }
 0x73d   :  { %v1779_v37 = vpop.permute.xlu2 %1778  ;;  %v1763_v11 = vmul.f32 %v4589_v59, %v1760_v35  ;;  %v1757_v8 = vmul.f32 %v4590_v39, %v1754_v40 }
 0x73e   :  { %v1782_v43 = vmul.f32 %v4591_v55, %v1779_v37 }
 0x73f   :  { %v1811_v33 = vpack.c.bf16 %v1763_v11, %v1757_v8  ;;  %v1962_v8 = vld [vmem:[#allocation4 + $0x20] sm:$0xf] }
 0x740   :  { %v1813_v48 = vpack.c.bf16 %v1782_v43, %v6026_v1 }
 0x742   :  { %1831 = vmatpush.bf16.msra.mxu0 %v1813_v48 }
 0x745   :  { %v1766_v61 = vpop.permute.xlu2 %1765 }
 0x746   :  { %v1769_v54 = vmul.f32 %v4592_v30, %v1766_v61  ;;  %v1868_v30 = vld [vmem:[#allocation4 + $0x1c] sm:$0xf] }
 0x74d   :  { %v1772_v45 = vpop.permute.xlu2 %1771 }
 0x74e   :  { %v1775_v49 = vmul.f32 %v4593_v17, %v1772_v45  ;;  %v4969_v17 = vmov 8  }
 0x74f   :  { %4561 = vset.pattern.permute.xlu0 %v4969_v17 }
 0x750   :  { %v1812_v9 = vpack.c.bf16 %v1775_v49, %v1769_v54 }
 0x752   :  { %1832 = vmatpush.bf16.msra.mxu0 %v1812_v9 }
 0x755   :  { %v1818_v12 = vpop.permute.xlu2 %1817 }
 0x756   :  { %1833 = vmatpush.bf16.msra.mxu0 %v1811_v33 }
 0x759   :  { %4433 = vmatmul.msk.bf16.vlgmr.msra.gmra.mxu0 %vm527_vm9, %v1752_v60 }
 0x75e   :  { %v1850_v51 = vpop.permute.xlu2 %1849 }
 0x7d6   :  { %v1835_v26 = vpop.f32.mrf.mxu0 }
 0x7d7   :  { %v1836_v3 = vadd.f32 %v1835_v26, %v1818_v12  ;;  %v4602_v12 = vld [vmem:[#allocation6 + $0x8] ss:$0 sm:$0xff] }
 0x7d9   :  { %vm1839_vm14 = vcmp.ge.f32.partialorder %v1836_v3, 0.0  ;;  %v1840_v23 = vmul.f32 0.01, %v1836_v3 }
 0x7db   :  { %v1841_v63 = vsel %vm1839_vm14, %v1836_v3, %v1840_v23 }
 0x7dc   :  { %v6050_v36 = vpack.c.bf16 %v1841_v63, %v6026_v1  ;;  %v4600_v1 = vld [vmem:[#allocation6 + $0x5] ss:$0 sm:$0xff] }
 0x7de   :  { %v1837_v50 = vpop.f32.mrf.mxu0  ;;  %1862 = vmatpush.bf16.msra.mxu1 %v6050_v36 }
 0x7df   :  { %v4603_v50 = vld [vmem:[#allocation6 + $0x7] ss:$0 sm:$0xff] }
 0x7e1   :  { %4434 = vmatmul.msk.bf16.vlgmr.msra.gmra.mxu1 %vm633_vm11, %v1846_v14  ;;  %v4606_v14 = vld [vmem:[#allocation6 + $0x6] ss:$0 sm:$0xff] }
 0x85e   :  { %v1864_v4 = vpop.f32.mrf.mxu1 }
 0x85f   :  { %v1865_v46 = vadd.f32 %v1864_v4, %v1850_v51 }
 0x861   :  { %1906 = vrot.lane.b32.xlu1 %v1865_v46, %s4964_s5  ;;  %1900 = vrot.lane.b32.xlu2 %v1865_v46, %s4963_s4 }
 0x862   :  { %1912 = vrot.lane.b32.xlu0 %v1865_v46, %s4962_s20 }
 0x866   :  { %v1866_v18 = vpop.f32.mrf.mxu1 }
 0x869   :  { %1887 = vrot.lane.b32.xlu1 %v1865_v46, %s4952_s25  ;;  %1881 = vrot.lane.b32.xlu2 %v1865_v46, %s4965_s23 }
 0x86a   :  { %1894 = vrot.lane.b32.xlu0 %v1865_v46, %s4950_s22 }
 0x871   :  { %1875 = vrot.lane.b32.xlu2 %v1865_v46, %s4960_s17  ;;  %1933 = vperm.xlu1 %4560, %v5914_v20  }
 0x872   :  { %1869 = vrot.lane.b32.xlu0 %v1865_v46, %s4961_s19 }
 0x87a   :  { %1966 = vperm.xlu0 %4561, %v5914_v20  }
 0x8bb   :  { %v1901_v10 = vpop.permute.xlu2 %1900 }
 0x8bc   :  { %v1904_v32 = vmul.f32 %v4594_v52, %v1901_v10 }
 0x8c3   :  { %v1882_v58 = vpop.permute.xlu2 %1881 }
 0x8c4   :  { %v1885_v56 = vmul.f32 %v4595_v47, %v1882_v58 }
 0x8cb   :  { %v1876_v55 = vpop.permute.xlu2 %1875 }
 0x8cc   :  { %v1879_v43 = vmul.f32 %v4596_v29, %v1876_v55  ;;  %v4610_v29 = vld [vmem:[#allocation6 + $0x4] ss:$0 sm:$0xff] }
 0x8d3   :  { %v1907_v31 = vpop.permute.xlu1 %1906 }
 0x8d4   :  { %v1913_v44 = vpop.permute.xlu0 %1912  ;;  %v1910_v41 = vmul.f32 %v4597_v15, %v1907_v31  ;;  %v4605_v31 = vld [vmem:[#allocation6 + $0x2] ss:$0 sm:$0xff] }
 0x8d5   :  { %v1916_v5 = vmul.f32 %v4598_v13, %v1913_v44  ;;  %v4608_v13 = vld [vmem:[#allocation6 + $0x5] ss:$0 sm:$0xff]  ;;  %v4604_v44 = vld [vmem:[#allocation6 + $0x3] ss:$0 sm:$0xff] }
 0x8d6   :  { %v1930_v6 = vpack.c.bf16 %v1910_v41, %v1904_v32 }
 0x8d7   :  { %v1931_v38 = vpack.c.bf16 %v1916_v5, %v1916_v5 }
 0x8d9   :  { %v1940_v62 = vsel %vm531_vm1, %v1931_v38, 0 }
 0x8da   :  { %1945 = vmatpush.bf16.msra.mxu2 %v1940_v62  ;;  %v4607_v62 = vld [vmem:[#allocation6 + $0x1] ss:$0 sm:$0xff] }
 0x8db   :  { %v1888_v2 = vpop.permute.xlu1 %1887 }
 0x8dc   :  { %v1895_v0 = vpop.permute.xlu0 %1894  ;;  %v1891_v16 = vmul.f32 %v4599_v27, %v1888_v2 }
 0x8dd   :  { %v1898_v19 = vmul.f32 %v4600_v1, %v1895_v0 }
 0x8de   :  { %1946 = vmatpush.bf16.msra.mxu2 %v1930_v6  ;;  %v1928_v57 = vpack.c.bf16 %v1891_v16, %v1885_v56 }
 0x8df   :  { %v1929_v24 = vpack.c.bf16 %v1898_v19, %v1865_v46  ;;  %v1988_v19 = vld [vmem:[#allocation4 + $0x24] sm:$0xf] }
 0x8e2   :  { %1947 = vmatpush.bf16.msra.mxu2 %v1929_v24 }
 0x8e3   :  { %v1934_v59 = vpop.permute.xlu1 %1933 }
 0x8e4   :  { %v1870_v37 = vpop.permute.xlu0 %1869 }
 0x8e5   :  { %v1873_v48 = vmul.f32 %v4601_v53, %v1870_v37  ;;  %v2117_v37 = vld [vmem:[#allocation12 + $0x78] sm:$0xff] }
 0x8e6   :  { %1948 = vmatpush.bf16.msra.mxu2 %v1928_v57 }
 0x8e7   :  { %v1927_v61 = vpack.c.bf16 %v1879_v43, %v1873_v48  ;;  %v2116_v43 = vld [vmem:[#allocation12 + $0x70] sm:$0xff]  ;;  %v2115_v48 = vld [vmem:[#allocation12 + $0x68] sm:$0xff] }
 0x8ea   :  { %1949 = vmatpush.bf16.msra.mxu2 %v1927_v61  ;;  %v2114_v61 = vld [vmem:[#allocation12 + $0x60] sm:$0xff] }
 0x8ec   :  { %v1967_v9 = vpop.permute.xlu0 %1966 }
 0x8ed   :  { %4435 = vmatmul.msk.bf16.vlgmr.msra.gmra.mxu2 %vm527_vm9, %v1868_v30 }
 0x970   :  { %v1951_v35 = vpop.f32.mrf.mxu2 }
 0x971   :  { %v1952_v39 = vadd.f32 %v1951_v35, %v1934_v59 }
 0x973   :  { %vm1955_vm15 = vcmp.ge.f32.partialorder %v1952_v39, 0.0  ;;  %v1956_v40 = vmul.f32 0.01, %v1952_v39 }
 0x975   :  { %v1957_v45 = vsel %vm1955_vm15, %v1952_v39, %v1956_v40  ;;  %v2113_v40 = vld [vmem:[#allocation12 + $0x58] sm:$0xff] }
 0x976   :  { %v1964_v54 = vpack.c.bf16 %v1957_v45, %v1957_v45  ;;  %v2112_v45 = vld [vmem:[#allocation12 + $0x50] sm:$0xff] }
 0x978   :  { %v1953_v49 = vpop.f32.mrf.mxu2  ;;  %v1973_v11 = vsel %vm531_vm1, %v1964_v54, 0  ;;  %v2111_v54 = vld [vmem:[#allocation12 + $0x48] sm:$0xff] }
 0x979   :  { %1981 = vmatpush.bf16.msra.mxu3 %v1973_v11  ;;  %v2110_v49 = vld [vmem:[#allocation12 + $0x40] sm:$0xff]  ;;  %v2109_v11 = vld [vmem:[#allocation12 + $0x38] sm:$0xff] }
 0x97d   :  { %1982 = vmatpush.bf16.msra.mxu3 %v6050_v36  ;;  %v4970_v36 = vmov 9  }
 0x97e   :  { %4562 = vset.pattern.permute.xlu2 %v4970_v36 }
 0x980   :  { %4436 = vmatmul.msk.bf16.vlgmr.msra.gmra.mxu3 %vm1102_vm12, %v1962_v8  ;;  %v2108_v8 = vld [vmem:[#allocation12 + $0x30] sm:$0xff] }
 0x981   :  { %2118 = vmatpush.msrb.mxu3 %v2117_v37 }
 0x983   :  { %2119 = vmatpush.msrb.mxu3 %v2116_v43 }
 0x985   :  { %2120 = vmatpush.msrb.mxu3 %v2115_v48 }
 0x987   :  { %2121 = vmatpush.msrb.mxu3 %v2114_v61 }
 0x989   :  { %2122 = vmatpush.msrb.mxu3 %v2113_v40 }
 0x98b   :  { %2123 = vmatpush.msrb.mxu3 %v2112_v45 }
 0x98d   :  { %2124 = vmatpush.msrb.mxu3 %v2111_v54 }
 0x98f   :  { %2125 = vmatpush.msrb.mxu3 %v2110_v49 }
 0x991   :  { %2126 = vmatpush.msrb.mxu3 %v2109_v11  ;;  %v2228_v11 = vld [vmem:[#allocation4 + $0x2c] sm:$0xf] }
 0x993   :  { %2127 = vmatpush.msrb.mxu3 %v2108_v8 }
 0xa03   :  { %v1984_v33 = vpop.f32.mrf.mxu3 }
 0xa04   :  { %v1985_v60 = vadd.f32 %v1984_v33, %v1967_v9  ;;  %v2107_v9 = vld [vmem:[#allocation12 + $0x28] sm:$0xff]  ;;  %v2106_v33 = vld [vmem:[#allocation12 + $0x20] sm:$0xff] }
 0xa05   :  { %2128 = vmatpush.msrb.mxu3 %v2107_v9 }
 0xa06   :  { %2001 = vrot.lane.b32.xlu0 %v1985_v60, %s4965_s23  ;;  %2020 = vrot.lane.b32.xlu1 %v1985_v60, %s4963_s4 }
 0xa07   :  { %2032 = vrot.lane.b32.xlu2 %v1985_v60, %s4962_s20  ;;  %2129 = vmatpush.msrb.mxu3 %v2106_v33 }
 0xa0b   :  { %v1986_v28 = vpop.f32.mrf.mxu3 }
 0xa0c   :  { %v2104_v28 = vld [vmem:[#allocation12 + $0x10] sm:$0xff] }
 0xa0e   :  { %1995 = vrot.lane.b32.xlu0 %v1985_v60, %s4960_s17  ;;  %2014 = vrot.lane.b32.xlu1 %v1985_v60, %s4950_s22 }
 0xa0f   :  { %2026 = vrot.lane.b32.xlu2 %v1985_v60, %s4964_s5 }
 0xa16   :  { %1989 = vrot.lane.b32.xlu1 %v1985_v60, %s4961_s19 }
 0xa17   :  { %2007 = vrot.lane.b32.xlu2 %v1985_v60, %s4952_s25 }
 0xa1f   :  { %2053 = vperm.xlu2 %4562, %v5914_v20   ;;  %v4609_v20 = vld [vmem:[#allocation6] ss:$0 sm:$0xff] }
 0xa61   :  { %v2033_v26 = vpop.permute.xlu2 %2032 }
 0xa62   :  { %v2036_v3 = vmul.f32 %v4602_v12, %v2033_v26  ;;  %v2103_v12 = vld [vmem:[#allocation12 + $0x8] sm:$0xff]  ;;  %v2102_v26 = vld [vmem:[#allocation12] sm:$0xff] }
 0xa64   :  { %v2051_v23 = vpack.c.bf16 %v2036_v3, %v2036_v3 }
 0xa66   :  { %v2060_v63 = vsel %vm531_vm1, %v2051_v23, 0 }
 0xa67   :  { %2065 = vmatpush.bf16.msrb.mxu1 %v2060_v63 }
 0xa69   :  { %v2027_v51 = vpop.permute.xlu2 %2026 }
 0xa6a   :  { %v2030_v46 = vmul.f32 %v4603_v50, %v2027_v51 }
 0xa71   :  { %v2008_v52 = vpop.permute.xlu2 %2007 }
 0xa72   :  { %v2011_v41 = vmul.f32 %v4604_v44, %v2008_v52 }
 0xa78   :  { %v2021_v4 = vpop.permute.xlu1 %2020  ;;  %v2002_v21 = vpop.permute.xlu0 %2001 }
 0xa79   :  { %v2024_v18 = vmul.f32 %v4606_v14, %v2021_v4  ;;  %v2005_v38 = vmul.f32 %v4605_v31, %v2002_v21  ;;  %v2054_v47 = vpop.permute.xlu2 %2053 }
 0xa7b   :  { %v2050_v10 = vpack.c.bf16 %v2030_v46, %v2024_v18  ;;  %v2048_v32 = vpack.c.bf16 %v2011_v41, %v2005_v38  ;;  %v4973_v38 = vmov 10   ;;  %v4613_v41 = vld [vmem:[#allocation8 + $0x6] ss:$0 sm:$0xff] }
 0xa7c   :  { %4563 = vset.pattern.permute.xlu0 %v4973_v38 }
 0xa7d   :  { %2066 = vmatpush.bf16.msrb.mxu1 %v2050_v10 }
 0xa80   :  { %v2015_v15 = vpop.permute.xlu1 %2014  ;;  %v1996_v1 = vpop.permute.xlu0 %1995 }
 0xa81   :  { %v2018_v5 = vmul.f32 %v4608_v13, %v2015_v15  ;;  %v1999_v27 = vmul.f32 %v4607_v62, %v1996_v1  ;;  %v4611_v13 = vld [vmem:[#allocation8 + $0x8] ss:$0 sm:$0xff]  ;;  %v4614_v62 = vld [vmem:[#allocation8 + $0x7] ss:$0 sm:$0xff] }
 0xa83   :  { %v2049_v58 = vpack.c.bf16 %v2018_v5, %v1985_v60  ;;  %v2105_v60 = vld [vmem:[#allocation12 + $0x18] sm:$0xff] }
 0xa84   :  { %2130 = vmatpush.msrb.mxu3 %v2105_v60 }
 0xa85   :  { %2067 = vmatpush.bf16.msrb.mxu1 %v2049_v58  ;;  %v6093_v58 = vld [vmem:[%s6713_s2] sm:$0xff] }
 0xa86   :  { %2131 = vmatpush.msrb.mxu3 %v2104_v28  ;;  %v4619_v28 = vld [vmem:[#allocation8 + $0x8] ss:$0 sm:$0xff] }
 0xa88   :  { %v1990_v6 = vpop.permute.xlu1 %1989  ;;  %2132 = vmatpush.msrb.mxu3 %v2103_v12 }
 0xa89   :  { %v1993_v0 = vmul.f32 %v4609_v20, %v1990_v6  ;;  %2068 = vmatpush.bf16.msrb.mxu1 %v2048_v32  ;;  %v4612_v20 = vld [vmem:[#allocation8 + $0x5] ss:$0 sm:$0xff] }
 0xa8a   :  { %2133 = vmatpush.msrb.mxu3 %v2102_v26 }
 0xa8b   :  { %v2047_v2 = vpack.c.bf16 %v1999_v27, %v1993_v0 }
 0xa8d   :  { %2069 = vmatpush.bf16.msrb.mxu1 %v2047_v2  ;;  %v4616_v2 = vld [vmem:[#allocation8 + $0x2] ss:$0 sm:$0xff] }
 0xa90   :  { %4437 = vmatmul.msk.bf16.vlgmr.msrb.gmra.mxu1 %vm527_vm9, %v1988_v19  ;;  %v4617_v19 = vld [vmem:[#allocation8 + $0x3] ss:$0 sm:$0xff] }
 0xb0d   :  { %v2071_v24 = vpop.f32.mrf.mxu1 }
 0xb0e   :  { %v2072_v16 = vadd.f32 %v2071_v24, %v2054_v47 }
 0xb10   :  { %v2076_v53 = vmul.f32 0.01, %v2072_v16  ;;  %vm2075_vm10 = vcmp.ge.f32.partialorder %v2072_v16, 0.0 }
 0xb12   :  { %v2077_v56 = vsel %vm2075_vm10, %v2072_v16, %v2076_v53 }
 0xb13   :  { %v2080_v55 = vmul.f32 %v4610_v29, %v2077_v56 }
 0xb15   :  { %v2073_v57 = vpop.f32.mrf.mxu1  ;;  %2081 = vadd.xlane.f32.xlu1 %v2080_v55  ;;  %v4618_v55 = vld [vmem:[#allocation8] ss:$0 sm:$0xff] }
 0xb88   :  { %v2082_v30 = vpop.xlane.xlu1 %2081 }
 0xb89   :  { %v2083_v17 = vmul.f32 0.03125, %v2082_v30  ;;  %v2138_v30 = vld [vmem:[#allocation4 + $0x28] sm:$0xf] }
 0xb8b   :  { %v2084_v59 = vsub.f32 %v2077_v56, %v2083_v17  ;;  %v4615_v56 = vld [vmem:[#allocation8 + $0x1] ss:$0 sm:$0xff]  ;;  %v4974_v17 = vmov 11  }
 0xb8c   :  { %4564 = vset.pattern.permute.xlu2 %v4974_v17  ;;  %v4627_v17 = vld [vmem:[#allocation8 + $0x8] ss:$0 sm:$0xff] }
 0xb8d   :  { %v2085_v35 = vmul.f32 %v4610_v29, %v2084_v59 }
 0xb8f   :  { %v2086_v39 = vmul.f32 %v2085_v35, %v2085_v35 }
 0xb91   :  { %2087 = vadd.xlane.f32.xlu0 %v2086_v39 }
 0xba5   :  { %2199 = vperm.xlu0 %4563, %v6093_v58  }
 0xc04   :  { %v2088_v3 = vpop.xlane.xlu0 %2087 }
 0xc05   :  { %v2089_v23 = vmul.f32 0.03125, %v2088_v3 }
 0xc07   :  { %v2090_v63 = vadd.f32 1e-05, %v2089_v23 }
 0xc09   :  { %4671 = vrsqrt.f32 %v2090_v63  ;;  %vm2097_vm14 = vweird.f32 %v2090_v63 }
 0xc0f   :  { %v4672_v36 = vpop.eup %4671 }
 0xc10   :  { %v2092_v50 = vmul.f32 %v4672_v36, %v2090_v63  ;;  %vm2098_vm13 = vweird.f32 %v4672_v36  ;;  %v4975_v63 = vmov 12  }
 0xc11   :  { %vm2099_vm15 = vmor %vm2097_vm14, %vm2098_vm13  ;;  %4565 = vset.pattern.permute.xlu1 %v4975_v63 }
 0xc12   :  { %v2093_v14 = vmul.f32 %v4672_v36, %v2092_v50  ;;  %v4621_v50 = vld [vmem:[#allocation8 + $0x6] ss:$0 sm:$0xff] }
 0xc14   :  { %v2094_v51 = vmul.f32 0.5, %v2093_v14  ;;  %v4624_v14 = vld [vmem:[#allocation8 + $0x7] ss:$0 sm:$0xff] }
 0xc16   :  { %v2095_v4 = vsub.f32 1.5, %v2094_v51  ;;  %v4620_v51 = vld [vmem:[#allocation8 + $0x5] ss:$0 sm:$0xff] }
 0xc18   :  { %v2096_v46 = vmul.f32 %v4672_v36, %v2095_v4 }
 0xc1a   :  { %v2100_v18 = vsel %vm2099_vm15, %v4672_v36, %v2096_v46 }
 0xc1b   :  { %v6080_v10 = vmul.f32 %v2100_v18, %v2084_v59  ;;  %v2200_v59 = vpop.permute.xlu0 %2199 }
 0xc1d   :  { %2134 = vmatmul.f32.vlgmr.msrb.gmra.mxu3 %v6080_v10 }
 0xca0   :  { %v2135_v21 = vpop.f32.mrf.mxu3 }
 0xca1   :  { %2145 = vrot.lane.b32.xlu1 %v2135_v21, %s4971_s26  ;;  %2178 = vrot.lane.b32.xlu2 %v2135_v21, %s4963_s4 }
 0xca9   :  { %2162 = vrot.lane.b32.xlu2 %v2135_v21, %s4950_s22 }
 0xcb1   :  { %2172 = vrot.lane.b32.xlu2 %v2135_v21, %s4972_s8 }
 0xcb9   :  { %2151 = vrot.lane.b32.xlu2 %v2135_v21, %s4952_s25 }
 0xcc1   :  { %2139 = vrot.lane.b32.xlu2 %v2135_v21, %s4965_s23 }
 0xcc9   :  { %2231 = vperm.xlu2 %4564, %v6093_v58  }
 0xcfb   :  { %v2179_v31 = vpop.permute.xlu2 %2178 }
 0xcfc   :  { %v2182_v15 = vmul.f32 %v4611_v13, %v2179_v31  ;;  %v4622_v31 = vld [vmem:[#allocation8 + $0x2] ss:$0 sm:$0xff] }
 0xcfe   :  { %v2197_v44 = vpack.c.bf16 %v2182_v15, %v2182_v15  ;;  %v4623_v15 = vld [vmem:[#allocation8 + $0x3] ss:$0 sm:$0xff] }
 0xd00   :  { %v2206_v5 = vsel %vm531_vm1, %v2197_v44, 0 }
 0xd01   :  { %2211 = vmatpush.bf16.msrb.mxu0 %v2206_v5 }
 0xd03   :  { %v2163_v52 = vpop.permute.xlu2 %2162 }
 0xd04   :  { %v2170_v32 = vmul.f32 %v4613_v41, %v2163_v52  ;;  %v2166_v27 = vmul.f32 %v4612_v20, %v2163_v52  ;;  %v4626_v41 = vld [vmem:[#allocation8] ss:$0 sm:$0xff]  ;;  %v4625_v20 = vld [vmem:[#allocation8 + $0x1] ss:$0 sm:$0xff] }
 0xd06   :  { %v2195_v47 = vpack.c.bf16 %v2166_v27, %v2135_v21 }
 0xd0b   :  { %v2173_v1 = vpop.permute.xlu2 %2172 }
 0xd0c   :  { %v2176_v6 = vmul.f32 %v4614_v62, %v2173_v1 }
 0xd0e   :  { %v2196_v0 = vpack.c.bf16 %v2176_v6, %v2170_v32 }
 0xd10   :  { %2212 = vmatpush.bf16.msrb.mxu0 %v2196_v0 }
 0xd13   :  { %v2152_v24 = vpop.permute.xlu2 %2151  ;;  %v2146_v57 = vpop.permute.xlu1 %2145 }
 0xd14   :  { %v2155_v16 = vmul.f32 %v4616_v2, %v2152_v24  ;;  %v2159_v29 = vmul.f32 %v4617_v19, %v2152_v24  ;;  %2213 = vmatpush.bf16.msrb.mxu0 %v2195_v47  ;;  %v2149_v43 = vmul.f32 %v4615_v56, %v2146_v57  ;;  %v2250_v2 = vld [vmem:[#allocation4 + $0x30] sm:$0xf]  ;;  %v4976_v19 = vmov 13  }
 0xd15   :  { %4566 = vset.pattern.permute.xlu0 %v4976_v19 }
 0xd16   :  { %v2194_v53 = vpack.c.bf16 %v2159_v29, %v2155_v16  ;;  %2344 = vperm.xlu0 %4566, %v6093_v58  }
 0xd18   :  { %2214 = vmatpush.bf16.msrb.mxu0 %v2194_v53 }
 0xd1b   :  { %v2140_v37 = vpop.permute.xlu2 %2139 }
 0xd1c   :  { %v2143_v48 = vmul.f32 %v4618_v55, %v2140_v37  ;;  %v2340_v37 = vld [vmem:[#allocation4 + $0x34] sm:$0xf] }
 0xd1e   :  { %v2193_v61 = vpack.c.bf16 %v2149_v43, %v2143_v48 }
 0xd20   :  { %2215 = vmatpush.bf16.msrb.mxu0 %v2193_v61 }
 0xd23   :  { %4438 = vmatmul.msk.bf16.vlgmr.msrb.gmra.mxu0 %vm527_vm9, %v2138_v30  ;;  %v2232_v8 = vpop.permute.xlu2 %2231 }
 0xd88   :  { %v2345_v43 = vpop.permute.xlu0 %2344 }
 0xda0   :  { %v2217_v35 = vpop.f32.mrf.mxu0 }
 0xda1   :  { %v2218_v39 = vadd.f32 %v2217_v35, %v2200_v59 }
 0xda3   :  { %vm2221_vm10 = vcmp.ge.f32.partialorder %v2218_v39, 0.0  ;;  %v2222_v40 = vmul.f32 0.01, %v2218_v39 }
 0xda5   :  { %v2223_v45 = vsel %vm2221_vm10, %v2218_v39, %v2222_v40 }
 0xda6   :  { %v6098_v54 = vpack.c.bf16 %v2223_v45, %v2135_v21  ;;  %v4977_v45 = vmov 14  }
 0xda8   :  { %v2219_v49 = vpop.f32.mrf.mxu0  ;;  %2244 = vmatpush.bf16.msrb.mxu2 %v6098_v54 }
 0xda9   :  { %v4632_v49 = vld [vmem:[#allocation8 + $0x6] ss:$0 sm:$0xff] }
 0xdab   :  { %4439 = vmatmul.msk.bf16.vlgmr.msrb.gmra.mxu2 %vm633_vm11, %v2228_v11 }
 0xe2e   :  { %v2246_v9 = vpop.f32.mrf.mxu2 }
 0xe2f   :  { %v2247_v33 = vadd.f32 %v2246_v9, %v2232_v8  ;;  %v4631_v8 = vld [vmem:[#allocation8 + $0x5] ss:$0 sm:$0xff] }
 0xe31   :  { %2284 = vrot.lane.b32.xlu1 %v2247_v33, %s4972_s8  ;;  %2290 = vrot.lane.b32.xlu2 %v2247_v33, %s4963_s4 }
 0xe36   :  { %v2248_v60 = vpop.f32.mrf.mxu2 }
 0xe39   :  { %2251 = vrot.lane.b32.xlu1 %v2247_v33, %s4965_s23  ;;  %2274 = vrot.lane.b32.xlu2 %v2247_v33, %s4950_s22 }
 0xe41   :  { %2263 = vrot.lane.b32.xlu2 %v2247_v33, %s4952_s25  ;;  %2311 = vperm.xlu1 %4565, %v6093_v58  }
 0xe49   :  { %2257 = vrot.lane.b32.xlu2 %v2247_v33, %s4971_s26  ;;  %4567 = vset.pattern.permute.xlu1 %v4977_v45 }
 0xe8b   :  { %v2291_v12 = vpop.permute.xlu2 %2290 }
 0xe8c   :  { %v2294_v26 = vmul.f32 %v4619_v28, %v2291_v12 }
 0xe8e   :  { %v2309_v3 = vpack.c.bf16 %v2294_v26, %v2294_v26  ;;  %v4633_v26 = vld [vmem:[#allocation8 + $0x2] ss:$0 sm:$0xff] }
 0xe90   :  { %v2318_v23 = vsel %vm531_vm1, %v2309_v3, 0  ;;  %v4634_v3 = vld [vmem:[#allocation8 + $0x3] ss:$0 sm:$0xff] }
 0xe91   :  { %2323 = vmatpush.bf16.msra.mxu1 %v2318_v23  ;;  %v4630_v23 = vld [vmem:[#allocation8] ss:$0 sm:$0xff] }
 0xe93   :  { %v2275_v36 = vpop.permute.xlu2 %2274 }
 0xe94   :  { %v2282_v18 = vmul.f32 %v4621_v50, %v2275_v36  ;;  %v2278_v13 = vmul.f32 %v4620_v51, %v2275_v36 }
 0xe96   :  { %v2307_v5 = vpack.c.bf16 %v2278_v13, %v2247_v33 }
 0xe9b   :  { %v2264_v4 = vpop.permute.xlu2 %2263 }
 0xe9c   :  { %v2267_v52 = vmul.f32 %v4622_v31, %v2264_v4  ;;  %v2271_v38 = vmul.f32 %v4623_v15, %v2264_v4  ;;  %v2366_v15 = vld [vmem:[#allocation4 + $0x38] sm:$0xf] }
 0xe9e   :  { %v2306_v32 = vpack.c.bf16 %v2271_v38, %v2267_v52  ;;  %v4635_v38 = vld [vmem:[#allocation8 + $0x4] ss:$0 sm:$0xff] }
 0xea3   :  { %v2285_v46 = vpop.permute.xlu1 %2284  ;;  %v2258_v1 = vpop.permute.xlu2 %2257 }
 0xea4   :  { %v2288_v21 = vmul.f32 %v4624_v14, %v2285_v46  ;;  %v2261_v27 = vmul.f32 %v4625_v20, %v2258_v1  ;;  %v4629_v14 = vld [vmem:[#allocation8 + $0x1] ss:$0 sm:$0xff] }
 0xea6   :  { %v2308_v44 = vpack.c.bf16 %v2288_v21, %v2282_v18 }
 0xea8   :  { %2324 = vmatpush.bf16.msra.mxu1 %v2308_v44 }
 0xeab   :  { %v2252_v62 = vpop.permute.xlu1 %2251 }
 0xeac   :  { %2325 = vmatpush.bf16.msra.mxu1 %v2307_v5  ;;  %v2255_v6 = vmul.f32 %v4626_v41, %v2252_v62 }
 0xeae   :  { %v2305_v0 = vpack.c.bf16 %v2261_v27, %v2255_v6  ;;  %v2490_v6 = vld [vmem:[#allocation14 + $0x70] sm:$0xff]  ;;  %v2489_v27 = vld [vmem:[#allocation14 + $0x68] sm:$0xff] }
 0xeb0   :  { %2326 = vmatpush.bf16.msra.mxu1 %v2306_v32  ;;  %v2491_v32 = vld [vmem:[#allocation14 + $0x78] sm:$0xff] }
 0xeb1   :  { %2492 = vmatpush.msra.mxu0 %v2491_v32 }
 0xeb3   :  { %v2312_v47 = vpop.permute.xlu1 %2311  ;;  %2493 = vmatpush.msra.mxu0 %v2490_v6 }
 0xeb4   :  { %2327 = vmatpush.bf16.msra.mxu1 %v2305_v0  ;;  %v2488_v0 = vld [vmem:[#allocation14 + $0x60] sm:$0xff] }
 0xeb5   :  { %2494 = vmatpush.msra.mxu0 %v2489_v27 }
 0xeb7   :  { %4440 = vmatmul.msk.bf16.vlgmr.msra.gmra.mxu1 %vm527_vm9, %v2250_v2  ;;  %2495 = vmatpush.msra.mxu0 %v2488_v0 }
 0xf34   :  { %v2329_v24 = vpop.f32.mrf.mxu1 }
 0xf35   :  { %v2330_v16 = vadd.f32 %v2329_v24, %v2312_v47 }
 0xf37   :  { %vm2333_vm13 = vcmp.ge.f32.partialorder %v2330_v16, 0.0  ;;  %v2334_v29 = vmul.f32 0.01, %v2330_v16 }
 0xf39   :  { %v2335_v53 = vsel %vm2333_vm13, %v2330_v16, %v2334_v29  ;;  %v2487_v29 = vld [vmem:[#allocation14 + $0x58] sm:$0xff] }
 0xf3a   :  { %v2342_v56 = vpack.c.bf16 %v2335_v53, %v2335_v53  ;;  %2496 = vmatpush.msra.mxu0 %v2487_v29  ;;  %v2486_v53 = vld [vmem:[#allocation14 + $0x50] sm:$0xff] }
 0xf3c   :  { %v2331_v55 = vpop.f32.mrf.mxu1  ;;  %v2351_v57 = vsel %vm531_vm1, %v2342_v56, 0  ;;  %2497 = vmatpush.msra.mxu0 %v2486_v53  ;;  %v2485_v56 = vld [vmem:[#allocation14 + $0x48] sm:$0xff] }
 0xf3d   :  { %2359 = vmatpush.bf16.msra.mxu3 %v2351_v57  ;;  %v2484_v55 = vld [vmem:[#allocation14 + $0x40] sm:$0xff]  ;;  %v2483_v57 = vld [vmem:[#allocation14 + $0x38] sm:$0xff] }
 0xf3e   :  { %2498 = vmatpush.msra.mxu0 %v2485_v56 }
 0xf40   :  { %2499 = vmatpush.msra.mxu0 %v2484_v55 }
 0xf41   :  { %2360 = vmatpush.bf16.msra.mxu3 %v6098_v54  ;;  %v4628_v54 = vld [vmem:[#allocation8 + $0x7] ss:$0 sm:$0xff] }
 0xf42   :  { %2500 = vmatpush.msra.mxu0 %v2483_v57  ;;  %v2625_v57 = vld [vmem:[#allocation4 + $0x4c] sm:$0xf] }
 0xf44   :  { %4441 = vmatmul.msk.bf16.vlgmr.msra.gmra.mxu3 %vm1102_vm12, %v2340_v37  ;;  %v2482_v37 = vld [vmem:[#allocation14 + $0x30] sm:$0xff] }
 0xf45   :  { %2501 = vmatpush.msra.mxu0 %v2482_v37 }
 0xfc7   :  { %v2362_v48 = vpop.f32.mrf.mxu3 }
 0xfc8   :  { %v2363_v61 = vadd.f32 %v2362_v48, %v2345_v43  ;;  %v2481_v43 = vld [vmem:[#allocation14 + $0x28] sm:$0xff]  ;;  %v2480_v48 = vld [vmem:[#allocation14 + $0x20] sm:$0xff] }
 0xfc9   :  { %2502 = vmatpush.msra.mxu0 %v2481_v43 }
 0xfca   :  { %2367 = vrot.lane.b32.xlu0 %v2363_v61, %s4965_s23  ;;  %2390 = vrot.lane.b32.xlu1 %v2363_v61, %s4950_s22 }
 0xfcb   :  { %2406 = vrot.lane.b32.xlu2 %v2363_v61, %s4963_s4  ;;  %2503 = vmatpush.msra.mxu0 %v2480_v48 }
 0xfcf   :  { %v2364_v30 = vpop.f32.mrf.mxu3 }
 0xfd0   :  { %v2478_v30 = vld [vmem:[#allocation14 + $0x10] sm:$0xff] }
 0xfd2   :  { %2379 = vrot.lane.b32.xlu1 %v2363_v61, %s4952_s25 }
 0xfd3   :  { %2400 = vrot.lane.b32.xlu2 %v2363_v61, %s4972_s8 }
 0xfda   :  { %2427 = vperm.xlu1 %4567, %v6093_v58  }
 0xfdb   :  { %2373 = vrot.lane.b32.xlu2 %v2363_v61, %s4971_s26 }
0x1025   :  { %v2407_v59 = vpop.permute.xlu2 %2406 }
0x1026   :  { %v2410_v35 = vmul.f32 %v4627_v17, %v2407_v59  ;;  %v2477_v17 = vld [vmem:[#allocation14 + $0x8] sm:$0xff]  ;;  %v2476_v59 = vld [vmem:[#allocation14] sm:$0xff] }
0x1028   :  { %v2425_v39 = vpack.c.bf16 %v2410_v35, %v2410_v35 }
0x102a   :  { %v2434_v40 = vsel %vm531_vm1, %v2425_v39, 0 }
0x102b   :  { %2439 = vmatpush.bf16.msra.mxu2 %v2434_v40 }
0x102d   :  { %v2401_v11 = vpop.permute.xlu2 %2400 }
0x102e   :  { %v2404_v33 = vmul.f32 %v4628_v54, %v2401_v11 }
0x1035   :  { %v2374_v46 = vpop.permute.xlu2 %2373 }
0x1036   :  { %v2377_v13 = vmul.f32 %v4629_v14, %v2374_v46 }
0x103c   :  { %v2391_v9 = vpop.permute.xlu1 %2390  ;;  %v2368_v36 = vpop.permute.xlu0 %2367 }
0x103d   :  { %v2398_v60 = vmul.f32 %v4632_v49, %v2391_v9  ;;  %v2394_v28 = vmul.f32 %v4631_v8, %v2391_v9  ;;  %v2371_v18 = vmul.f32 %v4630_v23, %v2368_v36  ;;  %v2512_v23 = vld [vmem:[#allocation4 + $0x3c] sm:$0xf] }
0x103f   :  { %v2424_v12 = vpack.c.bf16 %v2404_v33, %v2398_v60  ;;  %v2423_v63 = vpack.c.bf16 %v2394_v28, %v2363_v61  ;;  %v2421_v31 = vpack.c.bf16 %v2377_v13, %v2371_v18  ;;  %v2479_v61 = vld [vmem:[#allocation14 + $0x18] sm:$0xff]  ;;  %v4978_v28 = vmov 15  }
0x1040   :  { %2504 = vmatpush.msra.mxu0 %v2479_v61  ;;  %4568 = vset.pattern.permute.xlu1 %v4978_v28  ;;  %v4980_v13 = vmov 17  }
0x1041   :  { %2440 = vmatpush.bf16.msra.mxu2 %v2424_v12  ;;  %2515 = vperm.xlu1 %4568, %v6093_v58  }
0x1042   :  { %2505 = vmatpush.msra.mxu0 %v2478_v30  ;;  %v4636_v30 = vld [vmem:[#allocation9 + $0x4] ss:$0 sm:$0xff] }
0x1044   :  { %v2380_v50 = vpop.permute.xlu1 %2379  ;;  %2506 = vmatpush.msra.mxu0 %v2477_v17 }
0x1045   :  { %v2383_v51 = vmul.f32 %v4633_v26, %v2380_v50  ;;  %v2387_v4 = vmul.f32 %v4634_v3, %v2380_v50  ;;  %2441 = vmatpush.bf16.msra.mxu2 %v2423_v63  ;;  %v4979_v63 = vmov 16  }
0x1046   :  { %2507 = vmatpush.msra.mxu0 %v2476_v59 }
0x1047   :  { %v2422_v21 = vpack.c.bf16 %v2387_v4, %v2383_v51 }
0x1049   :  { %2442 = vmatpush.bf16.msra.mxu2 %v2422_v21  ;;  %4569 = vset.pattern.permute.xlu1 %v4979_v63  ;;  %v2545_v21 = vld [vmem:[#allocation4 + $0x40] sm:$0xf]  ;;  %v2684_v63 = vld [vmem:[#allocation15 + $0x38] sm:$0xff] }
0x104a   :  { %2548 = vperm.xlu1 %4569, %v6093_v58  }
0x104c   :  { %v2428_v44 = vpop.permute.xlu1 %2427 }
0x104d   :  { %2443 = vmatpush.bf16.msra.mxu2 %v2421_v31 }
0x1050   :  { %4442 = vmatmul.msk.bf16.vlgmr.msra.gmra.mxu2 %vm527_vm9, %v2366_v15 }
0x1052   :  { %4570 = vset.pattern.permute.xlu1 %v4980_v13 }
0x1053   :  { %2570 = vperm.xlu1 %4570, %v6093_v58  }
0x10b3   :  { %v2516_v36 = vpop.permute.xlu1 %2515 }
0x10bc   :  { %v2549_v31 = vpop.permute.xlu1 %2548 }
0x10d3   :  { %v2445_v5 = vpop.f32.mrf.mxu2 }
0x10d4   :  { %v2446_v52 = vadd.f32 %v2445_v5, %v2428_v44 }
0x10d6   :  { %v2450_v41 = vmul.f32 0.01, %v2446_v52  ;;  %vm2449_vm14 = vcmp.ge.f32.partialorder %v2446_v52, 0.0 }
0x10d8   :  { %v2451_v62 = vsel %vm2449_vm14, %v2446_v52, %v2450_v41  ;;  %vm2518_vm14 = vcmask 64512  }
0x10d9   :  { %v2454_v20 = vmul.f32 %v4635_v38, %v2451_v62 }
0x10db   :  { %v2447_v1 = vpop.f32.mrf.mxu2  ;;  %2455 = vadd.xlane.f32.xlu0 %v2454_v20  ;;  %v2571_v20 = vpop.permute.xlu1 %2570 }
0x114e   :  { %v2456_v2 = vpop.xlane.xlu0 %2455 }
0x114f   :  { %v2457_v19 = vmul.f32 0.125, %v2456_v2 }
0x1151   :  { %v2458_v47 = vsub.f32 %v2451_v62, %v2457_v19  ;;  %v4981_v62 = vmov 18  }
0x1152   :  { %4571 = vset.pattern.permute.xlu1 %v4981_v62 }
0x1153   :  { %v2459_v24 = vmul.f32 %v4635_v38, %v2458_v47  ;;  %v2567_v38 = vld [vmem:[#allocation4 + $0x44] sm:$0xf]  ;;  %2603 = vperm.xlu1 %4571, %v6093_v58  }
0x1155   :  { %v2460_v16 = vmul.f32 %v2459_v24, %v2459_v24  ;;  %v4982_v24 = vmov 19  }
0x1157   :  { %2461 = vadd.xlane.f32.xlu2 %v2460_v16 }
0x115b   :  { %4572 = vset.pattern.permute.xlu1 %v4982_v24 }
0x115c   :  { %2628 = vperm.xlu1 %4572, %v6093_v58  }
0x11c5   :  { %v2604_v16 = vpop.permute.xlu1 %2603 }
0x11ca   :  { %v2462_v35 = vpop.xlane.xlu2 %2461 }
0x11cb   :  { %v2463_v39 = vmul.f32 0.125, %v2462_v35 }
0x11cd   :  { %v2464_v40 = vadd.f32 1e-05, %v2463_v39 }
0x11ce   :  { %v2629_v43 = vpop.permute.xlu1 %2628 }
0x11cf   :  { %4673 = vrsqrt.f32 %v2464_v40  ;;  %vm2471_vm10 = vweird.f32 %v2464_v40 }
0x11d5   :  { %v4674_v45 = vpop.eup %4673 }
0x11d6   :  { %v2466_v54 = vmul.f32 %v4674_v45, %v2464_v40  ;;  %vm2472_vm15 = vweird.f32 %v4674_v45  ;;  %v2692_v40 = vld [vmem:[#allocation15 + $0x78] sm:$0xff] }
0x11d7   :  { %vm2473_vm13 = vmor %vm2471_vm10, %vm2472_vm15 }
0x11d8   :  { %v2467_v49 = vmul.f32 %v4674_v45, %v2466_v54  ;;  %v2690_v54 = vld [vmem:[#allocation15 + $0x68] sm:$0xff] }
0x11da   :  { %v2468_v11 = vmul.f32 0.5, %v2467_v49  ;;  %v2689_v49 = vld [vmem:[#allocation15 + $0x60] sm:$0xff] }
0x11dc   :  { %v2469_v8 = vsub.f32 1.5, %v2468_v11 }
0x11de   :  { %v2470_v9 = vmul.f32 %v4674_v45, %v2469_v8 }
0x11e0   :  { %v2474_v33 = vsel %vm2473_vm13, %v4674_v45, %v2470_v9  ;;  %v2691_v45 = vld [vmem:[#allocation15 + $0x70] sm:$0xff] }
0x11e1   :  { %v6124_v60 = vmul.f32 %v2474_v33, %v2458_v47  ;;  %v2599_v47 = vld [vmem:[#allocation4 + $0x48] sm:$0xf] }
0x11e3   :  { %2508 = vmatmul.f32.vlgmr.msra.gmra.mxu0 %v6124_v60 }
0x1260   :  { %v2509_v12 = vpop.f32.mrf.mxu0 }
0x1261   :  { %v2513_v26 = vpack.c.bf16 %v2509_v12, %v2509_v12 }
0x1263   :  { %v2523_v3 = vsel %vm531_vm1, %v2513_v26, 0  ;;  %v2687_v26 = vld [vmem:[#allocation15 + $0x50] sm:$0xff] }
0x1264   :  { %2532 = vmatpush.bf16.msrb.mxu1 %v2523_v3  ;;  %v2686_v3 = vld [vmem:[#allocation15 + $0x48] sm:$0xff] }
0x1267   :  { %4443 = vmatmul.msk.bf16.vlgmr.msrb.gmra.mxu1 %vm2518_vm14, %v2512_v23  ;;  %v2685_v23 = vld [vmem:[#allocation15 + $0x40] sm:$0xff] }
0x12e4   :  { %v2534_v50 = vpop.f32.mrf.mxu1 }
0x12e5   :  { %v2535_v14 = vadd.f32 %v2534_v50, %v2516_v36  ;;  %v2683_v36 = vld [vmem:[#allocation15 + $0x30] sm:$0xff]  ;;  %v2682_v50 = vld [vmem:[#allocation15 + $0x28] sm:$0xff] }
0x12e7   :  { %vm2538_vm15 = vcmp.ge.f32.partialorder %v2535_v14, 0.0  ;;  %v2539_v51 = vmul.f32 0.01, %v2535_v14 }
0x12e9   :  { %v2540_v4 = vsel %vm2538_vm15, %v2535_v14, %v2539_v51  ;;  %v2681_v14 = vld [vmem:[#allocation15 + $0x20] sm:$0xff]  ;;  %v2680_v51 = vld [vmem:[#allocation15 + $0x18] sm:$0xff] }
0x12ea   :  { %v2546_v46 = vpack.c.bf16 %v2540_v4, %v2509_v12  ;;  %v2688_v12 = vld [vmem:[#allocation15 + $0x58] sm:$0xff]  ;;  %v2679_v4 = vld [vmem:[#allocation15 + $0x10] sm:$0xff] }
0x12ec   :  { %v2536_v18 = vpop.f32.mrf.mxu1  ;;  %2561 = vmatpush.bf16.msrb.mxu3 %v2546_v46 }
0x12ed   :  { %v2677_v18 = vld [vmem:[#allocation15] sm:$0xff] }
0x12ef   :  { %4444 = vmatmul.msk.bf16.vlgmr.msrb.gmra.mxu3 %vm633_vm11, %v2545_v21 }
0x12f0   :  { %2693 = vmatpush.msra.mxu3 %v2692_v40 }
0x12f2   :  { %2694 = vmatpush.msra.mxu3 %v2691_v45 }
0x12f4   :  { %2695 = vmatpush.msra.mxu3 %v2690_v54 }
0x12f6   :  { %2696 = vmatpush.msra.mxu3 %v2689_v49 }
0x12f8   :  { %2697 = vmatpush.msra.mxu3 %v2688_v12 }
0x12fa   :  { %2698 = vmatpush.msra.mxu3 %v2687_v26 }
0x12fc   :  { %2699 = vmatpush.msra.mxu3 %v2686_v3 }
0x12fe   :  { %2700 = vmatpush.msra.mxu3 %v2685_v23  ;;  %v2739_v23 = vld [vmem:[#allocation4 + $0x54] sm:$0xf] }
0x1300   :  { %2701 = vmatpush.msra.mxu3 %v2684_v63  ;;  %v4985_v63 = vmov 22  }
0x1301   :  { %4575 = vset.pattern.permute.xlu0 %v4985_v63  ;;  %v2943_v63 = vld [vmem:[#allocation17 + $0x10] sm:$0xff] }
0x1302   :  { %2702 = vmatpush.msra.mxu3 %v2683_v36 }
0x1304   :  { %2703 = vmatpush.msra.mxu3 %v2682_v50 }
0x1306   :  { %2704 = vmatpush.msra.mxu3 %v2681_v14 }
0x1308   :  { %2705 = vmatpush.msra.mxu3 %v2680_v51 }
0x130a   :  { %2706 = vmatpush.msra.mxu3 %v2679_v4 }
0x1372   :  { %v2563_v15 = vpop.f32.mrf.mxu3 }
0x1373   :  { %v2564_v44 = vadd.f32 %v2563_v15, %v2549_v31 }
0x1375   :  { %v2568_v5 = vpack.c.bf16 %v2564_v44, %v2564_v44 }
0x1377   :  { %v2577_v52 = vsel %vm531_vm1, %v2568_v5, 0 }
0x1378   :  { %2586 = vmatpush.bf16.msrb.mxu2 %v2577_v52 }
0x137a   :  { %v2565_v41 = vpop.f32.mrf.mxu3 }
0x137b   :  { %4445 = vmatmul.msk.bf16.vlgmr.msrb.gmra.mxu2 %vm2518_vm14, %v2567_v38 }
0x13fe   :  { %v2588_v1 = vpop.f32.mrf.mxu2 }
0x13ff   :  { %v2589_v32 = vadd.f32 %v2588_v1, %v2571_v20  ;;  %v4983_v1 = vmov 20  }
0x1400   :  { %4573 = vset.pattern.permute.xlu1 %v4983_v1 }
0x1401   :  { %vm2592_vm10 = vcmp.ge.f32.partialorder %v2589_v32, 0.0  ;;  %v2593_v6 = vmul.f32 0.01, %v2589_v32  ;;  %2720 = vperm.xlu1 %4573, %v6093_v58  }
0x1403   :  { %v2594_v27 = vsel %vm2592_vm10, %v2589_v32, %v2593_v6 }
0x1404   :  { %v2601_v0 = vpack.c.bf16 %v2594_v27, %v2594_v27  ;;  %v2717_v27 = vld [vmem:[#allocation4 + $0x50] sm:$0xf] }
0x1406   :  { %v2590_v2 = vpop.f32.mrf.mxu2  ;;  %v2610_v19 = vsel %vm531_vm1, %v2601_v0, 0 }
0x1407   :  { %2618 = vmatpush.bf16.msrb.mxu0 %v2610_v19 }
0x140b   :  { %2619 = vmatpush.bf16.msrb.mxu0 %v2546_v46  ;;  %v2678_v46 = vld [vmem:[#allocation15 + $0x8] sm:$0xff] }
0x140c   :  { %2707 = vmatpush.msra.mxu3 %v2678_v46 }
0x140e   :  { %4446 = vmatmul.msk.bf16.vlgmr.msrb.gmra.mxu0 %vm1102_vm12, %v2599_v47  ;;  %2708 = vmatpush.msra.mxu3 %v2677_v18 }
0x1473   :  { %v2721_v0 = vpop.permute.xlu1 %2720 }
0x148b   :  { %v2621_v29 = vpop.f32.mrf.mxu0 }
0x148c   :  { %v2622_v53 = vadd.f32 %v2621_v29, %v2604_v16 }
0x148e   :  { %v2626_v56 = vpack.c.bf16 %v2622_v53, %v2622_v53 }
0x1490   :  { %v2635_v55 = vsel %vm531_vm1, %v2626_v56, 0  ;;  %v4984_v56 = vmov 21  }
0x1491   :  { %2644 = vmatpush.bf16.msra.mxu1 %v2635_v55  ;;  %4574 = vset.pattern.permute.xlu2 %v4984_v56  ;;  %v4638_v55 = vld [vmem:[#allocation8 + $0x7] ss:$0 sm:$0xff] }
0x1492   :  { %v2949_v56 = vld [vmem:[#allocation17 + $0x40] sm:$0xff] }
0x1493   :  { %v2623_v37 = vpop.f32.mrf.mxu0 }
0x1494   :  { %4447 = vmatmul.msk.bf16.vlgmr.msra.gmra.mxu1 %vm2518_vm14, %v2625_v57  ;;  %v4640_v57 = vld [vmem:[#allocation8 + $0x6] ss:$0 sm:$0xff]  ;;  %v4639_v37 = vld [vmem:[#allocation8 + $0x5] ss:$0 sm:$0xff] }
0x1511   :  { %v2646_v48 = vpop.f32.mrf.mxu1 }
0x1512   :  { %v2647_v61 = vadd.f32 %v2646_v48, %v2629_v43 }
0x1514   :  { %vm2650_vm13 = vcmp.ge.f32.partialorder %v2647_v61, 0.0  ;;  %v2651_v17 = vmul.f32 0.01, %v2647_v61 }
0x1516   :  { %v2652_v59 = vsel %vm2650_vm13, %v2647_v61, %v2651_v17 }
0x1517   :  { %v2655_v35 = vmul.f32 %v4636_v30, %v2652_v59 }
0x1519   :  { %v2648_v39 = vpop.f32.mrf.mxu1  ;;  %2656 = vadd.xlane.f32.xlu2 %v2655_v35  ;;  %v4641_v35 = vld [vmem:[#allocation8 + $0x2] ss:$0 sm:$0xff] }
0x151a   :  { %v4642_v39 = vld [vmem:[#allocation8 + $0x3] ss:$0 sm:$0xff] }
0x158c   :  { %v2657_v11 = vpop.xlane.xlu2 %2656 }
0x158d   :  { %v2658_v8 = vmul.f32 0.5, %v2657_v11 }
0x158f   :  { %v2659_v9 = vsub.f32 %v2652_v59, %v2658_v8  ;;  %v4643_v8 = vld [vmem:[#allocation8] ss:$0 sm:$0xff] }
0x1591   :  { %v2660_v33 = vmul.f32 %v4636_v30, %v2659_v9 }
0x1593   :  { %v2661_v28 = vmul.f32 %v2660_v33, %v2660_v33 }
0x1595   :  { %2662 = vadd.xlane.f32.xlu0 %v2661_v28 }
0x1608   :  { %v2663_v21 = vpop.xlane.xlu0 %2662 }
0x1609   :  { %v2664_v13 = vmul.f32 0.5, %v2663_v21 }
0x160b   :  { %v2665_v31 = vadd.f32 1e-05, %v2664_v13  ;;  %v2829_v13 = vld [vmem:[#allocation4 + $0x58] sm:$0xf] }
0x160d   :  { %4675 = vrsqrt.f32 %v2665_v31  ;;  %vm2672_vm10 = vweird.f32 %v2665_v31 }
0x1613   :  { %v4676_v15 = vpop.eup %4675 }
0x1614   :  { %v2667_v44 = vmul.f32 %v4676_v15, %v2665_v31  ;;  %vm2673_vm15 = vweird.f32 %v4676_v15 }
0x1615   :  { %vm2674_vm13 = vmor %vm2672_vm10, %vm2673_vm15 }
0x1616   :  { %v2668_v5 = vmul.f32 %v4676_v15, %v2667_v44 }
0x1618   :  { %v2669_v52 = vmul.f32 0.5, %v2668_v5 }
0x161a   :  { %v2670_v38 = vsub.f32 1.5, %v2669_v52  ;;  %v2956_v52 = vld [vmem:[#allocation17 + $0x78] sm:$0xff] }
0x161c   :  { %v2671_v41 = vmul.f32 %v4676_v15, %v2670_v38  ;;  %v2955_v38 = vld [vmem:[#allocation17 + $0x70] sm:$0xff] }
0x161e   :  { %v2675_v62 = vsel %vm2674_vm13, %v4676_v15, %v2671_v41  ;;  %v4650_v41 = vld [vmem:[#allocation8 + $0x8] ss:$0 sm:$0xff] }
0x161f   :  { %v2676_v20 = vmul.f32 %v2675_v62, %v2659_v9  ;;  %v4644_v9 = vld [vmem:[#allocation8 + $0x1] ss:$0 sm:$0xff]  ;;  %v4986_v62 = vmov 23  }
0x1621   :  { %2709 = vmatmul.f32.vlgmr.msra.gmra.mxu3 %v2676_v20  ;;  %v2954_v20 = vld [vmem:[#allocation17 + $0x68] sm:$0xff] }
0x16a4   :  { %v2710_v32 = vpop.f32.mrf.mxu3 }
0x16a5   :  { %v6143_v6 = vpack.c.bf16 %v6124_v60, %v2710_v32  ;;  %v4637_v60 = vld [vmem:[#allocation8 + $0x8] ss:$0 sm:$0xff]  ;;  %v2953_v32 = vld [vmem:[#allocation17 + $0x60] sm:$0xff] }
0x16a7   :  { %2733 = vmatpush.bf16.msra.mxu2 %v6143_v6 }
0x16aa   :  { %4448 = vmatmul.msk.bf16.vlgmr.msra.gmra.mxu2 %vm633_vm11, %v2717_v27 }
0x172d   :  { %v2735_v2 = vpop.f32.mrf.mxu2 }
0x172e   :  { %v2736_v19 = vadd.f32 %v2735_v2, %v2721_v0  ;;  %v2952_v0 = vld [vmem:[#allocation17 + $0x58] sm:$0xff] }
0x1730   :  { %2773 = vrot.lane.b32.xlu1 %v2736_v19, %s4972_s8  ;;  %2763 = vrot.lane.b32.xlu0 %v2736_v19, %s4950_s22 }
0x1731   :  { %2779 = vrot.lane.b32.xlu2 %v2736_v19, %s4963_s4 }
0x1735   :  { %v2737_v47 = vpop.f32.mrf.mxu2 }
0x1736   :  { %v4646_v47 = vld [vmem:[#allocation8 + $0x6] ss:$0 sm:$0xff] }
0x1738   :  { %2752 = vrot.lane.b32.xlu1 %v2736_v19, %s4952_s25  ;;  %2740 = vrot.lane.b32.xlu0 %v2736_v19, %s4965_s23 }
0x1739   :  { %2800 = vperm.xlu2 %4574, %v6093_v58  }
0x1740   :  { %2746 = vrot.lane.b32.xlu1 %v2736_v19, %s4971_s26  ;;  %2833 = vperm.xlu0 %4575, %v6093_v58  }
0x1741   :  { %4576 = vset.pattern.permute.xlu2 %v4986_v62 }
0x178b   :  { %v2780_v24 = vpop.permute.xlu2 %2779 }
0x178c   :  { %v2783_v16 = vmul.f32 %v4637_v60, %v2780_v24  ;;  %v4651_v24 = vld [vmem:[#allocation8 + $0x7] ss:$0 sm:$0xff] }
0x178e   :  { %v2798_v29 = vpack.c.bf16 %v2783_v16, %v2783_v16  ;;  %v2950_v16 = vld [vmem:[#allocation17 + $0x48] sm:$0xff] }
0x1790   :  { %v2807_v53 = vsel %vm531_vm1, %v2798_v29, 0  ;;  %v4645_v29 = vld [vmem:[#allocation8 + $0x5] ss:$0 sm:$0xff] }
0x1791   :  { %2812 = vmatpush.bf16.msra.mxu0 %v2807_v53 }
0x1793   :  { %v2801_v36 = vpop.permute.xlu2 %2800 }
0x17a2   :  { %v2774_v43 = vpop.permute.xlu1 %2773  ;;  %v2764_v48 = vpop.permute.xlu0 %2763 }
0x17a3   :  { %v2777_v61 = vmul.f32 %v4638_v55, %v2774_v43  ;;  %v2771_v30 = vmul.f32 %v4640_v57, %v2764_v48  ;;  %v2767_v17 = vmul.f32 %v4639_v37, %v2764_v48  ;;  %v2948_v37 = vld [vmem:[#allocation17 + $0x38] sm:$0xff]  ;;  %v4647_v48 = vld [vmem:[#allocation8 + $0x2] ss:$0 sm:$0xff] }
0x17a5   :  { %v2797_v59 = vpack.c.bf16 %v2777_v61, %v2771_v30  ;;  %v2796_v40 = vpack.c.bf16 %v2767_v17, %v2736_v19  ;;  %v2951_v19 = vld [vmem:[#allocation17 + $0x50] sm:$0xff]  ;;  %v4648_v61 = vld [vmem:[#allocation8 + $0x3] ss:$0 sm:$0xff] }
0x17a7   :  { %2813 = vmatpush.bf16.msra.mxu0 %v2797_v59  ;;  %v2947_v59 = vld [vmem:[#allocation17 + $0x30] sm:$0xff] }
0x17aa   :  { %v2753_v45 = vpop.permute.xlu1 %2752  ;;  %v2741_v33 = vpop.permute.xlu0 %2740 }
0x17ab   :  { %v2756_v54 = vmul.f32 %v4641_v35, %v2753_v45  ;;  %v2760_v49 = vmul.f32 %v4642_v39, %v2753_v45  ;;  %2814 = vmatpush.bf16.msra.mxu0 %v2796_v40  ;;  %v2744_v12 = vmul.f32 %v4643_v8, %v2741_v33  ;;  %v2946_v35 = vld [vmem:[#allocation17 + $0x28] sm:$0xff]  ;;  %v4649_v8 = vld [vmem:[#allocation8] ss:$0 sm:$0xff]  ;;  %v2944_v33 = vld [vmem:[#allocation17 + $0x18] sm:$0xff] }
0x17ad   :  { %v2795_v11 = vpack.c.bf16 %v2760_v49, %v2756_v54  ;;  %v4652_v54 = vld [vmem:[#allocation8 + $0x1] ss:$0 sm:$0xff] }
0x17af   :  { %2815 = vmatpush.bf16.msra.mxu0 %v2795_v11  ;;  %v2945_v11 = vld [vmem:[#allocation17 + $0x20] sm:$0xff] }
0x17b2   :  { %v2747_v28 = vpop.permute.xlu1 %2746  ;;  %v2834_v31 = vpop.permute.xlu0 %2833 }
0x17b3   :  { %v2750_v26 = vmul.f32 %v4644_v9, %v2747_v28 }
0x17b5   :  { %v2794_v3 = vpack.c.bf16 %v2750_v26, %v2744_v12 }
0x17b7   :  { %2816 = vmatpush.bf16.msra.mxu0 %v2794_v3 }
0x17ba   :  { %4449 = vmatmul.msk.bf16.vlgmr.msra.gmra.mxu0 %vm527_vm9, %v2739_v23  ;;  %v2855_v23 = vld [vmem:[#allocation4 + $0x5c] sm:$0xf] }
0x1837   :  { %v2818_v50 = vpop.f32.mrf.mxu0 }
0x1838   :  { %v2819_v14 = vadd.f32 %v2818_v50, %v2801_v36  ;;  %v2942_v36 = vld [vmem:[#allocation17 + $0x8] sm:$0xff]  ;;  %v2941_v50 = vld [vmem:[#allocation17] sm:$0xff] }
0x183a   :  { %vm2822_vm15 = vcmp.ge.f32.partialorder %v2819_v14, 0.0  ;;  %v2823_v51 = vmul.f32 0.01, %v2819_v14 }
0x183c   :  { %v2824_v4 = vsel %vm2822_vm15, %v2819_v14, %v2823_v51 }
0x183d   :  { %v2831_v46 = vpack.c.bf16 %v2824_v4, %v2824_v4 }
0x183f   :  { %v2820_v18 = vpop.f32.mrf.mxu0  ;;  %v2840_v21 = vsel %vm531_vm1, %v2831_v46, 0 }
0x1840   :  { %2848 = vmatpush.bf16.msrb.mxu1 %v2840_v21 }
0x1844   :  { %2849 = vmatpush.bf16.msrb.mxu1 %v6143_v6 }
0x1847   :  { %4450 = vmatmul.msk.bf16.vlgmr.msrb.gmra.mxu1 %vm1102_vm12, %v2829_v13  ;;  %v4987_v13 = vmov 24  }
0x1848   :  { %2957 = vmatpush.msra.mxu1 %v2956_v52  ;;  %4577 = vset.pattern.permute.xlu0 %v4987_v13  ;;  %v3269_v13 = vld [vmem:[#allocation18 + $0x1c0] sm:$0xff] }
0x184a   :  { %2958 = vmatpush.msra.mxu1 %v2955_v38 }
0x184c   :  { %2959 = vmatpush.msra.mxu1 %v2954_v20  ;;  %v6186_v20 = vld [vmem:[%s6713_s2] sm:$0xff] }
0x184e   :  { %2960 = vmatpush.msra.mxu1 %v2953_v32 }
0x1850   :  { %2961 = vmatpush.msra.mxu1 %v2952_v0 }
0x1852   :  { %2962 = vmatpush.msra.mxu1 %v2951_v19 }
0x1854   :  { %2963 = vmatpush.msra.mxu1 %v2950_v16 }
0x1856   :  { %2964 = vmatpush.msra.mxu1 %v2949_v56 }
0x1858   :  { %2965 = vmatpush.msra.mxu1 %v2948_v37 }
0x185a   :  { %2966 = vmatpush.msra.mxu1 %v2947_v59 }
0x185c   :  { %2967 = vmatpush.msra.mxu1 %v2946_v35 }
0x185e   :  { %2968 = vmatpush.msra.mxu1 %v2945_v11  ;;  %v4989_v11 = vmov 26  }
0x1860   :  { %2969 = vmatpush.msra.mxu1 %v2944_v33 }
0x1862   :  { %2970 = vmatpush.msra.mxu1 %v2943_v63  ;;  %v3097_v63 = vld [vmem:[#allocation4 + $0x68] sm:$0xf] }
0x1864   :  { %2971 = vmatpush.msra.mxu1 %v2942_v36 }
0x1866   :  { %2972 = vmatpush.msra.mxu1 %v2941_v50 }
0x18c4   :  { %v2851_v15 = vpop.f32.mrf.mxu1 }
0x18c5   :  { %v2852_v44 = vadd.f32 %v2851_v15, %v2834_v31 }
0x18c7   :  { %2856 = vrot.lane.b32.xlu0 %v2852_v44, %s4965_s23  ;;  %2879 = vrot.lane.b32.xlu2 %v2852_v44, %s4950_s22 }
0x18c8   :  { %2895 = vrot.lane.b32.xlu1 %v2852_v44, %s4963_s4 }
0x18cc   :  { %v2853_v5 = vpop.f32.mrf.mxu1 }
0x18cf   :  { %2868 = vrot.lane.b32.xlu2 %v2852_v44, %s4952_s25  ;;  %2984 = vperm.xlu0 %4577, %v6093_v58  }
0x18d0   :  { %2889 = vrot.lane.b32.xlu1 %v2852_v44, %s4972_s8 }
0x18d7   :  { %2916 = vperm.xlu2 %4576, %v6093_v58   ;;  %v4988_v58 = vmov 25  }
0x18d8   :  { %2862 = vrot.lane.b32.xlu1 %v2852_v44, %s4971_s26 }
0x18d9   :  { %4578 = vset.pattern.permute.xlu1 %v4988_v58 }
0x18df   :  { %4579 = vset.pattern.permute.xlu2 %v4989_v11  ;;  %v3243_v11 = vld [vmem:[#allocation18 + $0xf0] sm:$0xff] }
0x1921   :  { %v2880_v27 = vpop.permute.xlu2 %2879 }
0x1922   :  { %v2887_v55 = vmul.f32 %v4646_v47, %v2880_v27  ;;  %v2883_v43 = vmul.f32 %v4645_v29, %v2880_v27  ;;  %v4653_v27 = vld [vmem:[#allocation6 + $0x6] ss:$0 sm:$0xff]  ;;  %v4654_v47 = vld [vmem:[#allocation6 + $0x5] ss:$0 sm:$0xff] }
0x1924   :  { %v2912_v39 = vpack.c.bf16 %v2883_v43, %v2852_v44  ;;  %v2981_v44 = vld [vmem:[#allocation4 + $0x60] sm:$0xf]  ;;  %v4658_v43 = vld [vmem:[#allocation6 + $0x1] ss:$0 sm:$0xff] }
0x1929   :  { %v2869_v17 = vpop.permute.xlu2 %2868 }
0x192a   :  { %v2872_v40 = vmul.f32 %v4647_v48, %v2869_v17  ;;  %v2876_v45 = vmul.f32 %v4648_v61, %v2869_v17 }
0x192c   :  { %v2911_v28 = vpack.c.bf16 %v2876_v45, %v2872_v40 }
0x1931   :  { %v2917_v14 = vpop.permute.xlu2 %2916 }
0x1939   :  { %v2857_v9 = vpop.permute.xlu0 %2856 }
0x193a   :  { %v2896_v1 = vpop.permute.xlu1 %2895  ;;  %v2860_v26 = vmul.f32 %v4649_v8, %v2857_v9 }
0x193b   :  { %v2899_v6 = vmul.f32 %v4650_v41, %v2896_v1 }
0x193d   :  { %v2914_v2 = vpack.c.bf16 %v2899_v6, %v2899_v6 }
0x193f   :  { %v2923_v60 = vsel %vm531_vm1, %v2914_v2, 0  ;;  %v4659_v2 = vld [vmem:[#allocation6 + $0x7] ss:$0 sm:$0xff] }
0x1940   :  { %2928 = vmatpush.bf16.msrb.mxu2 %v2923_v60 }
0x1941   :  { %v2985_v5 = vpop.permute.xlu0 %2984 }
0x1942   :  { %v2890_v53 = vpop.permute.xlu1 %2889 }
0x1943   :  { %v2893_v57 = vmul.f32 %v4651_v24, %v2890_v53 }
0x1945   :  { %v2913_v30 = vpack.c.bf16 %v2893_v57, %v2887_v55  ;;  %v4656_v55 = vld [vmem:[#allocation6 + $0x2] ss:$0 sm:$0xff]  ;;  %v4660_v57 = vld [vmem:[#allocation6 + $0x3] ss:$0 sm:$0xff] }
0x1947   :  { %2929 = vmatpush.bf16.msrb.mxu2 %v2913_v30  ;;  %v4655_v30 = vld [vmem:[#allocation6] ss:$0 sm:$0xff] }
0x194a   :  { %v2863_v49 = vpop.permute.xlu1 %2862 }
0x194b   :  { %2930 = vmatpush.bf16.msrb.mxu2 %v2912_v39  ;;  %v2866_v12 = vmul.f32 %v4652_v54, %v2863_v49  ;;  %v3003_v49 = vld [vmem:[#allocation4 + $0x64] sm:$0xf] }
0x194d   :  { %v2910_v3 = vpack.c.bf16 %v2866_v12, %v2860_v26 }
0x194f   :  { %2931 = vmatpush.bf16.msrb.mxu2 %v2911_v28 }
0x1953   :  { %2932 = vmatpush.bf16.msrb.mxu2 %v2910_v3 }
0x1956   :  { %4451 = vmatmul.msk.bf16.vlgmr.msrb.gmra.mxu2 %vm527_vm9, %v2855_v23 }
0x19d9   :  { %v2934_v51 = vpop.f32.mrf.mxu2 }
0x19da   :  { %v2935_v4 = vadd.f32 %v2934_v51, %v2917_v14 }
0x19dc   :  { %vm2938_vm10 = vcmp.ge.f32.partialorder %v2935_v4, 0.0  ;;  %v2939_v46 = vmul.f32 0.01, %v2935_v4 }
0x19de   :  { %v2940_v18 = vsel %vm2938_vm10, %v2935_v4, %v2939_v46  ;;  %v3273_v4 = vld [vmem:[#allocation18 + $0x1e0] sm:$0xff]  ;;  %v3274_v46 = vld [vmem:[#allocation18 + $0x1e8] sm:$0xff] }
0x19df   :  { %2973 = vmatmul.f32.vlgmr.msra.gmra.mxu1 %v2940_v18  ;;  %v3275_v18 = vld [vmem:[#allocation18 + $0x1f0] sm:$0xff] }
0x19e0   :  { %3317 = vmatpush.msrb.mxu1 %v3275_v18  ;;  %v3230_v18 = vld [vmem:[#allocation18 + $0x88] sm:$0xff] }
0x19e1   :  { %v2936_v21 = vpop.f32.mrf.mxu2 }
0x19e2   :  { %v4990_v21 = vmov 27  }
0x1a5c   :  { %v2974_v31 = vpop.f32.mrf.mxu1 }
0x1a5d   :  { %v6171_v15 = vpack.c.bf16 %v6080_v10, %v2974_v31  ;;  %v4657_v10 = vld [vmem:[#allocation6 + $0x8] ss:$0 sm:$0xff]  ;;  %v3270_v31 = vld [vmem:[#allocation18 + $0x1c8] sm:$0xff] }
0x1a5f   :  { %2997 = vmatpush.bf16.msrb.mxu3 %v6171_v15 }
0x1a62   :  { %4452 = vmatmul.msk.bf16.vlgmr.msrb.gmra.mxu3 %vm633_vm11, %v2981_v44  ;;  %v3265_v44 = vld [vmem:[#allocation18 + $0x1a0] sm:$0xff] }
0x1ae5   :  { %v2999_v52 = vpop.f32.mrf.mxu3 }
0x1ae6   :  { %v3000_v38 = vadd.f32 %v2999_v52, %v2985_v5  ;;  %v3266_v5 = vld [vmem:[#allocation18 + $0x1a8] sm:$0xff]  ;;  %v4664_v52 = vld [vmem:[#allocation6 + $0x8] ss:$0 sm:$0xff] }
0x1ae8   :  { %3016 = vrot.lane.b32.xlu0 %v3000_v38, %s4965_s23  ;;  %3035 = vrot.lane.b32.xlu2 %v3000_v38, %s4963_s4 }
0x1ae9   :  { %3047 = vrot.lane.b32.xlu1 %v3000_v38, %s4962_s20 }
0x1aed   :  { %v3001_v41 = vpop.f32.mrf.mxu3 }
0x1aee   :  { %v3261_v41 = vld [vmem:[#allocation18 + $0x180] sm:$0xff] }
0x1af0   :  { %3010 = vrot.lane.b32.xlu0 %v3000_v38, %s4960_s17  ;;  %3029 = vrot.lane.b32.xlu2 %v3000_v38, %s4950_s22 }
0x1af1   :  { %3041 = vrot.lane.b32.xlu1 %v3000_v38, %s4964_s5 }
0x1af8   :  { %3004 = vrot.lane.b32.xlu2 %v3000_v38, %s4961_s19 }
0x1af9   :  { %3022 = vrot.lane.b32.xlu1 %v3000_v38, %s4952_s25 }
0x1b00   :  { %3101 = vperm.xlu2 %4579, %v6186_v20  }
0x1b01   :  { %3068 = vperm.xlu1 %4578, %v6186_v20  }
0x1b08   :  { %4580 = vset.pattern.permute.xlu2 %v4990_v21 }
0x1b42   :  { %v3036_v62 = vpop.permute.xlu2 %3035 }
0x1b43   :  { %v3039_v16 = vmul.f32 %v4653_v27, %v3036_v62  ;;  %v3263_v62 = vld [vmem:[#allocation18 + $0x190] sm:$0xff]  ;;  %v3258_v27 = vld [vmem:[#allocation18 + $0x168] sm:$0xff] }
0x1b4a   :  { %v3030_v60 = vpop.permute.xlu2 %3029 }
0x1b4b   :  { %v3033_v53 = vmul.f32 %v4654_v47, %v3030_v60  ;;  %v3253_v47 = vld [vmem:[#allocation18 + $0x140] sm:$0xff]  ;;  %v4661_v60 = vld [vmem:[#allocation6 + $0x7] ss:$0 sm:$0xff] }
0x1b4d   :  { %v3064_v37 = vpack.c.bf16 %v3033_v53, %v3000_v38  ;;  %v3267_v38 = vld [vmem:[#allocation18 + $0x1b0] sm:$0xff] }
0x1b52   :  { %v3005_v35 = vpop.permute.xlu2 %3004 }
0x1b53   :  { %v3008_v45 = vmul.f32 %v4655_v30, %v3005_v35  ;;  %v3246_v30 = vld [vmem:[#allocation18 + $0x108] sm:$0xff] }
0x1b5a   :  { %v3017_v19 = vpop.permute.xlu0 %3016  ;;  %v3102_v36 = vpop.permute.xlu2 %3101 }
0x1b5b   :  { %v3048_v1 = vpop.permute.xlu1 %3047  ;;  %v3020_v17 = vmul.f32 %v4656_v55, %v3017_v19  ;;  %v3259_v19 = vld [vmem:[#allocation18 + $0x170] sm:$0xff]  ;;  %v3250_v55 = vld [vmem:[#allocation18 + $0x128] sm:$0xff] }
0x1b5c   :  { %v3051_v32 = vmul.f32 %v4657_v10, %v3048_v1  ;;  %v3262_v10 = vld [vmem:[#allocation18 + $0x188] sm:$0xff]  ;;  %v3257_v1 = vld [vmem:[#allocation18 + $0x160] sm:$0xff] }
0x1b5e   :  { %v3066_v6 = vpack.c.bf16 %v3051_v32, %v3051_v32  ;;  %v4663_v32 = vld [vmem:[#allocation6 + $0x6] ss:$0 sm:$0xff] }
0x1b60   :  { %v3075_v0 = vsel %vm531_vm1, %v3066_v6, 0 }
0x1b61   :  { %3080 = vmatpush.bf16.msrb.mxu0 %v3075_v0 }
0x1b62   :  { %v3011_v48 = vpop.permute.xlu0 %3010 }
0x1b63   :  { %v3042_v24 = vpop.permute.xlu1 %3041  ;;  %v3014_v39 = vmul.f32 %v4658_v43, %v3011_v48  ;;  %v3251_v43 = vld [vmem:[#allocation18 + $0x130] sm:$0xff] }
0x1b64   :  { %v3045_v29 = vmul.f32 %v4659_v2, %v3042_v24  ;;  %v3254_v24 = vld [vmem:[#allocation18 + $0x148] sm:$0xff] }
0x1b65   :  { %v3062_v54 = vpack.c.bf16 %v3014_v39, %v3008_v45  ;;  %v4665_v39 = vld [vmem:[#allocation6 + $0x2] ss:$0 sm:$0xff]  ;;  %v3241_v45 = vld [vmem:[#allocation18 + $0xe0] sm:$0xff] }
0x1b66   :  { %v3065_v56 = vpack.c.bf16 %v3045_v29, %v3039_v16  ;;  %v3255_v29 = vld [vmem:[#allocation18 + $0x150] sm:$0xff] }
0x1b68   :  { %3081 = vmatpush.bf16.msrb.mxu0 %v3065_v56  ;;  %v3249_v56 = vld [vmem:[#allocation18 + $0x120] sm:$0xff] }
0x1b6b   :  { %v3023_v61 = vpop.permute.xlu1 %3022 }
0x1b6c   :  { %v3026_v59 = vmul.f32 %v4660_v57, %v3023_v61  ;;  %3082 = vmatpush.bf16.msrb.mxu0 %v3064_v37  ;;  %v4666_v37 = vld [vmem:[#allocation6 + $0x5] ss:$0 sm:$0xff]  ;;  %v3245_v61 = vld [vmem:[#allocation18 + $0x100] sm:$0xff] }
0x1b6e   :  { %v3063_v40 = vpack.c.bf16 %v3026_v59, %v3020_v17  ;;  %v3247_v59 = vld [vmem:[#allocation18 + $0x110] sm:$0xff] }
0x1b70   :  { %3083 = vmatpush.bf16.msrb.mxu0 %v3063_v40 }
0x1b73   :  { %v3069_v8 = vpop.permute.xlu1 %3068 }
0x1b74   :  { %3084 = vmatpush.bf16.msrb.mxu0 %v3062_v54  ;;  %v3242_v54 = vld [vmem:[#allocation18 + $0xe8] sm:$0xff] }
0x1b77   :  { %4453 = vmatmul.msk.bf16.vlgmr.msrb.gmra.mxu0 %vm527_vm9, %v3003_v49 }
0x1b78   :  { %3277 = vmatpush.msra.mxu0 %v3273_v4 }
0x1b7a   :  { %3278 = vmatpush.msra.mxu0 %v3269_v13 }
0x1b7c   :  { %3279 = vmatpush.msra.mxu0 %v3265_v44  ;;  %v3225_v44 = vld [vmem:[#allocation18 + $0x60] sm:$0xff] }
0x1b7e   :  { %3280 = vmatpush.msra.mxu0 %v3261_v41 }
0x1b80   :  { %3281 = vmatpush.msra.mxu0 %v3257_v1  ;;  %v3268_v1 = vld [vmem:[#allocation18 + $0x1b8] sm:$0xff] }
0x1b82   :  { %3282 = vmatpush.msra.mxu0 %v3253_v47  ;;  %v3240_v47 = vld [vmem:[#allocation18 + $0xd8] sm:$0xff] }
0x1b84   :  { %3283 = vmatpush.msra.mxu0 %v3249_v56  ;;  %v3223_v56 = vld [vmem:[#allocation18 + $0x50] sm:$0xff] }
0x1b86   :  { %3284 = vmatpush.msra.mxu0 %v3245_v61  ;;  %v3213_v61 = vld [vmem:[#allocation18] sm:$0xff] }
0x1b88   :  { %3285 = vmatpush.msra.mxu0 %v3241_v45 }
0x1bf4   :  { %v3086_v9 = vpop.f32.mrf.mxu0 }
0x1bf5   :  { %v3087_v33 = vadd.f32 %v3086_v9, %v3069_v8  ;;  %v4662_v8 = vld [vmem:[#allocation6 + $0x3] ss:$0 sm:$0xff]  ;;  %v3237_v9 = vld [vmem:[#allocation18 + $0xc0] sm:$0xff] }
0x1bf6   :  { %3286 = vmatpush.msra.mxu0 %v3237_v9 }
0x1bf7   :  { %vm3090_vm13 = vcmp.ge.f32.partialorder %v3087_v33, 0.0  ;;  %v3091_v28 = vmul.f32 0.01, %v3087_v33 }
0x1bf9   :  { %v3092_v12 = vsel %vm3090_vm13, %v3087_v33, %v3091_v28  ;;  %v3238_v33 = vld [vmem:[#allocation18 + $0xc8] sm:$0xff] }
0x1bfa   :  { %v3099_v26 = vpack.c.bf16 %v3092_v12, %v3092_v12 }
0x1bfc   :  { %v3088_v3 = vpop.f32.mrf.mxu0  ;;  %v3108_v23 = vsel %vm531_vm1, %v3099_v26, 0  ;;  %v3239_v26 = vld [vmem:[#allocation18 + $0xd0] sm:$0xff] }
0x1bfd   :  { %3116 = vmatpush.bf16.msra.mxu3 %v3108_v23  ;;  %v4667_v23 = vld [vmem:[#allocation6 + $0x1] ss:$0 sm:$0xff] }
0x1c01   :  { %3117 = vmatpush.bf16.msra.mxu3 %v6171_v15  ;;  %v3271_v15 = vld [vmem:[#allocation18 + $0x1d0] sm:$0xff] }
0x1c02   :  { %3318 = vmatpush.msrb.mxu1 %v3271_v15 }
0x1c04   :  { %4454 = vmatmul.msk.bf16.vlgmr.msra.gmra.mxu3 %vm1102_vm12, %v3097_v63  ;;  %3319 = vmatpush.msrb.mxu1 %v3267_v38  ;;  %v3233_v63 = vld [vmem:[#allocation18 + $0xa0] sm:$0xff]  ;;  %v3227_v38 = vld [vmem:[#allocation18 + $0x70] sm:$0xff] }
0x1c05   :  { %3297 = vmatpush.msrb.mxu3 %v3274_v46  ;;  %v3229_v46 = vld [vmem:[#allocation18 + $0x80] sm:$0xff]  ;;  %3287 = vmatpush.msra.mxu0 %v3233_v63 }
0x1c06   :  { %3320 = vmatpush.msrb.mxu1 %v3263_v62  ;;  %v3272_v62 = vld [vmem:[#allocation18 + $0x1d8] sm:$0xff] }
0x1c07   :  { %3298 = vmatpush.msrb.mxu3 %v3270_v31  ;;  %3288 = vmatpush.msra.mxu0 %v3229_v46 }
0x1c08   :  { %3321 = vmatpush.msrb.mxu1 %v3259_v19  ;;  %v3244_v19 = vld [vmem:[#allocation18 + $0xf8] sm:$0xff] }
0x1c09   :  { %3299 = vmatpush.msrb.mxu3 %v3266_v5  ;;  %v3226_v5 = vld [vmem:[#allocation18 + $0x68] sm:$0xff]  ;;  %3289 = vmatpush.msra.mxu0 %v3225_v44 }
0x1c0a   :  { %3322 = vmatpush.msrb.mxu1 %v3255_v29  ;;  %v3221_v29 = vld [vmem:[#allocation18 + $0x40] sm:$0xff] }
0x1c0b   :  { %3300 = vmatpush.msrb.mxu3 %v3262_v10  ;;  %v3276_v10 = vld [vmem:[#allocation18 + $0x1f8] sm:$0xff]  ;;  %3290 = vmatpush.msra.mxu0 %v3221_v29 }
0x1c0c   :  { %3323 = vmatpush.msrb.mxu1 %v3251_v43  ;;  %v3219_v43 = vld [vmem:[#allocation18 + $0x30] sm:$0xff] }
0x1c0d   :  { %3301 = vmatpush.msrb.mxu3 %v3258_v27  ;;  %v3256_v27 = vld [vmem:[#allocation18 + $0x158] sm:$0xff] }
0x1c0e   :  { %3324 = vmatpush.msrb.mxu1 %v3247_v59  ;;  %v3216_v59 = vld [vmem:[#allocation18 + $0x18] sm:$0xff] }
0x1c0f   :  { %3302 = vmatpush.msrb.mxu3 %v3254_v24  ;;  %v3232_v24 = vld [vmem:[#allocation18 + $0x98] sm:$0xff] }
0x1c10   :  { %3325 = vmatpush.msrb.mxu1 %v3243_v11  ;;  %v4991_v11 = vmov 28  }
0x1c11   :  { %3303 = vmatpush.msrb.mxu3 %v3250_v55  ;;  %v3224_v55 = vld [vmem:[#allocation18 + $0x58] sm:$0xff]  ;;  %4581 = vset.pattern.permute.xlu0 %v4991_v11 }
0x1c12   :  { %3326 = vmatpush.msrb.mxu1 %v3239_v26 }
0x1c13   :  { %3304 = vmatpush.msrb.mxu3 %v3246_v30  ;;  %v3214_v30 = vld [vmem:[#allocation18 + $0x8] sm:$0xff] }
0x1c15   :  { %3305 = vmatpush.msrb.mxu3 %v3242_v54 }
0x1c17   :  { %3306 = vmatpush.msrb.mxu3 %v3238_v33 }
0x1c87   :  { %v3119_v50 = vpop.f32.mrf.mxu3 }
0x1c88   :  { %v6195_v14 = vadd.f32 %v3119_v50, %v3102_v36  ;;  %v3234_v36 = vld [vmem:[#allocation18 + $0xa8] sm:$0xff]  ;;  %v4668_v50 = vld [vmem:[#allocation6] ss:$0 sm:$0xff] }
0x1c89   :  { %3307 = vmatpush.msrb.mxu3 %v3234_v36 }
0x1c8a   :  { %3161 = vrot.lane.b32.xlu2 %v6195_v14, %s4964_s5  ;;  %3155 = vrot.lane.b32.xlu1 %v6195_v14, %s4963_s4 }
0x1c8b   :  { %3167 = vrot.lane.b32.xlu0 %v6195_v14, %s4962_s20  ;;  %3308 = vmatpush.msrb.mxu3 %v3230_v18 }
0x1c8d   :  { %3309 = vmatpush.msrb.mxu3 %v3226_v5 }
0x1c8f   :  { %v3121_v51 = vpop.f32.mrf.mxu3 }
0x1c90   :  { %v3235_v51 = vld [vmem:[#allocation18 + $0xb0] sm:$0xff] }
0x1c91   :  { %3327 = vmatpush.msrb.mxu1 %v3235_v51 }
0x1c92   :  { %3142 = vrot.lane.b32.xlu2 %v6195_v14, %s4952_s25  ;;  %3136 = vrot.lane.b32.xlu1 %v6195_v14, %s4965_s23 }
0x1c93   :  { %3149 = vrot.lane.b32.xlu0 %v6195_v14, %s4950_s22 }
0x1c9a   :  { %3130 = vrot.lane.b32.xlu1 %v6195_v14, %s4960_s17  ;;  %3188 = vperm.xlu2 %4580, %v6186_v20  }
0x1c9b   :  { %3124 = vrot.lane.b32.xlu0 %v6195_v14, %s4961_s19 }
0x1ca3   :  { %3379 = vperm.xlu0 %4581, %v6186_v20  }
0x1cab   :  { %4585 = vset.pattern.permute.xlu0 %v4995_v7 }
0x1ce4   :  { %v3162_v0 = vpop.permute.xlu2 %3161 }
0x1ce5   :  { %v3165_v48 = vmul.f32 %v4661_v60, %v3162_v0  ;;  %v3252_v0 = vld [vmem:[#allocation18 + $0x138] sm:$0xff] }
0x1ce6   :  { %v3236_v60 = vld [vmem:[#allocation18 + $0xb8] sm:$0xff] }
0x1cec   :  { %v3143_v28 = vpop.permute.xlu2 %3142 }
0x1ced   :  { %v3146_v4 = vmul.f32 %v4662_v8, %v3143_v28 }
0x1cfc   :  { %v3156_v58 = vpop.permute.xlu1 %3155 }
0x1cfd   :  { %v3168_v6 = vpop.permute.xlu0 %3167  ;;  %v3159_v53 = vmul.f32 %v4663_v32, %v3156_v58  ;;  %v3123_v58 = vld [vmem:[#allocation4 + $0x6c] sm:$0xf] }
0x1cfe   :  { %v3171_v2 = vmul.f32 %v4664_v52, %v3168_v6  ;;  %v3264_v32 = vld [vmem:[#allocation18 + $0x198] sm:$0xff] }
0x1cff   :  { %v3185_v35 = vpack.c.bf16 %v3165_v48, %v3159_v53  ;;  %v3260_v6 = vld [vmem:[#allocation18 + $0x178] sm:$0xff]  ;;  %v3222_v53 = vld [vmem:[#allocation18 + $0x48] sm:$0xff] }
0x1d00   :  { %v3186_v16 = vpack.c.bf16 %v3171_v2, %v3171_v2  ;;  %v3248_v2 = vld [vmem:[#allocation18 + $0x118] sm:$0xff]  ;;  %3310 = vmatpush.msrb.mxu3 %v3222_v53 }
0x1d01   :  { %v3220_v48 = vld [vmem:[#allocation18 + $0x38] sm:$0xff] }
0x1d02   :  { %v3195_v57 = vsel %vm531_vm1, %v3186_v16, 0  ;;  %v3228_v16 = vld [vmem:[#allocation18 + $0x78] sm:$0xff] }
0x1d03   :  { %3200 = vmatpush.bf16.msra.mxu2 %v3195_v57  ;;  %v3217_v57 = vld [vmem:[#allocation18 + $0x20] sm:$0xff] }
0x1d04   :  { %v3137_v17 = vpop.permute.xlu1 %3136  ;;  %3291 = vmatpush.msra.mxu0 %v3217_v57 }
0x1d05   :  { %v3150_v40 = vpop.permute.xlu0 %3149  ;;  %v3140_v3 = vmul.f32 %v4665_v39, %v3137_v17  ;;  %v3215_v17 = vld [vmem:[#allocation18 + $0x10] sm:$0xff] }
0x1d06   :  { %v3153_v49 = vmul.f32 %v4666_v37, %v3150_v40  ;;  %v3218_v37 = vld [vmem:[#allocation18 + $0x28] sm:$0xff]  ;;  %3292 = vmatpush.msra.mxu0 %v3213_v61 }
0x1d07   :  { %3201 = vmatpush.bf16.msra.mxu2 %v3185_v35  ;;  %v3183_v13 = vpack.c.bf16 %v3146_v4, %v3140_v3  ;;  %3311 = vmatpush.msrb.mxu3 %v3218_v37  ;;  %v3189_v35 = vpop.permute.xlu2 %3188 }
0x1d08   :  { %v3184_v12 = vpack.c.bf16 %v3153_v49, %v6195_v14  ;;  %v3231_v14 = vld [vmem:[#allocation18 + $0x90] sm:$0xff] }
0x1d09   :  { %3328 = vmatpush.msrb.mxu1 %v3231_v14  ;;  %3312 = vmatpush.msrb.mxu3 %v3214_v30 }
0x1d0b   :  { %3202 = vmatpush.bf16.msra.mxu2 %v3184_v12  ;;  %3329 = vmatpush.msrb.mxu1 %v3227_v38  ;;  %v3373_v12 = vld [vmem:[#allocation4 + $0x70] sm:$0xf] }
0x1d0c   :  { %v3131_v21 = vpop.permute.xlu1 %3130 }
0x1d0d   :  { %v3134_v31 = vmul.f32 %v4667_v23, %v3131_v21  ;;  %v3125_v15 = vpop.permute.xlu0 %3124  ;;  %3330 = vmatpush.msrb.mxu1 %v3223_v56 }
0x1d0e   :  { %v3128_v52 = vmul.f32 %v4668_v50, %v3125_v15 }
0x1d0f   :  { %3203 = vmatpush.bf16.msra.mxu2 %v3183_v13  ;;  %3331 = vmatpush.msrb.mxu1 %v3219_v43 }
0x1d10   :  { %v3182_v41 = vpack.c.bf16 %v3134_v31, %v3128_v52 }
0x1d11   :  { %3332 = vmatpush.msrb.mxu1 %v3215_v17 }
0x1d13   :  { %3204 = vmatpush.bf16.msra.mxu2 %v3182_v41  ;;  %v4466_v41 = vld [vmem:[%s6714_s3 + $0x20] ss:$8 sm:$0xf] }
0x1d14   :  { %v3669_v29 = vperm.slane %v4466_v41, 3 }
0x1d16   :  { %4455 = vmatmul.msk.bf16.vlgmr.msra.gmra.mxu2 %vm527_vm9, %v3123_v58  ;;  %v3667_v58 = vperm.slane %v4466_v41, 1 }
0x1d17   :  { %3337 = vmatpush.msrb.mxu2 %v3276_v10  ;;  %v3666_v10 = vperm.slane %v4466_v41, 0 }
0x1d19   :  { %3338 = vmatpush.msrb.mxu2 %v3272_v62 }
0x1d1b   :  { %3339 = vmatpush.msrb.mxu2 %v3268_v1 }
0x1d1d   :  { %3340 = vmatpush.msrb.mxu2 %v3264_v32 }
0x1d1f   :  { %3341 = vmatpush.msrb.mxu2 %v3260_v6 }
0x1d21   :  { %3342 = vmatpush.msrb.mxu2 %v3256_v27 }
0x1d23   :  { %3343 = vmatpush.msrb.mxu2 %v3252_v0 }
0x1d25   :  { %3344 = vmatpush.msrb.mxu2 %v3248_v2 }
0x1d27   :  { %3345 = vmatpush.msrb.mxu2 %v3244_v19 }
0x1d29   :  { %3346 = vmatpush.msrb.mxu2 %v3240_v47 }
0x1d2b   :  { %3347 = vmatpush.msrb.mxu2 %v3236_v60 }
0x1d2d   :  { %3348 = vmatpush.msrb.mxu2 %v3232_v24 }
0x1d2f   :  { %3349 = vmatpush.msrb.mxu2 %v3228_v16  ;;  %v3668_v16 = vperm.slane %v4466_v41, 2 }
0x1d31   :  { %3350 = vmatpush.msrb.mxu2 %v3224_v55 }
0x1d33   :  { %3351 = vmatpush.msrb.mxu2 %v3220_v48 }
0x1d35   :  { %3352 = vmatpush.msrb.mxu2 %v3216_v59 }
0x1d99   :  { %v3206_v39 = vpop.f32.mrf.mxu2 }
0x1d9a   :  { %v3207_v40 = vadd.f32 %v3206_v39, %v3189_v35 }
0x1d9c   :  { %vm3210_vm15 = vcmp.ge.f32.partialorder %v3207_v40, 0.0  ;;  %v3211_v45 = vmul.f32 0.01, %v3207_v40 }
0x1d9e   :  { %v3212_v54 = vsel %vm3210_vm15, %v3207_v40, %v3211_v45 }
0x1d9f   :  { %3293 = vmatmul.f32.vlgmr.msra.gmra.mxu0 %v3212_v54  ;;  %3313 = vmatmul.f32.vlgmr.msrb.gmra.mxu3 %v3212_v54 }
0x1da0   :  { %3333 = vmatmul.f32.vlgmr.msrb.gmra.mxu1 %v3212_v54  ;;  %3353 = vmatmul.f32.vlgmr.msrb.gmra.mxu2 %v3212_v54 }
0x1da1   :  { %v3208_v49 = vpop.f32.mrf.mxu2 }
0x1e1c   :  { %v3294_v8 = vpop.f32.mrf.mxu0 }
0x1e1d   :  { %v6219_v9 = vpack.c.bf16 %v6011_v22, %v3294_v8  ;;  %v3334_v33 = vpop.f32.mrf.mxu1 }
0x1e1e   :  { %v6222_v28 = vpack.c.bf16 %v6017_v42, %v3334_v33  ;;  %v3380_v42 = vpop.permute.xlu0 %3379  ;;  %v4465_v33 = vld [vmem:[%s6714_s3 + $0x7] ss:$8 sm:$0xf] }
0x1e1f   :  { %3392 = vmatpush.bf16.msrb.mxu0 %v6219_v9 }
0x1e20   :  { %3418 = vmatpush.bf16.msra.mxu1 %v6222_v28 }
0x1e22   :  { %v3314_v26 = vpop.f32.mrf.mxu3  ;;  %4456 = vmatmul.msk.bf16.vlgmr.msrb.gmra.mxu0 %vm633_vm11, %v3373_v12 }
0x1e23   :  { %v6228_v3 = vpack.c.bf16 %v6014_v25, %v3314_v26  ;;  %v3354_v23 = vpop.f32.mrf.mxu2  ;;  %4458 = vmatmul.msk.bf16.vlgmr.msra.gmra.mxu1 %vm633_vm11, %v3373_v12  ;;  %v3636_v26 = vperm.slane %v4465_v33, 0 }
0x1e24   :  { %v6232_v22 = vpack.c.bf16 %v6020_v34, %v3354_v23  ;;  %v3637_v23 = vperm.slane %v4465_v33, 1 }
0x1e25   :  { %3405 = vmatpush.bf16.msra.mxu3 %v6228_v3 }
0x1e26   :  { %3431 = vmatpush.bf16.msra.mxu2 %v6232_v22 }
0x1e28   :  { %4457 = vmatmul.msk.bf16.vlgmr.msra.gmra.mxu3 %vm633_vm11, %v3373_v12 }
0x1e29   :  { %4459 = vmatmul.msk.bf16.vlgmr.msra.gmra.mxu2 %vm633_vm11, %v3373_v12  ;;  %v4464_v12 = vld [vmem:[%s6714_s3 + $0x6] ss:$8 sm:$0xf] }
0x1e9f   :  { %v3394_v63 = vpop.f32.mrf.mxu0 }
0x1ea0   :  { %v3420_v36 = vpop.f32.mrf.mxu1  ;;  %v6238_v50 = vadd.f32 %v3394_v63, %v3380_v42  ;;  %v3607_v63 = vperm.slane %v4464_v12, 1 }
0x1ea1   :  { %v6240_v25 = vadd.f32 %v3420_v36, %v3380_v42 }
0x1ea2   :  { %3592 = vrot.lane.b32.xlu0 %v6238_v50, %s4948_s1  ;;  %3652 = vrot.lane.b32.xlu1 %v6238_v50, %s4947_s21 }
0x1ea3   :  { %3596 = vrot.lane.b32.xlu2 %v6240_v25, %s4948_s1 }
0x1ea7   :  { %v3396_v34 = vpop.f32.mrf.mxu0 }
0x1ea8   :  { %v3422_v51 = vpop.f32.mrf.mxu1 }
0x1ea9   :  { %v4463_v51 = vld [vmem:[%s6714_s3 + $0x5] ss:$8 sm:$0xf] }
0x1eaa   :  { %3626 = vrot.lane.b32.xlu0 %v6240_v25, %s4949_s6  ;;  %3656 = vrot.lane.b32.xlu1 %v6240_v25, %s4947_s21 }
0x1eab   :  { %3562 = vrot.lane.b32.xlu2 %v6238_v50, %s4950_s22  ;;  %v3407_v4 = vpop.f32.mrf.mxu3 }
0x1eac   :  { %v3433_v46 = vpop.f32.mrf.mxu2  ;;  %v6266_v14 = vadd.f32 %v3407_v4, %v3380_v42 }
0x1ead   :  { %v6274_v13 = vadd.f32 %v3433_v46, %v3380_v42  ;;  %v3606_v42 = vperm.slane %v4464_v12, 0 }
0x1eb2   :  { %3498 = vrot.lane.b32.xlu0 %v6238_v50, %s4951_s24  ;;  %3622 = vrot.lane.b32.xlu1 %v6238_v50, %s4949_s6 }
0x1eb3   :  { %3502 = vrot.lane.b32.xlu2 %v6240_v25, %s4951_s24  ;;  %v3409_v18 = vpop.f32.mrf.mxu3 }
0x1eb4   :  { %v3435_v21 = vpop.f32.mrf.mxu2  ;;  %v3576_v18 = vperm.slane %v4463_v51, 0 }
0x1eb5   :  { %v3577_v21 = vperm.slane %v4463_v51, 1 }
0x1eba   :  { %3532 = vrot.lane.b32.xlu0 %v6240_v25, %s4952_s25  ;;  %3566 = vrot.lane.b32.xlu1 %v6240_v25, %s4950_s22 }
0x1ebb   :  { %3438 = vrot.lane.b32.xlu2 %v6238_v50, %s4953_s0 }
0x1ec2   :  { %3468 = vrot.lane.b32.xlu0 %v6238_v50, %s4954_s7  ;;  %3528 = vrot.lane.b32.xlu1 %v6238_v50, %s4952_s25 }
0x1ec3   :  { %3654 = vrot.lane.b32.xlu2 %v6266_v14, %s4947_s21 }
0x1eca   :  { %3598 = vrot.lane.b32.xlu0 %v6274_v13, %s4948_s1  ;;  %3442 = vrot.lane.b32.xlu1 %v6240_v25, %s4953_s0 }
0x1ecb   :  { %3658 = vrot.lane.b32.xlu2 %v6274_v13, %s4947_s21 }
0x1ed2   :  { %3564 = vrot.lane.b32.xlu0 %v6266_v14, %s4950_s22  ;;  %3594 = vrot.lane.b32.xlu1 %v6266_v14, %s4948_s1 }
0x1ed3   :  { %3624 = vrot.lane.b32.xlu2 %v6266_v14, %s4949_s6 }
0x1eda   :  { %3504 = vrot.lane.b32.xlu0 %v6274_v13, %s4951_s24  ;;  %3628 = vrot.lane.b32.xlu1 %v6274_v13, %s4949_s6 }
0x1edb   :  { %3568 = vrot.lane.b32.xlu2 %v6274_v13, %s4950_s22 }
0x1ee2   :  { %3440 = vrot.lane.b32.xlu0 %v6266_v14, %s4953_s0  ;;  %3500 = vrot.lane.b32.xlu1 %v6266_v14, %s4951_s24 }
0x1ee3   :  { %3530 = vrot.lane.b32.xlu2 %v6266_v14, %s4952_s25 }
0x1eea   :  { %3474 = vrot.lane.b32.xlu0 %v6274_v13, %s4954_s7  ;;  %3534 = vrot.lane.b32.xlu1 %v6274_v13, %s4952_s25 }
0x1eeb   :  { %3444 = vrot.lane.b32.xlu2 %v6274_v13, %s4953_s0 }
0x1ef2   :  { %3470 = vrot.lane.b32.xlu1 %v6266_v14, %s4954_s7 }
0x1ef3   :  { %3472 = vrot.lane.b32.xlu2 %v6240_v25, %s4954_s7 }
0x1efd   :  { %v6310_v31 = vpop.permute.xlu2 %3596 }
0x1f05   :  { %v6312_v15 = vpop.permute.xlu2 %3562 }
0x1f0d   :  { %v6314_v44 = vpop.permute.xlu2 %3502 }
0x1f14   :  { %v6316_v5 = vpop.permute.xlu0 %3592  ;;  %v3653_v52 = vpop.permute.xlu1 %3652 }
0x1f15   :  { %v6318_v38 = vpop.permute.xlu2 %3438 }
0x1f1c   :  { %v6323_v62 = vpop.permute.xlu0 %3626  ;;  %v3657_v1 = vpop.permute.xlu1 %3656 }
0x1f1d   :  { %v3655_v32 = vpop.permute.xlu2 %3654 }
0x1f1e   :  { %v3662_v6 = vsel %vm442_vm0, %v3653_v52, %v3655_v32  ;;  %v3661_v27 = vsel %vm442_vm0, %v3655_v32, %v3657_v1 }
0x1f1f   :  { %v3674_v0 = vmul.f32 %v3666_v10, %v3662_v6  ;;  %v3675_v2 = vmul.f32 %v3667_v58, %v3661_v27 }
0x1f21   :  { %v3734_v19 = vpack.c.bf16 %v3674_v0, %v3674_v0  ;;  %v3735_v47 = vpack.c.bf16 %v3675_v2, %v3675_v2 }
0x1f23   :  { %v3746_v60 = vsel %vm531_vm1, %v3734_v19, 0  ;;  %v3749_v24 = vsel %vm531_vm1, %v3735_v47, 0 }
0x1f24   :  { %3760 = vmatpush.bf16.msra.mxu0 %v3746_v60  ;;  %3773 = vmatpush.bf16.msrb.mxu3 %v3749_v24  ;;  %v6331_v53 = vpop.permute.xlu0 %3498  ;;  %v3623_v56 = vpop.permute.xlu1 %3622  ;;  %v3608_v24 = vperm.slane %v4464_v12, 2 }
0x1f25   :  { %v3659_v55 = vpop.permute.xlu2 %3658 }
0x1f26   :  { %v3660_v57 = vsel %vm442_vm0, %v3657_v1, %v3659_v55  ;;  %v3663_v37 = vsel %vm442_vm0, %v3659_v55, %v3653_v52  ;;  %v3639_v55 = vperm.slane %v4465_v33, 3 }
0x1f27   :  { %v3676_v43 = vmul.f32 %v3668_v16, %v3660_v57  ;;  %v3677_v48 = vmul.f32 %v3669_v29, %v3663_v37  ;;  %v3609_v16 = vperm.slane %v4464_v12, 3  ;;  %v3638_v29 = vperm.slane %v4465_v33, 2 }
0x1f29   :  { %v3736_v61 = vpack.c.bf16 %v3676_v43, %v3676_v43  ;;  %v3737_v30 = vpack.c.bf16 %v3677_v48, %v3677_v48  ;;  %v3578_v43 = vperm.slane %v4463_v51, 2  ;;  %v3579_v48 = vperm.slane %v4463_v51, 3 }
0x1f2b   :  { %v3752_v17 = vsel %vm531_vm1, %v3736_v61, 0  ;;  %v3755_v59 = vsel %vm531_vm1, %v3737_v30, 0 }
0x1f2c   :  { %3786 = vmatpush.bf16.msrb.mxu1 %v3752_v17  ;;  %3799 = vmatpush.bf16.msrb.mxu2 %v3755_v59  ;;  %v6339_v35 = vpop.permute.xlu0 %3532  ;;  %v3567_v39 = vpop.permute.xlu1 %3566 }
0x1f2d   :  { %v3625_v40 = vpop.permute.xlu2 %3624 }
0x1f2e   :  { %v3631_v36 = vsel %vm410_vm3, %v3625_v40, %v6323_v62  ;;  %v3632_v34 = vsel %vm410_vm3, %v3623_v56, %v3625_v40 }
0x1f2f   :  { %v3644_v1 = vmul.f32 %v3636_v26, %v3632_v34  ;;  %v3645_v32 = vmul.f32 %v3637_v23, %v3631_v36 }
0x1f34   :  { %v6341_v45 = vpop.permute.xlu0 %3468  ;;  %v6343_v54 = vpop.permute.xlu1 %3528 }
0x1f35   :  { %v3569_v8 = vpop.permute.xlu2 %3568 }
0x1f36   :  { %v3570_v61 = vsel %vm346_vm4, %v3567_v39, %v3569_v8  ;;  %v3573_v30 = vsel %vm346_vm4, %v3569_v8, %v6312_v15 }
0x1f37   :  { %v3586_v8 = vmul.f32 %v3578_v43, %v3570_v61 }
0x1f3c   :  { %v3599_v49 = vpop.permute.xlu0 %3598  ;;  %v6345_v11 = vpop.permute.xlu1 %3442 }
0x1f3d   :  { %v3531_v6 = vpop.permute.xlu2 %3530  ;;  %v3600_v57 = vsel %vm378_vm2, %v6310_v31, %v3599_v49  ;;  %v3603_v37 = vsel %vm378_vm2, %v3599_v49, %v6316_v5 }
0x1f3e   :  { %v3616_v33 = vmul.f32 %v3608_v24, %v3600_v57  ;;  %v3617_v12 = vmul.f32 %v3609_v16, %v3603_v37 }
0x1f44   :  { %v3565_v4 = vpop.permute.xlu0 %3564  ;;  %v3595_v46 = vpop.permute.xlu1 %3594 }
0x1f45   :  { %v3601_v52 = vsel %vm378_vm2, %v3595_v46, %v6310_v31  ;;  %v3602_v41 = vsel %vm378_vm2, %v6316_v5, %v3595_v46  ;;  %v3571_v10 = vsel %vm346_vm4, %v3565_v4, %v3567_v39  ;;  %v3572_v58 = vsel %vm346_vm4, %v6312_v15, %v3565_v4  ;;  %v4462_v15 = vld [vmem:[%s6714_s3 + $0x3] ss:$8 sm:$0xf] }
0x1f46   :  { %v3614_v27 = vmul.f32 %v3606_v42, %v3602_v41  ;;  %v3615_v0 = vmul.f32 %v3607_v63, %v3601_v52  ;;  %v3584_v2 = vmul.f32 %v3576_v18, %v3572_v58  ;;  %v3585_v19 = vmul.f32 %v3577_v21, %v3571_v10  ;;  %v3445_v63 = vpop.permute.xlu2 %3444 }
0x1f47   :  { %v4992_v42 = vmov 29   ;;  %v3544_v36 = vperm.slane %v4462_v15, 2  ;;  %v3537_v4 = vsel %vm310_vm6, %v3531_v6, %v6339_v35  ;;  %v3538_v46 = vsel %vm310_vm6, %v6343_v54, %v3531_v6 }
0x1f48   :  { %v3730_v47 = vpack.c.bf16 %v3644_v1, %v3614_v27  ;;  %v3731_v60 = vpack.c.bf16 %v3645_v32, %v3615_v0  ;;  %v3726_v40 = vpack.c.bf16 %v3584_v2, %v6238_v50  ;;  %v3727_v49 = vpack.c.bf16 %v3585_v19, %v6266_v14  ;;  %4582 = vset.pattern.permute.xlu1 %v4992_v42  ;;  %v4461_v50 = vld [vmem:[%s6714_s3 + $0x2] ss:$8 sm:$0xf]  ;;  %v4460_v19 = vld [vmem:[%s6714_s3 + $0x1] ss:$8 sm:$0xf] }
0x1f49   :  { %3739 = vperm.xlu1 %4582, %v6186_v20   ;;  %v3543_v14 = vperm.slane %v4462_v15, 1  ;;  %v3513_v34 = vperm.slane %v4461_v50, 1  ;;  %v3514_v51 = vperm.slane %v4461_v50, 2  ;;  %v3728_v52 = vpack.c.bf16 %v3586_v8, %v6240_v25  ;;  %v3450_v25 = vld [vmem:[%s6714_s3] ss:$8 sm:$0xf] }
0x1f4a   :  { %3761 = vmatpush.bf16.msra.mxu0 %v3730_v47  ;;  %3774 = vmatpush.bf16.msrb.mxu3 %v3731_v60  ;;  %v3552_v32 = vmul.f32 %v3544_v36, %v3537_v4  ;;  %v3512_v47 = vperm.slane %v4461_v50, 0  ;;  %v3515_v60 = vperm.slane %v4461_v50, 3  ;;  %v3545_v24 = vperm.slane %v4462_v15, 3 }
0x1f4b   :  { %v3551_v1 = vmul.f32 %v3543_v14, %v3538_v46  ;;  %v3452_v57 = vperm.slane %v3450_v25, 0  ;;  %v3455_v37 = vperm.slane %v3450_v25, 3  ;;  %v3482_v43 = vperm.slane %v4460_v19, 0 }
0x1f4c   :  { %v3505_v17 = vpop.permute.xlu0 %3504  ;;  %v3629_v59 = vpop.permute.xlu1 %3628  ;;  %v3453_v8 = vperm.slane %v3450_v25, 1  ;;  %v3484_v50 = vperm.slane %v4460_v19, 2 }
0x1f4d   :  { %v3630_v31 = vsel %vm410_vm3, %v6323_v62, %v3629_v59  ;;  %v3633_v5 = vsel %vm410_vm3, %v3629_v59, %v3623_v56  ;;  %v3587_v56 = vmul.f32 %v3579_v48, %v3573_v30  ;;  %v3485_v48 = vperm.slane %v4460_v19, 3 }
0x1f4e   :  { %v3646_v39 = vmul.f32 %v3638_v29, %v3630_v31  ;;  %v3647_v26 = vmul.f32 %v3639_v55, %v3633_v5  ;;  %3762 = vmatpush.bf16.msra.mxu0 %v3726_v40  ;;  %3775 = vmatpush.bf16.msrb.mxu3 %v3727_v49  ;;  %v3473_v16 = vpop.permute.xlu2 %3472  ;;  %v3506_v29 = vsel %vm278_vm5, %v6314_v44, %v3505_v17 }
0x1f4f   :  { %v3729_v58 = vpack.c.bf16 %v3587_v56, %v6274_v13  ;;  %v3542_v13 = vperm.slane %v4462_v15, 0  ;;  %v3509_v55 = vsel %vm278_vm5, %v3505_v17, %v6331_v53  ;;  %v3523_v5 = vmul.f32 %v3515_v60, %v3506_v29 }
0x1f50   :  { %v3732_v23 = vpack.c.bf16 %v3646_v39, %v3616_v33  ;;  %v3733_v62 = vpack.c.bf16 %v3647_v26, %v3617_v12  ;;  %v3520_v17 = vmul.f32 %v3512_v47, %v3509_v55  ;;  %v3446_v33 = vsel %vm215_vm7, %v6345_v11, %v3445_v63 }
0x1f51   :  { %v3449_v12 = vsel %vm215_vm7, %v3445_v63, %v6318_v38  ;;  %v3463_v42 = vmul.f32 %v3455_v37, %v3446_v33 }
0x1f52   :  { %3787 = vmatpush.bf16.msrb.mxu1 %v3732_v23  ;;  %3800 = vmatpush.bf16.msrb.mxu2 %v3733_v62  ;;  %v3454_v23 = vperm.slane %v3450_v25, 2  ;;  %v3483_v62 = vperm.slane %v4460_v19, 1 }
0x1f54   :  { %v3441_v18 = vpop.permute.xlu0 %3440  ;;  %v3501_v21 = vpop.permute.xlu1 %3500 }
0x1f55   :  { %v3507_v41 = vsel %vm278_vm5, %v3501_v21, %v6314_v44  ;;  %v3508_v10 = vsel %vm278_vm5, %v6331_v53, %v3501_v21  ;;  %v3448_v56 = vsel %vm215_vm7, %v6318_v38, %v3441_v18  ;;  %v3447_v63 = vsel %vm215_vm7, %v3441_v18, %v6345_v11 }
0x1f56   :  { %v3521_v27 = vmul.f32 %v3513_v34, %v3508_v10  ;;  %v3522_v0 = vmul.f32 %v3514_v51, %v3507_v41  ;;  %3788 = vmatpush.bf16.msrb.mxu1 %v3728_v52  ;;  %3801 = vmatpush.bf16.msrb.mxu2 %v3729_v58  ;;  %v3461_v51 = vmul.f32 %v3453_v8, %v3448_v56  ;;  %v3437_v41 = vld [vmem:[#allocation4 + $0x74] sm:$0xf]  ;;  %v4993_v11 = vmov 30  }
0x1f57   :  { %v3462_v21 = vmul.f32 %v3454_v23, %v3447_v63  ;;  %4583 = vset.pattern.permute.xlu2 %v4993_v11 }
0x1f58   :  { %v3723_v6 = vpack.c.bf16 %v3551_v1, %v3521_v27  ;;  %v3724_v2 = vpack.c.bf16 %v3552_v32, %v3522_v0  ;;  %3847 = vperm.xlu2 %4583, %v6186_v20  }
0x1f5a   :  { %3776 = vmatpush.bf16.msrb.mxu3 %v3723_v6  ;;  %3789 = vmatpush.bf16.msrb.mxu1 %v3724_v2 }
0x1f5c   :  { %v3475_v61 = vpop.permute.xlu0 %3474  ;;  %v3535_v30 = vpop.permute.xlu1 %3534 }
0x1f5d   :  { %v3476_v59 = vsel %vm246_vm8, %v3473_v16, %v3475_v61  ;;  %v3479_v31 = vsel %vm246_vm8, %v3475_v61, %v6341_v45  ;;  %v3536_v44 = vsel %vm310_vm6, %v6339_v35, %v3535_v30  ;;  %v3539_v53 = vsel %vm310_vm6, %v3535_v30, %v6343_v54  ;;  %v3837_v30 = vld [vmem:[#allocation4 + $0x78] sm:$0xf] }
0x1f5e   :  { %v3550_v40 = vmul.f32 %v3542_v13, %v3539_v53  ;;  %v3553_v49 = vmul.f32 %v3545_v24, %v3536_v44  ;;  %v3490_v39 = vmul.f32 %v3482_v43, %v3479_v31  ;;  %v3493_v26 = vmul.f32 %v3485_v48, %v3476_v59 }
0x1f5f   :  { %v3460_v54 = vmul.f32 %v3452_v57, %v3449_v12 }
0x1f60   :  { %v3722_v15 = vpack.c.bf16 %v3550_v40, %v3520_v17  ;;  %v3725_v35 = vpack.c.bf16 %v3553_v49, %v3523_v5  ;;  %v3721_v34 = vpack.c.bf16 %v3493_v26, %v3463_v42 }
0x1f61   :  { %v3718_v36 = vpack.c.bf16 %v3490_v39, %v3460_v54 }
0x1f62   :  { %3763 = vmatpush.bf16.msra.mxu0 %v3722_v15  ;;  %3802 = vmatpush.bf16.msrb.mxu2 %v3725_v35 }
0x1f64   :  { %v3471_v14 = vpop.permute.xlu1 %3470 }
0x1f65   :  { %v3477_v4 = vsel %vm246_vm8, %v3471_v14, %v3473_v16  ;;  %v3478_v46 = vsel %vm246_vm8, %v6341_v45, %v3471_v14 }
0x1f66   :  { %v3491_v38 = vmul.f32 %v3483_v62, %v3478_v46  ;;  %v3492_v52 = vmul.f32 %v3484_v50, %v3477_v4  ;;  %3764 = vmatpush.bf16.msra.mxu0 %v3718_v36  ;;  %3803 = vmatpush.bf16.msrb.mxu2 %v3721_v34 }
0x1f68   :  { %v3719_v10 = vpack.c.bf16 %v3491_v38, %v3461_v51  ;;  %v3720_v58 = vpack.c.bf16 %v3492_v52, %v3462_v21 }
0x1f69   :  { %4467 = vmatmul.msk.bf16.vlgmr.msra.gmra.mxu0 %vm527_vm9, %v3437_v41  ;;  %4470 = vmatmul.msk.bf16.vlgmr.msrb.gmra.mxu2 %vm527_vm9, %v3437_v41 }
0x1f6a   :  { %3777 = vmatpush.bf16.msrb.mxu3 %v3719_v10  ;;  %3790 = vmatpush.bf16.msrb.mxu1 %v3720_v58  ;;  %v4479_v10 = vld [vmem:[%s6714_s3 + $0x6] ss:$8 sm:$0xf] }
0x1f6d   :  { %4468 = vmatmul.msk.bf16.vlgmr.msrb.gmra.mxu3 %vm527_vm9, %v3437_v41  ;;  %4469 = vmatmul.msk.bf16.vlgmr.msrb.gmra.mxu1 %vm527_vm9, %v3437_v41  ;;  %v4481_v41 = vld [vmem:[%s6714_s3 + $0x20] ss:$8 sm:$0xf] }
0x1f6e   :  { %v4146_v11 = vperm.slane %v4481_v41, 0 }
0x1fbb   :  { %v3740_v45 = vpop.permute.xlu1 %3739 }
0x1fe6   :  { %v3766_v18 = vpop.f32.mrf.mxu0 }
0x1fe7   :  { %v3767_v1 = vadd.f32 %v3766_v18, %v3740_v45  ;;  %v4148_v18 = vperm.slane %v4481_v41, 2 }
0x1fe9   :  { %vm3809_vm11 = vcmp.ge.f32.partialorder %v3767_v1, 0.0  ;;  %v3813_v32 = vmul.f32 0.01, %v3767_v1 }
0x1fea   :  { %v3792_v27 = vpop.f32.mrf.mxu1 }
0x1feb   :  { %v3793_v0 = vadd.f32 %v3792_v27, %v3740_v45  ;;  %v3817_v6 = vsel %vm3809_vm11, %v3767_v1, %v3813_v32  ;;  %v4149_v1 = vperm.slane %v4481_v41, 3  ;;  %v4086_v32 = vperm.slane %v4479_v10, 0 }
0x1fec   :  { %v3805_v2 = vpop.f32.mrf.mxu2  ;;  %v3842_v25 = vpack.c.bf16 %v3817_v6, %v3817_v6  ;;  %v4087_v27 = vperm.slane %v4479_v10, 1 }
0x1fed   :  { %vm3811_vm10 = vcmp.ge.f32.partialorder %v3793_v0, 0.0  ;;  %v3815_v19 = vmul.f32 0.01, %v3793_v0  ;;  %v3806_v47 = vadd.f32 %v3805_v2, %v3740_v45 }
0x1fee   :  { %v3768_v60 = vpop.f32.mrf.mxu0  ;;  %v3854_v13 = vsel %vm531_vm1, %v3842_v25, 0 }
0x1fef   :  { %v3819_v24 = vsel %vm3811_vm10, %v3793_v0, %v3815_v19  ;;  %vm3812_vm13 = vcmp.ge.f32.partialorder %v3806_v47, 0.0  ;;  %v3816_v16 = vmul.f32 0.01, %v3806_v47  ;;  %3871 = vmatpush.bf16.msrb.mxu0 %v3854_v13  ;;  %v4480_v0 = vld [vmem:[%s6714_s3 + $0x7] ss:$8 sm:$0xf] }
0x1ff0   :  { %v3844_v20 = vpack.c.bf16 %v3819_v24, %v3819_v24  ;;  %v3779_v29 = vpop.f32.mrf.mxu3 }
0x1ff1   :  { %v3820_v55 = vsel %vm3812_vm13, %v3806_v47, %v3816_v16  ;;  %v3780_v57 = vadd.f32 %v3779_v29, %v3740_v45  ;;  %v4147_v45 = vperm.slane %v4481_v41, 1 }
0x1ff2   :  { %v3845_v37 = vpack.c.bf16 %v3820_v55, %v3820_v55  ;;  %v3794_v43 = vpop.f32.mrf.mxu1  ;;  %v3860_v48 = vsel %vm531_vm1, %v3844_v20, 0  ;;  %v4118_v55 = vperm.slane %v4480_v0, 2 }
0x1ff3   :  { %vm3810_vm15 = vcmp.ge.f32.partialorder %v3780_v57, 0.0  ;;  %v3814_v61 = vmul.f32 0.01, %v3780_v57  ;;  %3872 = vmatpush.bf16.msrb.mxu0 %v6219_v9  ;;  %3897 = vmatpush.bf16.msra.mxu1 %v3860_v48  ;;  %v3848_v9 = vpop.permute.xlu2 %3847 }
0x1ff4   :  { %v3863_v59 = vsel %vm531_vm1, %v3845_v37, 0  ;;  %v3807_v31 = vpop.f32.mrf.mxu2  ;;  %v4088_v37 = vperm.slane %v4479_v10, 2 }
0x1ff5   :  { %v3818_v44 = vsel %vm3810_vm15, %v3780_v57, %v3814_v61  ;;  %3910 = vmatpush.bf16.msra.mxu2 %v3863_v59  ;;  %v4119_v57 = vperm.slane %v4480_v0, 3 }
0x1ff6   :  { %v3843_v53 = vpack.c.bf16 %v3818_v44, %v3818_v44  ;;  %4471 = vmatmul.msk.bf16.vlgmr.msrb.gmra.mxu0 %vm1102_vm12, %v3837_v30 }
0x1ff7   :  { %3898 = vmatpush.bf16.msra.mxu1 %v6222_v28 }
0x1ff8   :  { %v3857_v17 = vsel %vm531_vm1, %v3843_v53, 0  ;;  %v3781_v5 = vpop.f32.mrf.mxu3  ;;  %v4089_v53 = vperm.slane %v4479_v10, 3 }
0x1ff9   :  { %3884 = vmatpush.bf16.msra.mxu3 %v3857_v17  ;;  %3911 = vmatpush.bf16.msra.mxu2 %v6232_v22 }
0x1ffa   :  { %4473 = vmatmul.msk.bf16.vlgmr.msra.gmra.mxu1 %vm1102_vm12, %v3837_v30 }
0x1ffc   :  { %4474 = vmatmul.msk.bf16.vlgmr.msra.gmra.mxu2 %vm1102_vm12, %v3837_v30 }
0x1ffd   :  { %3885 = vmatpush.bf16.msra.mxu3 %v6228_v3 }
0x2000   :  { %4472 = vmatmul.msk.bf16.vlgmr.msra.gmra.mxu3 %vm1102_vm12, %v3837_v30 }
0x2073   :  { %v3874_v40 = vpop.f32.mrf.mxu0 }
0x2074   :  { %v6468_v49 = vadd.f32 %v3874_v40, %v3848_v9  ;;  %v4117_v40 = vperm.slane %v4480_v0, 1 }
0x2076   :  { %4072 = vrot.lane.b32.xlu1 %v6468_v49, %s4948_s1  ;;  %4132 = vrot.lane.b32.xlu0 %v6468_v49, %s4947_s21 }
0x2077   :  { %v3900_v28 = vpop.f32.mrf.mxu1 }
0x2078   :  { %v6474_v22 = vadd.f32 %v3900_v28, %v3848_v9 }
0x207a   :  { %4136 = vrot.lane.b32.xlu2 %v6474_v22, %s4947_s21 }
0x207b   :  { %v3876_v33 = vpop.f32.mrf.mxu0 }
0x207e   :  { %4106 = vrot.lane.b32.xlu1 %v6474_v22, %s4949_s6  ;;  %4076 = vrot.lane.b32.xlu0 %v6474_v22, %s4948_s1 }
0x207f   :  { %v3902_v3 = vpop.f32.mrf.mxu1  ;;  %v3913_v12 = vpop.f32.mrf.mxu2 }
0x2080   :  { %v6502_v35 = vadd.f32 %v3913_v12, %v3848_v9 }
0x2082   :  { %4102 = vrot.lane.b32.xlu2 %v6468_v49, %s4949_s6 }
0x2083   :  { %v3887_v39 = vpop.f32.mrf.mxu3 }
0x2084   :  { %v6504_v8 = vadd.f32 %v3887_v39, %v3848_v9  ;;  %v4116_v9 = vperm.slane %v4480_v0, 0 }
0x2086   :  { %3978 = vrot.lane.b32.xlu1 %v6468_v49, %s4951_s24  ;;  %4042 = vrot.lane.b32.xlu0 %v6468_v49, %s4950_s22 }
0x2087   :  { %v3915_v26 = vpop.f32.mrf.mxu2 }
0x208a   :  { %4046 = vrot.lane.b32.xlu2 %v6474_v22, %s4950_s22 }
0x208b   :  { %v3889_v15 = vpop.f32.mrf.mxu3 }
0x208e   :  { %4012 = vrot.lane.b32.xlu1 %v6474_v22, %s4952_s25  ;;  %3982 = vrot.lane.b32.xlu0 %v6474_v22, %s4951_s24 }
0x2092   :  { %4008 = vrot.lane.b32.xlu2 %v6468_v49, %s4952_s25 }
0x2096   :  { %3948 = vrot.lane.b32.xlu1 %v6468_v49, %s4954_s7  ;;  %3918 = vrot.lane.b32.xlu0 %v6468_v49, %s4953_s0 }
0x209a   :  { %3922 = vrot.lane.b32.xlu2 %v6474_v22, %s4953_s0 }
0x209e   :  { %4134 = vrot.lane.b32.xlu1 %v6504_v8, %s4947_s21  ;;  %4138 = vrot.lane.b32.xlu0 %v6502_v35, %s4947_s21 }
0x20a2   :  { %4074 = vrot.lane.b32.xlu2 %v6504_v8, %s4948_s1 }
0x20a6   :  { %4078 = vrot.lane.b32.xlu1 %v6502_v35, %s4948_s1  ;;  %4104 = vrot.lane.b32.xlu0 %v6504_v8, %s4949_s6 }
0x20aa   :  { %4108 = vrot.lane.b32.xlu2 %v6502_v35, %s4949_s6 }
0x20ae   :  { %4044 = vrot.lane.b32.xlu1 %v6504_v8, %s4950_s22  ;;  %4048 = vrot.lane.b32.xlu0 %v6502_v35, %s4950_s22 }
0x20b2   :  { %3980 = vrot.lane.b32.xlu2 %v6504_v8, %s4951_s24 }
0x20b6   :  { %3984 = vrot.lane.b32.xlu1 %v6502_v35, %s4951_s24  ;;  %4010 = vrot.lane.b32.xlu0 %v6504_v8, %s4952_s25 }
0x20ba   :  { %4014 = vrot.lane.b32.xlu2 %v6502_v35, %s4952_s25 }
0x20be   :  { %3920 = vrot.lane.b32.xlu1 %v6504_v8, %s4953_s0  ;;  %3924 = vrot.lane.b32.xlu0 %v6502_v35, %s4953_s0 }
0x20c2   :  { %3950 = vrot.lane.b32.xlu2 %v6504_v8, %s4954_s7 }
0x20c6   :  { %3954 = vrot.lane.b32.xlu1 %v6502_v35, %s4954_s7  ;;  %3952 = vrot.lane.b32.xlu0 %v6474_v22, %s4954_s7 }
0x20d4   :  { %v4137_v23 = vpop.permute.xlu2 %4136 }
0x20dc   :  { %v6540_v62 = vpop.permute.xlu2 %4102 }
0x20e4   :  { %v6542_v54 = vpop.permute.xlu2 %4046 }
0x20e8   :  { %v6544_v42 = vpop.permute.xlu1 %4072  ;;  %v4133_v56 = vpop.permute.xlu0 %4132 }
0x20ec   :  { %v6546_v50 = vpop.permute.xlu2 %4008 }
0x20f0   :  { %v4107_v63 = vpop.permute.xlu1 %4106  ;;  %v4077_v14 = vpop.permute.xlu0 %4076 }
0x20f4   :  { %v6552_v51 = vpop.permute.xlu2 %3922 }
0x20f8   :  { %v6548_v36 = vpop.permute.xlu1 %3978  ;;  %v6550_v34 = vpop.permute.xlu0 %4042 }
0x20fc   :  { %v4075_v21 = vpop.permute.xlu2 %4074 }
0x20fd   :  { %v4082_v29 = vsel %vm378_vm2, %v6544_v42, %v4075_v21  ;;  %v4081_v59 = vsel %vm378_vm2, %v4075_v21, %v4077_v14 }
0x20fe   :  { %v4094_v28 = vmul.f32 %v4086_v32, %v4082_v29  ;;  %v4095_v39 = vmul.f32 %v4087_v27, %v4081_v59  ;;  %v4478_v32 = vld [vmem:[%s6714_s3 + $0x5] ss:$8 sm:$0xf] }
0x2100   :  { %v6554_v4 = vpop.permute.xlu1 %4012  ;;  %v6556_v46 = vpop.permute.xlu0 %3982 }
0x2104   :  { %v4109_v58 = vpop.permute.xlu2 %4108 }
0x2105   :  { %v4110_v31 = vsel %vm410_vm3, %v4107_v63, %v4109_v58  ;;  %v4113_v44 = vsel %vm410_vm3, %v4109_v58, %v6540_v62 }
0x2106   :  { %v4126_v26 = vmul.f32 %v4118_v55, %v4110_v31  ;;  %v4127_v15 = vmul.f32 %v4119_v57, %v4113_v44 }
0x2108   :  { %v6558_v38 = vpop.permute.xlu1 %3948  ;;  %v6560_v52 = vpop.permute.xlu0 %3918 }
0x210c   :  { %v3981_v33 = vpop.permute.xlu2 %3980 }
0x2110   :  { %v4135_v6 = vpop.permute.xlu1 %4134  ;;  %v4139_v2 = vpop.permute.xlu0 %4138 }
0x2111   :  { %v4141_v25 = vsel %vm442_vm0, %v4135_v6, %v4137_v23  ;;  %v4142_v19 = vsel %vm442_vm0, %v4133_v56, %v4135_v6  ;;  %v4140_v47 = vsel %vm442_vm0, %v4137_v23, %v4139_v2  ;;  %v4143_v60 = vsel %vm442_vm0, %v4139_v2, %v4133_v56 }
0x2112   :  { %v4154_v13 = vmul.f32 %v4146_v11, %v4142_v19  ;;  %v4155_v24 = vmul.f32 %v4147_v45, %v4141_v25  ;;  %v4156_v16 = vmul.f32 %v4148_v18, %v4140_v47  ;;  %v4157_v20 = vmul.f32 %v4149_v1, %v4143_v60  ;;  %v4477_v47 = vld [vmem:[%s6714_s3 + $0x3] ss:$8 sm:$0xf] }
0x2113   :  { %v4058_v2 = vperm.slane %v4478_v32, 2  ;;  %v4059_v25 = vperm.slane %v4478_v32, 3  ;;  %v4025_v59 = vperm.slane %v4477_v47, 3 }
0x2114   :  { %v4214_v43 = vpack.c.bf16 %v4154_v13, %v4154_v13  ;;  %v4215_v48 = vpack.c.bf16 %v4155_v24, %v4155_v24  ;;  %v4216_v61 = vpack.c.bf16 %v4156_v16, %v4156_v16  ;;  %v4217_v30 = vpack.c.bf16 %v4157_v20, %v4157_v20  ;;  %v4015_v55 = vpop.permute.xlu2 %4014 }
0x2116   :  { %v4226_v17 = vsel %vm531_vm1, %v4214_v43, 0  ;;  %v4229_v5 = vsel %vm531_vm1, %v4215_v48, 0  ;;  %v4232_v3 = vsel %vm531_vm1, %v4216_v61, 0  ;;  %v4235_v12 = vsel %vm531_vm1, %v4217_v30, 0 }
0x2117   :  { %4240 = vmatpush.bf16.msra.mxu0 %v4226_v17  ;;  %4253 = vmatpush.bf16.msrb.mxu3 %v4229_v5  ;;  %v4022_v30 = vperm.slane %v4477_v47, 0  ;;  %v4994_v17 = vmov 31   ;;  %v3988_v5 = vsel %vm278_vm5, %v6548_v36, %v3981_v33 }
0x2118   :  { %4266 = vmatpush.bf16.msrb.mxu1 %v4232_v3  ;;  %4279 = vmatpush.bf16.msrb.mxu2 %v4235_v12  ;;  %v4079_v23 = vpop.permute.xlu1 %4078  ;;  %v4105_v56 = vpop.permute.xlu0 %4104 }
0x2119   :  { %v4080_v21 = vsel %vm378_vm2, %v4077_v14, %v4079_v23  ;;  %v4083_v41 = vsel %vm378_vm2, %v4079_v23, %v6544_v42  ;;  %v4111_v10 = vsel %vm410_vm3, %v4105_v56, %v4107_v63  ;;  %v4112_v58 = vsel %vm410_vm3, %v6540_v62, %v4105_v56  ;;  %v4476_v42 = vld [vmem:[%s6714_s3 + $0x2] ss:$8 sm:$0xf]  ;;  %4584 = vset.pattern.permute.xlu2 %v4994_v17 }
0x211a   :  { %v4096_v11 = vmul.f32 %v4088_v37, %v4080_v21  ;;  %v4097_v45 = vmul.f32 %v4089_v53, %v4083_v41  ;;  %v4124_v18 = vmul.f32 %v4116_v9, %v4112_v58  ;;  %v4125_v1 = vmul.f32 %v4117_v40, %v4111_v10 }
0x211b   :  { %v4056_v63 = vperm.slane %v4478_v32, 0  ;;  %v4057_v62 = vperm.slane %v4478_v32, 1  ;;  %v3993_v19 = vperm.slane %v4476_v42, 1  ;;  %v3994_v61 = vperm.slane %v4476_v42, 2 }
0x211c   :  { %v4210_v14 = vpack.c.bf16 %v4124_v18, %v4094_v28  ;;  %v4211_v27 = vpack.c.bf16 %v4125_v1, %v4095_v39  ;;  %v4212_v0 = vpack.c.bf16 %v4126_v26, %v4096_v11  ;;  %v4213_v6 = vpack.c.bf16 %v4127_v15, %v4097_v45  ;;  %v3951_v18 = vpop.permute.xlu2 %3950 }
0x211d   :  { %v3995_v9 = vperm.slane %v4476_v42, 3  ;;  %v4023_v40 = vperm.slane %v4477_v47, 1  ;;  %v4024_v28 = vperm.slane %v4477_v47, 2 }
0x211e   :  { %4241 = vmatpush.bf16.msra.mxu0 %v4210_v14  ;;  %4254 = vmatpush.bf16.msrb.mxu3 %v4211_v27 }
0x211f   :  { %4267 = vmatpush.bf16.msrb.mxu1 %v4212_v0  ;;  %4280 = vmatpush.bf16.msrb.mxu2 %v4213_v6  ;;  %v3958_v0 = vsel %vm246_vm8, %v6558_v38, %v3951_v18 }
0x2120   :  { %v4045_v60 = vpop.permute.xlu1 %4044  ;;  %v4049_v13 = vpop.permute.xlu0 %4048 }
0x2121   :  { %v4051_v24 = vsel %vm346_vm4, %v4045_v60, %v6542_v54  ;;  %v4052_v16 = vsel %vm346_vm4, %v6550_v34, %v4045_v60  ;;  %v4050_v20 = vsel %vm346_vm4, %v6542_v54, %v4049_v13  ;;  %v4053_v29 = vsel %vm346_vm4, %v4049_v13, %v6550_v34 }
0x2122   :  { %v4064_v57 = vmul.f32 %v4056_v63, %v4052_v16  ;;  %v4065_v37 = vmul.f32 %v4057_v62, %v4051_v24  ;;  %v4066_v43 = vmul.f32 %v4058_v2, %v4050_v20  ;;  %v4067_v48 = vmul.f32 %v4059_v25, %v4053_v29 }
0x2123   :  { %v3987_v34 = vsel %vm278_vm5, %v3981_v33, %v6556_v46  ;;  %v4001_v33 = vmul.f32 %v3993_v19, %v3988_v5 }
0x2124   :  { %v4206_v31 = vpack.c.bf16 %v4064_v57, %v6468_v49  ;;  %v4207_v44 = vpack.c.bf16 %v4065_v37, %v6504_v8  ;;  %v4208_v53 = vpack.c.bf16 %v4066_v43, %v6474_v22  ;;  %v4209_v54 = vpack.c.bf16 %v4067_v48, %v6502_v35  ;;  %v6643_v35 = vld [vmem:[%s6713_s2] sm:$0xff] }
0x2125   :  { %v4016_v49 = vsel %vm310_vm6, %v6554_v4, %v4015_v55  ;;  %v4019_v22 = vsel %vm310_vm6, %v4015_v55, %v6546_v50  ;;  %4219 = vperm.xlu2 %4584, %v6643_v35   ;;  %v3992_v8 = vperm.slane %v4476_v42, 0  ;;  %v4002_v3 = vmul.f32 %v3994_v61, %v3987_v34  ;;  %v3917_v55 = vld [vmem:[#allocation4 + $0x7c] sm:$0xf]  ;;  %4307 = vperm.xlu0 %4585, %v6643_v35  }
0x2126   :  { %4242 = vmatpush.bf16.msra.mxu0 %v4206_v31  ;;  %4255 = vmatpush.bf16.msrb.mxu3 %v4207_v44  ;;  %v4030_v12 = vmul.f32 %v4022_v30, %v4019_v22  ;;  %v4033_v39 = vmul.f32 %v4025_v59, %v4016_v49 }
0x2127   :  { %4268 = vmatpush.bf16.msrb.mxu1 %v4208_v53  ;;  %4281 = vmatpush.bf16.msrb.mxu2 %v4209_v54 }
0x2128   :  { %v3985_v26 = vpop.permute.xlu1 %3984  ;;  %v4011_v15 = vpop.permute.xlu0 %4010 }
0x2129   :  { %v3986_v23 = vsel %vm278_vm5, %v6556_v46, %v3985_v26  ;;  %v3989_v56 = vsel %vm278_vm5, %v3985_v26, %v6548_v36  ;;  %v4017_v21 = vsel %vm310_vm6, %v4011_v15, %v6554_v4  ;;  %v4018_v41 = vsel %vm310_vm6, %v6546_v50, %v4011_v15  ;;  %v4475_v46 = vld [vmem:[%s6714_s3 + $0x1] ss:$8 sm:$0xf]  ;;  %v3930_v36 = vld [vmem:[%s6714_s3] ss:$8 sm:$0xf] }
0x212a   :  { %v4000_v10 = vmul.f32 %v3992_v8, %v3989_v56  ;;  %v4003_v58 = vmul.f32 %v3995_v9, %v3986_v23  ;;  %v4031_v11 = vmul.f32 %v4023_v40, %v4018_v41  ;;  %v4032_v45 = vmul.f32 %v4024_v28, %v4017_v21 }
0x212b   :  { %v3963_v27 = vperm.slane %v4475_v46, 1  ;;  %v3933_v50 = vperm.slane %v3930_v36, 1  ;;  %v3934_v25 = vperm.slane %v3930_v36, 2  ;;  %v3932_v60 = vperm.slane %v3930_v36, 0 }
0x212c   :  { %v4202_v1 = vpack.c.bf16 %v4030_v12, %v4000_v10  ;;  %v4203_v32 = vpack.c.bf16 %v4031_v11, %v4001_v33  ;;  %v4204_v4 = vpack.c.bf16 %v4032_v45, %v4002_v3  ;;  %v4205_v14 = vpack.c.bf16 %v4033_v39, %v4003_v58 }
0x212d   :  { %v3971_v62 = vmul.f32 %v3963_v27, %v3958_v0  ;;  %v3935_v13 = vperm.slane %v3930_v36, 3  ;;  %v3962_v16 = vperm.slane %v4475_v46, 0  ;;  %v3964_v20 = vperm.slane %v4475_v46, 2  ;;  %v4301_v36 = vld [vmem:[#allocation4 + $0x80] sm:$0xf] }
0x212e   :  { %4243 = vmatpush.bf16.msra.mxu0 %v4202_v1  ;;  %4256 = vmatpush.bf16.msrb.mxu3 %v4203_v32  ;;  %v3965_v29 = vperm.slane %v4475_v46, 3 }
0x212f   :  { %4269 = vmatpush.bf16.msrb.mxu1 %v4204_v4  ;;  %4282 = vmatpush.bf16.msrb.mxu2 %v4205_v14 }
0x2130   :  { %v3921_v6 = vpop.permute.xlu1 %3920  ;;  %v3925_v42 = vpop.permute.xlu0 %3924 }
0x2131   :  { %v3928_v63 = vsel %vm215_vm7, %v6560_v52, %v3921_v6  ;;  %v3927_v47 = vsel %vm215_vm7, %v3921_v6, %v6552_v51  ;;  %v3929_v24 = vsel %vm215_vm7, %v3925_v42, %v6560_v52  ;;  %v3926_v57 = vsel %vm215_vm7, %v6552_v51, %v3925_v42 }
0x2132   :  { %v3941_v2 = vmul.f32 %v3933_v50, %v3928_v63  ;;  %v3942_v37 = vmul.f32 %v3934_v25, %v3927_v47  ;;  %v3940_v61 = vmul.f32 %v3932_v60, %v3929_v24  ;;  %v3943_v31 = vmul.f32 %v3935_v13, %v3926_v57 }
0x2134   :  { %v4199_v19 = vpack.c.bf16 %v3971_v62, %v3941_v2 }
0x2136   :  { %4257 = vmatpush.bf16.msrb.mxu3 %v4199_v19 }
0x2138   :  { %v3955_v43 = vpop.permute.xlu1 %3954  ;;  %v3953_v48 = vpop.permute.xlu0 %3952 }
0x2139   :  { %v3959_v30 = vsel %vm246_vm8, %v3955_v43, %v6558_v38  ;;  %v3956_v52 = vsel %vm246_vm8, %v3953_v48, %v3955_v43  ;;  %v3957_v59 = vsel %vm246_vm8, %v3951_v18, %v3953_v48  ;;  %4483 = vmatmul.msk.bf16.vlgmr.msrb.gmra.mxu3 %vm527_vm9, %v3917_v55 }
0x213a   :  { %v3970_v44 = vmul.f32 %v3962_v16, %v3959_v30  ;;  %v3972_v53 = vmul.f32 %v3964_v20, %v3957_v59  ;;  %v3973_v51 = vmul.f32 %v3965_v29, %v3956_v52 }
0x213c   :  { %v4198_v54 = vpack.c.bf16 %v3970_v44, %v3940_v61  ;;  %v4200_v17 = vpack.c.bf16 %v3972_v53, %v3942_v37  ;;  %v4201_v34 = vpack.c.bf16 %v3973_v51, %v3943_v31 }
0x213e   :  { %4244 = vmatpush.bf16.msra.mxu0 %v4198_v54  ;;  %4270 = vmatpush.bf16.msrb.mxu1 %v4200_v17 }
0x213f   :  { %4283 = vmatpush.bf16.msrb.mxu2 %v4201_v34 }
0x2141   :  { %4482 = vmatmul.msk.bf16.vlgmr.msra.gmra.mxu0 %vm527_vm9, %v3917_v55  ;;  %4484 = vmatmul.msk.bf16.vlgmr.msrb.gmra.mxu1 %vm527_vm9, %v3917_v55 }
0x2142   :  { %4485 = vmatmul.msk.bf16.vlgmr.msrb.gmra.mxu2 %vm527_vm9, %v3917_v55 }
0x217f   :  { %v4220_v38 = vpop.permute.xlu2 %4219 }
0x2197   :  { %v4308_v27 = vpop.permute.xlu0 %4307 }
0x21bc   :  { %v4259_v5 = vpop.f32.mrf.mxu3 }
0x21bd   :  { %v4260_v49 = vadd.f32 %v4259_v5, %v4220_v38 }
0x21be   :  { %v4246_v22 = vpop.f32.mrf.mxu0  ;;  %v4272_v8 = vpop.f32.mrf.mxu1 }
0x21bf   :  { %v4294_v9 = vmul.f32 0.01, %v4260_v49  ;;  %v4247_v40 = vadd.f32 %v4246_v22, %v4220_v38  ;;  %v4273_v28 = vadd.f32 %v4272_v8, %v4220_v38  ;;  %vm4290_vm0 = vcmp.ge.f32.partialorder %v4260_v49, 0.0 }
0x21c1   :  { %vm4289_vm2 = vcmp.ge.f32.partialorder %v4247_v40, 0.0  ;;  %v4293_v33 = vmul.f32 0.01, %v4247_v40  ;;  %vm4291_vm3 = vcmp.ge.f32.partialorder %v4273_v28, 0.0  ;;  %v4295_v3 = vmul.f32 0.01, %v4273_v28 }
0x21c2   :  { %v4298_v12 = vsel %vm4290_vm0, %v4260_v49, %v4294_v9 }
0x21c3   :  { %v4297_v39 = vsel %vm4289_vm2, %v4247_v40, %v4293_v33  ;;  %v4299_v26 = vsel %vm4291_vm3, %v4273_v28, %v4295_v3  ;;  %v4303_v15 = vpack.c.bf16 %v4298_v12, %v4298_v12 }
0x21c4   :  { %v4302_v23 = vpack.c.bf16 %v4297_v39, %v4297_v39  ;;  %v4304_v56 = vpack.c.bf16 %v4299_v26, %v4299_v26  ;;  %v4261_v35 = vpop.f32.mrf.mxu3 }
0x21c5   :  { %v4285_v21 = vpop.f32.mrf.mxu2  ;;  %v4317_v41 = vsel %vm531_vm1, %v4303_v15, 0 }
0x21c6   :  { %v4286_v10 = vadd.f32 %v4285_v21, %v4220_v38  ;;  %v4248_v58 = vpop.f32.mrf.mxu0  ;;  %v4274_v11 = vpop.f32.mrf.mxu1  ;;  %v4314_v45 = vsel %vm531_vm1, %v4302_v23, 0  ;;  %4345 = vmatpush.bf16.msra.mxu3 %v4317_v41  ;;  %v4320_v46 = vsel %vm531_vm1, %v4304_v56, 0 }
0x21c7   :  { %4332 = vmatpush.bf16.msrb.mxu0 %v4314_v45  ;;  %4358 = vmatpush.bf16.msra.mxu1 %v4320_v46 }
0x21c8   :  { %vm4292_vm4 = vcmp.ge.f32.partialorder %v4286_v10, 0.0  ;;  %v4296_v18 = vmul.f32 0.01, %v4286_v10 }
0x21c9   :  { %4487 = vmatmul.msk.bf16.vlgmr.msra.gmra.mxu3 %vm2518_vm14, %v4301_v36 }
0x21ca   :  { %v4300_v1 = vsel %vm4292_vm4, %v4286_v10, %v4296_v18  ;;  %4486 = vmatmul.msk.bf16.vlgmr.msrb.gmra.mxu0 %vm2518_vm14, %v4301_v36  ;;  %4488 = vmatmul.msk.bf16.vlgmr.msra.gmra.mxu1 %vm2518_vm14, %v4301_v36 }
0x21cb   :  { %v4305_v32 = vpack.c.bf16 %v4300_v1, %v4300_v1 }
0x21cd   :  { %v4287_v4 = vpop.f32.mrf.mxu2  ;;  %v4323_v14 = vsel %vm531_vm1, %v4305_v32, 0 }
0x21ce   :  { %4371 = vmatpush.bf16.msra.mxu2 %v4323_v14 }
0x21d1   :  { %4489 = vmatmul.msk.bf16.vlgmr.msra.gmra.mxu2 %vm2518_vm14, %v4301_v36 }
0x2247   :  { %v4334_v50 = vpop.f32.mrf.mxu0  ;;  %v4360_v0 = vpop.f32.mrf.mxu1 }
0x2248   :  { %v4335_v6 = vadd.f32 %v4334_v50, %v4308_v27  ;;  %v4361_v42 = vadd.f32 %v4360_v0, %v4308_v27 }
0x224a   :  { %4377 = vst [vmem:[%s6724_s13] sm:$0xff] %v4335_v6 }
0x224b   :  { %4379 = vst [vmem:[%s6724_s13 + $0x10] sm:$0xff] %v4361_v42 }
0x224c   :  { %v4347_v63 = vpop.f32.mrf.mxu3 }
0x224d   :  { %v4348_v62 = vadd.f32 %v4347_v63, %v4308_v27 }
0x224f   :  { %v4336_v2 = vpop.f32.mrf.mxu0  ;;  %v4362_v25 = vpop.f32.mrf.mxu1  ;;  %4378 = vst [vmem:[%s6724_s13 + $0x8] sm:$0xff] %v4348_v62 }
0x2254   :  { %v4373_v19 = vpop.f32.mrf.mxu2  ;;  %v4349_v47 = vpop.f32.mrf.mxu3 }
0x2255   :  { %v4374_v60 = vadd.f32 %v4373_v19, %v4308_v27 }
0x2257   :  { %4380 = vst [vmem:[%s6724_s13 + $0x18] sm:$0xff] %v4374_v60 }
0x225c   :  { %v4375_v13 = vpop.f32.mrf.mxu2 }
0x225d   :  { %4385 = vsyncpa [#allocation5], 1 }
0x225e   :  { %4386 = vsyncpa [#allocation7], 1 }
0x225f   :  { %4387 = vsyncpa [#allocation10], 1 }
0x2260   :  { %4388 = vsyncpa [#allocation13], 1 }
0x2261   :  { %4389 = vsyncpa [#allocation16], 1 }
0x2262   :  { %4390 = vsyncpa [#allocation19], 1 }

</bundles_post_ra>
